<compile_context>
chip_gen: v7x
topology: tpu7x:2x2x1
jax: 0.10.0
libtpu: 0.0.40
codegen_flags: <defaults>
</compile_context>

<pallas_src>
import functools

import jax
import jax.numpy as jnp
import numpy as np
from jax.experimental import pallas as pl
from jax.experimental.pallas import tpu as pltpu


def _round_up(x, m):
    return ((x + m - 1) // m) * m


def _row_block(n, cap=1024):
    """Rows per grid step for the row-parallel head kernel (n is a multiple of 8)."""
    for c in (cap, 512, 256, 128, 64, 32, 16, 8):
        if c <= n and n % c == 0:
            return c
    return n


# ---------------------------------------------------------------------------
# LSTM cell + shared in-kernel recurrence (PyTorch gate order: i, f, g, o).
# All element-wise gate math is f32; lane slices are static multiples of Hp.
# ---------------------------------------------------------------------------
def _lstm_cell(gates, c_prev, Hp):
    i_g = jax.nn.sigmoid(gates[:, 0 * Hp:1 * Hp])
    f_g = jax.nn.sigmoid(gates[:, 1 * Hp:2 * Hp])
    g_g = jnp.tanh(gates[:, 2 * Hp:3 * Hp])
    o_g = jax.nn.sigmoid(gates[:, 3 * Hp:4 * Hp])
    c_new = f_g * c_prev + i_g * g_g
    h_new = o_g * jnp.tanh(c_new)
    return h_new, c_new


def _run_recurrence(T, Bc, Hp, gxf_ref, gxb_ref, whhf_ref, whhb_ref,
                    hf_ref, hb_ref):
    """Serial time loop; fwd and bwd directions advance together (bwd uses a
    reversed leading-dim index).  Separate per-direction h/c carries -> no
    concatenates on the critical path; per-direction gx slabs -> each step
    loads only the 4*Hp lanes it needs."""

    def step(s, carry):
        h_f, c_f, h_b, c_b = carry
        sr = T - 1 - s
        gates_f = gxf_ref[s] + jnp.dot(
            h_f.astype(jnp.bfloat16), whhf_ref[...],
            preferred_element_type=jnp.float32)
        gates_b = gxb_ref[sr] + jnp.dot(
            h_b.astype(jnp.bfloat16), whhb_ref[...],
            preferred_element_type=jnp.float32)
        h_f, c_f = _lstm_cell(gates_f, c_f, Hp)
        h_b, c_b = _lstm_cell(gates_b, c_b, Hp)
        hf_ref[s] = h_f
        hb_ref[sr] = h_b
        return h_f, c_f, h_b, c_b

    zeros = jnp.zeros((Bc, Hp), jnp.float32)
    unroll = True if T <= 32 else (2 if T % 2 == 0 else 1)
    _ = jax.lax.fori_loop(0, T, step, (zeros, zeros, zeros, zeros),
                          unroll=unroll)


# ---------------------------------------------------------------------------
# Layer 0: seq_emb (Linear + LayerNorm + ReLU) fused with the hoisted layer-0
# input projection for BOTH directions, followed by the recurrence — all in
# one pallas_call (gx never touches HBM).
# ---------------------------------------------------------------------------
def _make_layer0_kernel(T, Bc, C, E, Hp):
    G4 = 4 * Hp

    def kernel(x_ref, we_ref, be_ref, g_ref, beta_ref, win_ref, bin_ref,
               whhf_ref, whhb_ref, hf_ref, hb_ref, gxf_ref, gxb_ref):
        x = x_ref[...].reshape(T * Bc, C)
        y = jnp.dot(x, we_ref[...], preferred_element_type=jnp.float32) + be_ref[...]
        mu = jnp.mean(y, axis=-1, keepdims=True)
        var = jnp.mean((y - mu) ** 2, axis=-1, keepdims=True)
        y = (y - mu) * jax.lax.rsqrt(var + 1e-5) * g_ref[...] + beta_ref[...]
        y = jnp.maximum(y, 0.0).astype(jnp.bfloat16)              # MXU operand
        gxf_ref[...] = (jnp.dot(y, win_ref[:, :G4],
                                preferred_element_type=jnp.float32)
                        + bin_ref[:, :G4]).reshape(T, Bc, G4)
        gxb_ref[...] = (jnp.dot(y, win_ref[:, G4:],
                                preferred_element_type=jnp.float32)
                        + bin_ref[:, G4:]).reshape(T, Bc, G4)
        _run_recurrence(T, Bc, Hp, gxf_ref, gxb_ref, whhf_ref, whhb_ref,
                        hf_ref, hb_ref)

    return kernel


def _layer_compiler_params():
    return pltpu.CompilerParams(
        dimension_semantics=("parallel",),
        vmem_limit_bytes=32 * 1024 * 1024)


def bilstm_layer0(x3d, we, be, g, beta, w_in, b_in, whh_f, whh_b,
                  *, T, Bp, Hp, nb):
    C = x3d.shape[-1]
    E = we.shape[1]
    Bc = Bp // nb
    kern = _make_layer0_kernel(T, Bc, C, E, Hp)
    return pl.pallas_call(
        kern,
        out_shape=(jax.ShapeDtypeStruct((T, Bp, Hp), jnp.float32),
                   jax.ShapeDtypeStruct((T, Bp, Hp), jnp.float32)),
        grid=(nb,),
        in_specs=[
            pl.BlockSpec((T, Bc, C), lambda b: (0, b, 0)),
            pl.BlockSpec((C, E), lambda b: (0, 0)),
            pl.BlockSpec((1, E), lambda b: (0, 0)),
            pl.BlockSpec((1, E), lambda b: (0, 0)),
            pl.BlockSpec((1, E), lambda b: (0, 0)),
            pl.BlockSpec((E, 8 * Hp), lambda b: (0, 0)),
            pl.BlockSpec((1, 8 * Hp), lambda b: (0, 0)),
            pl.BlockSpec((Hp, 4 * Hp), lambda b: (0, 0)),
            pl.BlockSpec((Hp, 4 * Hp), lambda b: (0, 0)),
        ],
        out_specs=(pl.BlockSpec((T, Bc, Hp), lambda b: (0, b, 0)),
                   pl.BlockSpec((T, Bc, Hp), lambda b: (0, b, 0))),
        scratch_shapes=[pltpu.VMEM((T, Bc, 4 * Hp), jnp.float32),
                        pltpu.VMEM((T, Bc, 4 * Hp), jnp.float32)],
        compiler_params=_layer_compiler_params(),
    )(x3d, we, be, g, beta, w_in, b_in, whh_f, whh_b)


# ---------------------------------------------------------------------------
# Layers >= 1: hoisted input projection (two dots on static weight-row slices,
# no [h_fwd | h_bwd] concat) fused with the recurrence.
# ---------------------------------------------------------------------------
def _make_layer_kernel(T, Bc, Hp):
    G4 = 4 * Hp

    def kernel(hfin_ref, hbin_ref, win_ref, bin_ref, whhf_ref, whhb_ref,
               hf_ref, hb_ref, gxf_ref, gxb_ref):
        hf_in = hfin_ref[...].reshape(T * Bc, Hp).astype(jnp.bfloat16)
        hb_in = hbin_ref[...].reshape(T * Bc, Hp).astype(jnp.bfloat16)
        gxf_ref[...] = (
            jnp.dot(hf_in, win_ref[:Hp, :G4], preferred_element_type=jnp.float32)
            + jnp.dot(hb_in, win_ref[Hp:, :G4], preferred_element_type=jnp.float32)
            + bin_ref[:, :G4]).reshape(T, Bc, G4)
        gxb_ref[...] = (
            jnp.dot(hf_in, win_ref[:Hp, G4:], preferred_element_type=jnp.float32)
            + jnp.dot(hb_in, win_ref[Hp:, G4:], preferred_element_type=jnp.float32)
            + bin_ref[:, G4:]).reshape(T, Bc, G4)
        _run_recurrence(T, Bc, Hp, gxf_ref, gxb_ref, whhf_ref, whhb_ref,
                        hf_ref, hb_ref)

    return kernel


def bilstm_layer(hf, hb, w_in, b_in, whh_f, whh_b, *, T, Bp, Hp, nb):
    Bc = Bp // nb
    kern = _make_layer_kernel(T, Bc, Hp)
    return pl.pallas_call(
        kern,
        out_shape=(jax.ShapeDtypeStruct((T, Bp, Hp), jnp.float32),
                   jax.ShapeDtypeStruct((T, Bp, Hp), jnp.float32)),
        grid=(nb,),
        in_specs=[
            pl.BlockSpec((T, Bc, Hp), lambda b: (0, b, 0)),
            pl.BlockSpec((T, Bc, Hp), lambda b: (0, b, 0)),
            pl.BlockSpec((2 * Hp, 8 * Hp), lambda b: (0, 0)),
            pl.BlockSpec((1, 8 * Hp), lambda b: (0, 0)),
            pl.BlockSpec((Hp, 4 * Hp), lambda b: (0, 0)),
            pl.BlockSpec((Hp, 4 * Hp), lambda b: (0, 0)),
        ],
        out_specs=(pl.BlockSpec((T, Bc, Hp), lambda b: (0, b, 0)),
                   pl.BlockSpec((T, Bc, Hp), lambda b: (0, b, 0))),
        scratch_shapes=[pltpu.VMEM((T, Bc, 4 * Hp), jnp.float32),
                        pltpu.VMEM((T, Bc, 4 * Hp), jnp.float32)],
        compiler_params=_layer_compiler_params(),
    )(hf, hb, w_in, b_in, whh_f, whh_b)


# ---------------------------------------------------------------------------
# head: Linear(2H -> H) + LayerNorm(H) + ReLU + Linear(H -> NC); NC padded to
# 128 lanes (lane-dense store); two dots on static weight-row slices.
# ---------------------------------------------------------------------------
def _head_kernel(hf_ref, hb_ref, w1_ref, b1_ref, g_ref, beta_ref,
                 w2_ref, b2_ref, o_ref, *, Hp):
    y = (jnp.dot(hf_ref[...], w1_ref[:Hp, :], preferred_element_type=jnp.float32)
         + jnp.dot(hb_ref[...], w1_ref[Hp:, :], preferred_element_type=jnp.float32)
         + b1_ref[...])
    mu = jnp.mean(y, axis=-1, keepdims=True)
    var = jnp.mean((y - mu) ** 2, axis=-1, keepdims=True)
    y = (y - mu) * jax.lax.rsqrt(var + 1e-5) * g_ref[...] + beta_ref[...]
    y = jnp.maximum(y, 0.0)
    o_ref[...] = (jnp.dot(y, w2_ref[...], preferred_element_type=jnp.float32)
                  + b2_ref[...])


def head_fused(hf, hb, w1, b1, g, beta, w2, b2, *, Hp):
    n = hf.shape[0]
    hdim = w1.shape[1]
    ncp = w2.shape[1]
    rb = _row_block(n)
    return pl.pallas_call(
        functools.partial(_head_kernel, Hp=Hp),
        out_shape=jax.ShapeDtypeStruct((n, ncp), jnp.float32),
        grid=(n // rb,),
        in_specs=[
            pl.BlockSpec((rb, Hp), lambda i: (i, 0)),
            pl.BlockSpec((rb, Hp), lambda i: (i, 0)),
            pl.BlockSpec((2 * Hp, hdim), lambda i: (0, 0)),
            pl.BlockSpec((1, hdim), lambda i: (0, 0)),
            pl.BlockSpec((1, hdim), lambda i: (0, 0)),
            pl.BlockSpec((1, hdim), lambda i: (0, 0)),
            pl.BlockSpec((hdim, ncp), lambda i: (0, 0)),
            pl.BlockSpec((1, ncp), lambda i: (0, 0)),
        ],
        out_specs=pl.BlockSpec((rb, ncp), lambda i: (i, 0)),
        compiler_params=pltpu.CompilerParams(
            dimension_semantics=("parallel",)),
    )(hf, hb, w1, b1, g, beta, w2, b2)


# ---------------------------------------------------------------------------
# Parameter init (deterministic synthetic, matches nn.Module shapes) plus the
# fusion / lane-padding / bf16 preprocessing used by the kernels.
# ---------------------------------------------------------------------------
def _pad_gate_cols(w, H, Hp):
    """(rows, 4H) -> (rows, 4Hp): gate g occupies lanes [g*Hp : g*Hp + H]."""
    rows = w.shape[0]
    out = jnp.zeros((rows, 4 * Hp), jnp.float32)
    for g in range(4):
        out = out.at[:, g * Hp:g * Hp + H].set(w[:, g * H:(g + 1) * H])
    return out


def _pad_hidden_rows(w, H, Hp):
    """(2H, cols) -> (2Hp, cols): rows [0:H] -> fwd block, [H:2H] -> bwd block."""
    cols = w.shape[1]
    out = jnp.zeros((2 * Hp, cols), jnp.float32)
    out = out.at[0:H, :].set(w[0:H, :])
    out = out.at[Hp:Hp + H, :].set(w[H:2 * H, :])
    return out


def init_params(key, n_cont, embed, hidden, num_layers, num_classes):
    H = hidden
    Hp = _round_up(H, 128)
    NCp = _round_up(num_classes, 128)

    keys = iter(jax.random.split(key, 8 + 8 * num_layers))
    nk = lambda shape: 0.1 * jax.random.normal(next(keys), shape, jnp.float32)

    raw = {
        "emb_w": nk((n_cont, embed)),
        "emb_b": nk((1, embed)),
        "emb_g": jnp.ones((1, embed), jnp.float32),
        "emb_beta": jnp.zeros((1, embed), jnp.float32),
        "h1_w": nk((2 * H, H)),
        "h1_b": nk((1, H)),
        "h_g": jnp.ones((1, H), jnp.float32),
        "h_beta": jnp.zeros((1, H), jnp.float32),
        "h2_w": nk((H, num_classes)),
        "h2_b": nk((1, num_classes)),
        "lstm": [],
    }
    in_size = embed
    for _ in range(num_layers):
        layer = {}
        for d in ("fwd", "bwd"):
            wih = nk((in_size, 4 * H))               # transposed vs torch (4H, in)
            whh = nk((H, 4 * H))
            bias = nk((1, 4 * H)) + nk((1, 4 * H))   # b_ih + b_hh
            layer[d] = (wih, whh, bias)
        raw["lstm"].append(layer)
        in_size = 2 * H

    # --- fused / lane-padded / bf16 kernel parameters ------------------------
    layers = []
    for li, lyr in enumerate(raw["lstm"]):
        wih_f, whh_f, b_f = lyr["fwd"]
        wih_b, whh_b, b_b = lyr["bwd"]
        w_in = jnp.concatenate([_pad_gate_cols(wih_f, H, Hp),
                                _pad_gate_cols(wih_b, H, Hp)], axis=1)
        b_in = jnp.concatenate([_pad_gate_cols(b_f, H, Hp),
                                _pad_gate_cols(b_b, H, Hp)], axis=1)
        if li > 0:
            w_in = _pad_hidden_rows(w_in, H, Hp)     # input is [h_fwd | h_bwd]
        whhf_p = jnp.zeros((Hp, 4 * Hp), jnp.float32).at[:H, :].set(
            _pad_gate_cols(whh_f, H, Hp))
        whhb_p = jnp.zeros((Hp, 4 * Hp), jnp.float32).at[:H, :].set(
            _pad_gate_cols(whh_b, H, Hp))
        layers.append({
            "w_in": w_in.astype(jnp.bfloat16),       # MXU operand
            "b_in": b_in,                            # f32
            "whh_f": whhf_p.astype(jnp.bfloat16),
            "whh_b": whhb_p.astype(jnp.bfloat16),
        })

    fused = {
        "emb_w": raw["emb_w"], "emb_b": raw["emb_b"],
        "emb_g": raw["emb_g"], "emb_beta": raw["emb_beta"],
        "layers": layers,
        "h1_w_cat": _pad_hidden_rows(raw["h1_w"], H, Hp),
        "h1_b": raw["h1_b"], "h_g": raw["h_g"], "h_beta": raw["h_beta"],
        "h2_w_pad": jnp.zeros((H, NCp), jnp.float32)
            .at[:, :num_classes].set(raw["h2_w"]),
        "h2_b_pad": jnp.zeros((1, NCp), jnp.float32)
            .at[:, :num_classes].set(raw["h2_b"]),
    }
    return {"raw": raw, "fused": fused, "Hp": Hp, "NCp": NCp}


# ---------------------------------------------------------------------------
# Full forward pass (cate_seq_x is accepted but unused, as in the reference).
# ---------------------------------------------------------------------------
def net4_forward(params, cate_seq_x, cont_seq_x, hidden, num_classes):
    del cate_seq_x, hidden  # cate_seq_x unused by Net4.forward
    B, T, C = cont_seq_x.shape
    fp = params["fused"]
    Hp = params["Hp"]

    # Time-major (T, Bp, C) with batch zero-padded to a sublane multiple of 8
    # so every per-timestep access in the recurrence is full-tile.
    Bp = _round_up(B, 8)
    nb = 2 if (Bp % 16 == 0) else 1       # megacore-parallel batch chunks
    x_tm = jnp.swapaxes(cont_seq_x, 0, 1)
    if Bp != B:
        x_tm = jnp.pad(x_tm, ((0, 0), (0, Bp - B), (0, 0)))

    lyr0 = fp["layers"][0]
    hf, hb = bilstm_layer0(x_tm, fp["emb_w"], fp["emb_b"], fp["emb_g"],
                           fp["emb_beta"], lyr0["w_in"], lyr0["b_in"],
                           lyr0["whh_f"], lyr0["whh_b"],
                           T=T, Bp=Bp, Hp=Hp, nb=nb)
    for lyr in fp["layers"][1:]:
        hf, hb = bilstm_layer(hf, hb, lyr["w_in"], lyr["b_in"],
                              lyr["whh_f"], lyr["whh_b"],
                              T=T, Bp=Bp, Hp=Hp, nb=nb)

    out_pad = head_fused(hf.reshape(T * Bp, Hp), hb.reshape(T * Bp, Hp),
                         fp["h1_w_cat"], fp["h1_b"], fp["h_g"], fp["h_beta"],
                         fp["h2_w_pad"], fp["h2_b_pad"], Hp=Hp)

    out = out_pad.reshape(T, Bp, -1)[:, :B, :num_classes]
    out = jnp.swapaxes(out, 0, 1)                    # (B, T, NC)
    if num_classes == 1:                             # reg path
        return out.reshape(B, T)
    return out


# ---------------------------------------------------------------------------
# Pure-JAX f32 reference (mirrors the PyTorch forward) for a correctness check.
# ---------------------------------------------------------------------------
def reference_forward(raw, cont_seq_x, hidden, num_classes):
    B, T, C = cont_seq_x.shape
    H = hidden
    hi = jax.lax.Precision.HIGHEST

    x = cont_seq_x.reshape(B * T, C)
    y = jnp.dot(x, raw["emb_w"], precision=hi) + raw["emb_b"]
    mu = jnp.mean(y, -1, keepdims=True)
    var = jnp.mean((y - mu) ** 2, -1, keepdims=True)
    y = (y - mu) * jax.lax.rsqrt(var + 1e-5) * raw["emb_g"] + raw["emb_beta"]
    y = jnp.maximum(y, 0.0)
    xs = jnp.transpose(y.reshape(B, T, -1), (1, 0, 2))           # (T, B, E)

    def run_dir(x_seq, wih, whh, b):
        def step(carry, xt):
            h, c = carry
            gates = (jnp.dot(xt, wih, precision=hi)
                     + jnp.dot(h, whh, precision=hi) + b)
            i = jax.nn.sigmoid(gates[:, 0:H])
            f = jax.nn.sigmoid(gates[:, H:2 * H])
            g = jnp.tanh(gates[:, 2 * H:3 * H])
            o = jax.nn.sigmoid(gates[:, 3 * H:4 * H])
            c = f * c + i * g
            h = o * jnp.tanh(c)
            return (h, c), h
        init = (jnp.zeros((B, H), jnp.float32), jnp.zeros((B, H), jnp.float32))
        _, hs = jax.lax.scan(step, init, x_seq)
        return hs

    for lyr in raw["lstm"]:
        hf = run_dir(xs, *lyr["fwd"])
        hb = jnp.flip(run_dir(jnp.flip(xs, 0), *lyr["bwd"]), 0)
        xs = jnp.concatenate([hf, hb], axis=-1)

    seq = jnp.transpose(xs, (1, 0, 2)).reshape(B * T, 2 * H)
    y = jnp.dot(seq, raw["h1_w"], precision=hi) + raw["h1_b"]
    mu = jnp.mean(y, -1, keepdims=True)
    var = jnp.mean((y - mu) ** 2, -1, keepdims=True)
    y = (y - mu) * jax.lax.rsqrt(var + 1e-5) * raw["h_g"] + raw["h_beta"]
    y = jnp.maximum(y, 0.0)
    out = jnp.dot(y, raw["h2_w"], precision=hi) + raw["h2_b"]
    if num_classes == 1:
        return out.reshape(B, T)
    return out.reshape(B, T, num_classes)


if __name__ == "__main__":
    B, T = 2, 8
    n_cont = 4          # len(net_params.cont_seq_cols)
    embed = 16          # net_params.embed_size
    hidden = 32         # net_params.hidden_size
    num_layers = 2      # net_params.num_layers
    num_classes = 1     # -> reg path (output viewed to (B, T))

    key = jax.random.PRNGKey(0)
    kx, kp = jax.random.split(key)
    cont_seq_x = jax.random.normal(kx, (B, T, n_cont), jnp.float32)
    cate_seq_x = jnp.zeros((B, T), jnp.int32)   # unused in forward

    params = init_params(kp, n_cont, embed, hidden, num_layers, num_classes)

    fwd = jax.jit(functools.partial(net4_forward, params,
                                    hidden=hidden, num_classes=num_classes))
    out = fwd(cate_seq_x, cont_seq_x)
    jax.block_until_ready(out)
    assert out.shape == (B, T)

    ref = reference_forward(params["raw"], cont_seq_x, hidden, num_classes)
    # bf16 MXU operands (f32 accumulation) in the LSTM path -> slightly looser
    # tolerance than a pure-f32 comparison.
    np.testing.assert_allclose(np.asarray(out), np.asarray(ref),
                               rtol=1e-2, atol=1e-2)
    print("KERNEL_OK")
</pallas_src>

<mosaic_0001>
module attributes {stable_mosaic.version = 11 : i64} {
  func.func @kernel(%arg0: i32, %arg1: memref<8x8x4xf32, #tpu.memory_space<vmem>>, %arg2: memref<4x16xf32, #tpu.memory_space<vmem>>, %arg3: memref<1x16xf32, #tpu.memory_space<vmem>>, %arg4: memref<1x16xf32, #tpu.memory_space<vmem>>, %arg5: memref<1x16xf32, #tpu.memory_space<vmem>>, %arg6: memref<16x1024xbf16, #tpu.memory_space<vmem>>, %arg7: memref<1x1024xf32, #tpu.memory_space<vmem>>, %arg8: memref<128x512xbf16, #tpu.memory_space<vmem>>, %arg9: memref<128x512xbf16, #tpu.memory_space<vmem>>, %arg10: memref<8x8x128xf32, #tpu.memory_space<vmem>>, %arg11: memref<8x8x128xf32, #tpu.memory_space<vmem>>, %arg12: memref<8x8x512xf32, #tpu.memory_space<vmem>>, %arg13: memref<8x8x512xf32, #tpu.memory_space<vmem>>) attributes {dimension_semantics = [#tpu.dimension_semantics<parallel>], iteration_bounds = array<i64: 1>, scalar_prefetch = 0 : i64, scratch_operands = 2 : i64, tpu.core_type = #tpu.core_type<tc>, window_params = [{transform_indices = @transform_0, window_bounds = array<i64: 8, 8, 4>}, {pipeline_mode = #tpu.pipeline_mode<synchronous>, transform_indices = @transform_1, window_bounds = array<i64: 4, 16>}, {pipeline_mode = #tpu.pipeline_mode<synchronous>, transform_indices = @transform_2, window_bounds = array<i64: 1, 16>}, {pipeline_mode = #tpu.pipeline_mode<synchronous>, transform_indices = @transform_3, window_bounds = array<i64: 1, 16>}, {pipeline_mode = #tpu.pipeline_mode<synchronous>, transform_indices = @transform_4, window_bounds = array<i64: 1, 16>}, {pipeline_mode = #tpu.pipeline_mode<synchronous>, transform_indices = @transform_5, window_bounds = array<i64: 16, 1024>}, {pipeline_mode = #tpu.pipeline_mode<synchronous>, transform_indices = @transform_6, window_bounds = array<i64: 1, 1024>}, {pipeline_mode = #tpu.pipeline_mode<synchronous>, transform_indices = @transform_7, window_bounds = array<i64: 128, 512>}, {pipeline_mode = #tpu.pipeline_mode<synchronous>, transform_indices = @transform_8, window_bounds = array<i64: 128, 512>}, {transform_indices = @transform_9, window_bounds = array<i64: 8, 8, 128>}, {transform_indices = @transform_10, window_bounds = array<i64: 8, 8, 128>}]} {
    %c0 = arith.constant 0 : index
    %c0_0 = arith.constant 0 : index
    %c0_1 = arith.constant 0 : index
    %0 = vector.load %arg1[%c0, %c0_0, %c0_1] : memref<8x8x4xf32, #tpu.memory_space<vmem>>, vector<8x8x4xf32>
    %1 = vector.shape_cast %0 : vector<8x8x4xf32> to vector<64x4xf32>
    %c0_2 = arith.constant 0 : index
    %c0_3 = arith.constant 0 : index
    %2 = vector.load %arg2[%c0_2, %c0_3] : memref<4x16xf32, #tpu.memory_space<vmem>>, vector<4x16xf32>
    %cst = arith.constant dense<0.000000e+00> : vector<64x16xf32>
    %3 = tpu.matmul %1, %2, %cst {dimension_numbers = #tpu.dot_dimension_numbers<[1], [0], [0], [1], [0, 0, 1, 1], [], []>} : vector<64x4xf32>, vector<4x16xf32>, vector<64x16xf32> -> vector<64x16xf32>
    %c0_4 = arith.constant 0 : index
    %c0_5 = arith.constant 0 : index
    %4 = vector.load %arg3[%c0_4, %c0_5] : memref<1x16xf32, #tpu.memory_space<vmem>>, vector<1x16xf32>
    %5 = vector.broadcast %4 : vector<1x16xf32> to vector<64x16xf32>
    %6 = arith.addf %3, %5 : vector<64x16xf32>
    %cst_6 = arith.constant dense<0.000000e+00> : vector<64xf32>
    %7 = vector.multi_reduction <add>, %6, %cst_6 [1] : vector<64x16xf32> to vector<64xf32>
    %8 = vector.shape_cast %7 : vector<64xf32> to vector<64x1xf32>
    %cst_7 = arith.constant 1.600000e+01 : f32
    %9 = vector.broadcast %cst_7 : f32 to vector<64x1xf32>
    %10 = arith.divf %8, %9 : vector<64x1xf32>
    %11 = vector.broadcast %10 : vector<64x1xf32> to vector<64x16xf32>
    %12 = arith.subf %6, %11 : vector<64x16xf32>
    %13 = arith.mulf %12, %12 : vector<64x16xf32>
    %cst_8 = arith.constant dense<0.000000e+00> : vector<64xf32>
    %14 = vector.multi_reduction <add>, %13, %cst_8 [1] : vector<64x16xf32> to vector<64xf32>
    %15 = vector.shape_cast %14 : vector<64xf32> to vector<64x1xf32>
    %cst_9 = arith.constant 1.600000e+01 : f32
    %16 = vector.broadcast %cst_9 : f32 to vector<64x1xf32>
    %17 = arith.divf %15, %16 : vector<64x1xf32>
    %18 = vector.broadcast %10 : vector<64x1xf32> to vector<64x16xf32>
    %19 = arith.subf %6, %18 : vector<64x16xf32>
    %cst_10 = arith.constant 9.99999974E-6 : f32
    %20 = vector.broadcast %cst_10 : f32 to vector<64x1xf32>
    %21 = arith.addf %17, %20 : vector<64x1xf32>
    %22 = math.rsqrt %21 : vector<64x1xf32>
    %23 = vector.broadcast %22 : vector<64x1xf32> to vector<64x16xf32>
    %24 = arith.mulf %19, %23 : vector<64x16xf32>
    %c0_11 = arith.constant 0 : index
    %c0_12 = arith.constant 0 : index
    %25 = vector.load %arg4[%c0_11, %c0_12] : memref<1x16xf32, #tpu.memory_space<vmem>>, vector<1x16xf32>
    %26 = vector.broadcast %25 : vector<1x16xf32> to vector<64x16xf32>
    %27 = arith.mulf %24, %26 : vector<64x16xf32>
    %c0_13 = arith.constant 0 : index
    %c0_14 = arith.constant 0 : index
    %28 = vector.load %arg5[%c0_13, %c0_14] : memref<1x16xf32, #tpu.memory_space<vmem>>, vector<1x16xf32>
    %29 = vector.broadcast %28 : vector<1x16xf32> to vector<64x16xf32>
    %30 = arith.addf %27, %29 : vector<64x16xf32>
    %cst_15 = arith.constant 0.000000e+00 : f32
    %31 = vector.broadcast %cst_15 : f32 to vector<64x16xf32>
    %32 = arith.maximumf %30, %31 : vector<64x16xf32>
    %33 = arith.truncf %32 : vector<64x16xf32> to vector<64x16xbf16>
    %c0_16 = arith.constant 0 : index
    %c0_17 = arith.constant 0 : index
    %34 = vector.load %arg6[%c0_16, %c0_17] : memref<16x1024xbf16, #tpu.memory_space<vmem>>, vector<16x512xbf16>
    %cst_18 = arith.constant dense<0.000000e+00> : vector<64x512xf32>
    %35 = tpu.matmul %33, %34, %cst_18 {dimension_numbers = #tpu.dot_dimension_numbers<[1], [0], [0], [1], [0, 0, 1, 1], [], []>} : vector<64x16xbf16>, vector<16x512xbf16>, vector<64x512xf32> -> vector<64x512xf32>
    %c0_19 = arith.constant 0 : index
    %c0_20 = arith.constant 0 : index
    %36 = vector.load %arg7[%c0_19, %c0_20] : memref<1x1024xf32, #tpu.memory_space<vmem>>, vector<1x512xf32>
    %37 = vector.broadcast %36 : vector<1x512xf32> to vector<64x512xf32>
    %38 = arith.addf %35, %37 : vector<64x512xf32>
    %39 = vector.shape_cast %38 : vector<64x512xf32> to vector<8x8x512xf32>
    %c0_21 = arith.constant 0 : index
    %c0_22 = arith.constant 0 : index
    %c0_23 = arith.constant 0 : index
    %40 = vector.load %arg12[%c0_21, %c0_22, %c0_23] : memref<8x8x512xf32, #tpu.memory_space<vmem>>, vector<8x8x512xf32>
    tpu.vector_store %arg12[%c0_21, %c0_22, %c0_23], %39 {strides = array<i32>} : memref<8x8x512xf32, #tpu.memory_space<vmem>>, vector<8x8x512xf32>,
    %c0_24 = arith.constant 0 : index
    %c512 = arith.constant 512 : index
    %41 = vector.load %arg6[%c0_24, %c512] : memref<16x1024xbf16, #tpu.memory_space<vmem>>, vector<16x512xbf16>
    %cst_25 = arith.constant dense<0.000000e+00> : vector<64x512xf32>
    %42 = tpu.matmul %33, %41, %cst_25 {dimension_numbers = #tpu.dot_dimension_numbers<[1], [0], [0], [1], [0, 0, 1, 1], [], []>} : vector<64x16xbf16>, vector<16x512xbf16>, vector<64x512xf32> -> vector<64x512xf32>
    %c0_26 = arith.constant 0 : index
    %c512_27 = arith.constant 512 : index
    %43 = vector.load %arg7[%c0_26, %c512_27] : memref<1x1024xf32, #tpu.memory_space<vmem>>, vector<1x512xf32>
    %44 = vector.broadcast %43 : vector<1x512xf32> to vector<64x512xf32>
    %45 = arith.addf %42, %44 : vector<64x512xf32>
    %46 = vector.shape_cast %45 : vector<64x512xf32> to vector<8x8x512xf32>
    %c0_28 = arith.constant 0 : index
    %c0_29 = arith.constant 0 : index
    %c0_30 = arith.constant 0 : index
    %47 = vector.load %arg13[%c0_28, %c0_29, %c0_30] : memref<8x8x512xf32, #tpu.memory_space<vmem>>, vector<8x8x512xf32>
    tpu.vector_store %arg13[%c0_28, %c0_29, %c0_30], %46 {strides = array<i32>} : memref<8x8x512xf32, #tpu.memory_space<vmem>>, vector<8x8x512xf32>,
    %cst_31 = arith.constant 0.000000e+00 : f32
    %48 = vector.broadcast %cst_31 : f32 to vector<8x128xf32>
    %c0_i32 = arith.constant 0 : i32
    %c7_i32 = arith.constant 7 : i32
    %49 = arith.subi %c7_i32, %c0_i32 : i32
    %50 = arith.index_cast %c0_i32 : i32 to index
    %c0_32 = arith.constant 0 : index
    %c0_33 = arith.constant 0 : index
    %51 = vector.load %arg12[%50, %c0_32, %c0_33] : memref<8x8x512xf32, #tpu.memory_space<vmem>>, vector<1x8x512xf32>
    %52 = vector.shape_cast %51 : vector<1x8x512xf32> to vector<8x512xf32>
    %53 = arith.truncf %48 : vector<8x128xf32> to vector<8x128xbf16>
    %c0_34 = arith.constant 0 : index
    %c0_35 = arith.constant 0 : index
    %54 = vector.load %arg8[%c0_34, %c0_35] : memref<128x512xbf16, #tpu.memory_space<vmem>>, vector<128x512xbf16>
    %cst_36 = arith.constant dense<0.000000e+00> : vector<8x512xf32>
    %55 = tpu.matmul %53, %54, %cst_36 {dimension_numbers = #tpu.dot_dimension_numbers<[1], [0], [0], [1], [0, 0, 1, 1], [], []>} : vector<8x128xbf16>, vector<128x512xbf16>, vector<8x512xf32> -> vector<8x512xf32>
    %56 = arith.addf %52, %55 : vector<8x512xf32>
    %57 = arith.index_cast %49 : i32 to index
    %c0_37 = arith.constant 0 : index
    %c0_38 = arith.constant 0 : index
    %58 = vector.load %arg13[%57, %c0_37, %c0_38] : memref<8x8x512xf32, #tpu.memory_space<vmem>>, vector<1x8x512xf32>
    %59 = vector.shape_cast %58 : vector<1x8x512xf32> to vector<8x512xf32>
    %60 = arith.truncf %48 : vector<8x128xf32> to vector<8x128xbf16>
    %c0_39 = arith.constant 0 : index
    %c0_40 = arith.constant 0 : index
    %61 = vector.load %arg9[%c0_39, %c0_40] : memref<128x512xbf16, #tpu.memory_space<vmem>>, vector<128x512xbf16>
    %cst_41 = arith.constant dense<0.000000e+00> : vector<8x512xf32>
    %62 = tpu.matmul %60, %61, %cst_41 {dimension_numbers = #tpu.dot_dimension_numbers<[1], [0], [0], [1], [0, 0, 1, 1], [], []>} : vector<8x128xbf16>, vector<128x512xbf16>, vector<8x512xf32> -> vector<8x512xf32>
    %63 = arith.addf %59, %62 : vector<8x512xf32>
    %64 = vector.extract_strided_slice %56 {offsets = [0, 0], sizes = [8, 128], strides = [1, 1]} : vector<8x512xf32> to vector<8x128xf32>
    %65 = arith.negf %64 : vector<8x128xf32>
    %66 = math.exp %65 : vector<8x128xf32>
    %cst_42 = arith.constant 1.000000e+00 : f32
    %67 = vector.broadcast %cst_42 : f32 to vector<8x128xf32>
    %68 = arith.addf %67, %66 : vector<8x128xf32>
    %69 = arith.divf %67, %68 : vector<8x128xf32>
    %70 = vector.extract_strided_slice %56 {offsets = [0, 128], sizes = [8, 128], strides = [1, 1]} : vector<8x512xf32> to vector<8x128xf32>
    %71 = arith.negf %70 : vector<8x128xf32>
    %72 = math.exp %71 : vector<8x128xf32>
    %cst_43 = arith.constant 1.000000e+00 : f32
    %73 = vector.broadcast %cst_43 : f32 to vector<8x128xf32>
    %74 = arith.addf %73, %72 : vector<8x128xf32>
    %75 = arith.divf %73, %74 : vector<8x128xf32>
    %76 = vector.extract_strided_slice %56 {offsets = [0, 256], sizes = [8, 128], strides = [1, 1]} : vector<8x512xf32> to vector<8x128xf32>
    %77 = math.tanh %76 : vector<8x128xf32>
    %78 = vector.extract_strided_slice %56 {offsets = [0, 384], sizes = [8, 128], strides = [1, 1]} : vector<8x512xf32> to vector<8x128xf32>
    %79 = arith.negf %78 : vector<8x128xf32>
    %80 = math.exp %79 : vector<8x128xf32>
    %cst_44 = arith.constant 1.000000e+00 : f32
    %81 = vector.broadcast %cst_44 : f32 to vector<8x128xf32>
    %82 = arith.addf %81, %80 : vector<8x128xf32>
    %83 = arith.divf %81, %82 : vector<8x128xf32>
    %84 = arith.mulf %75, %48 : vector<8x128xf32>
    %85 = arith.mulf %69, %77 : vector<8x128xf32>
    %86 = arith.addf %84, %85 : vector<8x128xf32>
    %87 = math.tanh %86 : vector<8x128xf32>
    %88 = arith.mulf %83, %87 : vector<8x128xf32>
    %89 = vector.extract_strided_slice %63 {offsets = [0, 0], sizes = [8, 128], strides = [1, 1]} : vector<8x512xf32> to vector<8x128xf32>
    %90 = arith.negf %89 : vector<8x128xf32>
    %91 = math.exp %90 : vector<8x128xf32>
    %cst_45 = arith.constant 1.000000e+00 : f32
    %92 = vector.broadcast %cst_45 : f32 to vector<8x128xf32>
    %93 = arith.addf %92, %91 : vector<8x128xf32>
    %94 = arith.divf %92, %93 : vector<8x128xf32>
    %95 = vector.extract_strided_slice %63 {offsets = [0, 128], sizes = [8, 128], strides = [1, 1]} : vector<8x512xf32> to vector<8x128xf32>
    %96 = arith.negf %95 : vector<8x128xf32>
    %97 = math.exp %96 : vector<8x128xf32>
    %cst_46 = arith.constant 1.000000e+00 : f32
    %98 = vector.broadcast %cst_46 : f32 to vector<8x128xf32>
    %99 = arith.addf %98, %97 : vector<8x128xf32>
    %100 = arith.divf %98, %99 : vector<8x128xf32>
    %101 = vector.extract_strided_slice %63 {offsets = [0, 256], sizes = [8, 128], strides = [1, 1]} : vector<8x512xf32> to vector<8x128xf32>
    %102 = math.tanh %101 : vector<8x128xf32>
    %103 = vector.extract_strided_slice %63 {offsets = [0, 384], sizes = [8, 128], strides = [1, 1]} : vector<8x512xf32> to vector<8x128xf32>
    %104 = arith.negf %103 : vector<8x128xf32>
    %105 = math.exp %104 : vector<8x128xf32>
    %cst_47 = arith.constant 1.000000e+00 : f32
    %106 = vector.broadcast %cst_47 : f32 to vector<8x128xf32>
    %107 = arith.addf %106, %105 : vector<8x128xf32>
    %108 = arith.divf %106, %107 : vector<8x128xf32>
    %109 = arith.mulf %100, %48 : vector<8x128xf32>
    %110 = arith.mulf %94, %102 : vector<8x128xf32>
    %111 = arith.addf %109, %110 : vector<8x128xf32>
    %112 = math.tanh %111 : vector<8x128xf32>
    %113 = arith.mulf %108, %112 : vector<8x128xf32>
    %114 = arith.index_cast %c0_i32 : i32 to index
    %c0_48 = arith.constant 0 : index
    %c0_49 = arith.constant 0 : index
    %115 = vector.load %arg10[%114, %c0_48, %c0_49] : memref<8x8x128xf32, #tpu.memory_space<vmem>>, vector<1x8x128xf32>
    %116 = vector.shape_cast %115 : vector<1x8x128xf32> to vector<8x128xf32>
    %117 = vector.shape_cast %88 : vector<8x128xf32> to vector<1x8x128xf32>
    tpu.vector_store %arg10[%114, %c0_48, %c0_49], %117 {strides = array<i32>} : memref<8x8x128xf32, #tpu.memory_space<vmem>>, vector<1x8x128xf32>,
    %118 = arith.index_cast %49 : i32 to index
    %c0_50 = arith.constant 0 : index
    %c0_51 = arith.constant 0 : index
    %119 = vector.load %arg11[%118, %c0_50, %c0_51] : memref<8x8x128xf32, #tpu.memory_space<vmem>>, vector<1x8x128xf32>
    %120 = vector.shape_cast %119 : vector<1x8x128xf32> to vector<8x128xf32>
    %121 = vector.shape_cast %113 : vector<8x128xf32> to vector<1x8x128xf32>
    tpu.vector_store %arg11[%118, %c0_50, %c0_51], %121 {strides = array<i32>} : memref<8x8x128xf32, #tpu.memory_space<vmem>>, vector<1x8x128xf32>,
    %c1_i32 = arith.constant 1 : i32
    %c7_i32_52 = arith.constant 7 : i32
    %122 = arith.subi %c7_i32_52, %c1_i32 : i32
    %123 = arith.index_cast %c1_i32 : i32 to index
    %c0_53 = arith.constant 0 : index
    %c0_54 = arith.constant 0 : index
    %124 = vector.load %arg12[%123, %c0_53, %c0_54] : memref<8x8x512xf32, #tpu.memory_space<vmem>>, vector<1x8x512xf32>
    %125 = vector.shape_cast %124 : vector<1x8x512xf32> to vector<8x512xf32>
    %126 = arith.truncf %88 : vector<8x128xf32> to vector<8x128xbf16>
    %c0_55 = arith.constant 0 : index
    %c0_56 = arith.constant 0 : index
    %127 = vector.load %arg8[%c0_55, %c0_56] : memref<128x512xbf16, #tpu.memory_space<vmem>>, vector<128x512xbf16>
    %cst_57 = arith.constant dense<0.000000e+00> : vector<8x512xf32>
    %128 = tpu.matmul %126, %127, %cst_57 {dimension_numbers = #tpu.dot_dimension_numbers<[1], [0], [0], [1], [0, 0, 1, 1], [], []>} : vector<8x128xbf16>, vector<128x512xbf16>, vector<8x512xf32> -> vector<8x512xf32>
    %129 = arith.addf %125, %128 : vector<8x512xf32>
    %130 = arith.index_cast %122 : i32 to index
    %c0_58 = arith.constant 0 : index
    %c0_59 = arith.constant 0 : index
    %131 = vector.load %arg13[%130, %c0_58, %c0_59] : memref<8x8x512xf32, #tpu.memory_space<vmem>>, vector<1x8x512xf32>
    %132 = vector.shape_cast %131 : vector<1x8x512xf32> to vector<8x512xf32>
    %133 = arith.truncf %113 : vector<8x128xf32> to vector<8x128xbf16>
    %c0_60 = arith.constant 0 : index
    %c0_61 = arith.constant 0 : index
    %134 = vector.load %arg9[%c0_60, %c0_61] : memref<128x512xbf16, #tpu.memory_space<vmem>>, vector<128x512xbf16>
    %cst_62 = arith.constant dense<0.000000e+00> : vector<8x512xf32>
    %135 = tpu.matmul %133, %134, %cst_62 {dimension_numbers = #tpu.dot_dimension_numbers<[1], [0], [0], [1], [0, 0, 1, 1], [], []>} : vector<8x128xbf16>, vector<128x512xbf16>, vector<8x512xf32> -> vector<8x512xf32>
    %136 = arith.addf %132, %135 : vector<8x512xf32>
    %137 = vector.extract_strided_slice %129 {offsets = [0, 0], sizes = [8, 128], strides = [1, 1]} : vector<8x512xf32> to vector<8x128xf32>
    %138 = arith.negf %137 : vector<8x128xf32>
    %139 = math.exp %138 : vector<8x128xf32>
    %cst_63 = arith.constant 1.000000e+00 : f32
    %140 = vector.broadcast %cst_63 : f32 to vector<8x128xf32>
    %141 = arith.addf %140, %139 : vector<8x128xf32>
    %142 = arith.divf %140, %141 : vector<8x128xf32>
    %143 = vector.extract_strided_slice %129 {offsets = [0, 128], sizes = [8, 128], strides = [1, 1]} : vector<8x512xf32> to vector<8x128xf32>
    %144 = arith.negf %143 : vector<8x128xf32>
    %145 = math.exp %144 : vector<8x128xf32>
    %cst_64 = arith.constant 1.000000e+00 : f32
    %146 = vector.broadcast %cst_64 : f32 to vector<8x128xf32>
    %147 = arith.addf %146, %145 : vector<8x128xf32>
    %148 = arith.divf %146, %147 : vector<8x128xf32>
    %149 = vector.extract_strided_slice %129 {offsets = [0, 256], sizes = [8, 128], strides = [1, 1]} : vector<8x512xf32> to vector<8x128xf32>
    %150 = math.tanh %149 : vector<8x128xf32>
    %151 = vector.extract_strided_slice %129 {offsets = [0, 384], sizes = [8, 128], strides = [1, 1]} : vector<8x512xf32> to vector<8x128xf32>
    %152 = arith.negf %151 : vector<8x128xf32>
    %153 = math.exp %152 : vector<8x128xf32>
    %cst_65 = arith.constant 1.000000e+00 : f32
    %154 = vector.broadcast %cst_65 : f32 to vector<8x128xf32>
    %155 = arith.addf %154, %153 : vector<8x128xf32>
    %156 = arith.divf %154, %155 : vector<8x128xf32>
    %157 = arith.mulf %148, %86 : vector<8x128xf32>
    %158 = arith.mulf %142, %150 : vector<8x128xf32>
    %159 = arith.addf %157, %158 : vector<8x128xf32>
    %160 = math.tanh %159 : vector<8x128xf32>
    %161 = arith.mulf %156, %160 : vector<8x128xf32>
    %162 = vector.extract_strided_slice %136 {offsets = [0, 0], sizes = [8, 128], strides = [1, 1]} : vector<8x512xf32> to vector<8x128xf32>
    %163 = arith.negf %162 : vector<8x128xf32>
    %164 = math.exp %163 : vector<8x128xf32>
    %cst_66 = arith.constant 1.000000e+00 : f32
    %165 = vector.broadcast %cst_66 : f32 to vector<8x128xf32>
    %166 = arith.addf %165, %164 : vector<8x128xf32>
    %167 = arith.divf %165, %166 : vector<8x128xf32>
    %168 = vector.extract_strided_slice %136 {offsets = [0, 128], sizes = [8, 128], strides = [1, 1]} : vector<8x512xf32> to vector<8x128xf32>
    %169 = arith.negf %168 : vector<8x128xf32>
    %170 = math.exp %169 : vector<8x128xf32>
    %cst_67 = arith.constant 1.000000e+00 : f32
    %171 = vector.broadcast %cst_67 : f32 to vector<8x128xf32>
    %172 = arith.addf %171, %170 : vector<8x128xf32>
    %173 = arith.divf %171, %172 : vector<8x128xf32>
    %174 = vector.extract_strided_slice %136 {offsets = [0, 256], sizes = [8, 128], strides = [1, 1]} : vector<8x512xf32> to vector<8x128xf32>
    %175 = math.tanh %174 : vector<8x128xf32>
    %176 = vector.extract_strided_slice %136 {offsets = [0, 384], sizes = [8, 128], strides = [1, 1]} : vector<8x512xf32> to vector<8x128xf32>
    %177 = arith.negf %176 : vector<8x128xf32>
    %178 = math.exp %177 : vector<8x128xf32>
    %cst_68 = arith.constant 1.000000e+00 : f32
    %179 = vector.broadcast %cst_68 : f32 to vector<8x128xf32>
    %180 = arith.addf %179, %178 : vector<8x128xf32>
    %181 = arith.divf %179, %180 : vector<8x128xf32>
    %182 = arith.mulf %173, %111 : vector<8x128xf32>
    %183 = arith.mulf %167, %175 : vector<8x128xf32>
    %184 = arith.addf %182, %183 : vector<8x128xf32>
    %185 = math.tanh %184 : vector<8x128xf32>
    %186 = arith.mulf %181, %185 : vector<8x128xf32>
    %187 = arith.index_cast %c1_i32 : i32 to index
    %c0_69 = arith.constant 0 : index
    %c0_70 = arith.constant 0 : index
    %188 = vector.load %arg10[%187, %c0_69, %c0_70] : memref<8x8x128xf32, #tpu.memory_space<vmem>>, vector<1x8x128xf32>
    %189 = vector.shape_cast %188 : vector<1x8x128xf32> to vector<8x128xf32>
    %190 = vector.shape_cast %161 : vector<8x128xf32> to vector<1x8x128xf32>
    tpu.vector_store %arg10[%187, %c0_69, %c0_70], %190 {strides = array<i32>} : memref<8x8x128xf32, #tpu.memory_space<vmem>>, vector<1x8x128xf32>,
    %191 = arith.index_cast %122 : i32 to index
    %c0_71 = arith.constant 0 : index
    %c0_72 = arith.constant 0 : index
    %192 = vector.load %arg11[%191, %c0_71, %c0_72] : memref<8x8x128xf32, #tpu.memory_space<vmem>>, vector<1x8x128xf32>
    %193 = vector.shape_cast %192 : vector<1x8x128xf32> to vector<8x128xf32>
    %194 = vector.shape_cast %186 : vector<8x128xf32> to vector<1x8x128xf32>
    tpu.vector_store %arg11[%191, %c0_71, %c0_72], %194 {strides = array<i32>} : memref<8x8x128xf32, #tpu.memory_space<vmem>>, vector<1x8x128xf32>,
    %c2_i32 = arith.constant 2 : i32
    %c7_i32_73 = arith.constant 7 : i32
    %195 = arith.subi %c7_i32_73, %c2_i32 : i32
    %196 = arith.index_cast %c2_i32 : i32 to index
    %c0_74 = arith.constant 0 : index
    %c0_75 = arith.constant 0 : index
    %197 = vector.load %arg12[%196, %c0_74, %c0_75] : memref<8x8x512xf32, #tpu.memory_space<vmem>>, vector<1x8x512xf32>
    %198 = vector.shape_cast %197 : vector<1x8x512xf32> to vector<8x512xf32>
    %199 = arith.truncf %161 : vector<8x128xf32> to vector<8x128xbf16>
    %c0_76 = arith.constant 0 : index
    %c0_77 = arith.constant 0 : index
    %200 = vector.load %arg8[%c0_76, %c0_77] : memref<128x512xbf16, #tpu.memory_space<vmem>>, vector<128x512xbf16>
    %cst_78 = arith.constant dense<0.000000e+00> : vector<8x512xf32>
    %201 = tpu.matmul %199, %200, %cst_78 {dimension_numbers = #tpu.dot_dimension_numbers<[1], [0], [0], [1], [0, 0, 1, 1], [], []>} : vector<8x128xbf16>, vector<128x512xbf16>, vector<8x512xf32> -> vector<8x512xf32>
    %202 = arith.addf %198, %201 : vector<8x512xf32>
    %203 = arith.index_cast %195 : i32 to index
    %c0_79 = arith.constant 0 : index
    %c0_80 = arith.constant 0 : index
    %204 = vector.load %arg13[%203, %c0_79, %c0_80] : memref<8x8x512xf32, #tpu.memory_space<vmem>>, vector<1x8x512xf32>
    %205 = vector.shape_cast %204 : vector<1x8x512xf32> to vector<8x512xf32>
    %206 = arith.truncf %186 : vector<8x128xf32> to vector<8x128xbf16>
    %c0_81 = arith.constant 0 : index
    %c0_82 = arith.constant 0 : index
    %207 = vector.load %arg9[%c0_81, %c0_82] : memref<128x512xbf16, #tpu.memory_space<vmem>>, vector<128x512xbf16>
    %cst_83 = arith.constant dense<0.000000e+00> : vector<8x512xf32>
    %208 = tpu.matmul %206, %207, %cst_83 {dimension_numbers = #tpu.dot_dimension_numbers<[1], [0], [0], [1], [0, 0, 1, 1], [], []>} : vector<8x128xbf16>, vector<128x512xbf16>, vector<8x512xf32> -> vector<8x512xf32>
    %209 = arith.addf %205, %208 : vector<8x512xf32>
    %210 = vector.extract_strided_slice %202 {offsets = [0, 0], sizes = [8, 128], strides = [1, 1]} : vector<8x512xf32> to vector<8x128xf32>
    %211 = arith.negf %210 : vector<8x128xf32>
    %212 = math.exp %211 : vector<8x128xf32>
    %cst_84 = arith.constant 1.000000e+00 : f32
    %213 = vector.broadcast %cst_84 : f32 to vector<8x128xf32>
    %214 = arith.addf %213, %212 : vector<8x128xf32>
    %215 = arith.divf %213, %214 : vector<8x128xf32>
    %216 = vector.extract_strided_slice %202 {offsets = [0, 128], sizes = [8, 128], strides = [1, 1]} : vector<8x512xf32> to vector<8x128xf32>
    %217 = arith.negf %216 : vector<8x128xf32>
    %218 = math.exp %217 : vector<8x128xf32>
    %cst_85 = arith.constant 1.000000e+00 : f32
    %219 = vector.broadcast %cst_85 : f32 to vector<8x128xf32>
    %220 = arith.addf %219, %218 : vector<8x128xf32>
    %221 = arith.divf %219, %220 : vector<8x128xf32>
    %222 = vector.extract_strided_slice %202 {offsets = [0, 256], sizes = [8, 128], strides = [1, 1]} : vector<8x512xf32> to vector<8x128xf32>
    %223 = math.tanh %222 : vector<8x128xf32>
    %224 = vector.extract_strided_slice %202 {offsets = [0, 384], sizes = [8, 128], strides = [1, 1]} : vector<8x512xf32> to vector<8x128xf32>
    %225 = arith.negf %224 : vector<8x128xf32>
    %226 = math.exp %225 : vector<8x128xf32>
    %cst_86 = arith.constant 1.000000e+00 : f32
    %227 = vector.broadcast %cst_86 : f32 to vector<8x128xf32>
    %228 = arith.addf %227, %226 : vector<8x128xf32>
    %229 = arith.divf %227, %228 : vector<8x128xf32>
    %230 = arith.mulf %221, %159 : vector<8x128xf32>
    %231 = arith.mulf %215, %223 : vector<8x128xf32>
    %232 = arith.addf %230, %231 : vector<8x128xf32>
    %233 = math.tanh %232 : vector<8x128xf32>
    %234 = arith.mulf %229, %233 : vector<8x128xf32>
    %235 = vector.extract_strided_slice %209 {offsets = [0, 0], sizes = [8, 128], strides = [1, 1]} : vector<8x512xf32> to vector<8x128xf32>
    %236 = arith.negf %235 : vector<8x128xf32>
    %237 = math.exp %236 : vector<8x128xf32>
    %cst_87 = arith.constant 1.000000e+00 : f32
    %238 = vector.broadcast %cst_87 : f32 to vector<8x128xf32>
    %239 = arith.addf %238, %237 : vector<8x128xf32>
    %240 = arith.divf %238, %239 : vector<8x128xf32>
    %241 = vector.extract_strided_slice %209 {offsets = [0, 128], sizes = [8, 128], strides = [1, 1]} : vector<8x512xf32> to vector<8x128xf32>
    %242 = arith.negf %241 : vector<8x128xf32>
    %243 = math.exp %242 : vector<8x128xf32>
    %cst_88 = arith.constant 1.000000e+00 : f32
    %244 = vector.broadcast %cst_88 : f32 to vector<8x128xf32>
    %245 = arith.addf %244, %243 : vector<8x128xf32>
    %246 = arith.divf %244, %245 : vector<8x128xf32>
    %247 = vector.extract_strided_slice %209 {offsets = [0, 256], sizes = [8, 128], strides = [1, 1]} : vector<8x512xf32> to vector<8x128xf32>
    %248 = math.tanh %247 : vector<8x128xf32>
    %249 = vector.extract_strided_slice %209 {offsets = [0, 384], sizes = [8, 128], strides = [1, 1]} : vector<8x512xf32> to vector<8x128xf32>
    %250 = arith.negf %249 : vector<8x128xf32>
    %251 = math.exp %250 : vector<8x128xf32>
    %cst_89 = arith.constant 1.000000e+00 : f32
    %252 = vector.broadcast %cst_89 : f32 to vector<8x128xf32>
    %253 = arith.addf %252, %251 : vector<8x128xf32>
    %254 = arith.divf %252, %253 : vector<8x128xf32>
    %255 = arith.mulf %246, %184 : vector<8x128xf32>
    %256 = arith.mulf %240, %248 : vector<8x128xf32>
    %257 = arith.addf %255, %256 : vector<8x128xf32>
    %258 = math.tanh %257 : vector<8x128xf32>
    %259 = arith.mulf %254, %258 : vector<8x128xf32>
    %260 = arith.index_cast %c2_i32 : i32 to index
    %c0_90 = arith.constant 0 : index
    %c0_91 = arith.constant 0 : index
    %261 = vector.load %arg10[%260, %c0_90, %c0_91] : memref<8x8x128xf32, #tpu.memory_space<vmem>>, vector<1x8x128xf32>
    %262 = vector.shape_cast %261 : vector<1x8x128xf32> to vector<8x128xf32>
    %263 = vector.shape_cast %234 : vector<8x128xf32> to vector<1x8x128xf32>
    tpu.vector_store %arg10[%260, %c0_90, %c0_91], %263 {strides = array<i32>} : memref<8x8x128xf32, #tpu.memory_space<vmem>>, vector<1x8x128xf32>,
    %264 = arith.index_cast %195 : i32 to index
    %c0_92 = arith.constant 0 : index
    %c0_93 = arith.constant 0 : index
    %265 = vector.load %arg11[%264, %c0_92, %c0_93] : memref<8x8x128xf32, #tpu.memory_space<vmem>>, vector<1x8x128xf32>
    %266 = vector.shape_cast %265 : vector<1x8x128xf32> to vector<8x128xf32>
    %267 = vector.shape_cast %259 : vector<8x128xf32> to vector<1x8x128xf32>
    tpu.vector_store %arg11[%264, %c0_92, %c0_93], %267 {strides = array<i32>} : memref<8x8x128xf32, #tpu.memory_space<vmem>>, vector<1x8x128xf32>,
    %c3_i32 = arith.constant 3 : i32
    %c7_i32_94 = arith.constant 7 : i32
    %268 = arith.subi %c7_i32_94, %c3_i32 : i32
    %269 = arith.index_cast %c3_i32 : i32 to index
    %c0_95 = arith.constant 0 : index
    %c0_96 = arith.constant 0 : index
    %270 = vector.load %arg12[%269, %c0_95, %c0_96] : memref<8x8x512xf32, #tpu.memory_space<vmem>>, vector<1x8x512xf32>
    %271 = vector.shape_cast %270 : vector<1x8x512xf32> to vector<8x512xf32>
    %272 = arith.truncf %234 : vector<8x128xf32> to vector<8x128xbf16>
    %c0_97 = arith.constant 0 : index
    %c0_98 = arith.constant 0 : index
    %273 = vector.load %arg8[%c0_97, %c0_98] : memref<128x512xbf16, #tpu.memory_space<vmem>>, vector<128x512xbf16>
    %cst_99 = arith.constant dense<0.000000e+00> : vector<8x512xf32>
    %274 = tpu.matmul %272, %273, %cst_99 {dimension_numbers = #tpu.dot_dimension_numbers<[1], [0], [0], [1], [0, 0, 1, 1], [], []>} : vector<8x128xbf16>, vector<128x512xbf16>, vector<8x512xf32> -> vector<8x512xf32>
    %275 = arith.addf %271, %274 : vector<8x512xf32>
    %276 = arith.index_cast %268 : i32 to index
    %c0_100 = arith.constant 0 : index
    %c0_101 = arith.constant 0 : index
    %277 = vector.load %arg13[%276, %c0_100, %c0_101] : memref<8x8x512xf32, #tpu.memory_space<vmem>>, vector<1x8x512xf32>
    %278 = vector.shape_cast %277 : vector<1x8x512xf32> to vector<8x512xf32>
    %279 = arith.truncf %259 : vector<8x128xf32> to vector<8x128xbf16>
    %c0_102 = arith.constant 0 : index
    %c0_103 = arith.constant 0 : index
    %280 = vector.load %arg9[%c0_102, %c0_103] : memref<128x512xbf16, #tpu.memory_space<vmem>>, vector<128x512xbf16>
    %cst_104 = arith.constant dense<0.000000e+00> : vector<8x512xf32>
    %281 = tpu.matmul %279, %280, %cst_104 {dimension_numbers = #tpu.dot_dimension_numbers<[1], [0], [0], [1], [0, 0, 1, 1], [], []>} : vector<8x128xbf16>, vector<128x512xbf16>, vector<8x512xf32> -> vector<8x512xf32>
    %282 = arith.addf %278, %281 : vector<8x512xf32>
    %283 = vector.extract_strided_slice %275 {offsets = [0, 0], sizes = [8, 128], strides = [1, 1]} : vector<8x512xf32> to vector<8x128xf32>
    %284 = arith.negf %283 : vector<8x128xf32>
    %285 = math.exp %284 : vector<8x128xf32>
    %cst_105 = arith.constant 1.000000e+00 : f32
    %286 = vector.broadcast %cst_105 : f32 to vector<8x128xf32>
    %287 = arith.addf %286, %285 : vector<8x128xf32>
    %288 = arith.divf %286, %287 : vector<8x128xf32>
    %289 = vector.extract_strided_slice %275 {offsets = [0, 128], sizes = [8, 128], strides = [1, 1]} : vector<8x512xf32> to vector<8x128xf32>
    %290 = arith.negf %289 : vector<8x128xf32>
    %291 = math.exp %290 : vector<8x128xf32>
    %cst_106 = arith.constant 1.000000e+00 : f32
    %292 = vector.broadcast %cst_106 : f32 to vector<8x128xf32>
    %293 = arith.addf %292, %291 : vector<8x128xf32>
    %294 = arith.divf %292, %293 : vector<8x128xf32>
    %295 = vector.extract_strided_slice %275 {offsets = [0, 256], sizes = [8, 128], strides = [1, 1]} : vector<8x512xf32> to vector<8x128xf32>
    %296 = math.tanh %295 : vector<8x128xf32>
    %297 = vector.extract_strided_slice %275 {offsets = [0, 384], sizes = [8, 128], strides = [1, 1]} : vector<8x512xf32> to vector<8x128xf32>
    %298 = arith.negf %297 : vector<8x128xf32>
    %299 = math.exp %298 : vector<8x128xf32>
    %cst_107 = arith.constant 1.000000e+00 : f32
    %300 = vector.broadcast %cst_107 : f32 to vector<8x128xf32>
    %301 = arith.addf %300, %299 : vector<8x128xf32>
    %302 = arith.divf %300, %301 : vector<8x128xf32>
    %303 = arith.mulf %294, %232 : vector<8x128xf32>
    %304 = arith.mulf %288, %296 : vector<8x128xf32>
    %305 = arith.addf %303, %304 : vector<8x128xf32>
    %306 = math.tanh %305 : vector<8x128xf32>
    %307 = arith.mulf %302, %306 : vector<8x128xf32>
    %308 = vector.extract_strided_slice %282 {offsets = [0, 0], sizes = [8, 128], strides = [1, 1]} : vector<8x512xf32> to vector<8x128xf32>
    %309 = arith.negf %308 : vector<8x128xf32>
    %310 = math.exp %309 : vector<8x128xf32>
    %cst_108 = arith.constant 1.000000e+00 : f32
    %311 = vector.broadcast %cst_108 : f32 to vector<8x128xf32>
    %312 = arith.addf %311, %310 : vector<8x128xf32>
    %313 = arith.divf %311, %312 : vector<8x128xf32>
    %314 = vector.extract_strided_slice %282 {offsets = [0, 128], sizes = [8, 128], strides = [1, 1]} : vector<8x512xf32> to vector<8x128xf32>
    %315 = arith.negf %314 : vector<8x128xf32>
    %316 = math.exp %315 : vector<8x128xf32>
    %cst_109 = arith.constant 1.000000e+00 : f32
    %317 = vector.broadcast %cst_109 : f32 to vector<8x128xf32>
    %318 = arith.addf %317, %316 : vector<8x128xf32>
    %319 = arith.divf %317, %318 : vector<8x128xf32>
    %320 = vector.extract_strided_slice %282 {offsets = [0, 256], sizes = [8, 128], strides = [1, 1]} : vector<8x512xf32> to vector<8x128xf32>
    %321 = math.tanh %320 : vector<8x128xf32>
    %322 = vector.extract_strided_slice %282 {offsets = [0, 384], sizes = [8, 128], strides = [1, 1]} : vector<8x512xf32> to vector<8x128xf32>
    %323 = arith.negf %322 : vector<8x128xf32>
    %324 = math.exp %323 : vector<8x128xf32>
    %cst_110 = arith.constant 1.000000e+00 : f32
    %325 = vector.broadcast %cst_110 : f32 to vector<8x128xf32>
    %326 = arith.addf %325, %324 : vector<8x128xf32>
    %327 = arith.divf %325, %326 : vector<8x128xf32>
    %328 = arith.mulf %319, %257 : vector<8x128xf32>
    %329 = arith.mulf %313, %321 : vector<8x128xf32>
    %330 = arith.addf %328, %329 : vector<8x128xf32>
    %331 = math.tanh %330 : vector<8x128xf32>
    %332 = arith.mulf %327, %331 : vector<8x128xf32>
    %333 = arith.index_cast %c3_i32 : i32 to index
    %c0_111 = arith.constant 0 : index
    %c0_112 = arith.constant 0 : index
    %334 = vector.load %arg10[%333, %c0_111, %c0_112] : memref<8x8x128xf32, #tpu.memory_space<vmem>>, vector<1x8x128xf32>
    %335 = vector.shape_cast %334 : vector<1x8x128xf32> to vector<8x128xf32>
    %336 = vector.shape_cast %307 : vector<8x128xf32> to vector<1x8x128xf32>
    tpu.vector_store %arg10[%333, %c0_111, %c0_112], %336 {strides = array<i32>} : memref<8x8x128xf32, #tpu.memory_space<vmem>>, vector<1x8x128xf32>,
    %337 = arith.index_cast %268 : i32 to index
    %c0_113 = arith.constant 0 : index
    %c0_114 = arith.constant 0 : index
    %338 = vector.load %arg11[%337, %c0_113, %c0_114] : memref<8x8x128xf32, #tpu.memory_space<vmem>>, vector<1x8x128xf32>
    %339 = vector.shape_cast %338 : vector<1x8x128xf32> to vector<8x128xf32>
    %340 = vector.shape_cast %332 : vector<8x128xf32> to vector<1x8x128xf32>
    tpu.vector_store %arg11[%337, %c0_113, %c0_114], %340 {strides = array<i32>} : memref<8x8x128xf32, #tpu.memory_space<vmem>>, vector<1x8x128xf32>,
    %c4_i32 = arith.constant 4 : i32
    %c7_i32_115 = arith.constant 7 : i32
    %341 = arith.subi %c7_i32_115, %c4_i32 : i32
    %342 = arith.index_cast %c4_i32 : i32 to index
    %c0_116 = arith.constant 0 : index
    %c0_117 = arith.constant 0 : index
    %343 = vector.load %arg12[%342, %c0_116, %c0_117] : memref<8x8x512xf32, #tpu.memory_space<vmem>>, vector<1x8x512xf32>
    %344 = vector.shape_cast %343 : vector<1x8x512xf32> to vector<8x512xf32>
    %345 = arith.truncf %307 : vector<8x128xf32> to vector<8x128xbf16>
    %c0_118 = arith.constant 0 : index
    %c0_119 = arith.constant 0 : index
    %346 = vector.load %arg8[%c0_118, %c0_119] : memref<128x512xbf16, #tpu.memory_space<vmem>>, vector<128x512xbf16>
    %cst_120 = arith.constant dense<0.000000e+00> : vector<8x512xf32>
    %347 = tpu.matmul %345, %346, %cst_120 {dimension_numbers = #tpu.dot_dimension_numbers<[1], [0], [0], [1], [0, 0, 1, 1], [], []>} : vector<8x128xbf16>, vector<128x512xbf16>, vector<8x512xf32> -> vector<8x512xf32>
    %348 = arith.addf %344, %347 : vector<8x512xf32>
    %349 = arith.index_cast %341 : i32 to index
    %c0_121 = arith.constant 0 : index
    %c0_122 = arith.constant 0 : index
    %350 = vector.load %arg13[%349, %c0_121, %c0_122] : memref<8x8x512xf32, #tpu.memory_space<vmem>>, vector<1x8x512xf32>
    %351 = vector.shape_cast %350 : vector<1x8x512xf32> to vector<8x512xf32>
    %352 = arith.truncf %332 : vector<8x128xf32> to vector<8x128xbf16>
    %c0_123 = arith.constant 0 : index
    %c0_124 = arith.constant 0 : index
    %353 = vector.load %arg9[%c0_123, %c0_124] : memref<128x512xbf16, #tpu.memory_space<vmem>>, vector<128x512xbf16>
    %cst_125 = arith.constant dense<0.000000e+00> : vector<8x512xf32>
    %354 = tpu.matmul %352, %353, %cst_125 {dimension_numbers = #tpu.dot_dimension_numbers<[1], [0], [0], [1], [0, 0, 1, 1], [], []>} : vector<8x128xbf16>, vector<128x512xbf16>, vector<8x512xf32> -> vector<8x512xf32>
    %355 = arith.addf %351, %354 : vector<8x512xf32>
    %356 = vector.extract_strided_slice %348 {offsets = [0, 0], sizes = [8, 128], strides = [1, 1]} : vector<8x512xf32> to vector<8x128xf32>
    %357 = arith.negf %356 : vector<8x128xf32>
    %358 = math.exp %357 : vector<8x128xf32>
    %cst_126 = arith.constant 1.000000e+00 : f32
    %359 = vector.broadcast %cst_126 : f32 to vector<8x128xf32>
    %360 = arith.addf %359, %358 : vector<8x128xf32>
    %361 = arith.divf %359, %360 : vector<8x128xf32>
    %362 = vector.extract_strided_slice %348 {offsets = [0, 128], sizes = [8, 128], strides = [1, 1]} : vector<8x512xf32> to vector<8x128xf32>
    %363 = arith.negf %362 : vector<8x128xf32>
    %364 = math.exp %363 : vector<8x128xf32>
    %cst_127 = arith.constant 1.000000e+00 : f32
    %365 = vector.broadcast %cst_127 : f32 to vector<8x128xf32>
    %366 = arith.addf %365, %364 : vector<8x128xf32>
    %367 = arith.divf %365, %366 : vector<8x128xf32>
    %368 = vector.extract_strided_slice %348 {offsets = [0, 256], sizes = [8, 128], strides = [1, 1]} : vector<8x512xf32> to vector<8x128xf32>
    %369 = math.tanh %368 : vector<8x128xf32>
    %370 = vector.extract_strided_slice %348 {offsets = [0, 384], sizes = [8, 128], strides = [1, 1]} : vector<8x512xf32> to vector<8x128xf32>
    %371 = arith.negf %370 : vector<8x128xf32>
    %372 = math.exp %371 : vector<8x128xf32>
    %cst_128 = arith.constant 1.000000e+00 : f32
    %373 = vector.broadcast %cst_128 : f32 to vector<8x128xf32>
    %374 = arith.addf %373, %372 : vector<8x128xf32>
    %375 = arith.divf %373, %374 : vector<8x128xf32>
    %376 = arith.mulf %367, %305 : vector<8x128xf32>
    %377 = arith.mulf %361, %369 : vector<8x128xf32>
    %378 = arith.addf %376, %377 : vector<8x128xf32>
    %379 = math.tanh %378 : vector<8x128xf32>
    %380 = arith.mulf %375, %379 : vector<8x128xf32>
    %381 = vector.extract_strided_slice %355 {offsets = [0, 0], sizes = [8, 128], strides = [1, 1]} : vector<8x512xf32> to vector<8x128xf32>
    %382 = arith.negf %381 : vector<8x128xf32>
    %383 = math.exp %382 : vector<8x128xf32>
    %cst_129 = arith.constant 1.000000e+00 : f32
    %384 = vector.broadcast %cst_129 : f32 to vector<8x128xf32>
    %385 = arith.addf %384, %383 : vector<8x128xf32>
    %386 = arith.divf %384, %385 : vector<8x128xf32>
    %387 = vector.extract_strided_slice %355 {offsets = [0, 128], sizes = [8, 128], strides = [1, 1]} : vector<8x512xf32> to vector<8x128xf32>
    %388 = arith.negf %387 : vector<8x128xf32>
    %389 = math.exp %388 : vector<8x128xf32>
    %cst_130 = arith.constant 1.000000e+00 : f32
    %390 = vector.broadcast %cst_130 : f32 to vector<8x128xf32>
    %391 = arith.addf %390, %389 : vector<8x128xf32>
    %392 = arith.divf %390, %391 : vector<8x128xf32>
    %393 = vector.extract_strided_slice %355 {offsets = [0, 256], sizes = [8, 128], strides = [1, 1]} : vector<8x512xf32> to vector<8x128xf32>
    %394 = math.tanh %393 : vector<8x128xf32>
    %395 = vector.extract_strided_slice %355 {offsets = [0, 384], sizes = [8, 128], strides = [1, 1]} : vector<8x512xf32> to vector<8x128xf32>
    %396 = arith.negf %395 : vector<8x128xf32>
    %397 = math.exp %396 : vector<8x128xf32>
    %cst_131 = arith.constant 1.000000e+00 : f32
    %398 = vector.broadcast %cst_131 : f32 to vector<8x128xf32>
    %399 = arith.addf %398, %397 : vector<8x128xf32>
    %400 = arith.divf %398, %399 : vector<8x128xf32>
    %401 = arith.mulf %392, %330 : vector<8x128xf32>
    %402 = arith.mulf %386, %394 : vector<8x128xf32>
    %403 = arith.addf %401, %402 : vector<8x128xf32>
    %404 = math.tanh %403 : vector<8x128xf32>
    %405 = arith.mulf %400, %404 : vector<8x128xf32>
    %406 = arith.index_cast %c4_i32 : i32 to index
    %c0_132 = arith.constant 0 : index
    %c0_133 = arith.constant 0 : index
    %407 = vector.load %arg10[%406, %c0_132, %c0_133] : memref<8x8x128xf32, #tpu.memory_space<vmem>>, vector<1x8x128xf32>
    %408 = vector.shape_cast %407 : vector<1x8x128xf32> to vector<8x128xf32>
    %409 = vector.shape_cast %380 : vector<8x128xf32> to vector<1x8x128xf32>
    tpu.vector_store %arg10[%406, %c0_132, %c0_133], %409 {strides = array<i32>} : memref<8x8x128xf32, #tpu.memory_space<vmem>>, vector<1x8x128xf32>,
    %410 = arith.index_cast %341 : i32 to index
    %c0_134 = arith.constant 0 : index
    %c0_135 = arith.constant 0 : index
    %411 = vector.load %arg11[%410, %c0_134, %c0_135] : memref<8x8x128xf32, #tpu.memory_space<vmem>>, vector<1x8x128xf32>
    %412 = vector.shape_cast %411 : vector<1x8x128xf32> to vector<8x128xf32>
    %413 = vector.shape_cast %405 : vector<8x128xf32> to vector<1x8x128xf32>
    tpu.vector_store %arg11[%410, %c0_134, %c0_135], %413 {strides = array<i32>} : memref<8x8x128xf32, #tpu.memory_space<vmem>>, vector<1x8x128xf32>,
    %c5_i32 = arith.constant 5 : i32
    %c7_i32_136 = arith.constant 7 : i32
    %414 = arith.subi %c7_i32_136, %c5_i32 : i32
    %415 = arith.index_cast %c5_i32 : i32 to index
    %c0_137 = arith.constant 0 : index
    %c0_138 = arith.constant 0 : index
    %416 = vector.load %arg12[%415, %c0_137, %c0_138] : memref<8x8x512xf32, #tpu.memory_space<vmem>>, vector<1x8x512xf32>
    %417 = vector.shape_cast %416 : vector<1x8x512xf32> to vector<8x512xf32>
    %418 = arith.truncf %380 : vector<8x128xf32> to vector<8x128xbf16>
    %c0_139 = arith.constant 0 : index
    %c0_140 = arith.constant 0 : index
    %419 = vector.load %arg8[%c0_139, %c0_140] : memref<128x512xbf16, #tpu.memory_space<vmem>>, vector<128x512xbf16>
    %cst_141 = arith.constant dense<0.000000e+00> : vector<8x512xf32>
    %420 = tpu.matmul %418, %419, %cst_141 {dimension_numbers = #tpu.dot_dimension_numbers<[1], [0], [0], [1], [0, 0, 1, 1], [], []>} : vector<8x128xbf16>, vector<128x512xbf16>, vector<8x512xf32> -> vector<8x512xf32>
    %421 = arith.addf %417, %420 : vector<8x512xf32>
    %422 = arith.index_cast %414 : i32 to index
    %c0_142 = arith.constant 0 : index
    %c0_143 = arith.constant 0 : index
    %423 = vector.load %arg13[%422, %c0_142, %c0_143] : memref<8x8x512xf32, #tpu.memory_space<vmem>>, vector<1x8x512xf32>
    %424 = vector.shape_cast %423 : vector<1x8x512xf32> to vector<8x512xf32>
    %425 = arith.truncf %405 : vector<8x128xf32> to vector<8x128xbf16>
    %c0_144 = arith.constant 0 : index
    %c0_145 = arith.constant 0 : index
    %426 = vector.load %arg9[%c0_144, %c0_145] : memref<128x512xbf16, #tpu.memory_space<vmem>>, vector<128x512xbf16>
    %cst_146 = arith.constant dense<0.000000e+00> : vector<8x512xf32>
    %427 = tpu.matmul %425, %426, %cst_146 {dimension_numbers = #tpu.dot_dimension_numbers<[1], [0], [0], [1], [0, 0, 1, 1], [], []>} : vector<8x128xbf16>, vector<128x512xbf16>, vector<8x512xf32> -> vector<8x512xf32>
    %428 = arith.addf %424, %427 : vector<8x512xf32>
    %429 = vector.extract_strided_slice %421 {offsets = [0, 0], sizes = [8, 128], strides = [1, 1]} : vector<8x512xf32> to vector<8x128xf32>
    %430 = arith.negf %429 : vector<8x128xf32>
    %431 = math.exp %430 : vector<8x128xf32>
    %cst_147 = arith.constant 1.000000e+00 : f32
    %432 = vector.broadcast %cst_147 : f32 to vector<8x128xf32>
    %433 = arith.addf %432, %431 : vector<8x128xf32>
    %434 = arith.divf %432, %433 : vector<8x128xf32>
    %435 = vector.extract_strided_slice %421 {offsets = [0, 128], sizes = [8, 128], strides = [1, 1]} : vector<8x512xf32> to vector<8x128xf32>
    %436 = arith.negf %435 : vector<8x128xf32>
    %437 = math.exp %436 : vector<8x128xf32>
    %cst_148 = arith.constant 1.000000e+00 : f32
    %438 = vector.broadcast %cst_148 : f32 to vector<8x128xf32>
    %439 = arith.addf %438, %437 : vector<8x128xf32>
    %440 = arith.divf %438, %439 : vector<8x128xf32>
    %441 = vector.extract_strided_slice %421 {offsets = [0, 256], sizes = [8, 128], strides = [1, 1]} : vector<8x512xf32> to vector<8x128xf32>
    %442 = math.tanh %441 : vector<8x128xf32>
    %443 = vector.extract_strided_slice %421 {offsets = [0, 384], sizes = [8, 128], strides = [1, 1]} : vector<8x512xf32> to vector<8x128xf32>
    %444 = arith.negf %443 : vector<8x128xf32>
    %445 = math.exp %444 : vector<8x128xf32>
    %cst_149 = arith.constant 1.000000e+00 : f32
    %446 = vector.broadcast %cst_149 : f32 to vector<8x128xf32>
    %447 = arith.addf %446, %445 : vector<8x128xf32>
    %448 = arith.divf %446, %447 : vector<8x128xf32>
    %449 = arith.mulf %440, %378 : vector<8x128xf32>
    %450 = arith.mulf %434, %442 : vector<8x128xf32>
    %451 = arith.addf %449, %450 : vector<8x128xf32>
    %452 = math.tanh %451 : vector<8x128xf32>
    %453 = arith.mulf %448, %452 : vector<8x128xf32>
    %454 = vector.extract_strided_slice %428 {offsets = [0, 0], sizes = [8, 128], strides = [1, 1]} : vector<8x512xf32> to vector<8x128xf32>
    %455 = arith.negf %454 : vector<8x128xf32>
    %456 = math.exp %455 : vector<8x128xf32>
    %cst_150 = arith.constant 1.000000e+00 : f32
    %457 = vector.broadcast %cst_150 : f32 to vector<8x128xf32>
    %458 = arith.addf %457, %456 : vector<8x128xf32>
    %459 = arith.divf %457, %458 : vector<8x128xf32>
    %460 = vector.extract_strided_slice %428 {offsets = [0, 128], sizes = [8, 128], strides = [1, 1]} : vector<8x512xf32> to vector<8x128xf32>
    %461 = arith.negf %460 : vector<8x128xf32>
    %462 = math.exp %461 : vector<8x128xf32>
    %cst_151 = arith.constant 1.000000e+00 : f32
    %463 = vector.broadcast %cst_151 : f32 to vector<8x128xf32>
    %464 = arith.addf %463, %462 : vector<8x128xf32>
    %465 = arith.divf %463, %464 : vector<8x128xf32>
    %466 = vector.extract_strided_slice %428 {offsets = [0, 256], sizes = [8, 128], strides = [1, 1]} : vector<8x512xf32> to vector<8x128xf32>
    %467 = math.tanh %466 : vector<8x128xf32>
    %468 = vector.extract_strided_slice %428 {offsets = [0, 384], sizes = [8, 128], strides = [1, 1]} : vector<8x512xf32> to vector<8x128xf32>
    %469 = arith.negf %468 : vector<8x128xf32>
    %470 = math.exp %469 : vector<8x128xf32>
    %cst_152 = arith.constant 1.000000e+00 : f32
    %471 = vector.broadcast %cst_152 : f32 to vector<8x128xf32>
    %472 = arith.addf %471, %470 : vector<8x128xf32>
    %473 = arith.divf %471, %472 : vector<8x128xf32>
    %474 = arith.mulf %465, %403 : vector<8x128xf32>
    %475 = arith.mulf %459, %467 : vector<8x128xf32>
    %476 = arith.addf %474, %475 : vector<8x128xf32>
    %477 = math.tanh %476 : vector<8x128xf32>
    %478 = arith.mulf %473, %477 : vector<8x128xf32>
    %479 = arith.index_cast %c5_i32 : i32 to index
    %c0_153 = arith.constant 0 : index
    %c0_154 = arith.constant 0 : index
    %480 = vector.load %arg10[%479, %c0_153, %c0_154] : memref<8x8x128xf32, #tpu.memory_space<vmem>>, vector<1x8x128xf32>
    %481 = vector.shape_cast %480 : vector<1x8x128xf32> to vector<8x128xf32>
    %482 = vector.shape_cast %453 : vector<8x128xf32> to vector<1x8x128xf32>
    tpu.vector_store %arg10[%479, %c0_153, %c0_154], %482 {strides = array<i32>} : memref<8x8x128xf32, #tpu.memory_space<vmem>>, vector<1x8x128xf32>,
    %483 = arith.index_cast %414 : i32 to index
    %c0_155 = arith.constant 0 : index
    %c0_156 = arith.constant 0 : index
    %484 = vector.load %arg11[%483, %c0_155, %c0_156] : memref<8x8x128xf32, #tpu.memory_space<vmem>>, vector<1x8x128xf32>
    %485 = vector.shape_cast %484 : vector<1x8x128xf32> to vector<8x128xf32>
    %486 = vector.shape_cast %478 : vector<8x128xf32> to vector<1x8x128xf32>
    tpu.vector_store %arg11[%483, %c0_155, %c0_156], %486 {strides = array<i32>} : memref<8x8x128xf32, #tpu.memory_space<vmem>>, vector<1x8x128xf32>,
    %c6_i32 = arith.constant 6 : i32
    %c7_i32_157 = arith.constant 7 : i32
    %487 = arith.subi %c7_i32_157, %c6_i32 : i32
    %488 = arith.index_cast %c6_i32 : i32 to index
    %c0_158 = arith.constant 0 : index
    %c0_159 = arith.constant 0 : index
    %489 = vector.load %arg12[%488, %c0_158, %c0_159] : memref<8x8x512xf32, #tpu.memory_space<vmem>>, vector<1x8x512xf32>
    %490 = vector.shape_cast %489 : vector<1x8x512xf32> to vector<8x512xf32>
    %491 = arith.truncf %453 : vector<8x128xf32> to vector<8x128xbf16>
    %c0_160 = arith.constant 0 : index
    %c0_161 = arith.constant 0 : index
    %492 = vector.load %arg8[%c0_160, %c0_161] : memref<128x512xbf16, #tpu.memory_space<vmem>>, vector<128x512xbf16>
    %cst_162 = arith.constant dense<0.000000e+00> : vector<8x512xf32>
    %493 = tpu.matmul %491, %492, %cst_162 {dimension_numbers = #tpu.dot_dimension_numbers<[1], [0], [0], [1], [0, 0, 1, 1], [], []>} : vector<8x128xbf16>, vector<128x512xbf16>, vector<8x512xf32> -> vector<8x512xf32>
    %494 = arith.addf %490, %493 : vector<8x512xf32>
    %495 = arith.index_cast %487 : i32 to index
    %c0_163 = arith.constant 0 : index
    %c0_164 = arith.constant 0 : index
    %496 = vector.load %arg13[%495, %c0_163, %c0_164] : memref<8x8x512xf32, #tpu.memory_space<vmem>>, vector<1x8x512xf32>
    %497 = vector.shape_cast %496 : vector<1x8x512xf32> to vector<8x512xf32>
    %498 = arith.truncf %478 : vector<8x128xf32> to vector<8x128xbf16>
    %c0_165 = arith.constant 0 : index
    %c0_166 = arith.constant 0 : index
    %499 = vector.load %arg9[%c0_165, %c0_166] : memref<128x512xbf16, #tpu.memory_space<vmem>>, vector<128x512xbf16>
    %cst_167 = arith.constant dense<0.000000e+00> : vector<8x512xf32>
    %500 = tpu.matmul %498, %499, %cst_167 {dimension_numbers = #tpu.dot_dimension_numbers<[1], [0], [0], [1], [0, 0, 1, 1], [], []>} : vector<8x128xbf16>, vector<128x512xbf16>, vector<8x512xf32> -> vector<8x512xf32>
    %501 = arith.addf %497, %500 : vector<8x512xf32>
    %502 = vector.extract_strided_slice %494 {offsets = [0, 0], sizes = [8, 128], strides = [1, 1]} : vector<8x512xf32> to vector<8x128xf32>
    %503 = arith.negf %502 : vector<8x128xf32>
    %504 = math.exp %503 : vector<8x128xf32>
    %cst_168 = arith.constant 1.000000e+00 : f32
    %505 = vector.broadcast %cst_168 : f32 to vector<8x128xf32>
    %506 = arith.addf %505, %504 : vector<8x128xf32>
    %507 = arith.divf %505, %506 : vector<8x128xf32>
    %508 = vector.extract_strided_slice %494 {offsets = [0, 128], sizes = [8, 128], strides = [1, 1]} : vector<8x512xf32> to vector<8x128xf32>
    %509 = arith.negf %508 : vector<8x128xf32>
    %510 = math.exp %509 : vector<8x128xf32>
    %cst_169 = arith.constant 1.000000e+00 : f32
    %511 = vector.broadcast %cst_169 : f32 to vector<8x128xf32>
    %512 = arith.addf %511, %510 : vector<8x128xf32>
    %513 = arith.divf %511, %512 : vector<8x128xf32>
    %514 = vector.extract_strided_slice %494 {offsets = [0, 256], sizes = [8, 128], strides = [1, 1]} : vector<8x512xf32> to vector<8x128xf32>
    %515 = math.tanh %514 : vector<8x128xf32>
    %516 = vector.extract_strided_slice %494 {offsets = [0, 384], sizes = [8, 128], strides = [1, 1]} : vector<8x512xf32> to vector<8x128xf32>
    %517 = arith.negf %516 : vector<8x128xf32>
    %518 = math.exp %517 : vector<8x128xf32>
    %cst_170 = arith.constant 1.000000e+00 : f32
    %519 = vector.broadcast %cst_170 : f32 to vector<8x128xf32>
    %520 = arith.addf %519, %518 : vector<8x128xf32>
    %521 = arith.divf %519, %520 : vector<8x128xf32>
    %522 = arith.mulf %513, %451 : vector<8x128xf32>
    %523 = arith.mulf %507, %515 : vector<8x128xf32>
    %524 = arith.addf %522, %523 : vector<8x128xf32>
    %525 = math.tanh %524 : vector<8x128xf32>
    %526 = arith.mulf %521, %525 : vector<8x128xf32>
    %527 = vector.extract_strided_slice %501 {offsets = [0, 0], sizes = [8, 128], strides = [1, 1]} : vector<8x512xf32> to vector<8x128xf32>
    %528 = arith.negf %527 : vector<8x128xf32>
    %529 = math.exp %528 : vector<8x128xf32>
    %cst_171 = arith.constant 1.000000e+00 : f32
    %530 = vector.broadcast %cst_171 : f32 to vector<8x128xf32>
    %531 = arith.addf %530, %529 : vector<8x128xf32>
    %532 = arith.divf %530, %531 : vector<8x128xf32>
    %533 = vector.extract_strided_slice %501 {offsets = [0, 128], sizes = [8, 128], strides = [1, 1]} : vector<8x512xf32> to vector<8x128xf32>
    %534 = arith.negf %533 : vector<8x128xf32>
    %535 = math.exp %534 : vector<8x128xf32>
    %cst_172 = arith.constant 1.000000e+00 : f32
    %536 = vector.broadcast %cst_172 : f32 to vector<8x128xf32>
    %537 = arith.addf %536, %535 : vector<8x128xf32>
    %538 = arith.divf %536, %537 : vector<8x128xf32>
    %539 = vector.extract_strided_slice %501 {offsets = [0, 256], sizes = [8, 128], strides = [1, 1]} : vector<8x512xf32> to vector<8x128xf32>
    %540 = math.tanh %539 : vector<8x128xf32>
    %541 = vector.extract_strided_slice %501 {offsets = [0, 384], sizes = [8, 128], strides = [1, 1]} : vector<8x512xf32> to vector<8x128xf32>
    %542 = arith.negf %541 : vector<8x128xf32>
    %543 = math.exp %542 : vector<8x128xf32>
    %cst_173 = arith.constant 1.000000e+00 : f32
    %544 = vector.broadcast %cst_173 : f32 to vector<8x128xf32>
    %545 = arith.addf %544, %543 : vector<8x128xf32>
    %546 = arith.divf %544, %545 : vector<8x128xf32>
    %547 = arith.mulf %538, %476 : vector<8x128xf32>
    %548 = arith.mulf %532, %540 : vector<8x128xf32>
    %549 = arith.addf %547, %548 : vector<8x128xf32>
    %550 = math.tanh %549 : vector<8x128xf32>
    %551 = arith.mulf %546, %550 : vector<8x128xf32>
    %552 = arith.index_cast %c6_i32 : i32 to index
    %c0_174 = arith.constant 0 : index
    %c0_175 = arith.constant 0 : index
    %553 = vector.load %arg10[%552, %c0_174, %c0_175] : memref<8x8x128xf32, #tpu.memory_space<vmem>>, vector<1x8x128xf32>
    %554 = vector.shape_cast %553 : vector<1x8x128xf32> to vector<8x128xf32>
    %555 = vector.shape_cast %526 : vector<8x128xf32> to vector<1x8x128xf32>
    tpu.vector_store %arg10[%552, %c0_174, %c0_175], %555 {strides = array<i32>} : memref<8x8x128xf32, #tpu.memory_space<vmem>>, vector<1x8x128xf32>,
    %556 = arith.index_cast %487 : i32 to index
    %c0_176 = arith.constant 0 : index
    %c0_177 = arith.constant 0 : index
    %557 = vector.load %arg11[%556, %c0_176, %c0_177] : memref<8x8x128xf32, #tpu.memory_space<vmem>>, vector<1x8x128xf32>
    %558 = vector.shape_cast %557 : vector<1x8x128xf32> to vector<8x128xf32>
    %559 = vector.shape_cast %551 : vector<8x128xf32> to vector<1x8x128xf32>
    tpu.vector_store %arg11[%556, %c0_176, %c0_177], %559 {strides = array<i32>} : memref<8x8x128xf32, #tpu.memory_space<vmem>>, vector<1x8x128xf32>,
    %c7_i32_178 = arith.constant 7 : i32
    %c7_i32_179 = arith.constant 7 : i32
    %560 = arith.subi %c7_i32_179, %c7_i32_178 : i32
    %561 = arith.index_cast %c7_i32_178 : i32 to index
    %c0_180 = arith.constant 0 : index
    %c0_181 = arith.constant 0 : index
    %562 = vector.load %arg12[%561, %c0_180, %c0_181] : memref<8x8x512xf32, #tpu.memory_space<vmem>>, vector<1x8x512xf32>
    %563 = vector.shape_cast %562 : vector<1x8x512xf32> to vector<8x512xf32>
    %564 = arith.truncf %526 : vector<8x128xf32> to vector<8x128xbf16>
    %c0_182 = arith.constant 0 : index
    %c0_183 = arith.constant 0 : index
    %565 = vector.load %arg8[%c0_182, %c0_183] : memref<128x512xbf16, #tpu.memory_space<vmem>>, vector<128x512xbf16>
    %cst_184 = arith.constant dense<0.000000e+00> : vector<8x512xf32>
    %566 = tpu.matmul %564, %565, %cst_184 {dimension_numbers = #tpu.dot_dimension_numbers<[1], [0], [0], [1], [0, 0, 1, 1], [], []>} : vector<8x128xbf16>, vector<128x512xbf16>, vector<8x512xf32> -> vector<8x512xf32>
    %567 = arith.addf %563, %566 : vector<8x512xf32>
    %568 = arith.index_cast %560 : i32 to index
    %c0_185 = arith.constant 0 : index
    %c0_186 = arith.constant 0 : index
    %569 = vector.load %arg13[%568, %c0_185, %c0_186] : memref<8x8x512xf32, #tpu.memory_space<vmem>>, vector<1x8x512xf32>
    %570 = vector.shape_cast %569 : vector<1x8x512xf32> to vector<8x512xf32>
    %571 = arith.truncf %551 : vector<8x128xf32> to vector<8x128xbf16>
    %c0_187 = arith.constant 0 : index
    %c0_188 = arith.constant 0 : index
    %572 = vector.load %arg9[%c0_187, %c0_188] : memref<128x512xbf16, #tpu.memory_space<vmem>>, vector<128x512xbf16>
    %cst_189 = arith.constant dense<0.000000e+00> : vector<8x512xf32>
    %573 = tpu.matmul %571, %572, %cst_189 {dimension_numbers = #tpu.dot_dimension_numbers<[1], [0], [0], [1], [0, 0, 1, 1], [], []>} : vector<8x128xbf16>, vector<128x512xbf16>, vector<8x512xf32> -> vector<8x512xf32>
    %574 = arith.addf %570, %573 : vector<8x512xf32>
    %575 = vector.extract_strided_slice %567 {offsets = [0, 0], sizes = [8, 128], strides = [1, 1]} : vector<8x512xf32> to vector<8x128xf32>
    %576 = arith.negf %575 : vector<8x128xf32>
    %577 = math.exp %576 : vector<8x128xf32>
    %cst_190 = arith.constant 1.000000e+00 : f32
    %578 = vector.broadcast %cst_190 : f32 to vector<8x128xf32>
    %579 = arith.addf %578, %577 : vector<8x128xf32>
    %580 = arith.divf %578, %579 : vector<8x128xf32>
    %581 = vector.extract_strided_slice %567 {offsets = [0, 128], sizes = [8, 128], strides = [1, 1]} : vector<8x512xf32> to vector<8x128xf32>
    %582 = arith.negf %581 : vector<8x128xf32>
    %583 = math.exp %582 : vector<8x128xf32>
    %cst_191 = arith.constant 1.000000e+00 : f32
    %584 = vector.broadcast %cst_191 : f32 to vector<8x128xf32>
    %585 = arith.addf %584, %583 : vector<8x128xf32>
    %586 = arith.divf %584, %585 : vector<8x128xf32>
    %587 = vector.extract_strided_slice %567 {offsets = [0, 256], sizes = [8, 128], strides = [1, 1]} : vector<8x512xf32> to vector<8x128xf32>
    %588 = math.tanh %587 : vector<8x128xf32>
    %589 = vector.extract_strided_slice %567 {offsets = [0, 384], sizes = [8, 128], strides = [1, 1]} : vector<8x512xf32> to vector<8x128xf32>
    %590 = arith.negf %589 : vector<8x128xf32>
    %591 = math.exp %590 : vector<8x128xf32>
    %cst_192 = arith.constant 1.000000e+00 : f32
    %592 = vector.broadcast %cst_192 : f32 to vector<8x128xf32>
    %593 = arith.addf %592, %591 : vector<8x128xf32>
    %594 = arith.divf %592, %593 : vector<8x128xf32>
    %595 = arith.mulf %586, %524 : vector<8x128xf32>
    %596 = arith.mulf %580, %588 : vector<8x128xf32>
    %597 = arith.addf %595, %596 : vector<8x128xf32>
    %598 = math.tanh %597 : vector<8x128xf32>
    %599 = arith.mulf %594, %598 : vector<8x128xf32>
    %600 = vector.extract_strided_slice %574 {offsets = [0, 0], sizes = [8, 128], strides = [1, 1]} : vector<8x512xf32> to vector<8x128xf32>
    %601 = arith.negf %600 : vector<8x128xf32>
    %602 = math.exp %601 : vector<8x128xf32>
    %cst_193 = arith.constant 1.000000e+00 : f32
    %603 = vector.broadcast %cst_193 : f32 to vector<8x128xf32>
    %604 = arith.addf %603, %602 : vector<8x128xf32>
    %605 = arith.divf %603, %604 : vector<8x128xf32>
    %606 = vector.extract_strided_slice %574 {offsets = [0, 128], sizes = [8, 128], strides = [1, 1]} : vector<8x512xf32> to vector<8x128xf32>
    %607 = arith.negf %606 : vector<8x128xf32>
    %608 = math.exp %607 : vector<8x128xf32>
    %cst_194 = arith.constant 1.000000e+00 : f32
    %609 = vector.broadcast %cst_194 : f32 to vector<8x128xf32>
    %610 = arith.addf %609, %608 : vector<8x128xf32>
    %611 = arith.divf %609, %610 : vector<8x128xf32>
    %612 = vector.extract_strided_slice %574 {offsets = [0, 256], sizes = [8, 128], strides = [1, 1]} : vector<8x512xf32> to vector<8x128xf32>
    %613 = math.tanh %612 : vector<8x128xf32>
    %614 = vector.extract_strided_slice %574 {offsets = [0, 384], sizes = [8, 128], strides = [1, 1]} : vector<8x512xf32> to vector<8x128xf32>
    %615 = arith.negf %614 : vector<8x128xf32>
    %616 = math.exp %615 : vector<8x128xf32>
    %cst_195 = arith.constant 1.000000e+00 : f32
    %617 = vector.broadcast %cst_195 : f32 to vector<8x128xf32>
    %618 = arith.addf %617, %616 : vector<8x128xf32>
    %619 = arith.divf %617, %618 : vector<8x128xf32>
    %620 = arith.mulf %611, %549 : vector<8x128xf32>
    %621 = arith.mulf %605, %613 : vector<8x128xf32>
    %622 = arith.addf %620, %621 : vector<8x128xf32>
    %623 = math.tanh %622 : vector<8x128xf32>
    %624 = arith.mulf %619, %623 : vector<8x128xf32>
    %625 = arith.index_cast %c7_i32_178 : i32 to index
    %c0_196 = arith.constant 0 : index
    %c0_197 = arith.constant 0 : index
    %626 = vector.load %arg10[%625, %c0_196, %c0_197] : memref<8x8x128xf32, #tpu.memory_space<vmem>>, vector<1x8x128xf32>
    %627 = vector.shape_cast %626 : vector<1x8x128xf32> to vector<8x128xf32>
    %628 = vector.shape_cast %599 : vector<8x128xf32> to vector<1x8x128xf32>
    tpu.vector_store %arg10[%625, %c0_196, %c0_197], %628 {strides = array<i32>} : memref<8x8x128xf32, #tpu.memory_space<vmem>>, vector<1x8x128xf32>,
    %629 = arith.index_cast %560 : i32 to index
    %c0_198 = arith.constant 0 : index
    %c0_199 = arith.constant 0 : index
    %630 = vector.load %arg11[%629, %c0_198, %c0_199] : memref<8x8x128xf32, #tpu.memory_space<vmem>>, vector<1x8x128xf32>
    %631 = vector.shape_cast %630 : vector<1x8x128xf32> to vector<8x128xf32>
    %632 = vector.shape_cast %624 : vector<8x128xf32> to vector<1x8x128xf32>
    tpu.vector_store %arg11[%629, %c0_198, %c0_199], %632 {strides = array<i32>} : memref<8x8x128xf32, #tpu.memory_space<vmem>>, vector<1x8x128xf32>,
    %c8_i32 = arith.constant 8 : i32
    return
  }
  func.func @transform_0(%arg0: i32) -> (i32, i32, i32) {
    %c0_i32 = arith.constant 0 : i32
    %c0_i32_0 = arith.constant 0 : i32
    %c0_i32_1 = arith.constant 0 : i32
    return %c0_i32, %arg0, %c0_i32_0 : i32, i32, i32
  }
  func.func @transform_1(%arg0: i32) -> (i32, i32) {
    %c0_i32 = arith.constant 0 : i32
    %c0_i32_0 = arith.constant 0 : i32
    %c0_i32_1 = arith.constant 0 : i32
    return %c0_i32, %c0_i32_0 : i32, i32
  }
  func.func @transform_2(%arg0: i32) -> (i32, i32) {
    %c0_i32 = arith.constant 0 : i32
    %c0_i32_0 = arith.constant 0 : i32
    %c0_i32_1 = arith.constant 0 : i32
    return %c0_i32, %c0_i32_0 : i32, i32
  }
  func.func @transform_3(%arg0: i32) -> (i32, i32) {
    %c0_i32 = arith.constant 0 : i32
    %c0_i32_0 = arith.constant 0 : i32
    %c0_i32_1 = arith.constant 0 : i32
    return %c0_i32, %c0_i32_0 : i32, i32
  }
  func.func @transform_4(%arg0: i32) -> (i32, i32) {
    %c0_i32 = arith.constant 0 : i32
    %c0_i32_0 = arith.constant 0 : i32
    %c0_i32_1 = arith.constant 0 : i32
    return %c0_i32, %c0_i32_0 : i32, i32
  }
  func.func @transform_5(%arg0: i32) -> (i32, i32) {
    %c0_i32 = arith.constant 0 : i32
    %c0_i32_0 = arith.constant 0 : i32
    %c0_i32_1 = arith.constant 0 : i32
    return %c0_i32, %c0_i32_0 : i32, i32
  }
  func.func @transform_6(%arg0: i32) -> (i32, i32) {
    %c0_i32 = arith.constant 0 : i32
    %c0_i32_0 = arith.constant 0 : i32
    %c0_i32_1 = arith.constant 0 : i32
    return %c0_i32, %c0_i32_0 : i32, i32
  }
  func.func @transform_7(%arg0: i32) -> (i32, i32) {
    %c0_i32 = arith.constant 0 : i32
    %c0_i32_0 = arith.constant 0 : i32
    %c0_i32_1 = arith.constant 0 : i32
    return %c0_i32, %c0_i32_0 : i32, i32
  }
  func.func @transform_8(%arg0: i32) -> (i32, i32) {
    %c0_i32 = arith.constant 0 : i32
    %c0_i32_0 = arith.constant 0 : i32
    %c0_i32_1 = arith.constant 0 : i32
    return %c0_i32, %c0_i32_0 : i32, i32
  }
  func.func @transform_9(%arg0: i32) -> (i32, i32, i32) {
    %c0_i32 = arith.constant 0 : i32
    %c0_i32_0 = arith.constant 0 : i32
    %c0_i32_1 = arith.constant 0 : i32
    return %c0_i32, %arg0, %c0_i32_0 : i32, i32, i32
  }
  func.func @transform_10(%arg0: i32) -> (i32, i32, i32) {
    %c0_i32 = arith.constant 0 : i32
    %c0_i32_0 = arith.constant 0 : i32
    %c0_i32_1 = arith.constant 0 : i32
    return %c0_i32, %arg0, %c0_i32_0 : i32, i32, i32
  }
}

module attributes {stable_mosaic.version = 11 : i64} {
  func.func @_head_kernel(%arg0: i32, %arg1: memref<64x128xf32, #tpu.memory_space<vmem>>, %arg2: memref<64x128xf32, #tpu.memory_space<vmem>>, %arg3: memref<256x32xf32, #tpu.memory_space<vmem>>, %arg4: memref<1x32xf32, #tpu.memory_space<vmem>>, %arg5: memref<1x32xf32, #tpu.memory_space<vmem>>, %arg6: memref<1x32xf32, #tpu.memory_space<vmem>>, %arg7: memref<32x128xf32, #tpu.memory_space<vmem>>, %arg8: memref<1x128xf32, #tpu.memory_space<vmem>>, %arg9: memref<64x128xf32, #tpu.memory_space<vmem>>) attributes {dimension_semantics = [#tpu.dimension_semantics<parallel>], iteration_bounds = array<i64: 1>, scalar_prefetch = 0 : i64, scratch_operands = 0 : i64, tpu.core_type = #tpu.core_type<tc>, window_params = [{transform_indices = @transform_0, window_bounds = array<i64: 64, 128>}, {transform_indices = @transform_1, window_bounds = array<i64: 64, 128>}, {pipeline_mode = #tpu.pipeline_mode<synchronous>, transform_indices = @transform_2, window_bounds = array<i64: 256, 32>}, {pipeline_mode = #tpu.pipeline_mode<synchronous>, transform_indices = @transform_3, window_bounds = array<i64: 1, 32>}, {pipeline_mode = #tpu.pipeline_mode<synchronous>, transform_indices = @transform_4, window_bounds = array<i64: 1, 32>}, {pipeline_mode = #tpu.pipeline_mode<synchronous>, transform_indices = @transform_5, window_bounds = array<i64: 1, 32>}, {pipeline_mode = #tpu.pipeline_mode<synchronous>, transform_indices = @transform_6, window_bounds = array<i64: 32, 128>}, {pipeline_mode = #tpu.pipeline_mode<synchronous>, transform_indices = @transform_7, window_bounds = array<i64: 1, 128>}, {transform_indices = @transform_8, window_bounds = array<i64: 64, 128>}]} {
    %c0 = arith.constant 0 : index
    %c0_0 = arith.constant 0 : index
    %0 = vector.load %arg1[%c0, %c0_0] : memref<64x128xf32, #tpu.memory_space<vmem>>, vector<64x128xf32>
    %c0_1 = arith.constant 0 : index
    %c0_2 = arith.constant 0 : index
    %1 = vector.load %arg3[%c0_1, %c0_2] : memref<256x32xf32, #tpu.memory_space<vmem>>, vector<128x32xf32>
    %cst = arith.constant dense<0.000000e+00> : vector<64x32xf32>
    %2 = tpu.matmul %0, %1, %cst {dimension_numbers = #tpu.dot_dimension_numbers<[1], [0], [0], [1], [0, 0, 1, 1], [], []>} : vector<64x128xf32>, vector<128x32xf32>, vector<64x32xf32> -> vector<64x32xf32>
    %c0_3 = arith.constant 0 : index
    %c0_4 = arith.constant 0 : index
    %3 = vector.load %arg2[%c0_3, %c0_4] : memref<64x128xf32, #tpu.memory_space<vmem>>, vector<64x128xf32>
    %c128 = arith.constant 128 : index
    %c0_5 = arith.constant 0 : index
    %4 = vector.load %arg3[%c128, %c0_5] : memref<256x32xf32, #tpu.memory_space<vmem>>, vector<128x32xf32>
    %cst_6 = arith.constant dense<0.000000e+00> : vector<64x32xf32>
    %5 = tpu.matmul %3, %4, %cst_6 {dimension_numbers = #tpu.dot_dimension_numbers<[1], [0], [0], [1], [0, 0, 1, 1], [], []>} : vector<64x128xf32>, vector<128x32xf32>, vector<64x32xf32> -> vector<64x32xf32>
    %6 = arith.addf %2, %5 : vector<64x32xf32>
    %c0_7 = arith.constant 0 : index
    %c0_8 = arith.constant 0 : index
    %7 = vector.load %arg4[%c0_7, %c0_8] : memref<1x32xf32, #tpu.memory_space<vmem>>, vector<1x32xf32>
    %8 = vector.broadcast %7 : vector<1x32xf32> to vector<64x32xf32>
    %9 = arith.addf %6, %8 : vector<64x32xf32>
    %cst_9 = arith.constant dense<0.000000e+00> : vector<64xf32>
    %10 = vector.multi_reduction <add>, %9, %cst_9 [1] : vector<64x32xf32> to vector<64xf32>
    %11 = vector.shape_cast %10 : vector<64xf32> to vector<64x1xf32>
    %cst_10 = arith.constant 3.200000e+01 : f32
    %12 = vector.broadcast %cst_10 : f32 to vector<64x1xf32>
    %13 = arith.divf %11, %12 : vector<64x1xf32>
    %14 = vector.broadcast %13 : vector<64x1xf32> to vector<64x32xf32>
    %15 = arith.subf %9, %14 : vector<64x32xf32>
    %16 = arith.mulf %15, %15 : vector<64x32xf32>
    %cst_11 = arith.constant dense<0.000000e+00> : vector<64xf32>
    %17 = vector.multi_reduction <add>, %16, %cst_11 [1] : vector<64x32xf32> to vector<64xf32>
    %18 = vector.shape_cast %17 : vector<64xf32> to vector<64x1xf32>
    %cst_12 = arith.constant 3.200000e+01 : f32
    %19 = vector.broadcast %cst_12 : f32 to vector<64x1xf32>
    %20 = arith.divf %18, %19 : vector<64x1xf32>
    %21 = vector.broadcast %13 : vector<64x1xf32> to vector<64x32xf32>
    %22 = arith.subf %9, %21 : vector<64x32xf32>
    %cst_13 = arith.constant 9.99999974E-6 : f32
    %23 = vector.broadcast %cst_13 : f32 to vector<64x1xf32>
    %24 = arith.addf %20, %23 : vector<64x1xf32>
    %25 = math.rsqrt %24 : vector<64x1xf32>
    %26 = vector.broadcast %25 : vector<64x1xf32> to vector<64x32xf32>
    %27 = arith.mulf %22, %26 : vector<64x32xf32>
    %c0_14 = arith.constant 0 : index
    %c0_15 = arith.constant 0 : index
    %28 = vector.load %arg5[%c0_14, %c0_15] : memref<1x32xf32, #tpu.memory_space<vmem>>, vector<1x32xf32>
    %29 = vector.broadcast %28 : vector<1x32xf32> to vector<64x32xf32>
    %30 = arith.mulf %27, %29 : vector<64x32xf32>
    %c0_16 = arith.constant 0 : index
    %c0_17 = arith.constant 0 : index
    %31 = vector.load %arg6[%c0_16, %c0_17] : memref<1x32xf32, #tpu.memory_space<vmem>>, vector<1x32xf32>
    %32 = vector.broadcast %31 : vector<1x32xf32> to vector<64x32xf32>
    %33 = arith.addf %30, %32 : vector<64x32xf32>
    %cst_18 = arith.constant 0.000000e+00 : f32
    %34 = vector.broadcast %cst_18 : f32 to vector<64x32xf32>
    %35 = arith.maximumf %33, %34 : vector<64x32xf32>
    %c0_19 = arith.constant 0 : index
    %c0_20 = arith.constant 0 : index
    %36 = vector.load %arg7[%c0_19, %c0_20] : memref<32x128xf32, #tpu.memory_space<vmem>>, vector<32x128xf32>
    %cst_21 = arith.constant dense<0.000000e+00> : vector<64x128xf32>
    %37 = tpu.matmul %35, %36, %cst_21 {dimension_numbers = #tpu.dot_dimension_numbers<[1], [0], [0], [1], [0, 0, 1, 1], [], []>} : vector<64x32xf32>, vector<32x128xf32>, vector<64x128xf32> -> vector<64x128xf32>
    %c0_22 = arith.constant 0 : index
    %c0_23 = arith.constant 0 : index
    %38 = vector.load %arg8[%c0_22, %c0_23] : memref<1x128xf32, #tpu.memory_space<vmem>>, vector<1x128xf32>
    %39 = vector.broadcast %38 : vector<1x128xf32> to vector<64x128xf32>
    %40 = arith.addf %37, %39 : vector<64x128xf32>
    %c0_24 = arith.constant 0 : index
    %c0_25 = arith.constant 0 : index
    %41 = vector.load %arg9[%c0_24, %c0_25] : memref<64x128xf32, #tpu.memory_space<vmem>>, vector<64x128xf32>
    tpu.vector_store %arg9[%c0_24, %c0_25], %40 {strides = array<i32>} : memref<64x128xf32, #tpu.memory_space<vmem>>, vector<64x128xf32>,
    return
  }
  func.func @transform_0(%arg0: i32) -> (i32, i32) {
    %c0_i32 = arith.constant 0 : i32
    %c0_i32_0 = arith.constant 0 : i32
    return %arg0, %c0_i32 : i32, i32
  }
  func.func @transform_1(%arg0: i32) -> (i32, i32) {
    %c0_i32 = arith.constant 0 : i32
    %c0_i32_0 = arith.constant 0 : i32
    return %arg0, %c0_i32 : i32, i32
  }
  func.func @transform_2(%arg0: i32) -> (i32, i32) {
    %c0_i32 = arith.constant 0 : i32
    %c0_i32_0 = arith.constant 0 : i32
    %c0_i32_1 = arith.constant 0 : i32
    return %c0_i32, %c0_i32_0 : i32, i32
  }
  func.func @transform_3(%arg0: i32) -> (i32, i32) {
    %c0_i32 = arith.constant 0 : i32
    %c0_i32_0 = arith.constant 0 : i32
    %c0_i32_1 = arith.constant 0 : i32
    return %c0_i32, %c0_i32_0 : i32, i32
  }
  func.func @transform_4(%arg0: i32) -> (i32, i32) {
    %c0_i32 = arith.constant 0 : i32
    %c0_i32_0 = arith.constant 0 : i32
    %c0_i32_1 = arith.constant 0 : i32
    return %c0_i32, %c0_i32_0 : i32, i32
  }
  func.func @transform_5(%arg0: i32) -> (i32, i32) {
    %c0_i32 = arith.constant 0 : i32
    %c0_i32_0 = arith.constant 0 : i32
    %c0_i32_1 = arith.constant 0 : i32
    return %c0_i32, %c0_i32_0 : i32, i32
  }
  func.func @transform_6(%arg0: i32) -> (i32, i32) {
    %c0_i32 = arith.constant 0 : i32
    %c0_i32_0 = arith.constant 0 : i32
    %c0_i32_1 = arith.constant 0 : i32
    return %c0_i32, %c0_i32_0 : i32, i32
  }
  func.func @transform_7(%arg0: i32) -> (i32, i32) {
    %c0_i32 = arith.constant 0 : i32
    %c0_i32_0 = arith.constant 0 : i32
    %c0_i32_1 = arith.constant 0 : i32
    return %c0_i32, %c0_i32_0 : i32, i32
  }
  func.func @transform_8(%arg0: i32) -> (i32, i32) {
    %c0_i32 = arith.constant 0 : i32
    %c0_i32_0 = arith.constant 0 : i32
    return %arg0, %c0_i32 : i32, i32
  }
}

module attributes {stable_mosaic.version = 11 : i64} {
  func.func @kernel(%arg0: i32, %arg1: memref<8x8x128xf32, #tpu.memory_space<vmem>>, %arg2: memref<8x8x128xf32, #tpu.memory_space<vmem>>, %arg3: memref<256x1024xbf16, #tpu.memory_space<vmem>>, %arg4: memref<1x1024xf32, #tpu.memory_space<vmem>>, %arg5: memref<128x512xbf16, #tpu.memory_space<vmem>>, %arg6: memref<128x512xbf16, #tpu.memory_space<vmem>>, %arg7: memref<8x8x128xf32, #tpu.memory_space<vmem>>, %arg8: memref<8x8x128xf32, #tpu.memory_space<vmem>>, %arg9: memref<8x8x512xf32, #tpu.memory_space<vmem>>, %arg10: memref<8x8x512xf32, #tpu.memory_space<vmem>>) attributes {dimension_semantics = [#tpu.dimension_semantics<parallel>], iteration_bounds = array<i64: 1>, scalar_prefetch = 0 : i64, scratch_operands = 2 : i64, tpu.core_type = #tpu.core_type<tc>, window_params = [{transform_indices = @transform_0, window_bounds = array<i64: 8, 8, 128>}, {transform_indices = @transform_1, window_bounds = array<i64: 8, 8, 128>}, {pipeline_mode = #tpu.pipeline_mode<synchronous>, transform_indices = @transform_2, window_bounds = array<i64: 256, 1024>}, {pipeline_mode = #tpu.pipeline_mode<synchronous>, transform_indices = @transform_3, window_bounds = array<i64: 1, 1024>}, {pipeline_mode = #tpu.pipeline_mode<synchronous>, transform_indices = @transform_4, window_bounds = array<i64: 128, 512>}, {pipeline_mode = #tpu.pipeline_mode<synchronous>, transform_indices = @transform_5, window_bounds = array<i64: 128, 512>}, {transform_indices = @transform_6, window_bounds = array<i64: 8, 8, 128>}, {transform_indices = @transform_7, window_bounds = array<i64: 8, 8, 128>}]} {
    %c0 = arith.constant 0 : index
    %c0_0 = arith.constant 0 : index
    %c0_1 = arith.constant 0 : index
    %0 = vector.load %arg1[%c0, %c0_0, %c0_1] : memref<8x8x128xf32, #tpu.memory_space<vmem>>, vector<8x8x128xf32>
    %1 = vector.shape_cast %0 : vector<8x8x128xf32> to vector<64x128xf32>
    %2 = arith.truncf %1 : vector<64x128xf32> to vector<64x128xbf16>
    %c0_2 = arith.constant 0 : index
    %c0_3 = arith.constant 0 : index
    %c0_4 = arith.constant 0 : index
    %3 = vector.load %arg2[%c0_2, %c0_3, %c0_4] : memref<8x8x128xf32, #tpu.memory_space<vmem>>, vector<8x8x128xf32>
    %4 = vector.shape_cast %3 : vector<8x8x128xf32> to vector<64x128xf32>
    %5 = arith.truncf %4 : vector<64x128xf32> to vector<64x128xbf16>
    %c0_5 = arith.constant 0 : index
    %c0_6 = arith.constant 0 : index
    %6 = vector.load %arg3[%c0_5, %c0_6] : memref<256x1024xbf16, #tpu.memory_space<vmem>>, vector<128x512xbf16>
    %cst = arith.constant dense<0.000000e+00> : vector<64x512xf32>
    %7 = tpu.matmul %2, %6, %cst {dimension_numbers = #tpu.dot_dimension_numbers<[1], [0], [0], [1], [0, 0, 1, 1], [], []>} : vector<64x128xbf16>, vector<128x512xbf16>, vector<64x512xf32> -> vector<64x512xf32>
    %c128 = arith.constant 128 : index
    %c0_7 = arith.constant 0 : index
    %8 = vector.load %arg3[%c128, %c0_7] : memref<256x1024xbf16, #tpu.memory_space<vmem>>, vector<128x512xbf16>
    %cst_8 = arith.constant dense<0.000000e+00> : vector<64x512xf32>
    %9 = tpu.matmul %5, %8, %cst_8 {dimension_numbers = #tpu.dot_dimension_numbers<[1], [0], [0], [1], [0, 0, 1, 1], [], []>} : vector<64x128xbf16>, vector<128x512xbf16>, vector<64x512xf32> -> vector<64x512xf32>
    %10 = arith.addf %7, %9 : vector<64x512xf32>
    %c0_9 = arith.constant 0 : index
    %c0_10 = arith.constant 0 : index
    %11 = vector.load %arg4[%c0_9, %c0_10] : memref<1x1024xf32, #tpu.memory_space<vmem>>, vector<1x512xf32>
    %12 = vector.broadcast %11 : vector<1x512xf32> to vector<64x512xf32>
    %13 = arith.addf %10, %12 : vector<64x512xf32>
    %14 = vector.shape_cast %13 : vector<64x512xf32> to vector<8x8x512xf32>
    %c0_11 = arith.constant 0 : index
    %c0_12 = arith.constant 0 : index
    %c0_13 = arith.constant 0 : index
    %15 = vector.load %arg9[%c0_11, %c0_12, %c0_13] : memref<8x8x512xf32, #tpu.memory_space<vmem>>, vector<8x8x512xf32>
    tpu.vector_store %arg9[%c0_11, %c0_12, %c0_13], %14 {strides = array<i32>} : memref<8x8x512xf32, #tpu.memory_space<vmem>>, vector<8x8x512xf32>,
    %c0_14 = arith.constant 0 : index
    %c512 = arith.constant 512 : index
    %16 = vector.load %arg3[%c0_14, %c512] : memref<256x1024xbf16, #tpu.memory_space<vmem>>, vector<128x512xbf16>
    %cst_15 = arith.constant dense<0.000000e+00> : vector<64x512xf32>
    %17 = tpu.matmul %2, %16, %cst_15 {dimension_numbers = #tpu.dot_dimension_numbers<[1], [0], [0], [1], [0, 0, 1, 1], [], []>} : vector<64x128xbf16>, vector<128x512xbf16>, vector<64x512xf32> -> vector<64x512xf32>
    %c128_16 = arith.constant 128 : index
    %c512_17 = arith.constant 512 : index
    %18 = vector.load %arg3[%c128_16, %c512_17] : memref<256x1024xbf16, #tpu.memory_space<vmem>>, vector<128x512xbf16>
    %cst_18 = arith.constant dense<0.000000e+00> : vector<64x512xf32>
    %19 = tpu.matmul %5, %18, %cst_18 {dimension_numbers = #tpu.dot_dimension_numbers<[1], [0], [0], [1], [0, 0, 1, 1], [], []>} : vector<64x128xbf16>, vector<128x512xbf16>, vector<64x512xf32> -> vector<64x512xf32>
    %20 = arith.addf %17, %19 : vector<64x512xf32>
    %c0_19 = arith.constant 0 : index
    %c512_20 = arith.constant 512 : index
    %21 = vector.load %arg4[%c0_19, %c512_20] : memref<1x1024xf32, #tpu.memory_space<vmem>>, vector<1x512xf32>
    %22 = vector.broadcast %21 : vector<1x512xf32> to vector<64x512xf32>
    %23 = arith.addf %20, %22 : vector<64x512xf32>
    %24 = vector.shape_cast %23 : vector<64x512xf32> to vector<8x8x512xf32>
    %c0_21 = arith.constant 0 : index
    %c0_22 = arith.constant 0 : index
    %c0_23 = arith.constant 0 : index
    %25 = vector.load %arg10[%c0_21, %c0_22, %c0_23] : memref<8x8x512xf32, #tpu.memory_space<vmem>>, vector<8x8x512xf32>
    tpu.vector_store %arg10[%c0_21, %c0_22, %c0_23], %24 {strides = array<i32>} : memref<8x8x512xf32, #tpu.memory_space<vmem>>, vector<8x8x512xf32>,
    %cst_24 = arith.constant 0.000000e+00 : f32
    %26 = vector.broadcast %cst_24 : f32 to vector<8x128xf32>
    %c0_i32 = arith.constant 0 : i32
    %c7_i32 = arith.constant 7 : i32
    %27 = arith.subi %c7_i32, %c0_i32 : i32
    %28 = arith.index_cast %c0_i32 : i32 to index
    %c0_25 = arith.constant 0 : index
    %c0_26 = arith.constant 0 : index
    %29 = vector.load %arg9[%28, %c0_25, %c0_26] : memref<8x8x512xf32, #tpu.memory_space<vmem>>, vector<1x8x512xf32>
    %30 = vector.shape_cast %29 : vector<1x8x512xf32> to vector<8x512xf32>
    %31 = arith.truncf %26 : vector<8x128xf32> to vector<8x128xbf16>
    %c0_27 = arith.constant 0 : index
    %c0_28 = arith.constant 0 : index
    %32 = vector.load %arg5[%c0_27, %c0_28] : memref<128x512xbf16, #tpu.memory_space<vmem>>, vector<128x512xbf16>
    %cst_29 = arith.constant dense<0.000000e+00> : vector<8x512xf32>
    %33 = tpu.matmul %31, %32, %cst_29 {dimension_numbers = #tpu.dot_dimension_numbers<[1], [0], [0], [1], [0, 0, 1, 1], [], []>} : vector<8x128xbf16>, vector<128x512xbf16>, vector<8x512xf32> -> vector<8x512xf32>
    %34 = arith.addf %30, %33 : vector<8x512xf32>
    %35 = arith.index_cast %27 : i32 to index
    %c0_30 = arith.constant 0 : index
    %c0_31 = arith.constant 0 : index
    %36 = vector.load %arg10[%35, %c0_30, %c0_31] : memref<8x8x512xf32, #tpu.memory_space<vmem>>, vector<1x8x512xf32>
    %37 = vector.shape_cast %36 : vector<1x8x512xf32> to vector<8x512xf32>
    %38 = arith.truncf %26 : vector<8x128xf32> to vector<8x128xbf16>
    %c0_32 = arith.constant 0 : index
    %c0_33 = arith.constant 0 : index
    %39 = vector.load %arg6[%c0_32, %c0_33] : memref<128x512xbf16, #tpu.memory_space<vmem>>, vector<128x512xbf16>
    %cst_34 = arith.constant dense<0.000000e+00> : vector<8x512xf32>
    %40 = tpu.matmul %38, %39, %cst_34 {dimension_numbers = #tpu.dot_dimension_numbers<[1], [0], [0], [1], [0, 0, 1, 1], [], []>} : vector<8x128xbf16>, vector<128x512xbf16>, vector<8x512xf32> -> vector<8x512xf32>
    %41 = arith.addf %37, %40 : vector<8x512xf32>
    %42 = vector.extract_strided_slice %34 {offsets = [0, 0], sizes = [8, 128], strides = [1, 1]} : vector<8x512xf32> to vector<8x128xf32>
    %43 = arith.negf %42 : vector<8x128xf32>
    %44 = math.exp %43 : vector<8x128xf32>
    %cst_35 = arith.constant 1.000000e+00 : f32
    %45 = vector.broadcast %cst_35 : f32 to vector<8x128xf32>
    %46 = arith.addf %45, %44 : vector<8x128xf32>
    %47 = arith.divf %45, %46 : vector<8x128xf32>
    %48 = vector.extract_strided_slice %34 {offsets = [0, 128], sizes = [8, 128], strides = [1, 1]} : vector<8x512xf32> to vector<8x128xf32>
    %49 = arith.negf %48 : vector<8x128xf32>
    %50 = math.exp %49 : vector<8x128xf32>
    %cst_36 = arith.constant 1.000000e+00 : f32
    %51 = vector.broadcast %cst_36 : f32 to vector<8x128xf32>
    %52 = arith.addf %51, %50 : vector<8x128xf32>
    %53 = arith.divf %51, %52 : vector<8x128xf32>
    %54 = vector.extract_strided_slice %34 {offsets = [0, 256], sizes = [8, 128], strides = [1, 1]} : vector<8x512xf32> to vector<8x128xf32>
    %55 = math.tanh %54 : vector<8x128xf32>
    %56 = vector.extract_strided_slice %34 {offsets = [0, 384], sizes = [8, 128], strides = [1, 1]} : vector<8x512xf32> to vector<8x128xf32>
    %57 = arith.negf %56 : vector<8x128xf32>
    %58 = math.exp %57 : vector<8x128xf32>
    %cst_37 = arith.constant 1.000000e+00 : f32
    %59 = vector.broadcast %cst_37 : f32 to vector<8x128xf32>
    %60 = arith.addf %59, %58 : vector<8x128xf32>
    %61 = arith.divf %59, %60 : vector<8x128xf32>
    %62 = arith.mulf %53, %26 : vector<8x128xf32>
    %63 = arith.mulf %47, %55 : vector<8x128xf32>
    %64 = arith.addf %62, %63 : vector<8x128xf32>
    %65 = math.tanh %64 : vector<8x128xf32>
    %66 = arith.mulf %61, %65 : vector<8x128xf32>
    %67 = vector.extract_strided_slice %41 {offsets = [0, 0], sizes = [8, 128], strides = [1, 1]} : vector<8x512xf32> to vector<8x128xf32>
    %68 = arith.negf %67 : vector<8x128xf32>
    %69 = math.exp %68 : vector<8x128xf32>
    %cst_38 = arith.constant 1.000000e+00 : f32
    %70 = vector.broadcast %cst_38 : f32 to vector<8x128xf32>
    %71 = arith.addf %70, %69 : vector<8x128xf32>
    %72 = arith.divf %70, %71 : vector<8x128xf32>
    %73 = vector.extract_strided_slice %41 {offsets = [0, 128], sizes = [8, 128], strides = [1, 1]} : vector<8x512xf32> to vector<8x128xf32>
    %74 = arith.negf %73 : vector<8x128xf32>
    %75 = math.exp %74 : vector<8x128xf32>
    %cst_39 = arith.constant 1.000000e+00 : f32
    %76 = vector.broadcast %cst_39 : f32 to vector<8x128xf32>
    %77 = arith.addf %76, %75 : vector<8x128xf32>
    %78 = arith.divf %76, %77 : vector<8x128xf32>
    %79 = vector.extract_strided_slice %41 {offsets = [0, 256], sizes = [8, 128], strides = [1, 1]} : vector<8x512xf32> to vector<8x128xf32>
    %80 = math.tanh %79 : vector<8x128xf32>
    %81 = vector.extract_strided_slice %41 {offsets = [0, 384], sizes = [8, 128], strides = [1, 1]} : vector<8x512xf32> to vector<8x128xf32>
    %82 = arith.negf %81 : vector<8x128xf32>
    %83 = math.exp %82 : vector<8x128xf32>
    %cst_40 = arith.constant 1.000000e+00 : f32
    %84 = vector.broadcast %cst_40 : f32 to vector<8x128xf32>
    %85 = arith.addf %84, %83 : vector<8x128xf32>
    %86 = arith.divf %84, %85 : vector<8x128xf32>
    %87 = arith.mulf %78, %26 : vector<8x128xf32>
    %88 = arith.mulf %72, %80 : vector<8x128xf32>
    %89 = arith.addf %87, %88 : vector<8x128xf32>
    %90 = math.tanh %89 : vector<8x128xf32>
    %91 = arith.mulf %86, %90 : vector<8x128xf32>
    %92 = arith.index_cast %c0_i32 : i32 to index
    %c0_41 = arith.constant 0 : index
    %c0_42 = arith.constant 0 : index
    %93 = vector.load %arg7[%92, %c0_41, %c0_42] : memref<8x8x128xf32, #tpu.memory_space<vmem>>, vector<1x8x128xf32>
    %94 = vector.shape_cast %93 : vector<1x8x128xf32> to vector<8x128xf32>
    %95 = vector.shape_cast %66 : vector<8x128xf32> to vector<1x8x128xf32>
    tpu.vector_store %arg7[%92, %c0_41, %c0_42], %95 {strides = array<i32>} : memref<8x8x128xf32, #tpu.memory_space<vmem>>, vector<1x8x128xf32>,
    %96 = arith.index_cast %27 : i32 to index
    %c0_43 = arith.constant 0 : index
    %c0_44 = arith.constant 0 : index
    %97 = vector.load %arg8[%96, %c0_43, %c0_44] : memref<8x8x128xf32, #tpu.memory_space<vmem>>, vector<1x8x128xf32>
    %98 = vector.shape_cast %97 : vector<1x8x128xf32> to vector<8x128xf32>
    %99 = vector.shape_cast %91 : vector<8x128xf32> to vector<1x8x128xf32>
    tpu.vector_store %arg8[%96, %c0_43, %c0_44], %99 {strides = array<i32>} : memref<8x8x128xf32, #tpu.memory_space<vmem>>, vector<1x8x128xf32>,
    %c1_i32 = arith.constant 1 : i32
    %c7_i32_45 = arith.constant 7 : i32
    %100 = arith.subi %c7_i32_45, %c1_i32 : i32
    %101 = arith.index_cast %c1_i32 : i32 to index
    %c0_46 = arith.constant 0 : index
    %c0_47 = arith.constant 0 : index
    %102 = vector.load %arg9[%101, %c0_46, %c0_47] : memref<8x8x512xf32, #tpu.memory_space<vmem>>, vector<1x8x512xf32>
    %103 = vector.shape_cast %102 : vector<1x8x512xf32> to vector<8x512xf32>
    %104 = arith.truncf %66 : vector<8x128xf32> to vector<8x128xbf16>
    %c0_48 = arith.constant 0 : index
    %c0_49 = arith.constant 0 : index
    %105 = vector.load %arg5[%c0_48, %c0_49] : memref<128x512xbf16, #tpu.memory_space<vmem>>, vector<128x512xbf16>
    %cst_50 = arith.constant dense<0.000000e+00> : vector<8x512xf32>
    %106 = tpu.matmul %104, %105, %cst_50 {dimension_numbers = #tpu.dot_dimension_numbers<[1], [0], [0], [1], [0, 0, 1, 1], [], []>} : vector<8x128xbf16>, vector<128x512xbf16>, vector<8x512xf32> -> vector<8x512xf32>
    %107 = arith.addf %103, %106 : vector<8x512xf32>
    %108 = arith.index_cast %100 : i32 to index
    %c0_51 = arith.constant 0 : index
    %c0_52 = arith.constant 0 : index
    %109 = vector.load %arg10[%108, %c0_51, %c0_52] : memref<8x8x512xf32, #tpu.memory_space<vmem>>, vector<1x8x512xf32>
    %110 = vector.shape_cast %109 : vector<1x8x512xf32> to vector<8x512xf32>
    %111 = arith.truncf %91 : vector<8x128xf32> to vector<8x128xbf16>
    %c0_53 = arith.constant 0 : index
    %c0_54 = arith.constant 0 : index
    %112 = vector.load %arg6[%c0_53, %c0_54] : memref<128x512xbf16, #tpu.memory_space<vmem>>, vector<128x512xbf16>
    %cst_55 = arith.constant dense<0.000000e+00> : vector<8x512xf32>
    %113 = tpu.matmul %111, %112, %cst_55 {dimension_numbers = #tpu.dot_dimension_numbers<[1], [0], [0], [1], [0, 0, 1, 1], [], []>} : vector<8x128xbf16>, vector<128x512xbf16>, vector<8x512xf32> -> vector<8x512xf32>
    %114 = arith.addf %110, %113 : vector<8x512xf32>
    %115 = vector.extract_strided_slice %107 {offsets = [0, 0], sizes = [8, 128], strides = [1, 1]} : vector<8x512xf32> to vector<8x128xf32>
    %116 = arith.negf %115 : vector<8x128xf32>
    %117 = math.exp %116 : vector<8x128xf32>
    %cst_56 = arith.constant 1.000000e+00 : f32
    %118 = vector.broadcast %cst_56 : f32 to vector<8x128xf32>
    %119 = arith.addf %118, %117 : vector<8x128xf32>
    %120 = arith.divf %118, %119 : vector<8x128xf32>
    %121 = vector.extract_strided_slice %107 {offsets = [0, 128], sizes = [8, 128], strides = [1, 1]} : vector<8x512xf32> to vector<8x128xf32>
    %122 = arith.negf %121 : vector<8x128xf32>
    %123 = math.exp %122 : vector<8x128xf32>
    %cst_57 = arith.constant 1.000000e+00 : f32
    %124 = vector.broadcast %cst_57 : f32 to vector<8x128xf32>
    %125 = arith.addf %124, %123 : vector<8x128xf32>
    %126 = arith.divf %124, %125 : vector<8x128xf32>
    %127 = vector.extract_strided_slice %107 {offsets = [0, 256], sizes = [8, 128], strides = [1, 1]} : vector<8x512xf32> to vector<8x128xf32>
    %128 = math.tanh %127 : vector<8x128xf32>
    %129 = vector.extract_strided_slice %107 {offsets = [0, 384], sizes = [8, 128], strides = [1, 1]} : vector<8x512xf32> to vector<8x128xf32>
    %130 = arith.negf %129 : vector<8x128xf32>
    %131 = math.exp %130 : vector<8x128xf32>
    %cst_58 = arith.constant 1.000000e+00 : f32
    %132 = vector.broadcast %cst_58 : f32 to vector<8x128xf32>
    %133 = arith.addf %132, %131 : vector<8x128xf32>
    %134 = arith.divf %132, %133 : vector<8x128xf32>
    %135 = arith.mulf %126, %64 : vector<8x128xf32>
    %136 = arith.mulf %120, %128 : vector<8x128xf32>
    %137 = arith.addf %135, %136 : vector<8x128xf32>
    %138 = math.tanh %137 : vector<8x128xf32>
    %139 = arith.mulf %134, %138 : vector<8x128xf32>
    %140 = vector.extract_strided_slice %114 {offsets = [0, 0], sizes = [8, 128], strides = [1, 1]} : vector<8x512xf32> to vector<8x128xf32>
    %141 = arith.negf %140 : vector<8x128xf32>
    %142 = math.exp %141 : vector<8x128xf32>
    %cst_59 = arith.constant 1.000000e+00 : f32
    %143 = vector.broadcast %cst_59 : f32 to vector<8x128xf32>
    %144 = arith.addf %143, %142 : vector<8x128xf32>
    %145 = arith.divf %143, %144 : vector<8x128xf32>
    %146 = vector.extract_strided_slice %114 {offsets = [0, 128], sizes = [8, 128], strides = [1, 1]} : vector<8x512xf32> to vector<8x128xf32>
    %147 = arith.negf %146 : vector<8x128xf32>
    %148 = math.exp %147 : vector<8x128xf32>
    %cst_60 = arith.constant 1.000000e+00 : f32
    %149 = vector.broadcast %cst_60 : f32 to vector<8x128xf32>
    %150 = arith.addf %149, %148 : vector<8x128xf32>
    %151 = arith.divf %149, %150 : vector<8x128xf32>
    %152 = vector.extract_strided_slice %114 {offsets = [0, 256], sizes = [8, 128], strides = [1, 1]} : vector<8x512xf32> to vector<8x128xf32>
    %153 = math.tanh %152 : vector<8x128xf32>
    %154 = vector.extract_strided_slice %114 {offsets = [0, 384], sizes = [8, 128], strides = [1, 1]} : vector<8x512xf32> to vector<8x128xf32>
    %155 = arith.negf %154 : vector<8x128xf32>
    %156 = math.exp %155 : vector<8x128xf32>
    %cst_61 = arith.constant 1.000000e+00 : f32
    %157 = vector.broadcast %cst_61 : f32 to vector<8x128xf32>
    %158 = arith.addf %157, %156 : vector<8x128xf32>
    %159 = arith.divf %157, %158 : vector<8x128xf32>
    %160 = arith.mulf %151, %89 : vector<8x128xf32>
    %161 = arith.mulf %145, %153 : vector<8x128xf32>
    %162 = arith.addf %160, %161 : vector<8x128xf32>
    %163 = math.tanh %162 : vector<8x128xf32>
    %164 = arith.mulf %159, %163 : vector<8x128xf32>
    %165 = arith.index_cast %c1_i32 : i32 to index
    %c0_62 = arith.constant 0 : index
    %c0_63 = arith.constant 0 : index
    %166 = vector.load %arg7[%165, %c0_62, %c0_63] : memref<8x8x128xf32, #tpu.memory_space<vmem>>, vector<1x8x128xf32>
    %167 = vector.shape_cast %166 : vector<1x8x128xf32> to vector<8x128xf32>
    %168 = vector.shape_cast %139 : vector<8x128xf32> to vector<1x8x128xf32>
    tpu.vector_store %arg7[%165, %c0_62, %c0_63], %168 {strides = array<i32>} : memref<8x8x128xf32, #tpu.memory_space<vmem>>, vector<1x8x128xf32>,
    %169 = arith.index_cast %100 : i32 to index
    %c0_64 = arith.constant 0 : index
    %c0_65 = arith.constant 0 : index
    %170 = vector.load %arg8[%169, %c0_64, %c0_65] : memref<8x8x128xf32, #tpu.memory_space<vmem>>, vector<1x8x128xf32>
    %171 = vector.shape_cast %170 : vector<1x8x128xf32> to vector<8x128xf32>
    %172 = vector.shape_cast %164 : vector<8x128xf32> to vector<1x8x128xf32>
    tpu.vector_store %arg8[%169, %c0_64, %c0_65], %172 {strides = array<i32>} : memref<8x8x128xf32, #tpu.memory_space<vmem>>, vector<1x8x128xf32>,
    %c2_i32 = arith.constant 2 : i32
    %c7_i32_66 = arith.constant 7 : i32
    %173 = arith.subi %c7_i32_66, %c2_i32 : i32
    %174 = arith.index_cast %c2_i32 : i32 to index
    %c0_67 = arith.constant 0 : index
    %c0_68 = arith.constant 0 : index
    %175 = vector.load %arg9[%174, %c0_67, %c0_68] : memref<8x8x512xf32, #tpu.memory_space<vmem>>, vector<1x8x512xf32>
    %176 = vector.shape_cast %175 : vector<1x8x512xf32> to vector<8x512xf32>
    %177 = arith.truncf %139 : vector<8x128xf32> to vector<8x128xbf16>
    %c0_69 = arith.constant 0 : index
    %c0_70 = arith.constant 0 : index
    %178 = vector.load %arg5[%c0_69, %c0_70] : memref<128x512xbf16, #tpu.memory_space<vmem>>, vector<128x512xbf16>
    %cst_71 = arith.constant dense<0.000000e+00> : vector<8x512xf32>
    %179 = tpu.matmul %177, %178, %cst_71 {dimension_numbers = #tpu.dot_dimension_numbers<[1], [0], [0], [1], [0, 0, 1, 1], [], []>} : vector<8x128xbf16>, vector<128x512xbf16>, vector<8x512xf32> -> vector<8x512xf32>
    %180 = arith.addf %176, %179 : vector<8x512xf32>
    %181 = arith.index_cast %173 : i32 to index
    %c0_72 = arith.constant 0 : index
    %c0_73 = arith.constant 0 : index
    %182 = vector.load %arg10[%181, %c0_72, %c0_73] : memref<8x8x512xf32, #tpu.memory_space<vmem>>, vector<1x8x512xf32>
    %183 = vector.shape_cast %182 : vector<1x8x512xf32> to vector<8x512xf32>
    %184 = arith.truncf %164 : vector<8x128xf32> to vector<8x128xbf16>
    %c0_74 = arith.constant 0 : index
    %c0_75 = arith.constant 0 : index
    %185 = vector.load %arg6[%c0_74, %c0_75] : memref<128x512xbf16, #tpu.memory_space<vmem>>, vector<128x512xbf16>
    %cst_76 = arith.constant dense<0.000000e+00> : vector<8x512xf32>
    %186 = tpu.matmul %184, %185, %cst_76 {dimension_numbers = #tpu.dot_dimension_numbers<[1], [0], [0], [1], [0, 0, 1, 1], [], []>} : vector<8x128xbf16>, vector<128x512xbf16>, vector<8x512xf32> -> vector<8x512xf32>
    %187 = arith.addf %183, %186 : vector<8x512xf32>
    %188 = vector.extract_strided_slice %180 {offsets = [0, 0], sizes = [8, 128], strides = [1, 1]} : vector<8x512xf32> to vector<8x128xf32>
    %189 = arith.negf %188 : vector<8x128xf32>
    %190 = math.exp %189 : vector<8x128xf32>
    %cst_77 = arith.constant 1.000000e+00 : f32
    %191 = vector.broadcast %cst_77 : f32 to vector<8x128xf32>
    %192 = arith.addf %191, %190 : vector<8x128xf32>
    %193 = arith.divf %191, %192 : vector<8x128xf32>
    %194 = vector.extract_strided_slice %180 {offsets = [0, 128], sizes = [8, 128], strides = [1, 1]} : vector<8x512xf32> to vector<8x128xf32>
    %195 = arith.negf %194 : vector<8x128xf32>
    %196 = math.exp %195 : vector<8x128xf32>
    %cst_78 = arith.constant 1.000000e+00 : f32
    %197 = vector.broadcast %cst_78 : f32 to vector<8x128xf32>
    %198 = arith.addf %197, %196 : vector<8x128xf32>
    %199 = arith.divf %197, %198 : vector<8x128xf32>
    %200 = vector.extract_strided_slice %180 {offsets = [0, 256], sizes = [8, 128], strides = [1, 1]} : vector<8x512xf32> to vector<8x128xf32>
    %201 = math.tanh %200 : vector<8x128xf32>
    %202 = vector.extract_strided_slice %180 {offsets = [0, 384], sizes = [8, 128], strides = [1, 1]} : vector<8x512xf32> to vector<8x128xf32>
    %203 = arith.negf %202 : vector<8x128xf32>
    %204 = math.exp %203 : vector<8x128xf32>
    %cst_79 = arith.constant 1.000000e+00 : f32
    %205 = vector.broadcast %cst_79 : f32 to vector<8x128xf32>
    %206 = arith.addf %205, %204 : vector<8x128xf32>
    %207 = arith.divf %205, %206 : vector<8x128xf32>
    %208 = arith.mulf %199, %137 : vector<8x128xf32>
    %209 = arith.mulf %193, %201 : vector<8x128xf32>
    %210 = arith.addf %208, %209 : vector<8x128xf32>
    %211 = math.tanh %210 : vector<8x128xf32>
    %212 = arith.mulf %207, %211 : vector<8x128xf32>
    %213 = vector.extract_strided_slice %187 {offsets = [0, 0], sizes = [8, 128], strides = [1, 1]} : vector<8x512xf32> to vector<8x128xf32>
    %214 = arith.negf %213 : vector<8x128xf32>
    %215 = math.exp %214 : vector<8x128xf32>
    %cst_80 = arith.constant 1.000000e+00 : f32
    %216 = vector.broadcast %cst_80 : f32 to vector<8x128xf32>
    %217 = arith.addf %216, %215 : vector<8x128xf32>
    %218 = arith.divf %216, %217 : vector<8x128xf32>
    %219 = vector.extract_strided_slice %187 {offsets = [0, 128], sizes = [8, 128], strides = [1, 1]} : vector<8x512xf32> to vector<8x128xf32>
    %220 = arith.negf %219 : vector<8x128xf32>
    %221 = math.exp %220 : vector<8x128xf32>
    %cst_81 = arith.constant 1.000000e+00 : f32
    %222 = vector.broadcast %cst_81 : f32 to vector<8x128xf32>
    %223 = arith.addf %222, %221 : vector<8x128xf32>
    %224 = arith.divf %222, %223 : vector<8x128xf32>
    %225 = vector.extract_strided_slice %187 {offsets = [0, 256], sizes = [8, 128], strides = [1, 1]} : vector<8x512xf32> to vector<8x128xf32>
    %226 = math.tanh %225 : vector<8x128xf32>
    %227 = vector.extract_strided_slice %187 {offsets = [0, 384], sizes = [8, 128], strides = [1, 1]} : vector<8x512xf32> to vector<8x128xf32>
    %228 = arith.negf %227 : vector<8x128xf32>
    %229 = math.exp %228 : vector<8x128xf32>
    %cst_82 = arith.constant 1.000000e+00 : f32
    %230 = vector.broadcast %cst_82 : f32 to vector<8x128xf32>
    %231 = arith.addf %230, %229 : vector<8x128xf32>
    %232 = arith.divf %230, %231 : vector<8x128xf32>
    %233 = arith.mulf %224, %162 : vector<8x128xf32>
    %234 = arith.mulf %218, %226 : vector<8x128xf32>
    %235 = arith.addf %233, %234 : vector<8x128xf32>
    %236 = math.tanh %235 : vector<8x128xf32>
    %237 = arith.mulf %232, %236 : vector<8x128xf32>
    %238 = arith.index_cast %c2_i32 : i32 to index
    %c0_83 = arith.constant 0 : index
    %c0_84 = arith.constant 0 : index
    %239 = vector.load %arg7[%238, %c0_83, %c0_84] : memref<8x8x128xf32, #tpu.memory_space<vmem>>, vector<1x8x128xf32>
    %240 = vector.shape_cast %239 : vector<1x8x128xf32> to vector<8x128xf32>
    %241 = vector.shape_cast %212 : vector<8x128xf32> to vector<1x8x128xf32>
    tpu.vector_store %arg7[%238, %c0_83, %c0_84], %241 {strides = array<i32>} : memref<8x8x128xf32, #tpu.memory_space<vmem>>, vector<1x8x128xf32>,
    %242 = arith.index_cast %173 : i32 to index
    %c0_85 = arith.constant 0 : index
    %c0_86 = arith.constant 0 : index
    %243 = vector.load %arg8[%242, %c0_85, %c0_86] : memref<8x8x128xf32, #tpu.memory_space<vmem>>, vector<1x8x128xf32>
    %244 = vector.shape_cast %243 : vector<1x8x128xf32> to vector<8x128xf32>
    %245 = vector.shape_cast %237 : vector<8x128xf32> to vector<1x8x128xf32>
    tpu.vector_store %arg8[%242, %c0_85, %c0_86], %245 {strides = array<i32>} : memref<8x8x128xf32, #tpu.memory_space<vmem>>, vector<1x8x128xf32>,
    %c3_i32 = arith.constant 3 : i32
    %c7_i32_87 = arith.constant 7 : i32
    %246 = arith.subi %c7_i32_87, %c3_i32 : i32
    %247 = arith.index_cast %c3_i32 : i32 to index
    %c0_88 = arith.constant 0 : index
    %c0_89 = arith.constant 0 : index
    %248 = vector.load %arg9[%247, %c0_88, %c0_89] : memref<8x8x512xf32, #tpu.memory_space<vmem>>, vector<1x8x512xf32>
    %249 = vector.shape_cast %248 : vector<1x8x512xf32> to vector<8x512xf32>
    %250 = arith.truncf %212 : vector<8x128xf32> to vector<8x128xbf16>
    %c0_90 = arith.constant 0 : index
    %c0_91 = arith.constant 0 : index
    %251 = vector.load %arg5[%c0_90, %c0_91] : memref<128x512xbf16, #tpu.memory_space<vmem>>, vector<128x512xbf16>
    %cst_92 = arith.constant dense<0.000000e+00> : vector<8x512xf32>
    %252 = tpu.matmul %250, %251, %cst_92 {dimension_numbers = #tpu.dot_dimension_numbers<[1], [0], [0], [1], [0, 0, 1, 1], [], []>} : vector<8x128xbf16>, vector<128x512xbf16>, vector<8x512xf32> -> vector<8x512xf32>
    %253 = arith.addf %249, %252 : vector<8x512xf32>
    %254 = arith.index_cast %246 : i32 to index
    %c0_93 = arith.constant 0 : index
    %c0_94 = arith.constant 0 : index
    %255 = vector.load %arg10[%254, %c0_93, %c0_94] : memref<8x8x512xf32, #tpu.memory_space<vmem>>, vector<1x8x512xf32>
    %256 = vector.shape_cast %255 : vector<1x8x512xf32> to vector<8x512xf32>
    %257 = arith.truncf %237 : vector<8x128xf32> to vector<8x128xbf16>
    %c0_95 = arith.constant 0 : index
    %c0_96 = arith.constant 0 : index
    %258 = vector.load %arg6[%c0_95, %c0_96] : memref<128x512xbf16, #tpu.memory_space<vmem>>, vector<128x512xbf16>
    %cst_97 = arith.constant dense<0.000000e+00> : vector<8x512xf32>
    %259 = tpu.matmul %257, %258, %cst_97 {dimension_numbers = #tpu.dot_dimension_numbers<[1], [0], [0], [1], [0, 0, 1, 1], [], []>} : vector<8x128xbf16>, vector<128x512xbf16>, vector<8x512xf32> -> vector<8x512xf32>
    %260 = arith.addf %256, %259 : vector<8x512xf32>
    %261 = vector.extract_strided_slice %253 {offsets = [0, 0], sizes = [8, 128], strides = [1, 1]} : vector<8x512xf32> to vector<8x128xf32>
    %262 = arith.negf %261 : vector<8x128xf32>
    %263 = math.exp %262 : vector<8x128xf32>
    %cst_98 = arith.constant 1.000000e+00 : f32
    %264 = vector.broadcast %cst_98 : f32 to vector<8x128xf32>
    %265 = arith.addf %264, %263 : vector<8x128xf32>
    %266 = arith.divf %264, %265 : vector<8x128xf32>
    %267 = vector.extract_strided_slice %253 {offsets = [0, 128], sizes = [8, 128], strides = [1, 1]} : vector<8x512xf32> to vector<8x128xf32>
    %268 = arith.negf %267 : vector<8x128xf32>
    %269 = math.exp %268 : vector<8x128xf32>
    %cst_99 = arith.constant 1.000000e+00 : f32
    %270 = vector.broadcast %cst_99 : f32 to vector<8x128xf32>
    %271 = arith.addf %270, %269 : vector<8x128xf32>
    %272 = arith.divf %270, %271 : vector<8x128xf32>
    %273 = vector.extract_strided_slice %253 {offsets = [0, 256], sizes = [8, 128], strides = [1, 1]} : vector<8x512xf32> to vector<8x128xf32>
    %274 = math.tanh %273 : vector<8x128xf32>
    %275 = vector.extract_strided_slice %253 {offsets = [0, 384], sizes = [8, 128], strides = [1, 1]} : vector<8x512xf32> to vector<8x128xf32>
    %276 = arith.negf %275 : vector<8x128xf32>
    %277 = math.exp %276 : vector<8x128xf32>
    %cst_100 = arith.constant 1.000000e+00 : f32
    %278 = vector.broadcast %cst_100 : f32 to vector<8x128xf32>
    %279 = arith.addf %278, %277 : vector<8x128xf32>
    %280 = arith.divf %278, %279 : vector<8x128xf32>
    %281 = arith.mulf %272, %210 : vector<8x128xf32>
    %282 = arith.mulf %266, %274 : vector<8x128xf32>
    %283 = arith.addf %281, %282 : vector<8x128xf32>
    %284 = math.tanh %283 : vector<8x128xf32>
    %285 = arith.mulf %280, %284 : vector<8x128xf32>
    %286 = vector.extract_strided_slice %260 {offsets = [0, 0], sizes = [8, 128], strides = [1, 1]} : vector<8x512xf32> to vector<8x128xf32>
    %287 = arith.negf %286 : vector<8x128xf32>
    %288 = math.exp %287 : vector<8x128xf32>
    %cst_101 = arith.constant 1.000000e+00 : f32
    %289 = vector.broadcast %cst_101 : f32 to vector<8x128xf32>
    %290 = arith.addf %289, %288 : vector<8x128xf32>
    %291 = arith.divf %289, %290 : vector<8x128xf32>
    %292 = vector.extract_strided_slice %260 {offsets = [0, 128], sizes = [8, 128], strides = [1, 1]} : vector<8x512xf32> to vector<8x128xf32>
    %293 = arith.negf %292 : vector<8x128xf32>
    %294 = math.exp %293 : vector<8x128xf32>
    %cst_102 = arith.constant 1.000000e+00 : f32
    %295 = vector.broadcast %cst_102 : f32 to vector<8x128xf32>
    %296 = arith.addf %295, %294 : vector<8x128xf32>
    %297 = arith.divf %295, %296 : vector<8x128xf32>
    %298 = vector.extract_strided_slice %260 {offsets = [0, 256], sizes = [8, 128], strides = [1, 1]} : vector<8x512xf32> to vector<8x128xf32>
    %299 = math.tanh %298 : vector<8x128xf32>
    %300 = vector.extract_strided_slice %260 {offsets = [0, 384], sizes = [8, 128], strides = [1, 1]} : vector<8x512xf32> to vector<8x128xf32>
    %301 = arith.negf %300 : vector<8x128xf32>
    %302 = math.exp %301 : vector<8x128xf32>
    %cst_103 = arith.constant 1.000000e+00 : f32
    %303 = vector.broadcast %cst_103 : f32 to vector<8x128xf32>
    %304 = arith.addf %303, %302 : vector<8x128xf32>
    %305 = arith.divf %303, %304 : vector<8x128xf32>
    %306 = arith.mulf %297, %235 : vector<8x128xf32>
    %307 = arith.mulf %291, %299 : vector<8x128xf32>
    %308 = arith.addf %306, %307 : vector<8x128xf32>
    %309 = math.tanh %308 : vector<8x128xf32>
    %310 = arith.mulf %305, %309 : vector<8x128xf32>
    %311 = arith.index_cast %c3_i32 : i32 to index
    %c0_104 = arith.constant 0 : index
    %c0_105 = arith.constant 0 : index
    %312 = vector.load %arg7[%311, %c0_104, %c0_105] : memref<8x8x128xf32, #tpu.memory_space<vmem>>, vector<1x8x128xf32>
    %313 = vector.shape_cast %312 : vector<1x8x128xf32> to vector<8x128xf32>
    %314 = vector.shape_cast %285 : vector<8x128xf32> to vector<1x8x128xf32>
    tpu.vector_store %arg7[%311, %c0_104, %c0_105], %314 {strides = array<i32>} : memref<8x8x128xf32, #tpu.memory_space<vmem>>, vector<1x8x128xf32>,
    %315 = arith.index_cast %246 : i32 to index
    %c0_106 = arith.constant 0 : index
    %c0_107 = arith.constant 0 : index
    %316 = vector.load %arg8[%315, %c0_106, %c0_107] : memref<8x8x128xf32, #tpu.memory_space<vmem>>, vector<1x8x128xf32>
    %317 = vector.shape_cast %316 : vector<1x8x128xf32> to vector<8x128xf32>
    %318 = vector.shape_cast %310 : vector<8x128xf32> to vector<1x8x128xf32>
    tpu.vector_store %arg8[%315, %c0_106, %c0_107], %318 {strides = array<i32>} : memref<8x8x128xf32, #tpu.memory_space<vmem>>, vector<1x8x128xf32>,
    %c4_i32 = arith.constant 4 : i32
    %c7_i32_108 = arith.constant 7 : i32
    %319 = arith.subi %c7_i32_108, %c4_i32 : i32
    %320 = arith.index_cast %c4_i32 : i32 to index
    %c0_109 = arith.constant 0 : index
    %c0_110 = arith.constant 0 : index
    %321 = vector.load %arg9[%320, %c0_109, %c0_110] : memref<8x8x512xf32, #tpu.memory_space<vmem>>, vector<1x8x512xf32>
    %322 = vector.shape_cast %321 : vector<1x8x512xf32> to vector<8x512xf32>
    %323 = arith.truncf %285 : vector<8x128xf32> to vector<8x128xbf16>
    %c0_111 = arith.constant 0 : index
    %c0_112 = arith.constant 0 : index
    %324 = vector.load %arg5[%c0_111, %c0_112] : memref<128x512xbf16, #tpu.memory_space<vmem>>, vector<128x512xbf16>
    %cst_113 = arith.constant dense<0.000000e+00> : vector<8x512xf32>
    %325 = tpu.matmul %323, %324, %cst_113 {dimension_numbers = #tpu.dot_dimension_numbers<[1], [0], [0], [1], [0, 0, 1, 1], [], []>} : vector<8x128xbf16>, vector<128x512xbf16>, vector<8x512xf32> -> vector<8x512xf32>
    %326 = arith.addf %322, %325 : vector<8x512xf32>
    %327 = arith.index_cast %319 : i32 to index
    %c0_114 = arith.constant 0 : index
    %c0_115 = arith.constant 0 : index
    %328 = vector.load %arg10[%327, %c0_114, %c0_115] : memref<8x8x512xf32, #tpu.memory_space<vmem>>, vector<1x8x512xf32>
    %329 = vector.shape_cast %328 : vector<1x8x512xf32> to vector<8x512xf32>
    %330 = arith.truncf %310 : vector<8x128xf32> to vector<8x128xbf16>
    %c0_116 = arith.constant 0 : index
    %c0_117 = arith.constant 0 : index
    %331 = vector.load %arg6[%c0_116, %c0_117] : memref<128x512xbf16, #tpu.memory_space<vmem>>, vector<128x512xbf16>
    %cst_118 = arith.constant dense<0.000000e+00> : vector<8x512xf32>
    %332 = tpu.matmul %330, %331, %cst_118 {dimension_numbers = #tpu.dot_dimension_numbers<[1], [0], [0], [1], [0, 0, 1, 1], [], []>} : vector<8x128xbf16>, vector<128x512xbf16>, vector<8x512xf32> -> vector<8x512xf32>
    %333 = arith.addf %329, %332 : vector<8x512xf32>
    %334 = vector.extract_strided_slice %326 {offsets = [0, 0], sizes = [8, 128], strides = [1, 1]} : vector<8x512xf32> to vector<8x128xf32>
    %335 = arith.negf %334 : vector<8x128xf32>
    %336 = math.exp %335 : vector<8x128xf32>
    %cst_119 = arith.constant 1.000000e+00 : f32
    %337 = vector.broadcast %cst_119 : f32 to vector<8x128xf32>
    %338 = arith.addf %337, %336 : vector<8x128xf32>
    %339 = arith.divf %337, %338 : vector<8x128xf32>
    %340 = vector.extract_strided_slice %326 {offsets = [0, 128], sizes = [8, 128], strides = [1, 1]} : vector<8x512xf32> to vector<8x128xf32>
    %341 = arith.negf %340 : vector<8x128xf32>
    %342 = math.exp %341 : vector<8x128xf32>
    %cst_120 = arith.constant 1.000000e+00 : f32
    %343 = vector.broadcast %cst_120 : f32 to vector<8x128xf32>
    %344 = arith.addf %343, %342 : vector<8x128xf32>
    %345 = arith.divf %343, %344 : vector<8x128xf32>
    %346 = vector.extract_strided_slice %326 {offsets = [0, 256], sizes = [8, 128], strides = [1, 1]} : vector<8x512xf32> to vector<8x128xf32>
    %347 = math.tanh %346 : vector<8x128xf32>
    %348 = vector.extract_strided_slice %326 {offsets = [0, 384], sizes = [8, 128], strides = [1, 1]} : vector<8x512xf32> to vector<8x128xf32>
    %349 = arith.negf %348 : vector<8x128xf32>
    %350 = math.exp %349 : vector<8x128xf32>
    %cst_121 = arith.constant 1.000000e+00 : f32
    %351 = vector.broadcast %cst_121 : f32 to vector<8x128xf32>
    %352 = arith.addf %351, %350 : vector<8x128xf32>
    %353 = arith.divf %351, %352 : vector<8x128xf32>
    %354 = arith.mulf %345, %283 : vector<8x128xf32>
    %355 = arith.mulf %339, %347 : vector<8x128xf32>
    %356 = arith.addf %354, %355 : vector<8x128xf32>
    %357 = math.tanh %356 : vector<8x128xf32>
    %358 = arith.mulf %353, %357 : vector<8x128xf32>
    %359 = vector.extract_strided_slice %333 {offsets = [0, 0], sizes = [8, 128], strides = [1, 1]} : vector<8x512xf32> to vector<8x128xf32>
    %360 = arith.negf %359 : vector<8x128xf32>
    %361 = math.exp %360 : vector<8x128xf32>
    %cst_122 = arith.constant 1.000000e+00 : f32
    %362 = vector.broadcast %cst_122 : f32 to vector<8x128xf32>
    %363 = arith.addf %362, %361 : vector<8x128xf32>
    %364 = arith.divf %362, %363 : vector<8x128xf32>
    %365 = vector.extract_strided_slice %333 {offsets = [0, 128], sizes = [8, 128], strides = [1, 1]} : vector<8x512xf32> to vector<8x128xf32>
    %366 = arith.negf %365 : vector<8x128xf32>
    %367 = math.exp %366 : vector<8x128xf32>
    %cst_123 = arith.constant 1.000000e+00 : f32
    %368 = vector.broadcast %cst_123 : f32 to vector<8x128xf32>
    %369 = arith.addf %368, %367 : vector<8x128xf32>
    %370 = arith.divf %368, %369 : vector<8x128xf32>
    %371 = vector.extract_strided_slice %333 {offsets = [0, 256], sizes = [8, 128], strides = [1, 1]} : vector<8x512xf32> to vector<8x128xf32>
    %372 = math.tanh %371 : vector<8x128xf32>
    %373 = vector.extract_strided_slice %333 {offsets = [0, 384], sizes = [8, 128], strides = [1, 1]} : vector<8x512xf32> to vector<8x128xf32>
    %374 = arith.negf %373 : vector<8x128xf32>
    %375 = math.exp %374 : vector<8x128xf32>
    %cst_124 = arith.constant 1.000000e+00 : f32
    %376 = vector.broadcast %cst_124 : f32 to vector<8x128xf32>
    %377 = arith.addf %376, %375 : vector<8x128xf32>
    %378 = arith.divf %376, %377 : vector<8x128xf32>
    %379 = arith.mulf %370, %308 : vector<8x128xf32>
    %380 = arith.mulf %364, %372 : vector<8x128xf32>
    %381 = arith.addf %379, %380 : vector<8x128xf32>
    %382 = math.tanh %381 : vector<8x128xf32>
    %383 = arith.mulf %378, %382 : vector<8x128xf32>
    %384 = arith.index_cast %c4_i32 : i32 to index
    %c0_125 = arith.constant 0 : index
    %c0_126 = arith.constant 0 : index
    %385 = vector.load %arg7[%384, %c0_125, %c0_126] : memref<8x8x128xf32, #tpu.memory_space<vmem>>, vector<1x8x128xf32>
    %386 = vector.shape_cast %385 : vector<1x8x128xf32> to vector<8x128xf32>
    %387 = vector.shape_cast %358 : vector<8x128xf32> to vector<1x8x128xf32>
    tpu.vector_store %arg7[%384, %c0_125, %c0_126], %387 {strides = array<i32>} : memref<8x8x128xf32, #tpu.memory_space<vmem>>, vector<1x8x128xf32>,
    %388 = arith.index_cast %319 : i32 to index
    %c0_127 = arith.constant 0 : index
    %c0_128 = arith.constant 0 : index
    %389 = vector.load %arg8[%388, %c0_127, %c0_128] : memref<8x8x128xf32, #tpu.memory_space<vmem>>, vector<1x8x128xf32>
    %390 = vector.shape_cast %389 : vector<1x8x128xf32> to vector<8x128xf32>
    %391 = vector.shape_cast %383 : vector<8x128xf32> to vector<1x8x128xf32>
    tpu.vector_store %arg8[%388, %c0_127, %c0_128], %391 {strides = array<i32>} : memref<8x8x128xf32, #tpu.memory_space<vmem>>, vector<1x8x128xf32>,
    %c5_i32 = arith.constant 5 : i32
    %c7_i32_129 = arith.constant 7 : i32
    %392 = arith.subi %c7_i32_129, %c5_i32 : i32
    %393 = arith.index_cast %c5_i32 : i32 to index
    %c0_130 = arith.constant 0 : index
    %c0_131 = arith.constant 0 : index
    %394 = vector.load %arg9[%393, %c0_130, %c0_131] : memref<8x8x512xf32, #tpu.memory_space<vmem>>, vector<1x8x512xf32>
    %395 = vector.shape_cast %394 : vector<1x8x512xf32> to vector<8x512xf32>
    %396 = arith.truncf %358 : vector<8x128xf32> to vector<8x128xbf16>
    %c0_132 = arith.constant 0 : index
    %c0_133 = arith.constant 0 : index
    %397 = vector.load %arg5[%c0_132, %c0_133] : memref<128x512xbf16, #tpu.memory_space<vmem>>, vector<128x512xbf16>
    %cst_134 = arith.constant dense<0.000000e+00> : vector<8x512xf32>
    %398 = tpu.matmul %396, %397, %cst_134 {dimension_numbers = #tpu.dot_dimension_numbers<[1], [0], [0], [1], [0, 0, 1, 1], [], []>} : vector<8x128xbf16>, vector<128x512xbf16>, vector<8x512xf32> -> vector<8x512xf32>
    %399 = arith.addf %395, %398 : vector<8x512xf32>
    %400 = arith.index_cast %392 : i32 to index
    %c0_135 = arith.constant 0 : index
    %c0_136 = arith.constant 0 : index
    %401 = vector.load %arg10[%400, %c0_135, %c0_136] : memref<8x8x512xf32, #tpu.memory_space<vmem>>, vector<1x8x512xf32>
    %402 = vector.shape_cast %401 : vector<1x8x512xf32> to vector<8x512xf32>
    %403 = arith.truncf %383 : vector<8x128xf32> to vector<8x128xbf16>
    %c0_137 = arith.constant 0 : index
    %c0_138 = arith.constant 0 : index
    %404 = vector.load %arg6[%c0_137, %c0_138] : memref<128x512xbf16, #tpu.memory_space<vmem>>, vector<128x512xbf16>
    %cst_139 = arith.constant dense<0.000000e+00> : vector<8x512xf32>
    %405 = tpu.matmul %403, %404, %cst_139 {dimension_numbers = #tpu.dot_dimension_numbers<[1], [0], [0], [1], [0, 0, 1, 1], [], []>} : vector<8x128xbf16>, vector<128x512xbf16>, vector<8x512xf32> -> vector<8x512xf32>
    %406 = arith.addf %402, %405 : vector<8x512xf32>
    %407 = vector.extract_strided_slice %399 {offsets = [0, 0], sizes = [8, 128], strides = [1, 1]} : vector<8x512xf32> to vector<8x128xf32>
    %408 = arith.negf %407 : vector<8x128xf32>
    %409 = math.exp %408 : vector<8x128xf32>
    %cst_140 = arith.constant 1.000000e+00 : f32
    %410 = vector.broadcast %cst_140 : f32 to vector<8x128xf32>
    %411 = arith.addf %410, %409 : vector<8x128xf32>
    %412 = arith.divf %410, %411 : vector<8x128xf32>
    %413 = vector.extract_strided_slice %399 {offsets = [0, 128], sizes = [8, 128], strides = [1, 1]} : vector<8x512xf32> to vector<8x128xf32>
    %414 = arith.negf %413 : vector<8x128xf32>
    %415 = math.exp %414 : vector<8x128xf32>
    %cst_141 = arith.constant 1.000000e+00 : f32
    %416 = vector.broadcast %cst_141 : f32 to vector<8x128xf32>
    %417 = arith.addf %416, %415 : vector<8x128xf32>
    %418 = arith.divf %416, %417 : vector<8x128xf32>
    %419 = vector.extract_strided_slice %399 {offsets = [0, 256], sizes = [8, 128], strides = [1, 1]} : vector<8x512xf32> to vector<8x128xf32>
    %420 = math.tanh %419 : vector<8x128xf32>
    %421 = vector.extract_strided_slice %399 {offsets = [0, 384], sizes = [8, 128], strides = [1, 1]} : vector<8x512xf32> to vector<8x128xf32>
    %422 = arith.negf %421 : vector<8x128xf32>
    %423 = math.exp %422 : vector<8x128xf32>
    %cst_142 = arith.constant 1.000000e+00 : f32
    %424 = vector.broadcast %cst_142 : f32 to vector<8x128xf32>
    %425 = arith.addf %424, %423 : vector<8x128xf32>
    %426 = arith.divf %424, %425 : vector<8x128xf32>
    %427 = arith.mulf %418, %356 : vector<8x128xf32>
    %428 = arith.mulf %412, %420 : vector<8x128xf32>
    %429 = arith.addf %427, %428 : vector<8x128xf32>
    %430 = math.tanh %429 : vector<8x128xf32>
    %431 = arith.mulf %426, %430 : vector<8x128xf32>
    %432 = vector.extract_strided_slice %406 {offsets = [0, 0], sizes = [8, 128], strides = [1, 1]} : vector<8x512xf32> to vector<8x128xf32>
    %433 = arith.negf %432 : vector<8x128xf32>
    %434 = math.exp %433 : vector<8x128xf32>
    %cst_143 = arith.constant 1.000000e+00 : f32
    %435 = vector.broadcast %cst_143 : f32 to vector<8x128xf32>
    %436 = arith.addf %435, %434 : vector<8x128xf32>
    %437 = arith.divf %435, %436 : vector<8x128xf32>
    %438 = vector.extract_strided_slice %406 {offsets = [0, 128], sizes = [8, 128], strides = [1, 1]} : vector<8x512xf32> to vector<8x128xf32>
    %439 = arith.negf %438 : vector<8x128xf32>
    %440 = math.exp %439 : vector<8x128xf32>
    %cst_144 = arith.constant 1.000000e+00 : f32
    %441 = vector.broadcast %cst_144 : f32 to vector<8x128xf32>
    %442 = arith.addf %441, %440 : vector<8x128xf32>
    %443 = arith.divf %441, %442 : vector<8x128xf32>
    %444 = vector.extract_strided_slice %406 {offsets = [0, 256], sizes = [8, 128], strides = [1, 1]} : vector<8x512xf32> to vector<8x128xf32>
    %445 = math.tanh %444 : vector<8x128xf32>
    %446 = vector.extract_strided_slice %406 {offsets = [0, 384], sizes = [8, 128], strides = [1, 1]} : vector<8x512xf32> to vector<8x128xf32>
    %447 = arith.negf %446 : vector<8x128xf32>
    %448 = math.exp %447 : vector<8x128xf32>
    %cst_145 = arith.constant 1.000000e+00 : f32
    %449 = vector.broadcast %cst_145 : f32 to vector<8x128xf32>
    %450 = arith.addf %449, %448 : vector<8x128xf32>
    %451 = arith.divf %449, %450 : vector<8x128xf32>
    %452 = arith.mulf %443, %381 : vector<8x128xf32>
    %453 = arith.mulf %437, %445 : vector<8x128xf32>
    %454 = arith.addf %452, %453 : vector<8x128xf32>
    %455 = math.tanh %454 : vector<8x128xf32>
    %456 = arith.mulf %451, %455 : vector<8x128xf32>
    %457 = arith.index_cast %c5_i32 : i32 to index
    %c0_146 = arith.constant 0 : index
    %c0_147 = arith.constant 0 : index
    %458 = vector.load %arg7[%457, %c0_146, %c0_147] : memref<8x8x128xf32, #tpu.memory_space<vmem>>, vector<1x8x128xf32>
    %459 = vector.shape_cast %458 : vector<1x8x128xf32> to vector<8x128xf32>
    %460 = vector.shape_cast %431 : vector<8x128xf32> to vector<1x8x128xf32>
    tpu.vector_store %arg7[%457, %c0_146, %c0_147], %460 {strides = array<i32>} : memref<8x8x128xf32, #tpu.memory_space<vmem>>, vector<1x8x128xf32>,
    %461 = arith.index_cast %392 : i32 to index
    %c0_148 = arith.constant 0 : index
    %c0_149 = arith.constant 0 : index
    %462 = vector.load %arg8[%461, %c0_148, %c0_149] : memref<8x8x128xf32, #tpu.memory_space<vmem>>, vector<1x8x128xf32>
    %463 = vector.shape_cast %462 : vector<1x8x128xf32> to vector<8x128xf32>
    %464 = vector.shape_cast %456 : vector<8x128xf32> to vector<1x8x128xf32>
    tpu.vector_store %arg8[%461, %c0_148, %c0_149], %464 {strides = array<i32>} : memref<8x8x128xf32, #tpu.memory_space<vmem>>, vector<1x8x128xf32>,
    %c6_i32 = arith.constant 6 : i32
    %c7_i32_150 = arith.constant 7 : i32
    %465 = arith.subi %c7_i32_150, %c6_i32 : i32
    %466 = arith.index_cast %c6_i32 : i32 to index
    %c0_151 = arith.constant 0 : index
    %c0_152 = arith.constant 0 : index
    %467 = vector.load %arg9[%466, %c0_151, %c0_152] : memref<8x8x512xf32, #tpu.memory_space<vmem>>, vector<1x8x512xf32>
    %468 = vector.shape_cast %467 : vector<1x8x512xf32> to vector<8x512xf32>
    %469 = arith.truncf %431 : vector<8x128xf32> to vector<8x128xbf16>
    %c0_153 = arith.constant 0 : index
    %c0_154 = arith.constant 0 : index
    %470 = vector.load %arg5[%c0_153, %c0_154] : memref<128x512xbf16, #tpu.memory_space<vmem>>, vector<128x512xbf16>
    %cst_155 = arith.constant dense<0.000000e+00> : vector<8x512xf32>
    %471 = tpu.matmul %469, %470, %cst_155 {dimension_numbers = #tpu.dot_dimension_numbers<[1], [0], [0], [1], [0, 0, 1, 1], [], []>} : vector<8x128xbf16>, vector<128x512xbf16>, vector<8x512xf32> -> vector<8x512xf32>
    %472 = arith.addf %468, %471 : vector<8x512xf32>
    %473 = arith.index_cast %465 : i32 to index
    %c0_156 = arith.constant 0 : index
    %c0_157 = arith.constant 0 : index
    %474 = vector.load %arg10[%473, %c0_156, %c0_157] : memref<8x8x512xf32, #tpu.memory_space<vmem>>, vector<1x8x512xf32>
    %475 = vector.shape_cast %474 : vector<1x8x512xf32> to vector<8x512xf32>
    %476 = arith.truncf %456 : vector<8x128xf32> to vector<8x128xbf16>
    %c0_158 = arith.constant 0 : index
    %c0_159 = arith.constant 0 : index
    %477 = vector.load %arg6[%c0_158, %c0_159] : memref<128x512xbf16, #tpu.memory_space<vmem>>, vector<128x512xbf16>
    %cst_160 = arith.constant dense<0.000000e+00> : vector<8x512xf32>
    %478 = tpu.matmul %476, %477, %cst_160 {dimension_numbers = #tpu.dot_dimension_numbers<[1], [0], [0], [1], [0, 0, 1, 1], [], []>} : vector<8x128xbf16>, vector<128x512xbf16>, vector<8x512xf32> -> vector<8x512xf32>
    %479 = arith.addf %475, %478 : vector<8x512xf32>
    %480 = vector.extract_strided_slice %472 {offsets = [0, 0], sizes = [8, 128], strides = [1, 1]} : vector<8x512xf32> to vector<8x128xf32>
    %481 = arith.negf %480 : vector<8x128xf32>
    %482 = math.exp %481 : vector<8x128xf32>
    %cst_161 = arith.constant 1.000000e+00 : f32
    %483 = vector.broadcast %cst_161 : f32 to vector<8x128xf32>
    %484 = arith.addf %483, %482 : vector<8x128xf32>
    %485 = arith.divf %483, %484 : vector<8x128xf32>
    %486 = vector.extract_strided_slice %472 {offsets = [0, 128], sizes = [8, 128], strides = [1, 1]} : vector<8x512xf32> to vector<8x128xf32>
    %487 = arith.negf %486 : vector<8x128xf32>
    %488 = math.exp %487 : vector<8x128xf32>
    %cst_162 = arith.constant 1.000000e+00 : f32
    %489 = vector.broadcast %cst_162 : f32 to vector<8x128xf32>
    %490 = arith.addf %489, %488 : vector<8x128xf32>
    %491 = arith.divf %489, %490 : vector<8x128xf32>
    %492 = vector.extract_strided_slice %472 {offsets = [0, 256], sizes = [8, 128], strides = [1, 1]} : vector<8x512xf32> to vector<8x128xf32>
    %493 = math.tanh %492 : vector<8x128xf32>
    %494 = vector.extract_strided_slice %472 {offsets = [0, 384], sizes = [8, 128], strides = [1, 1]} : vector<8x512xf32> to vector<8x128xf32>
    %495 = arith.negf %494 : vector<8x128xf32>
    %496 = math.exp %495 : vector<8x128xf32>
    %cst_163 = arith.constant 1.000000e+00 : f32
    %497 = vector.broadcast %cst_163 : f32 to vector<8x128xf32>
    %498 = arith.addf %497, %496 : vector<8x128xf32>
    %499 = arith.divf %497, %498 : vector<8x128xf32>
    %500 = arith.mulf %491, %429 : vector<8x128xf32>
    %501 = arith.mulf %485, %493 : vector<8x128xf32>
    %502 = arith.addf %500, %501 : vector<8x128xf32>
    %503 = math.tanh %502 : vector<8x128xf32>
    %504 = arith.mulf %499, %503 : vector<8x128xf32>
    %505 = vector.extract_strided_slice %479 {offsets = [0, 0], sizes = [8, 128], strides = [1, 1]} : vector<8x512xf32> to vector<8x128xf32>
    %506 = arith.negf %505 : vector<8x128xf32>
    %507 = math.exp %506 : vector<8x128xf32>
    %cst_164 = arith.constant 1.000000e+00 : f32
    %508 = vector.broadcast %cst_164 : f32 to vector<8x128xf32>
    %509 = arith.addf %508, %507 : vector<8x128xf32>
    %510 = arith.divf %508, %509 : vector<8x128xf32>
    %511 = vector.extract_strided_slice %479 {offsets = [0, 128], sizes = [8, 128], strides = [1, 1]} : vector<8x512xf32> to vector<8x128xf32>
    %512 = arith.negf %511 : vector<8x128xf32>
    %513 = math.exp %512 : vector<8x128xf32>
    %cst_165 = arith.constant 1.000000e+00 : f32
    %514 = vector.broadcast %cst_165 : f32 to vector<8x128xf32>
    %515 = arith.addf %514, %513 : vector<8x128xf32>
    %516 = arith.divf %514, %515 : vector<8x128xf32>
    %517 = vector.extract_strided_slice %479 {offsets = [0, 256], sizes = [8, 128], strides = [1, 1]} : vector<8x512xf32> to vector<8x128xf32>
    %518 = math.tanh %517 : vector<8x128xf32>
    %519 = vector.extract_strided_slice %479 {offsets = [0, 384], sizes = [8, 128], strides = [1, 1]} : vector<8x512xf32> to vector<8x128xf32>
    %520 = arith.negf %519 : vector<8x128xf32>
    %521 = math.exp %520 : vector<8x128xf32>
    %cst_166 = arith.constant 1.000000e+00 : f32
    %522 = vector.broadcast %cst_166 : f32 to vector<8x128xf32>
    %523 = arith.addf %522, %521 : vector<8x128xf32>
    %524 = arith.divf %522, %523 : vector<8x128xf32>
    %525 = arith.mulf %516, %454 : vector<8x128xf32>
    %526 = arith.mulf %510, %518 : vector<8x128xf32>
    %527 = arith.addf %525, %526 : vector<8x128xf32>
    %528 = math.tanh %527 : vector<8x128xf32>
    %529 = arith.mulf %524, %528 : vector<8x128xf32>
    %530 = arith.index_cast %c6_i32 : i32 to index
    %c0_167 = arith.constant 0 : index
    %c0_168 = arith.constant 0 : index
    %531 = vector.load %arg7[%530, %c0_167, %c0_168] : memref<8x8x128xf32, #tpu.memory_space<vmem>>, vector<1x8x128xf32>
    %532 = vector.shape_cast %531 : vector<1x8x128xf32> to vector<8x128xf32>
    %533 = vector.shape_cast %504 : vector<8x128xf32> to vector<1x8x128xf32>
    tpu.vector_store %arg7[%530, %c0_167, %c0_168], %533 {strides = array<i32>} : memref<8x8x128xf32, #tpu.memory_space<vmem>>, vector<1x8x128xf32>,
    %534 = arith.index_cast %465 : i32 to index
    %c0_169 = arith.constant 0 : index
    %c0_170 = arith.constant 0 : index
    %535 = vector.load %arg8[%534, %c0_169, %c0_170] : memref<8x8x128xf32, #tpu.memory_space<vmem>>, vector<1x8x128xf32>
    %536 = vector.shape_cast %535 : vector<1x8x128xf32> to vector<8x128xf32>
    %537 = vector.shape_cast %529 : vector<8x128xf32> to vector<1x8x128xf32>
    tpu.vector_store %arg8[%534, %c0_169, %c0_170], %537 {strides = array<i32>} : memref<8x8x128xf32, #tpu.memory_space<vmem>>, vector<1x8x128xf32>,
    %c7_i32_171 = arith.constant 7 : i32
    %c7_i32_172 = arith.constant 7 : i32
    %538 = arith.subi %c7_i32_172, %c7_i32_171 : i32
    %539 = arith.index_cast %c7_i32_171 : i32 to index
    %c0_173 = arith.constant 0 : index
    %c0_174 = arith.constant 0 : index
    %540 = vector.load %arg9[%539, %c0_173, %c0_174] : memref<8x8x512xf32, #tpu.memory_space<vmem>>, vector<1x8x512xf32>
    %541 = vector.shape_cast %540 : vector<1x8x512xf32> to vector<8x512xf32>
    %542 = arith.truncf %504 : vector<8x128xf32> to vector<8x128xbf16>
    %c0_175 = arith.constant 0 : index
    %c0_176 = arith.constant 0 : index
    %543 = vector.load %arg5[%c0_175, %c0_176] : memref<128x512xbf16, #tpu.memory_space<vmem>>, vector<128x512xbf16>
    %cst_177 = arith.constant dense<0.000000e+00> : vector<8x512xf32>
    %544 = tpu.matmul %542, %543, %cst_177 {dimension_numbers = #tpu.dot_dimension_numbers<[1], [0], [0], [1], [0, 0, 1, 1], [], []>} : vector<8x128xbf16>, vector<128x512xbf16>, vector<8x512xf32> -> vector<8x512xf32>
    %545 = arith.addf %541, %544 : vector<8x512xf32>
    %546 = arith.index_cast %538 : i32 to index
    %c0_178 = arith.constant 0 : index
    %c0_179 = arith.constant 0 : index
    %547 = vector.load %arg10[%546, %c0_178, %c0_179] : memref<8x8x512xf32, #tpu.memory_space<vmem>>, vector<1x8x512xf32>
    %548 = vector.shape_cast %547 : vector<1x8x512xf32> to vector<8x512xf32>
    %549 = arith.truncf %529 : vector<8x128xf32> to vector<8x128xbf16>
    %c0_180 = arith.constant 0 : index
    %c0_181 = arith.constant 0 : index
    %550 = vector.load %arg6[%c0_180, %c0_181] : memref<128x512xbf16, #tpu.memory_space<vmem>>, vector<128x512xbf16>
    %cst_182 = arith.constant dense<0.000000e+00> : vector<8x512xf32>
    %551 = tpu.matmul %549, %550, %cst_182 {dimension_numbers = #tpu.dot_dimension_numbers<[1], [0], [0], [1], [0, 0, 1, 1], [], []>} : vector<8x128xbf16>, vector<128x512xbf16>, vector<8x512xf32> -> vector<8x512xf32>
    %552 = arith.addf %548, %551 : vector<8x512xf32>
    %553 = vector.extract_strided_slice %545 {offsets = [0, 0], sizes = [8, 128], strides = [1, 1]} : vector<8x512xf32> to vector<8x128xf32>
    %554 = arith.negf %553 : vector<8x128xf32>
    %555 = math.exp %554 : vector<8x128xf32>
    %cst_183 = arith.constant 1.000000e+00 : f32
    %556 = vector.broadcast %cst_183 : f32 to vector<8x128xf32>
    %557 = arith.addf %556, %555 : vector<8x128xf32>
    %558 = arith.divf %556, %557 : vector<8x128xf32>
    %559 = vector.extract_strided_slice %545 {offsets = [0, 128], sizes = [8, 128], strides = [1, 1]} : vector<8x512xf32> to vector<8x128xf32>
    %560 = arith.negf %559 : vector<8x128xf32>
    %561 = math.exp %560 : vector<8x128xf32>
    %cst_184 = arith.constant 1.000000e+00 : f32
    %562 = vector.broadcast %cst_184 : f32 to vector<8x128xf32>
    %563 = arith.addf %562, %561 : vector<8x128xf32>
    %564 = arith.divf %562, %563 : vector<8x128xf32>
    %565 = vector.extract_strided_slice %545 {offsets = [0, 256], sizes = [8, 128], strides = [1, 1]} : vector<8x512xf32> to vector<8x128xf32>
    %566 = math.tanh %565 : vector<8x128xf32>
    %567 = vector.extract_strided_slice %545 {offsets = [0, 384], sizes = [8, 128], strides = [1, 1]} : vector<8x512xf32> to vector<8x128xf32>
    %568 = arith.negf %567 : vector<8x128xf32>
    %569 = math.exp %568 : vector<8x128xf32>
    %cst_185 = arith.constant 1.000000e+00 : f32
    %570 = vector.broadcast %cst_185 : f32 to vector<8x128xf32>
    %571 = arith.addf %570, %569 : vector<8x128xf32>
    %572 = arith.divf %570, %571 : vector<8x128xf32>
    %573 = arith.mulf %564, %502 : vector<8x128xf32>
    %574 = arith.mulf %558, %566 : vector<8x128xf32>
    %575 = arith.addf %573, %574 : vector<8x128xf32>
    %576 = math.tanh %575 : vector<8x128xf32>
    %577 = arith.mulf %572, %576 : vector<8x128xf32>
    %578 = vector.extract_strided_slice %552 {offsets = [0, 0], sizes = [8, 128], strides = [1, 1]} : vector<8x512xf32> to vector<8x128xf32>
    %579 = arith.negf %578 : vector<8x128xf32>
    %580 = math.exp %579 : vector<8x128xf32>
    %cst_186 = arith.constant 1.000000e+00 : f32
    %581 = vector.broadcast %cst_186 : f32 to vector<8x128xf32>
    %582 = arith.addf %581, %580 : vector<8x128xf32>
    %583 = arith.divf %581, %582 : vector<8x128xf32>
    %584 = vector.extract_strided_slice %552 {offsets = [0, 128], sizes = [8, 128], strides = [1, 1]} : vector<8x512xf32> to vector<8x128xf32>
    %585 = arith.negf %584 : vector<8x128xf32>
    %586 = math.exp %585 : vector<8x128xf32>
    %cst_187 = arith.constant 1.000000e+00 : f32
    %587 = vector.broadcast %cst_187 : f32 to vector<8x128xf32>
    %588 = arith.addf %587, %586 : vector<8x128xf32>
    %589 = arith.divf %587, %588 : vector<8x128xf32>
    %590 = vector.extract_strided_slice %552 {offsets = [0, 256], sizes = [8, 128], strides = [1, 1]} : vector<8x512xf32> to vector<8x128xf32>
    %591 = math.tanh %590 : vector<8x128xf32>
    %592 = vector.extract_strided_slice %552 {offsets = [0, 384], sizes = [8, 128], strides = [1, 1]} : vector<8x512xf32> to vector<8x128xf32>
    %593 = arith.negf %592 : vector<8x128xf32>
    %594 = math.exp %593 : vector<8x128xf32>
    %cst_188 = arith.constant 1.000000e+00 : f32
    %595 = vector.broadcast %cst_188 : f32 to vector<8x128xf32>
    %596 = arith.addf %595, %594 : vector<8x128xf32>
    %597 = arith.divf %595, %596 : vector<8x128xf32>
    %598 = arith.mulf %589, %527 : vector<8x128xf32>
    %599 = arith.mulf %583, %591 : vector<8x128xf32>
    %600 = arith.addf %598, %599 : vector<8x128xf32>
    %601 = math.tanh %600 : vector<8x128xf32>
    %602 = arith.mulf %597, %601 : vector<8x128xf32>
    %603 = arith.index_cast %c7_i32_171 : i32 to index
    %c0_189 = arith.constant 0 : index
    %c0_190 = arith.constant 0 : index
    %604 = vector.load %arg7[%603, %c0_189, %c0_190] : memref<8x8x128xf32, #tpu.memory_space<vmem>>, vector<1x8x128xf32>
    %605 = vector.shape_cast %604 : vector<1x8x128xf32> to vector<8x128xf32>
    %606 = vector.shape_cast %577 : vector<8x128xf32> to vector<1x8x128xf32>
    tpu.vector_store %arg7[%603, %c0_189, %c0_190], %606 {strides = array<i32>} : memref<8x8x128xf32, #tpu.memory_space<vmem>>, vector<1x8x128xf32>,
    %607 = arith.index_cast %538 : i32 to index
    %c0_191 = arith.constant 0 : index
    %c0_192 = arith.constant 0 : index
    %608 = vector.load %arg8[%607, %c0_191, %c0_192] : memref<8x8x128xf32, #tpu.memory_space<vmem>>, vector<1x8x128xf32>
    %609 = vector.shape_cast %608 : vector<1x8x128xf32> to vector<8x128xf32>
    %610 = vector.shape_cast %602 : vector<8x128xf32> to vector<1x8x128xf32>
    tpu.vector_store %arg8[%607, %c0_191, %c0_192], %610 {strides = array<i32>} : memref<8x8x128xf32, #tpu.memory_space<vmem>>, vector<1x8x128xf32>,
    %c8_i32 = arith.constant 8 : i32
    return
  }
  func.func @transform_0(%arg0: i32) -> (i32, i32, i32) {
    %c0_i32 = arith.constant 0 : i32
    %c0_i32_0 = arith.constant 0 : i32
    %c0_i32_1 = arith.constant 0 : i32
    return %c0_i32, %arg0, %c0_i32_0 : i32, i32, i32
  }
  func.func @transform_1(%arg0: i32) -> (i32, i32, i32) {
    %c0_i32 = arith.constant 0 : i32
    %c0_i32_0 = arith.constant 0 : i32
    %c0_i32_1 = arith.constant 0 : i32
    return %c0_i32, %arg0, %c0_i32_0 : i32, i32, i32
  }
  func.func @transform_2(%arg0: i32) -> (i32, i32) {
    %c0_i32 = arith.constant 0 : i32
    %c0_i32_0 = arith.constant 0 : i32
    %c0_i32_1 = arith.constant 0 : i32
    return %c0_i32, %c0_i32_0 : i32, i32
  }
  func.func @transform_3(%arg0: i32) -> (i32, i32) {
    %c0_i32 = arith.constant 0 : i32
    %c0_i32_0 = arith.constant 0 : i32
    %c0_i32_1 = arith.constant 0 : i32
    return %c0_i32, %c0_i32_0 : i32, i32
  }
  func.func @transform_4(%arg0: i32) -> (i32, i32) {
    %c0_i32 = arith.constant 0 : i32
    %c0_i32_0 = arith.constant 0 : i32
    %c0_i32_1 = arith.constant 0 : i32
    return %c0_i32, %c0_i32_0 : i32, i32
  }
  func.func @transform_5(%arg0: i32) -> (i32, i32) {
    %c0_i32 = arith.constant 0 : i32
    %c0_i32_0 = arith.constant 0 : i32
    %c0_i32_1 = arith.constant 0 : i32
    return %c0_i32, %c0_i32_0 : i32, i32
  }
  func.func @transform_6(%arg0: i32) -> (i32, i32, i32) {
    %c0_i32 = arith.constant 0 : i32
    %c0_i32_0 = arith.constant 0 : i32
    %c0_i32_1 = arith.constant 0 : i32
    return %c0_i32, %arg0, %c0_i32_0 : i32, i32, i32
  }
  func.func @transform_7(%arg0: i32) -> (i32, i32, i32) {
    %c0_i32 = arith.constant 0 : i32
    %c0_i32_0 = arith.constant 0 : i32
    %c0_i32_1 = arith.constant 0 : i32
    return %c0_i32, %arg0, %c0_i32_0 : i32, i32, i32
  }
}

</mosaic_0001>

<bundles_post_ra>
// kernel: net4_forward.5
= control target key start
LH: loop header
LB: loop body
LE: loop exit
PB: predicated region body
PF: predicated region fallthrough
CT: control target
= control target key end

     0   :  { %vm302_vm0 = vcmask 261120   ;;  %s1179_s2 = inlined_call_operand.vmem [shape: f32[256,32], index: 2, kind: input, shape index: {}]   ;;  %s1180_s1 = inlined_call_operand.vmem [shape: f32[64,128], index: 1, kind: input, shape index: {}]   ;;  %s1181_s0 = inlined_call_operand.vmem [shape: f32[64,128], index: 0, kind: input, shape index: {}]   ;;  %s1182_s3 = inlined_call_operand.vmem [shape: f32[1,32], index: 3, kind: input, shape index: {}]   ;;  %s1183_s6 = inlined_call_operand.vmem [shape: f32[32,128], index: 6, kind: input, shape index: {}]   ;;  %s1184_s4 = inlined_call_operand.vmem [shape: f32[1,32], index: 4, kind: input, shape index: {}]   ;;  %s1185_s5 = inlined_call_operand.vmem [shape: f32[1,32], index: 5, kind: input, shape index: {}]   ;;  %s1186_s7 = inlined_call_operand.vmem [shape: f32[1,128], index: 7, kind: input, shape index: {}]   ;;  %s1187_s8 = inlined_call_operand.vmem [shape: f32[64,128], index: 8, kind: output, shape index: {}]  }
   0x1   :  { %v61_v0 = vld [vmem:[%s1179_s2 + $0x80] sm:$0xff]  ;;  %v62_v1 = vld [vmem:[%s1179_s2 + $0x88] sm:$0xff]  ;;  %v63_v5 = vld [vmem:[%s1179_s2 + $0x90] sm:$0xff] }
   0x2   :  { %v37_v2 = vld [vmem:[%s1179_s2] sm:$0xff]  ;;  %v778_v3 = vpack.c.bf16 %v62_v1, %v61_v0  ;;  %v38_v4 = vld [vmem:[%s1179_s2 + $0x8] sm:$0xff]  ;;  %v64_v6 = vld [vmem:[%s1179_s2 + $0x98] sm:$0xff] }
   0x3   :  { %v810_v7 = vpack.c.bf16 %v38_v4, %v37_v2  ;;  %v782_v8 = vpack.c.bf16 %v64_v6, %v63_v5  ;;  %v39_v9 = vld [vmem:[%s1179_s2 + $0x10] sm:$0xff]  ;;  %v40_v10 = vld [vmem:[%s1179_s2 + $0x18] sm:$0xff]  ;;  %v65_v11 = vld [vmem:[%s1179_s2 + $0xa0] sm:$0xff] }
   0x4   :  { %779 = vmatprep.subr.bf16.mxu1 %v778_v3  ;;  %v814_v12 = vpack.c.bf16 %v40_v10, %v39_v9  ;;  %v66_v13 = vld [vmem:[%s1179_s2 + $0xa8] sm:$0xff]  ;;  %v41_v14 = vld [vmem:[%s1179_s2 + $0x20] sm:$0xff]  ;;  %v67_v18 = vld [vmem:[%s1179_s2 + $0xb0] sm:$0xff] }
   0x5   :  { %v42_v15 = vld [vmem:[%s1179_s2 + $0x28] sm:$0xff]  ;;  %811 = vmatprep.subr.bf16.mxu0 %v810_v7  ;;  %781 = vmatpush3.bf16.msra.mxu1 %v778_v3  ;;  %v786_v16 = vpack.c.bf16 %v66_v13, %v65_v11  ;;  %v68_v19 = vld [vmem:[%s1179_s2 + $0xb8] sm:$0xff]  ;;  %v43_v20 = vld [vmem:[%s1179_s2 + $0x30] sm:$0xff] }
   0x6   :  { %813 = vmatpush3.bf16.msra.mxu0 %v810_v7  ;;  %783 = vmatprep.subr.bf16.mxu1 %v782_v8  ;;  %v818_v17 = vpack.c.bf16 %v42_v15, %v41_v14  ;;  %v44_v21 = vld [vmem:[%s1179_s2 + $0x38] sm:$0xff]  ;;  %v790_v22 = vpack.c.bf16 %v68_v19, %v67_v18  ;;  %v69_v24 = vld [vmem:[%s1179_s2 + $0xc0] sm:$0xff]  ;;  %v70_v25 = vld [vmem:[%s1179_s2 + $0xc8] sm:$0xff] }
   0x7   :  { %815 = vmatprep.subr.bf16.mxu0 %v814_v12  ;;  %v822_v23 = vpack.c.bf16 %v44_v21, %v43_v20  ;;  %v53_v26 = vld [vmem:[%s1180_s1] sm:$0xff]  ;;  %v46_v28 = vld [vmem:[%s1179_s2 + $0x48] sm:$0xff]  ;;  %v794_v30 = vpack.c.bf16 %v70_v25, %v69_v24  ;;  %v71_v32 = vld [vmem:[%s1179_s2 + $0xd0] sm:$0xff] }
   0x8   :  { %v45_v27 = vld [vmem:[%s1179_s2 + $0x40] sm:$0xff]  ;;  %702 = vmatprep.mubr.f32.mxu1 %v53_v26  ;;  %v72_v33 = vld [vmem:[%s1179_s2 + $0xd8] sm:$0xff]  ;;  %v47_v34 = vld [vmem:[%s1179_s2 + $0x50] sm:$0xff] }
   0x9   :  { %785 = vmatpush3.bf16.msra.mxu1 %v782_v8  ;;  %v29_v29 = vld [vmem:[%s1181_s0] sm:$0xff]  ;;  %v826_v31 = vpack.c.bf16 %v46_v28, %v45_v27  ;;  %v48_v35 = vld [vmem:[%s1179_s2 + $0x58] sm:$0xff]  ;;  %v798_v36 = vpack.c.bf16 %v72_v33, %v71_v32  ;;  %v74_v39 = vld [vmem:[%s1179_s2 + $0xe8] sm:$0xff] }
   0xa   :  { %817 = vmatpush3.bf16.msra.mxu0 %v814_v12  ;;  %787 = vmatprep.subr.bf16.mxu1 %v786_v16  ;;  %v830_v37 = vpack.c.bf16 %v48_v35, %v47_v34  ;;  %v73_v38 = vld [vmem:[%s1179_s2 + $0xe0] sm:$0xff]  ;;  %v50_v41 = vld [vmem:[%s1179_s2 + $0x68] sm:$0xff]  ;;  %v75_v44 = vld [vmem:[%s1179_s2 + $0xf0] sm:$0xff] }
   0xb   :  { %819 = vmatprep.subr.bf16.mxu0 %v818_v17  ;;  %746 = vmatprep.mubr.f32.mxu0 %v29_v29  ;;  %v49_v40 = vld [vmem:[%s1179_s2 + $0x60] sm:$0xff]  ;;  %v802_v42 = vpack.c.bf16 %v74_v39, %v73_v38  ;;  %v76_v45 = vld [vmem:[%s1179_s2 + $0xf8] sm:$0xff]  ;;  %v51_v46 = vld [vmem:[%s1179_s2 + $0x70] sm:$0xff] }
   0xc   :  { %v834_v43 = vpack.c.bf16 %v50_v41, %v49_v40  ;;  %v52_v47 = vld [vmem:[%s1179_s2 + $0x78] sm:$0xff]  ;;  %v806_v48 = vpack.c.bf16 %v76_v45, %v75_v44  ;;  %v54_v50 = vld [vmem:[%s1180_s1 + $0x8] sm:$0xff]  ;;  %v55_v52 = vld [vmem:[%s1180_s1 + $0x10] sm:$0xff] }
   0xd   :  { %789 = vmatpush3.bf16.msra.mxu1 %v786_v16  ;;  %v838_v49 = vpack.c.bf16 %v52_v47, %v51_v46  ;;  %v30_v51 = vld [vmem:[%s1181_s0 + $0x8] sm:$0xff]  ;;  %v31_v53 = vld [vmem:[%s1181_s0 + $0x10] sm:$0xff]  ;;  %v56_v54 = vld [vmem:[%s1180_s1 + $0x18] sm:$0xff] }
   0xe   :  { %821 = vmatpush3.bf16.msra.mxu0 %v818_v17  ;;  %791 = vmatprep.subr.bf16.mxu1 %v790_v22  ;;  %v32_v55 = vld [vmem:[%s1181_s0 + $0x18] sm:$0xff]  ;;  %v57_v56 = vld [vmem:[%s1180_s1 + $0x20] sm:$0xff]  ;;  %v58_v58 = vld [vmem:[%s1180_s1 + $0x28] sm:$0xff] }
   0xf   :  { %823 = vmatprep.subr.bf16.mxu0 %v822_v23  ;;  %v33_v57 = vld [vmem:[%s1181_s0 + $0x20] sm:$0xff]  ;;  %v34_v59 = vld [vmem:[%s1181_s0 + $0x28] sm:$0xff]  ;;  %v59_v60 = vld [vmem:[%s1180_s1 + $0x30] sm:$0xff] }
  0x10   :  { %v35_v61 = vld [vmem:[%s1181_s0 + $0x30] sm:$0xff]  ;;  %v60_v62 = vld [vmem:[%s1180_s1 + $0x38] sm:$0xff]  ;;  %v598_v3 = vld [vmem:[%s1182_s3] ss:$0 sm:$0xff] }
  0x11   :  { %793 = vmatpush3.bf16.msra.mxu1 %v790_v22  ;;  %v36_v63 = vld [vmem:[%s1181_s0 + $0x38] sm:$0xff] }
  0x12   :  { %825 = vmatpush3.bf16.msra.mxu0 %v822_v23  ;;  %795 = vmatprep.subr.bf16.mxu1 %v794_v30 }
  0x13   :  { %827 = vmatprep.subr.bf16.mxu0 %v826_v31 }
  0x15   :  { %797 = vmatpush3.bf16.msra.mxu1 %v794_v30 }
  0x16   :  { %829 = vmatpush3.bf16.msra.mxu0 %v826_v31  ;;  %799 = vmatprep.subr.bf16.mxu1 %v798_v36 }
  0x17   :  { %831 = vmatprep.subr.bf16.mxu0 %v830_v37 }
  0x19   :  { %801 = vmatpush3.bf16.msra.mxu1 %v798_v36 }
  0x1a   :  { %833 = vmatpush3.bf16.msra.mxu0 %v830_v37  ;;  %803 = vmatprep.subr.bf16.mxu1 %v802_v42 }
  0x1b   :  { %835 = vmatprep.subr.bf16.mxu0 %v834_v43 }
  0x1d   :  { %805 = vmatpush3.bf16.msra.mxu1 %v802_v42 }
  0x1e   :  { %837 = vmatpush3.bf16.msra.mxu0 %v834_v43  ;;  %807 = vmatprep.subr.bf16.mxu1 %v806_v48 }
  0x1f   :  { %839 = vmatprep.subr.bf16.mxu0 %v838_v49 }
  0x21   :  { %809 = vmatpush3.bf16.msra.mxu1 %v806_v48 }
  0x22   :  { %841 = vmatpush3.bf16.msra.mxu0 %v838_v49 }
  0x24   :  { %703 = vmatmul.mubr.f32.vlgmr.msra.gmra.mrb[0].mxu1 %v54_v50 }
  0x25   :  { %747 = vmatmul.mubr.f32.vlgmr.msra.gmra.mrb[0].mxu0 %v30_v51  ;;  %705 = vmatprep.mubr.f32.mxu1 %v55_v52 }
  0x26   :  { %749 = vmatprep.mubr.f32.mxu0 %v31_v53 }
  0x28   :  { %706 = vmatmul.mubr.f32.gmra.mrb[2].mxu1 %v56_v54 }
  0x29   :  { %750 = vmatmul.mubr.f32.gmra.mrb[2].mxu0 %v32_v55  ;;  %708 = vmatprep.mubr.f32.mxu1 %v57_v56 }
  0x2a   :  { %752 = vmatprep.mubr.f32.mxu0 %v33_v57 }
  0x2c   :  { %709 = vmatmul.mubr.f32.gmra.mrb[4].mxu1 %v58_v58 }
  0x2d   :  { %753 = vmatmul.mubr.f32.gmra.mrb[4].mxu0 %v34_v59  ;;  %711 = vmatprep.mubr.f32.mxu1 %v59_v60 }
  0x2e   :  { %755 = vmatprep.mubr.f32.mxu0 %v35_v61 }
  0x30   :  { %712 = vmatmul.mubr.f32.gmra.mrb[6].mxu1 %v60_v62 }
  0x31   :  { %756 = vmatmul.mubr.f32.gmra.mrb[6].mxu0 %v36_v63 }
  0xf7   :  { %v704_v0 = vpop.f32.mrb[0].mxu1 }
  0xf8   :  { %v748_v1 = vpop.f32.mrb[0].mxu0  ;;  %v143_v2 = vpop.f32.mrb[1].mxu1 }
  0xf9   :  { %v254_v4 = vadd.f32 %v748_v1, %v704_v0  ;;  %v248_v5 = vpop.f32.mrb[1].mxu0 }
  0xfa   :  { %v249_v6 = vadd.f32 %v248_v5, %v143_v2 }
  0xfb   :  { %v707_v7 = vpop.f32.mrb[2].mxu1  ;;  %v295_v8 = vadd.f32 %v598_v3, %v254_v4 }
  0xfc   :  { %v751_v9 = vpop.f32.mrb[2].mxu0  ;;  %v153_v10 = vpop.f32.mrb[3].mxu1  ;;  %v294_v11 = vadd.f32 %v598_v3, %v249_v6 }
  0xfd   :  { %v264_v12 = vadd.f32 %v751_v9, %v707_v7  ;;  %v258_v13 = vpop.f32.mrb[3].mxu0  ;;  %v306_v14 = vsel %vm302_vm0, %v295_v8, 0.0 }
  0xfe   :  { %v259_v15 = vadd.f32 %v258_v13, %v153_v10  ;;  %307 = vadd.xlane.f32.xlu1 %v306_v14  ;;  %v303_v16 = vsel %vm302_vm0, %v294_v11, 0.0 }
  0xff   :  { %304 = vadd.xlane.f32.xlu0 %v303_v16  ;;  %v710_v17 = vpop.f32.mrb[4].mxu1  ;;  %v297_v38 = vadd.f32 %v598_v3, %v264_v12 }
 0x100   :  { %v754_v18 = vpop.f32.mrb[4].mxu0  ;;  %v163_v19 = vpop.f32.mrb[5].mxu1  ;;  %v296_v33 = vadd.f32 %v598_v3, %v259_v15 }
 0x101   :  { %v274_v20 = vadd.f32 %v754_v18, %v710_v17  ;;  %v268_v21 = vpop.f32.mrb[5].mxu0  ;;  %v312_v40 = vsel %vm302_vm0, %v297_v38, 0.0  ;;  %v446_v17 = vld [vmem:[%s1183_s6] sm:$0xff]  ;;  %v447_v18 = vld [vmem:[%s1183_s6 + $0x8] sm:$0xff] }
 0x102   :  { %v269_v22 = vadd.f32 %v268_v21, %v163_v19  ;;  %v309_v36 = vsel %vm302_vm0, %v296_v33, 0.0  ;;  %v842_v19 = vpack.c.bf16 %v447_v18, %v446_v17  ;;  %v449_v21 = vld [vmem:[%s1183_s6 + $0x18] sm:$0xff] }
 0x103   :  { %v713_v23 = vpop.f32.mrb[6].mxu1  ;;  %v299_v24 = vadd.f32 %v598_v3, %v274_v20  ;;  %v448_v20 = vld [vmem:[%s1183_s6 + $0x10] sm:$0xff] }
 0x104   :  { %v757_v25 = vpop.f32.mrb[6].mxu0  ;;  %v173_v26 = vpop.f32.mrb[7].mxu1  ;;  %v298_v27 = vadd.f32 %v598_v3, %v269_v22  ;;  %843 = vmatprep.subr.bf16.mxu0 %v842_v19  ;;  %850 = vmatprep.subr.bf16.mxu1 %v842_v19  ;;  %v846_v22 = vpack.c.bf16 %v449_v21, %v448_v20 }
 0x105   :  { %v284_v28 = vadd.f32 %v757_v25, %v713_v23  ;;  %v278_v29 = vpop.f32.mrb[7].mxu0  ;;  %v318_v30 = vsel %vm302_vm0, %v299_v24, 0.0  ;;  %845 = vmatpush3.bf16.msra.mxu0 %v842_v19  ;;  %852 = vmatpush3.bf16.msra.mxu1 %v842_v19 }
 0x106   :  { %v279_v31 = vadd.f32 %v278_v29, %v173_v26  ;;  %319 = vadd.xlane.f32.xlu1 %v318_v30  ;;  %v315_v32 = vsel %vm302_vm0, %v298_v27, 0.0  ;;  %847 = vmatprep.subr.bf16.mxu0 %v846_v22 }
 0x107   :  { %316 = vadd.xlane.f32.xlu0 %v315_v32  ;;  %v301_v37 = vadd.f32 %v598_v3, %v284_v28  ;;  %851 = vmatprep.subr.bf16.mxu1 %v846_v22 }
 0x108   :  { %v300_v34 = vadd.f32 %v598_v3, %v279_v31 }
 0x109   :  { %v324_v39 = vsel %vm302_vm0, %v301_v37, 0.0  ;;  %849 = vmatpush3.bf16.msra.mxu0 %v846_v22  ;;  %853 = vmatpush3.bf16.msra.mxu1 %v846_v22 }
 0x10a   :  { %v321_v35 = vsel %vm302_vm0, %v300_v34, 0.0 }
 0x10b   :  { %322 = vadd.xlane.f32.xlu1 %v321_v35  ;;  %310 = vadd.xlane.f32.xlu0 %v309_v36 }
 0x10f   :  { %325 = vadd.xlane.f32.xlu1 %v324_v39  ;;  %313 = vadd.xlane.f32.xlu0 %v312_v40 }
 0x18b   :  { %v308_v41 = vpop.xlane.xlu1 %307 }
 0x18c   :  { %v329_v42 = vmul.f32 0.03125, %v308_v41  ;;  %v305_v43 = vpop.xlane.xlu0 %304 }
 0x18d   :  { %v328_v44 = vmul.f32 0.03125, %v305_v43 }
 0x18e   :  { %v1078_v45 = vsub.f32 %v295_v8, %v329_v42 }
 0x18f   :  { %v1080_v46 = vsub.f32 %v294_v11, %v328_v44 }
 0x190   :  { %v345_v47 = vmul.f32 %v1078_v45, %v1078_v45 }
 0x191   :  { %v344_v49 = vmul.f32 %v1080_v46, %v1080_v46 }
 0x192   :  { %v355_v48 = vsel %vm302_vm0, %v345_v47, 0.0 }
 0x193   :  { %v320_v50 = vpop.xlane.xlu1 %319  ;;  %356 = vadd.xlane.f32.xlu0 %v355_v48  ;;  %v352_v55 = vsel %vm302_vm0, %v344_v49, 0.0 }
 0x194   :  { %v333_v51 = vmul.f32 0.03125, %v320_v50  ;;  %v317_v52 = vpop.xlane.xlu0 %316  ;;  %v600_v50 = vld [vmem:[%s1185_s5] ss:$0 sm:$0xff] }
 0x195   :  { %v332_v53 = vmul.f32 0.03125, %v317_v52 }
 0x196   :  { %v1087_v54 = vsub.f32 %v299_v24, %v333_v51 }
 0x197   :  { %v1090_v56 = vsub.f32 %v298_v27, %v332_v53  ;;  %353 = vadd.xlane.f32.xlu0 %v352_v55 }
 0x198   :  { %v323_v57 = vpop.xlane.xlu1 %322  ;;  %v311_v58 = vpop.xlane.xlu0 %310  ;;  %v349_v59 = vmul.f32 %v1087_v54, %v1087_v54 }
 0x199   :  { %v334_v60 = vmul.f32 0.03125, %v323_v57  ;;  %v330_v61 = vmul.f32 0.03125, %v311_v58  ;;  %v348_v63 = vmul.f32 %v1090_v56, %v1090_v56 }
 0x19a   :  { %v367_v62 = vsel %vm302_vm0, %v349_v59, 0.0 }
 0x19b   :  { %v1097_v0 = vsub.f32 %v300_v34, %v334_v60  ;;  %v1099_v1 = vsub.f32 %v296_v33, %v330_v61  ;;  %368 = vadd.xlane.f32.xlu1 %v367_v62  ;;  %v364_v7 = vsel %vm302_vm0, %v348_v63, 0.0 }
 0x19c   :  { %v326_v2 = vpop.xlane.xlu1 %325  ;;  %v314_v3 = vpop.xlane.xlu0 %313 }
 0x19d   :  { %v335_v4 = vmul.f32 0.03125, %v326_v2  ;;  %v331_v5 = vmul.f32 0.03125, %v314_v3  ;;  %v346_v6 = vmul.f32 %v1099_v1, %v1099_v1  ;;  %v350_v8 = vmul.f32 %v1097_v0, %v1097_v0 }
 0x19f   :  { %v1106_v9 = vsub.f32 %v301_v37, %v335_v4  ;;  %v1108_v10 = vsub.f32 %v297_v38, %v331_v5  ;;  %365 = vadd.xlane.f32.xlu1 %v364_v7  ;;  %v358_v11 = vsel %vm302_vm0, %v346_v6, 0.0  ;;  %v370_v13 = vsel %vm302_vm0, %v350_v8, 0.0  ;;  %v599_v38 = vld [vmem:[%s1184_s4] ss:$0 sm:$0xff] }
 0x1a0   :  { %359 = vadd.xlane.f32.xlu0 %v358_v11 }
 0x1a1   :  { %v347_v12 = vmul.f32 %v1108_v10, %v1108_v10  ;;  %v351_v14 = vmul.f32 %v1106_v9, %v1106_v9 }
 0x1a3   :  { %371 = vadd.xlane.f32.xlu1 %v370_v13  ;;  %v361_v15 = vsel %vm302_vm0, %v347_v12, 0.0  ;;  %v373_v16 = vsel %vm302_vm0, %v351_v14, 0.0 }
 0x1a4   :  { %362 = vadd.xlane.f32.xlu0 %v361_v15 }
 0x1a7   :  { %374 = vadd.xlane.f32.xlu1 %v373_v16 }
 0x220   :  { %v357_v23 = vpop.xlane.xlu0 %356 }
 0x221   :  { %v377_v24 = vmul.f32 0.03125, %v357_v23 }
 0x223   :  { %v385_v25 = vadd.f32 1e-05, %v377_v24 }
 0x224   :  { %v354_v26 = vpop.xlane.xlu0 %353 }
 0x225   :  { %862 = vrsqrt.f32 %v385_v25  ;;  %v376_v27 = vmul.f32 0.03125, %v354_v26 }
 0x227   :  { %v384_v28 = vadd.f32 1e-05, %v376_v27 }
 0x228   :  { %v369_v29 = vpop.xlane.xlu1 %368 }
 0x229   :  { %864 = vrsqrt.f32 %v384_v28  ;;  %v381_v30 = vmul.f32 0.03125, %v369_v29 }
 0x22b   :  { %v389_v31 = vadd.f32 1e-05, %v381_v30 }
 0x22c   :  { %v366_v32 = vpop.xlane.xlu1 %365 }
 0x22d   :  { %866 = vrsqrt.f32 %v389_v31  ;;  %v380_v33 = vmul.f32 0.03125, %v366_v32  ;;  %v360_v34 = vpop.xlane.xlu0 %359 }
 0x22e   :  { %v378_v35 = vmul.f32 0.03125, %v360_v34 }
 0x22f   :  { %v863_v36 = vpop.eup %862  ;;  %v388_v37 = vadd.f32 1e-05, %v380_v33 }
 0x230   :  { %v401_v39 = vmul.f32 %v863_v36, %v1078_v45  ;;  %v386_v40 = vadd.f32 1e-05, %v378_v35  ;;  %v372_v41 = vpop.xlane.xlu1 %371 }
 0x231   :  { %868 = vrsqrt.f32 %v388_v37  ;;  %v382_v42 = vmul.f32 0.03125, %v372_v41  ;;  %v363_v43 = vpop.xlane.xlu0 %362 }
 0x232   :  { %870 = vrsqrt.f32 %v386_v40  ;;  %v379_v44 = vmul.f32 0.03125, %v363_v43  ;;  %v416_v48 = vmul.f32 %v599_v38, %v401_v39 }
 0x233   :  { %v865_v47 = vpop.eup %864  ;;  %v390_v49 = vadd.f32 1e-05, %v382_v42 }
 0x234   :  { %v387_v51 = vadd.f32 1e-05, %v379_v44  ;;  %v375_v52 = vpop.xlane.xlu1 %374  ;;  %v400_v53 = vmul.f32 %v865_v47, %v1080_v46  ;;  %v431_v58 = vadd.f32 %v600_v50, %v416_v48 }
 0x235   :  { %872 = vrsqrt.f32 %v390_v49  ;;  %v383_v45 = vmul.f32 0.03125, %v375_v52 }
 0x236   :  { %874 = vrsqrt.f32 %v387_v51  ;;  %v415_v55 = vmul.f32 %v599_v38, %v400_v53  ;;  %v439_v2 = vmax.f32 %v431_v58, 0.0 }
 0x237   :  { %v867_v57 = vpop.eup %866  ;;  %v391_v59 = vadd.f32 1e-05, %v383_v45 }
 0x238   :  { %v405_v60 = vmul.f32 %v867_v57, %v1087_v54  ;;  %v430_v61 = vadd.f32 %v600_v50, %v415_v55 }
 0x239   :  { %876 = vrsqrt.f32 %v391_v59 }
 0x23a   :  { %v438_v62 = vmax.f32 %v430_v61, 0.0  ;;  %v420_v3 = vmul.f32 %v599_v38, %v405_v60 }
 0x23b   :  { %v869_v63 = vpop.eup %868 }
 0x23c   :  { %v871_v4 = vpop.eup %870  ;;  %766 = vmatprep.mubr.msk.f32.mxu0 %vm302_vm0, %v438_v62  ;;  %v404_v46 = vmul.f32 %v869_v63, %v1090_v56  ;;  %v435_v8 = vadd.f32 %v600_v50, %v420_v3 }
 0x23d   :  { %767 = vmatmul.mubr.msk.f32.vlgmr.msra.gmra.mrb[8].mxu0 %vm302_vm0, %v439_v2  ;;  %v402_v5 = vmul.f32 %v871_v4, %v1099_v1 }
 0x23e   :  { %v419_v6 = vmul.f32 %v599_v38, %v404_v46  ;;  %v443_v19 = vmax.f32 %v435_v8, 0.0 }
 0x23f   :  { %v873_v7 = vpop.eup %872  ;;  %v417_v11 = vmul.f32 %v599_v38, %v402_v5 }
 0x240   :  { %v875_v54 = vpop.eup %874  ;;  %v434_v12 = vadd.f32 %v600_v50, %v419_v6  ;;  %v406_v13 = vmul.f32 %v873_v7, %v1097_v0 }
 0x241   :  { %v403_v14 = vmul.f32 %v875_v54, %v1108_v10  ;;  %v432_v15 = vadd.f32 %v600_v50, %v417_v11 }
 0x242   :  { %v442_v16 = vmax.f32 %v434_v12, 0.0  ;;  %v421_v17 = vmul.f32 %v599_v38, %v406_v13 }
 0x243   :  { %v877_v18 = vpop.eup %876  ;;  %v440_v56 = vmax.f32 %v432_v15, 0.0  ;;  %v418_v20 = vmul.f32 %v599_v38, %v403_v14 }
 0x244   :  { %v407_v21 = vmul.f32 %v877_v18, %v1106_v9  ;;  %772 = vmatprep.mubr.msk.f32.mxu1 %vm302_vm0, %v442_v16  ;;  %v436_v1 = vadd.f32 %v600_v50, %v421_v17  ;;  %v601_v9 = vld [vmem:[%s1186_s7] ss:$0 sm:$0xff] }
 0x245   :  { %769 = vmatprep.mubr.msk.f32.mxu0 %vm302_vm0, %v440_v56  ;;  %773 = vmatmul.mubr.msk.f32.vlgmr.msra.gmra.mrb[8].mxu1 %vm302_vm0, %v443_v19  ;;  %v433_v22 = vadd.f32 %v600_v50, %v418_v20 }
 0x246   :  { %v444_v0 = vmax.f32 %v436_v1, 0.0  ;;  %v422_v23 = vmul.f32 %v599_v38, %v407_v21 }
 0x247   :  { %v441_v10 = vmax.f32 %v433_v22, 0.0 }
 0x248   :  { %775 = vmatprep.mubr.msk.f32.mxu1 %vm302_vm0, %v444_v0  ;;  %v437_v24 = vadd.f32 %v600_v50, %v422_v23 }
 0x249   :  { %770 = vmatmul.mubr.msk.f32.gmra.mrb[10].mxu0 %vm302_vm0, %v441_v10 }
 0x24a   :  { %v445_v25 = vmax.f32 %v437_v24, 0.0 }
 0x24c   :  { %776 = vmatmul.mubr.msk.f32.gmra.mrb[10].mxu1 %vm302_vm0, %v445_v25 }
 0x310   :  { %v768_v26 = vpop.f32.mrb[8].mxu0 }
 0x311   :  { %v553_v27 = vadd.f32 %v768_v26, %v601_v9  ;;  %v547_v28 = vpop.f32.mrb[9].mxu0 }
 0x312   :  { %v548_v29 = vadd.f32 %v601_v9, %v547_v28 }
 0x313   :  { %587 = vst [vmem:[%s1187_s8 + $0x8] sm:$0xff] %v553_v27 }
 0x314   :  { %586 = vst [vmem:[%s1187_s8] sm:$0xff] %v548_v29 }
 0x318   :  { %v774_v30 = vpop.f32.mrb[8].mxu1 }
 0x319   :  { %v573_v31 = vadd.f32 %v774_v30, %v601_v9  ;;  %v567_v32 = vpop.f32.mrb[9].mxu1 }
 0x31a   :  { %v568_v33 = vadd.f32 %v601_v9, %v567_v32 }
 0x31b   :  { %591 = vst [vmem:[%s1187_s8 + $0x28] sm:$0xff] %v573_v31 }
 0x31c   :  { %590 = vst [vmem:[%s1187_s8 + $0x20] sm:$0xff] %v568_v33  ;;  %v771_v34 = vpop.f32.mrb[10].mxu0 }
 0x31d   :  { %v563_v35 = vadd.f32 %v771_v34, %v601_v9  ;;  %v557_v36 = vpop.f32.mrb[11].mxu0 }
 0x31e   :  { %v558_v37 = vadd.f32 %v601_v9, %v557_v36 }
 0x31f   :  { %589 = vst [vmem:[%s1187_s8 + $0x18] sm:$0xff] %v563_v35  ;;  %v777_v38 = vpop.f32.mrb[10].mxu1 }
 0x320   :  { %588 = vst [vmem:[%s1187_s8 + $0x10] sm:$0xff] %v558_v37  ;;  %v583_v39 = vadd.f32 %v777_v38, %v601_v9  ;;  %v577_v40 = vpop.f32.mrb[11].mxu1 }
 0x321   :  { %v578_v41 = vadd.f32 %v601_v9, %v577_v40 }
 0x322   :  { %593 = vst [vmem:[%s1187_s8 + $0x38] sm:$0xff] %v583_v39 }
 0x323   :  { %592 = vst [vmem:[%s1187_s8 + $0x30] sm:$0xff] %v578_v41 }

// kernel: net4_forward.3
= control target key start
LH: loop header
LB: loop body
LE: loop exit
PB: predicated region body
PF: predicated region fallthrough
CT: control target
= control target key end

     0   :  { %16 = vsyncpa [#allocation5], 0  ;;  %s9644_s0 = inlined_call_operand.vmem [shape: f32[8,8,4], index: 0, kind: input, shape index: {}]   ;;  %s9645_s1 = inlined_call_operand.hbm [shape: f32[4,16], index: 1, kind: input, shape index: {}]   ;;  %s9646_s2 = inlined_call_operand.hbm [shape: f32[1,16], index: 2, kind: input, shape index: {}]   ;;  %s9647_s3 = inlined_call_operand.vmem [shape: f32[1,16], index: 3, kind: input, shape index: {}]   ;;  %s9648_s4 = inlined_call_operand.vmem [shape: f32[1,16], index: 4, kind: input, shape index: {}]   ;;  %s9649_s5 = inlined_call_operand.vmem [shape: bf16[16,1024], index: 5, kind: input, shape index: {}]   ;;  %s9650_s6 = inlined_call_operand.hbm [shape: f32[1,1024], index: 6, kind: input, shape index: {}]   ;;  %s9651_s7 = inlined_call_operand.vmem [shape: bf16[128,512], index: 7, kind: input, shape index: {}]   ;;  %s9652_s8 = inlined_call_operand.vmem [shape: bf16[128,512], index: 8, kind: input, shape index: {}]   ;;  %s9653_s9 = inlined_call_operand.vmem [shape: f32[8,8,128], index: 9, kind: output, shape index: {0}]   ;;  %s9654_s10 = inlined_call_operand.vmem [shape: f32[8,8,128], index: 10, kind: output, shape index: {1}]  }
   0x1   :  { %17 = vsyncpa [#allocation7], 0  ;;  %s7157_s13 = smov [#allocation6]   ;;  %s7158_s15 = smov [#allocation4]  }
   0x2   :  { %s36_s14 = sshll.u32 %s7157_s13, 4  ;;  %s26_s16 = sshll.u32 %s7158_s15, 4  ;;  %s37_s14 = int_to_ptr.vmem [resolvable:$true] %s36_s14  ;;  %s27_s16 = int_to_ptr.vmem [resolvable:$true] %s26_s16 }
   0x3   :  { %s7087_s19 = scalar_lea.hbm %s9646_s2, 16 }
   0x4   :  { %p7088_p0 = scmp.ne.s32.totalorder %s9646_s2, %s7087_s19  ;;  %p7091_p1 = scmp.lt.u32.totalorder %s7087_s19, %s9646_s2 }
   0x6   :  { %p7093_p2 = pnand %p7091_p1, %p7088_p0 }
   0x8   :  { %7096 = shalt.err (!%p7093_p2)
}
   0x9   :  { %s7097_s24 = scalar_lea.vmem %s37_s14, 16  ;;  %s7101_s25 = scalar_lea.vmem %s37_s14, 32 }
   0xa   :  { %p7098_p3 = scmp.ne.s32.totalorder %s37_s14, %s7097_s24  ;;  %p7102_p4 = scmp.lt.s32.totalorder %s37_s14, %s37_s14 }
   0xb   :  { %p7103_p5 = scmp.lt.s32.totalorder %s7101_s25, %s7097_s24 }
   0xd   :  { %p7104_p6 = por %p7103_p5, %p7102_p4 }
   0xf   :  { %p7105_p7 = pnand %p7104_p6, %p7098_p3 }
  0x11   :  { %7108 = shalt.err (!%p7105_p7)
}
  0x12   :  { %39 = dma.hbm_to_vmem [thread:$0]  %s9646_s2, 16, %s37_s14, [#allocation7]  }
  0x13   :  { %s7109_s30 = scalar_lea.hbm %s9645_s1, 64 }
  0x14   :  { %p7110_p8 = scmp.ne.s32.totalorder %s9645_s1, %s7109_s30  ;;  %p7113_p9 = scmp.lt.u32.totalorder %s7109_s30, %s9645_s1 }
  0x16   :  { %p7115_p10 = pnand %p7113_p9, %p7110_p8 }
  0x18   :  { %7118 = shalt.err (!%p7115_p10)
}
  0x19   :  { %s7119_s17 = scalar_lea.vmem %s27_s16, 64  ;;  %p7124_p12 = scmp.lt.s32.totalorder %s27_s16, %s27_s16 }
  0x1a   :  { %p7120_p11 = scmp.ne.s32.totalorder %s27_s16, %s7119_s17  ;;  %p7125_p13 = scmp.lt.s32.totalorder %s7119_s17, %s7119_s17 }
  0x1c   :  { %p7126_p0 = por %p7125_p13, %p7124_p12 }
  0x1e   :  { %p7127_p1 = pnand %p7126_p0, %p7120_p11 }
  0x20   :  { %7130 = shalt.err (!%p7127_p1)
}
  0x21   :  { %29 = dma.hbm_to_vmem [thread:$0]  %s9645_s1, 64, %s27_s16, [#allocation5]  }
  0x22   :  { %s7159_s18 = smov [#allocation8]   ;;  %s7131_s22 = scalar_lea.hbm %s9650_s6, 128 }
  0x23   :  { %s52_s19 = sshll.u32 %s7159_s18, 4  ;;  %p7132_p2 = scmp.ne.s32.totalorder %s9650_s6, %s7131_s22  ;;  %s53_s19 = int_to_ptr.vmem [resolvable:$true] %s52_s19 }
  0x24   :  { %p7135_p3 = scmp.lt.u32.totalorder %s7131_s22, %s9650_s6 }
  0x26   :  { %p7137_p4 = pnand %p7135_p3, %p7132_p2 }
  0x28   :  { %7140 = shalt.err (!%p7137_p4)
}
  0x29   :  { %s7141_s27 = scalar_lea.vmem %s53_s19, 128  ;;  %p7146_p6 = scmp.lt.s32.totalorder %s53_s19, %s53_s19 }
  0x2a   :  { %p7142_p5 = scmp.ne.s32.totalorder %s53_s19, %s7141_s27  ;;  %p7147_p7 = scmp.lt.s32.totalorder %s7141_s27, %s7141_s27 }
  0x2c   :  { %p7148_p8 = por %p7147_p7, %p7146_p6 }
  0x2e   :  { %p7149_p9 = pnand %p7148_p8, %p7142_p5 }
  0x30   :  { %7152 = shalt.err (!%p7149_p9)
}
  0x31   :  { %55 = dma.hbm_to_vmem [thread:$0]  %s9650_s6, 128, %s53_s19, [#allocation7]  }
  0x32   :  { %7153 = dma.done.wait [#allocation5], 64  }
  0x33   :  { %7154 = vsyncadd [#allocation5], 4294967232 }
  0x34   :  { %7155 = dma.done.wait [#allocation7], 144  }
  0x35   :  { %7156 = vsyncadd [#allocation7], 4294967152  ;;  %vm111_vm0 = vcmask 1043456   ;;  %vm86_vm1 = vcmask 31744   ;;  %v78_v0 = vld [vmem:[#allocation4] sm:$0xf] }
  0x36   :  { %v70_v1 = vld [vmem:[%s9644_s0] sm:$0xff]  ;;  %v71_v2 = vld [vmem:[%s9644_s0 + $0x8] sm:$0xff]  ;;  %6411 = vmatprep.subr.msk.mxu0 %vm111_vm0, %v78_v0  ;;  %v72_v3 = vld [vmem:[%s9644_s0 + $0x10] sm:$0xff]  ;;  %6425 = vmatprep.subr.msk.mxu1 %vm111_vm0, %v78_v0  ;;  %vm220_vm2 = vcmask 130048  }
  0x37   :  { %6413 = vmatprep.mubr.msk.f32.mxu0 %vm86_vm1, %v70_v1  ;;  %v74_v4 = vld [vmem:[%s9644_s0 + $0x20] sm:$0xff]  ;;  %6412 = vmatpush3.msk.msra.mxu0 %vm111_vm0, %v78_v0  ;;  %v73_v5 = vld [vmem:[%s9644_s0 + $0x18] sm:$0xff]  ;;  %v75_v6 = vld [vmem:[%s9644_s0 + $0x28] sm:$0xff] }
  0x38   :  { %v76_v7 = vld [vmem:[%s9644_s0 + $0x30] sm:$0xff]  ;;  %6414 = vmatmul.mubr.msk.f32.vlgmr.msra.gmra.mrb[0].mxu0 %vm86_vm1, %v71_v2  ;;  %6426 = vmatpush3.msk.msra.mxu1 %vm111_vm0, %v78_v0  ;;  %v77_v8 = vld [vmem:[%s9644_s0 + $0x38] sm:$0xff]  ;;  %v5792_v9 = vld [vmem:[#allocation6] ss:$0 sm:$0xff] }
  0x39   :  { %6416 = vmatprep.mubr.msk.f32.mxu0 %vm86_vm1, %v72_v3  ;;  %6419 = vmatprep.mubr.msk.f32.mxu1 %vm86_vm1, %v74_v4 }
  0x3a   :  { %6420 = vmatmul.mubr.msk.f32.vlgmr.msra.gmra.mrb[0].mxu1 %vm86_vm1, %v75_v6 }
  0x3b   :  { %6422 = vmatprep.mubr.msk.f32.mxu1 %vm86_vm1, %v76_v7 }
  0x3c   :  { %6417 = vmatmul.mubr.msk.f32.gmra.mrb[2].mxu0 %vm86_vm1, %v73_v5 }
  0x3e   :  { %6423 = vmatmul.mubr.msk.f32.gmra.mrb[2].mxu1 %vm86_vm1, %v77_v8 }
 0x10b   :  { %v6415_v10 = vpop.f32.mrb[0].mxu0 }
 0x10c   :  { %v181_v11 = vpop.f32.mrb[1].mxu0  ;;  %v187_v15 = vadd.f32 %v6415_v10, %v5792_v9  ;;  %v368_v10 = vld [vmem:[%s9649_s5] sm:$0xff] }
 0x10d   :  { %v182_v12 = vadd.f32 %v5792_v9, %v181_v11  ;;  %v6421_v13 = vpop.f32.mrb[0].mxu1  ;;  %v370_v11 = vld [vmem:[%s9649_s5 + $0x20] sm:$0xff] }
 0x10e   :  { %v201_v14 = vpop.f32.mrb[1].mxu1  ;;  %v224_v25 = vsel %vm220_vm2, %v187_v15, 0.0  ;;  %v207_v26 = vadd.f32 %v6421_v13, %v5792_v9  ;;  %v5805_v13 = vcombine.high %v368_v10, %v370_v11 }
 0x10f   :  { %v6418_v16 = vpop.f32.mrb[2].mxu0  ;;  %v221_v17 = vsel %vm220_vm2, %v182_v12, 0.0  ;;  %v202_v21 = vadd.f32 %v5792_v9, %v201_v14  ;;  %v371_v14 = vld [vmem:[%s9649_s5 + $0x28] sm:$0xff] }
 0x110   :  { %v191_v18 = vpop.f32.mrb[3].mxu0  ;;  %222 = vadd.xlane.f32.xlu0 %v221_v17  ;;  %v197_v19 = vadd.f32 %v6418_v16, %v5792_v9  ;;  %v236_v31 = vsel %vm220_vm2, %v207_v26, 0.0  ;;  %426 = vmatprep.subr.bf16.mxu1 %v5805_v13 }
 0x111   :  { %v192_v20 = vadd.f32 %v5792_v9, %v191_v18  ;;  %v6424_v22 = vpop.f32.mrb[2].mxu1  ;;  %v233_v29 = vsel %vm220_vm2, %v202_v21, 0.0  ;;  %v9655_v18 = vmov 0  }
 0x112   :  { %v211_v23 = vpop.f32.mrb[3].mxu1  ;;  %v230_v28 = vsel %vm220_vm2, %v197_v19, 0.0  ;;  %v217_v30 = vadd.f32 %v6424_v22, %v5792_v9  ;;  %458 = vmatprep.mubr.bf16.mxu1 %v9655_v18  ;;  %531 = vmatprep.mubr.bf16.mxu0 %v9655_v18 }
 0x113   :  { %v227_v24 = vsel %vm220_vm2, %v192_v20, 0.0  ;;  %v212_v27 = vadd.f32 %v5792_v9, %v211_v23  ;;  %v7363_v23 = vld [vmem:[%s9649_s5 + $0x18] sm:$0xff] }
 0x114   :  { %228 = vadd.xlane.f32.xlu1 %v227_v24  ;;  %225 = vadd.xlane.f32.xlu0 %v224_v25  ;;  %v242_v33 = vsel %vm220_vm2, %v217_v30, 0.0  ;;  %v7368_v24 = vld [vmem:[%s9649_s5 + $0x38] sm:$0xff] }
 0x115   :  { %v239_v32 = vsel %vm220_vm2, %v212_v27, 0.0  ;;  %v5818_v25 = vcombine.low %v7363_v23, %v7368_v24 }
 0x118   :  { %231 = vadd.xlane.f32.xlu1 %v230_v28  ;;  %234 = vadd.xlane.f32.xlu0 %v233_v29 }
 0x11c   :  { %237 = vadd.xlane.f32.xlu1 %v236_v31  ;;  %240 = vadd.xlane.f32.xlu0 %v239_v32 }
 0x120   :  { %243 = vadd.xlane.f32.xlu1 %v242_v33 }
 0x19d   :  { %v223_v34 = vpop.xlane.xlu0 %222 }
 0x19e   :  { %v246_v35 = vmul.f32 0.0625, %v223_v34 }
 0x1a0   :  { %v7292_v36 = vsub.f32 %v182_v12, %v246_v35  ;;  %v369_v12 = vld [vmem:[%s9649_s5 + $0x8] sm:$0xff] }
 0x1a1   :  { %v229_v37 = vpop.xlane.xlu1 %228  ;;  %v226_v38 = vpop.xlane.xlu0 %225  ;;  %v5806_v16 = vcombine.low %v369_v12, %v371_v14  ;;  %v5807_v17 = vcombine.high %v369_v12, %v371_v14 }
 0x1a2   :  { %v248_v39 = vmul.f32 0.0625, %v229_v37  ;;  %v247_v40 = vmul.f32 0.0625, %v226_v38  ;;  %v262_v41 = vmul.f32 %v7292_v36, %v7292_v36 }
 0x1a3   :  { %499 = vmatprep.subr.bf16.mxu0 %v5807_v17 }
 0x1a4   :  { %v7296_v42 = vsub.f32 %v192_v20, %v248_v39  ;;  %v7298_v43 = vsub.f32 %v187_v15, %v247_v40  ;;  %v270_v44 = vsel %vm220_vm2, %v262_v41, 0.0  ;;  %v5804_v15 = vcombine.low %v368_v10, %v370_v11  ;;  %500 = vmatpush1.bf16.msra.mxu0 %v5806_v16  ;;  %v7354_v20 = vld [vmem:[%s9649_s5 + $0x30] sm:$0xff] }
 0x1a5   :  { %v232_v45 = vpop.xlane.xlu1 %231  ;;  %271 = vadd.xlane.f32.xlu0 %v270_v44  ;;  %v235_v46 = vpop.xlane.xlu0 %234 }
 0x1a6   :  { %v249_v47 = vmul.f32 0.0625, %v232_v45  ;;  %v250_v48 = vmul.f32 0.0625, %v235_v46  ;;  %v264_v49 = vmul.f32 %v7296_v42, %v7296_v42  ;;  %v263_v50 = vmul.f32 %v7298_v43, %v7298_v43  ;;  %427 = vmatpush1.bf16.msra.mxu1 %v5804_v15 }
 0x1a8   :  { %v7305_v51 = vsub.f32 %v197_v19, %v249_v47  ;;  %v7307_v52 = vsub.f32 %v202_v21, %v250_v48  ;;  %v276_v53 = vsel %vm220_vm2, %v264_v49, 0.0  ;;  %v273_v54 = vsel %vm220_vm2, %v263_v50, 0.0  ;;  %v7349_v19 = vld [vmem:[%s9649_s5 + $0x10] sm:$0xff]  ;;  %v5802_v49 = vld [vmem:[%s9647_s3] ss:$0 sm:$0xff] }
 0x1a9   :  { %v238_v55 = vpop.xlane.xlu1 %237  ;;  %277 = vadd.xlane.f32.xlu0 %v276_v53  ;;  %274 = vadd.xlane.f32.xlu1 %v273_v54  ;;  %v241_v56 = vpop.xlane.xlu0 %240  ;;  %v5816_v21 = vcombine.low %v7349_v19, %v7354_v20  ;;  %v5817_v22 = vcombine.high %v7349_v19, %v7354_v20 }
 0x1aa   :  { %v251_v57 = vmul.f32 0.0625, %v238_v55  ;;  %v252_v58 = vmul.f32 0.0625, %v241_v56  ;;  %v265_v59 = vmul.f32 %v7305_v51, %v7305_v51  ;;  %v266_v60 = vmul.f32 %v7307_v52, %v7307_v52 }
 0x1ab   :  { %650 = vmatprep.subr.bf16.mxu1 %v5817_v22 }
 0x1ac   :  { %v7315_v61 = vsub.f32 %v207_v26, %v251_v57  ;;  %v7317_v62 = vsub.f32 %v212_v27, %v252_v58  ;;  %v279_v63 = vsel %vm220_vm2, %v265_v59, 0.0  ;;  %v282_v0 = vsel %vm220_vm2, %v266_v60, 0.0  ;;  %v5803_v59 = vld [vmem:[%s9648_s4] ss:$0 sm:$0xff] }
 0x1ad   :  { %v244_v1 = vpop.xlane.xlu1 %243  ;;  %280 = vadd.xlane.f32.xlu1 %v279_v63  ;;  %283 = vadd.xlane.f32.xlu0 %v282_v0  ;;  %v5819_v26 = vcombine.high %v7363_v23, %v7368_v24 }
 0x1ae   :  { %v253_v2 = vmul.f32 0.0625, %v244_v1  ;;  %v267_v3 = vmul.f32 %v7315_v61, %v7315_v61  ;;  %v268_v4 = vmul.f32 %v7317_v62, %v7317_v62 }
 0x1af   :  { %723 = vmatprep.subr.bf16.mxu0 %v5819_v26 }
 0x1b0   :  { %v7325_v5 = vsub.f32 %v217_v30, %v253_v2  ;;  %v285_v6 = vsel %vm220_vm2, %v267_v3, 0.0  ;;  %v288_v7 = vsel %vm220_vm2, %v268_v4, 0.0 }
 0x1b1   :  { %286 = vadd.xlane.f32.xlu1 %v285_v6  ;;  %289 = vadd.xlane.f32.xlu0 %v288_v7 }
 0x1b2   :  { %v269_v8 = vmul.f32 %v7325_v5, %v7325_v5 }
 0x1b4   :  { %v291_v9 = vsel %vm220_vm2, %v269_v8, 0.0 }
 0x1b5   :  { %292 = vadd.xlane.f32.xlu1 %v291_v9 }
 0x232   :  { %v272_v27 = vpop.xlane.xlu0 %271 }
 0x233   :  { %v294_v28 = vmul.f32 0.0625, %v272_v27 }
 0x235   :  { %v302_v29 = vadd.f32 1e-05, %v294_v28 }
 0x236   :  { %v275_v30 = vpop.xlane.xlu1 %274  ;;  %v278_v31 = vpop.xlane.xlu0 %277 }
 0x237   :  { %6815 = vrsqrt.f32 %v302_v29  ;;  %v295_v32 = vmul.f32 0.0625, %v275_v30  ;;  %v296_v33 = vmul.f32 0.0625, %v278_v31 }
 0x239   :  { %v303_v34 = vadd.f32 1e-05, %v295_v32  ;;  %v304_v35 = vadd.f32 1e-05, %v296_v33 }
 0x23a   :  { %v281_v37 = vpop.xlane.xlu1 %280  ;;  %v284_v38 = vpop.xlane.xlu0 %283 }
 0x23b   :  { %6817 = vrsqrt.f32 %v303_v34  ;;  %v297_v39 = vmul.f32 0.0625, %v281_v37  ;;  %v298_v40 = vmul.f32 0.0625, %v284_v38  ;;  %v7429_v37 = vld [vmem:[%s9651_s7] ss:$16 sps:$4 sm:$0xff]   ;;  %v7434_v38 = vld [vmem:[%s9651_s7 + $0x8] ss:$16 sps:$4 sm:$0xff]  }
 0x23c   :  { %6819 = vrsqrt.f32 %v304_v35 }
 0x23d   :  { %v305_v41 = vadd.f32 1e-05, %v297_v39  ;;  %v306_v44 = vadd.f32 1e-05, %v298_v40  ;;  %v7439_v39 = vld [vmem:[%s9651_s7 + $0x24] ss:$16 sps:$4 sm:$0xff]  }
 0x23e   :  { %v287_v45 = vpop.xlane.xlu1 %286  ;;  %v290_v47 = vpop.xlane.xlu0 %289  ;;  %v7444_v40 = vld [vmem:[%s9651_s7 + $0x2c] ss:$16 sps:$4 sm:$0xff]  }
 0x23f   :  { %6821 = vrsqrt.f32 %v305_v41  ;;  %v299_v46 = vmul.f32 0.0625, %v287_v45  ;;  %v300_v55 = vmul.f32 0.0625, %v290_v47  ;;  %v7453_v41 = vld [vmem:[%s9651_s7 + $0x20] ss:$16 sps:$4 sm:$0xff]   ;;  %v7465_v45 = vld [vmem:[%s9651_s7 + $0x44] ss:$16 sps:$4 sm:$0xff]  }
 0x240   :  { %6823 = vrsqrt.f32 %v306_v44  ;;  %v7458_v44 = vld [vmem:[%s9651_s7 + $0x28] ss:$16 sps:$4 sm:$0xff]   ;;  %v7479_v47 = vld [vmem:[%s9651_s7 + $0x40] ss:$16 sps:$4 sm:$0xff]  }
 0x241   :  { %v6816_v48 = vpop.eup %6815  ;;  %v307_v50 = vadd.f32 1e-05, %v299_v46  ;;  %v308_v1 = vadd.f32 1e-05, %v300_v55  ;;  %v7470_v46 = vld [vmem:[%s9651_s7 + $0x4c] ss:$16 sps:$4 sm:$0xff]  }
 0x242   :  { %v318_v53 = vmul.f32 %v6816_v48, %v7292_v36  ;;  %v293_v54 = vpop.xlane.xlu1 %292  ;;  %v7484_v48 = vld [vmem:[%s9651_s7 + $0x48] ss:$16 sps:$4 sm:$0xff]   ;;  %v7517_v55 = vld [vmem:[%s9651_s7 + $0x84] ss:$16 sps:$4 sm:$0xff]  }
 0x243   :  { %6825 = vrsqrt.f32 %v307_v50  ;;  %v301_v56 = vmul.f32 0.0625, %v293_v54  ;;  %v7496_v50 = vld [vmem:[%s9651_s7 + $0x6c] ss:$16 sps:$4 sm:$0xff]   ;;  %v7510_v54 = vld [vmem:[%s9651_s7 + $0x68] ss:$16 sps:$4 sm:$0xff]  }
 0x244   :  { %v333_v57 = vmul.f32 %v5802_v49, %v318_v53  ;;  %v7505_v53 = vld [vmem:[%s9651_s7 + $0x60] ss:$16 sps:$4 sm:$0xff]  }
 0x245   :  { %v6818_v58 = vpop.eup %6817  ;;  %v309_v60 = vadd.f32 1e-05, %v301_v56  ;;  %v7522_v56 = vld [vmem:[%s9651_s7 + $0x8c] ss:$16 sps:$4 sm:$0xff]  }
 0x246   :  { %v6820_v63 = vpop.eup %6819  ;;  %v319_v0 = vmul.f32 %v6818_v58, %v7298_v43  ;;  %v348_v2 = vadd.f32 %v5803_v59, %v333_v57  ;;  %v7531_v57 = vld [vmem:[%s9651_s7 + $0x80] ss:$16 sps:$4 sm:$0xff]   ;;  %v7536_v58 = vld [vmem:[%s9651_s7 + $0x88] ss:$16 sps:$4 sm:$0xff]  }
 0x247   :  { %v320_v36 = vmul.f32 %v6820_v63, %v7296_v42  ;;  %6827 = vrsqrt.f32 %v309_v60  ;;  %v7388_v42 = vld [vmem:[%s9651_s7 + $0x4] ss:$16 sps:$4 sm:$0xff]   ;;  %v7548_v60 = vld [vmem:[%s9651_s7 + $0xac] ss:$16 sps:$4 sm:$0xff]   ;;  %v7557_v63 = vld [vmem:[%s9651_s7 + $0xa0] ss:$16 sps:$4 sm:$0xff]  }
 0x248   :  { %v334_v3 = vmul.f32 %v5802_v49, %v319_v0  ;;  %6829 = vrsqrt.f32 %v308_v1  ;;  %v356_v9 = vmax.f32 %v348_v2, 0.0  ;;  %v7562_v0 = vld [vmem:[%s9651_s7 + $0xa8] ss:$16 sps:$4 sm:$0xff]   ;;  %v7569_v1 = vld [vmem:[%s9651_s7 + $0xc4] ss:$16 sps:$4 sm:$0xff]  }
 0x249   :  { %v6822_v4 = vpop.eup %6821  ;;  %v335_v11 = vmul.f32 %v5802_v49, %v320_v36  ;;  %v7574_v2 = vld [vmem:[%s9651_s7 + $0xcc] ss:$16 sps:$4 sm:$0xff]   ;;  %v7588_v36 = vld [vmem:[%s9651_s7 + $0xc8] ss:$16 sps:$4 sm:$0xff]  }
 0x24a   :  { %v349_v6 = vadd.f32 %v5803_v59, %v334_v3  ;;  %v321_v7 = vmul.f32 %v6822_v4, %v7305_v51  ;;  %v6824_v8 = vpop.eup %6823  ;;  %v7393_v51 = vld [vmem:[%s9651_s7 + $0xc] ss:$16 sps:$4 sm:$0xff]   ;;  %v7583_v3 = vld [vmem:[%s9651_s7 + $0xc0] ss:$16 sps:$4 sm:$0xff]   ;;  %v7595_v4 = vld [vmem:[%s9651_s7 + $0xe4] ss:$16 sps:$4 sm:$0xff]  }
 0x24b   :  { %v322_v16 = vmul.f32 %v6824_v8, %v7307_v52  ;;  %v350_v17 = vadd.f32 %v5803_v59, %v335_v11  ;;  %v7616_v8 = vld [vmem:[%s9651_s7 + $0xe8] ss:$16 sps:$4 sm:$0xff]   ;;  %v7637_v11 = vld [vmem:[%s9652_s8] ss:$16 sps:$4 sm:$0xff]  }
 0x24c   :  { %v357_v10 = vmax.f32 %v349_v6, 0.0  ;;  %v336_v12 = vmul.f32 %v5802_v49, %v321_v7  ;;  %v7600_v6 = vld [vmem:[%s9651_s7 + $0xec] ss:$16 sps:$4 sm:$0xff]   ;;  %v7611_v7 = vld [vmem:[%s9651_s7 + $0xe0] ss:$16 sps:$4 sm:$0xff]  }
 0x24d   :  { %v6826_v13 = vpop.eup %6825  ;;  %v358_v26 = vmax.f32 %v350_v17, 0.0  ;;  %v337_v27 = vmul.f32 %v5802_v49, %v322_v16  ;;  %v7675_v16 = vld [vmem:[%s9652_s8 + $0x44] ss:$16 sps:$4 sm:$0xff]   ;;  %v7680_v17 = vld [vmem:[%s9652_s8 + $0x4c] ss:$16 sps:$4 sm:$0xff]  }
 0x24e   :  { %v323_v14 = vmul.f32 %v6826_v13, %v7315_v61  ;;  %v364_v43 = vpack.c.bf16 %v357_v10, %v356_v9  ;;  %v351_v15 = vadd.f32 %v5803_v59, %v336_v12  ;;  %v7623_v9 = vld [vmem:[%s9652_s8 + $0x4] ss:$16 sps:$4 sm:$0xff]   ;;  %v7628_v10 = vld [vmem:[%s9652_s8 + $0xc] ss:$16 sps:$4 sm:$0xff]   ;;  %v7642_v12 = vld [vmem:[%s9652_s8 + $0x8] ss:$16 sps:$4 sm:$0xff]  }
 0x24f   :  { %v352_v23 = vadd.f32 %v5803_v59, %v337_v27  ;;  %v7649_v13 = vld [vmem:[%s9652_s8 + $0x24] ss:$16 sps:$4 sm:$0xff]   ;;  %v7713_v27 = vld [vmem:[%s9652_s8 + $0x60] ss:$16 sps:$4 sm:$0xff]  }
 0x250   :  { %5808 = vmatmul.mubr.msk.bf16.vlgmr.msra.gmra.mrb[4].mxu1 %vm220_vm2, %v364_v43  ;;  %5812 = vmatmul.mubr.msk.bf16.vlgmr.msra.gmra.mrb[4].mxu0 %vm220_vm2, %v364_v43  ;;  %v359_v61 = vmax.f32 %v351_v15, 0.0  ;;  %v338_v22 = vmul.f32 %v5802_v49, %v323_v14  ;;  %v7654_v14 = vld [vmem:[%s9652_s8 + $0x2c] ss:$16 sps:$4 sm:$0xff]   ;;  %v7668_v15 = vld [vmem:[%s9652_s8 + $0x28] ss:$16 sps:$4 sm:$0xff]  }
 0x251   :  { %651 = vmatpush1.bf16.msra.mxu1 %v5816_v21  ;;  %468 = vmatprep.mubr.bf16.mxu1 %v9655_v18  ;;  %v6828_v52 = vpop.eup %6827  ;;  %v360_v30 = vmax.f32 %v352_v23, 0.0  ;;  %v7749_v23 = vld [vmem:[%s9652_s8 + $0xa4] ss:$16 sps:$4 sm:$0xff]  }
 0x252   :  { %541 = vmatprep.mubr.bf16.mxu0 %v9655_v18  ;;  %724 = vmatpush1.bf16.msra.mxu0 %v5818_v25  ;;  %v6830_v28 = vpop.eup %6829  ;;  %v325_v19 = vmul.f32 %v6828_v52, %v7325_v5  ;;  %v365_v20 = vpack.c.bf16 %v359_v61, %v358_v26  ;;  %v353_v21 = vadd.f32 %v5803_v59, %v338_v22  ;;  %v7689_v61 = vld [vmem:[%s9652_s8 + $0x40] ss:$16 sps:$4 sm:$0xff]   ;;  %v7694_v22 = vld [vmem:[%s9652_s8 + $0x48] ss:$16 sps:$4 sm:$0xff]   ;;  %v7701_v52 = vld [vmem:[%s9652_s8 + $0x64] ss:$16 sps:$4 sm:$0xff]  }
 0x253   :  { %1024 = vmatprep.subr.bf16.mxu1 %v7388_v42  ;;  %1065 = vmatprep.subr.bf16.mxu0 %v7393_v51  ;;  %v324_v29 = vmul.f32 %v6830_v28, %v7317_v62  ;;  %v7706_v26 = vld [vmem:[%s9652_s8 + $0x6c] ss:$16 sps:$4 sm:$0xff]   ;;  %v7718_v28 = vld [vmem:[%s9652_s8 + $0x68] ss:$16 sps:$4 sm:$0xff]  }
 0x254   :  { %v361_v24 = vmax.f32 %v353_v21, 0.0  ;;  %v340_v25 = vmul.f32 %v5802_v49, %v325_v19  ;;  %v7725_v19 = vld [vmem:[%s9652_s8 + $0x84] ss:$16 sps:$4 sm:$0xff]   ;;  %v7737_v21 = vld [vmem:[%s9652_s8 + $0x80] ss:$16 sps:$4 sm:$0xff]  }
 0x255   :  { %v339_v31 = vmul.f32 %v5802_v49, %v324_v29  ;;  %v7491_v49 = vld [vmem:[%s9651_s7 + $0x64] ss:$16 sps:$4 sm:$0xff]   ;;  %v7742_v29 = vld [vmem:[%s9652_s8 + $0x88] ss:$16 sps:$4 sm:$0xff]  }
 0x256   :  { %v366_v32 = vpack.c.bf16 %v361_v24, %v360_v30  ;;  %v355_v33 = vadd.f32 %v5803_v59, %v340_v25  ;;  %v7754_v24 = vld [vmem:[%s9652_s8 + $0xac] ss:$16 sps:$4 sm:$0xff]   ;;  %v7761_v25 = vld [vmem:[%s9652_s8 + $0xa0] ss:$16 sps:$4 sm:$0xff]   ;;  %v7766_v30 = vld [vmem:[%s9652_s8 + $0xa8] ss:$16 sps:$4 sm:$0xff]  }
 0x257   :  { %v354_v62 = vadd.f32 %v5803_v59, %v339_v31  ;;  %v7543_v59 = vld [vmem:[%s9651_s7 + $0xa4] ss:$16 sps:$4 sm:$0xff]  }
 0x258   :  { %5809 = vmatmul.mubr.msk.bf16.gmra.mrb[8].mxu1 %vm220_vm2, %v365_v20  ;;  %5813 = vmatmul.mubr.msk.bf16.gmra.mrb[8].mxu0 %vm220_vm2, %v365_v20  ;;  %v363_v5 = vmax.f32 %v355_v33, 0.0  ;;  %v7773_v31 = vld [vmem:[%s9652_s8 + $0xc4] ss:$16 sps:$4 sm:$0xff]   ;;  %v7785_v33 = vld [vmem:[%s9652_s8 + $0xc0] ss:$16 sps:$4 sm:$0xff]  }
 0x259   :  { %478 = vmatprep.mubr.bf16.mxu1 %v9655_v18  ;;  %551 = vmatprep.mubr.bf16.mxu0 %v9655_v18  ;;  %v362_v34 = vmax.f32 %v354_v62, 0.0  ;;  %v7790_v62 = vld [vmem:[%s9652_s8 + $0xc8] ss:$16 sps:$4 sm:$0xff]  }
 0x25a   :  { %9683 = vst [vmem:[#allocation11_spill] sm:$0xff] %v7790_v62 }
 0x25b   :  { %v7418_v35 = vpack.c.bf16 %v363_v5, %v362_v34  ;;  %v7797_v5 = vld [vmem:[%s9652_s8 + $0xe4] ss:$16 sps:$4 sm:$0xff]   ;;  %v7802_v34 = vld [vmem:[%s9652_s8 + $0xec] ss:$16 sps:$4 sm:$0xff]  }
 0x260   :  { %5810 = vmatmul.mubr.msk.bf16.gmra.mrb[12].mxu1 %vm220_vm2, %v366_v32  ;;  %5814 = vmatmul.mubr.msk.bf16.gmra.mrb[12].mxu0 %vm220_vm2, %v366_v32 }
 0x261   :  { %488 = vmatprep.mubr.bf16.mxu1 %v9655_v18  ;;  %561 = vmatprep.mubr.bf16.mxu0 %v9655_v18 }
 0x268   :  { %5811 = vmatmul.mubr.msk.bf16.gmra.mrb[16].mxu1 %vm220_vm2, %v7418_v35  ;;  %5815 = vmatmul.mubr.msk.bf16.gmra.mrb[16].mxu0 %vm220_vm2, %v7418_v35 }
 0x269   :  { %682 = vmatprep.mubr.bf16.mxu1 %v9655_v18  ;;  %755 = vmatprep.mubr.bf16.mxu0 %v9655_v18 }
 0x270   :  { %5820 = vmatmul.mubr.msk.bf16.vlgmr.msra.gmra.mrb[20].mxu1 %vm220_vm2, %v364_v43  ;;  %5824 = vmatmul.mubr.msk.bf16.vlgmr.msra.gmra.mrb[20].mxu0 %vm220_vm2, %v364_v43  ;;  %v7663_v43 = vld [vmem:[%s9652_s8 + $0x20] ss:$16 sps:$4 sm:$0xff]  }
 0x271   :  { %1025 = vmatpush1.bf16.msra.mxu1 %v7429_v37  ;;  %1066 = vmatpush1.bf16.msra.mxu0 %v7434_v38 }
 0x272   :  { %1026 = vmatprep.subr.bf16.mxu1 %v7439_v39  ;;  %1067 = vmatprep.subr.bf16.mxu0 %v7444_v40 }
 0x273   :  { %692 = vmatprep.mubr.bf16.mxu1 %v9655_v18  ;;  %765 = vmatprep.mubr.bf16.mxu0 %v9655_v18 }
 0x275   :  { %1027 = vmatpush1.bf16.msra.mxu1 %v7453_v41  ;;  %1068 = vmatpush1.bf16.msra.mxu0 %v7458_v44 }
 0x276   :  { %1028 = vmatprep.subr.bf16.mxu1 %v7465_v45  ;;  %1069 = vmatprep.subr.bf16.mxu0 %v7470_v46 }
 0x278   :  { %5821 = vmatmul.mubr.msk.bf16.gmra.mrb[24].mxu1 %vm220_vm2, %v365_v20  ;;  %5825 = vmatmul.mubr.msk.bf16.gmra.mrb[24].mxu0 %vm220_vm2, %v365_v20  ;;  %v7730_v20 = vld [vmem:[%s9652_s8 + $0x8c] ss:$16 sps:$4 sm:$0xff]  }
 0x279   :  { %1029 = vmatpush1.bf16.msra.mxu1 %v7479_v47  ;;  %1070 = vmatpush1.bf16.msra.mxu0 %v7484_v48 }
 0x27a   :  { %1030 = vmatprep.subr.bf16.mxu1 %v7491_v49  ;;  %1071 = vmatprep.subr.bf16.mxu0 %v7496_v50 }
 0x27b   :  { %702 = vmatprep.mubr.bf16.mxu1 %v9655_v18  ;;  %775 = vmatprep.mubr.bf16.mxu0 %v9655_v18 }
 0x27d   :  { %1031 = vmatpush1.bf16.msra.mxu1 %v7505_v53  ;;  %1072 = vmatpush1.bf16.msra.mxu0 %v7510_v54 }
 0x27e   :  { %1032 = vmatprep.subr.bf16.mxu1 %v7517_v55  ;;  %1073 = vmatprep.subr.bf16.mxu0 %v7522_v56 }
 0x280   :  { %5822 = vmatmul.mubr.msk.bf16.gmra.mrb[28].mxu1 %vm220_vm2, %v366_v32  ;;  %5826 = vmatmul.mubr.msk.bf16.gmra.mrb[28].mxu0 %vm220_vm2, %v366_v32  ;;  %v7778_v32 = vld [vmem:[%s9652_s8 + $0xcc] ss:$16 sps:$4 sm:$0xff]  }
 0x281   :  { %1033 = vmatpush1.bf16.msra.mxu1 %v7531_v57  ;;  %1074 = vmatpush1.bf16.msra.mxu0 %v7536_v58 }
 0x282   :  { %1034 = vmatprep.subr.bf16.mxu1 %v7543_v59  ;;  %1075 = vmatprep.subr.bf16.mxu0 %v7548_v60 }
 0x283   :  { %712 = vmatprep.mubr.bf16.mxu1 %v9655_v18  ;;  %785 = vmatprep.mubr.bf16.mxu0 %v9655_v18 }
 0x285   :  { %1035 = vmatpush1.bf16.msra.mxu1 %v7557_v63  ;;  %1076 = vmatpush1.bf16.msra.mxu0 %v7562_v0 }
 0x286   :  { %1036 = vmatprep.subr.bf16.mxu1 %v7569_v1  ;;  %1077 = vmatprep.subr.bf16.mxu0 %v7574_v2 }
 0x288   :  { %5823 = vmatmul.mubr.msk.bf16.gmra.mrb[32].mxu1 %vm220_vm2, %v7418_v35  ;;  %5827 = vmatmul.mubr.msk.bf16.gmra.mrb[32].mxu0 %vm220_vm2, %v7418_v35  ;;  %v7809_v35 = vld [vmem:[%s9652_s8 + $0xe0] ss:$16 sps:$4 sm:$0xff]  }
 0x289   :  { %1037 = vmatpush1.bf16.msra.mxu1 %v7583_v3  ;;  %1078 = vmatpush1.bf16.msra.mxu0 %v7588_v36 }
 0x28a   :  { %1038 = vmatprep.subr.bf16.mxu1 %v7595_v4  ;;  %1079 = vmatprep.subr.bf16.mxu0 %v7600_v6 }
 0x28b   :  { %1056 = vmatprep.mubr.bf16.mxu1 %v9655_v18  ;;  %1097 = vmatprep.mubr.bf16.mxu0 %v9655_v18 }
 0x28d   :  { %1039 = vmatpush1.bf16.msra.mxu1 %v7611_v7  ;;  %1080 = vmatpush1.bf16.msra.mxu0 %v7616_v8 }
 0x28e   :  { %1307 = vmatprep.subr.bf16.mxu1 %v7623_v9  ;;  %1348 = vmatprep.subr.bf16.mxu0 %v7628_v10 }
 0x290   :  { %1057 = vmatmul.mubr.bf16.vlgmr.msra.gmra.mrb[36].mxu1 %v9655_v18  ;;  %1098 = vmatmul.mubr.bf16.vlgmr.msra.gmra.mrb[36].mxu0 %v9655_v18 }
 0x291   :  { %1308 = vmatpush1.bf16.msra.mxu1 %v7637_v11  ;;  %1349 = vmatpush1.bf16.msra.mxu0 %v7642_v12 }
 0x292   :  { %1309 = vmatprep.subr.bf16.mxu1 %v7649_v13  ;;  %1350 = vmatprep.subr.bf16.mxu0 %v7654_v14 }
 0x293   :  { %1339 = vmatprep.mubr.bf16.mxu1 %v9655_v18  ;;  %1380 = vmatprep.mubr.bf16.mxu0 %v9655_v18  ;;  %v7814_v18 = vld [vmem:[%s9652_s8 + $0xe8] ss:$16 sps:$4 sm:$0xff]  }
 0x295   :  { %1310 = vmatpush1.bf16.msra.mxu1 %v7663_v43  ;;  %1351 = vmatpush1.bf16.msra.mxu0 %v7668_v15 }
 0x296   :  { %1311 = vmatprep.subr.bf16.mxu1 %v7675_v16  ;;  %1352 = vmatprep.subr.bf16.mxu0 %v7680_v17 }
 0x299   :  { %1312 = vmatpush1.bf16.msra.mxu1 %v7689_v61  ;;  %1353 = vmatpush1.bf16.msra.mxu0 %v7694_v22 }
 0x29a   :  { %1313 = vmatprep.subr.bf16.mxu1 %v7701_v52  ;;  %1354 = vmatprep.subr.bf16.mxu0 %v7706_v26 }
 0x29d   :  { %1314 = vmatpush1.bf16.msra.mxu1 %v7713_v27  ;;  %1355 = vmatpush1.bf16.msra.mxu0 %v7718_v28 }
 0x29e   :  { %1315 = vmatprep.subr.bf16.mxu1 %v7725_v19  ;;  %1356 = vmatprep.subr.bf16.mxu0 %v7730_v20 }
 0x2a1   :  { %1316 = vmatpush1.bf16.msra.mxu1 %v7737_v21  ;;  %1357 = vmatpush1.bf16.msra.mxu0 %v7742_v29 }
 0x2a2   :  { %1317 = vmatprep.subr.bf16.mxu1 %v7749_v23  ;;  %1358 = vmatprep.subr.bf16.mxu0 %v7754_v24 }
 0x2a5   :  { %1318 = vmatpush1.bf16.msra.mxu1 %v7761_v25  ;;  %1359 = vmatpush1.bf16.msra.mxu0 %v7766_v30 }
 0x2a6   :  { %1319 = vmatprep.subr.bf16.mxu1 %v7773_v31  ;;  %1360 = vmatprep.subr.bf16.mxu0 %v7778_v32 }
 0x2a9   :  { %1320 = vmatpush1.bf16.msra.mxu1 %v7785_v33  ;;  %1361 = vmatpush1.bf16.msra.mxu0 %v7790_v62  ;;  %v9684_v62 = vmov 0  }
 0x2aa   :  { %1321 = vmatprep.subr.bf16.mxu1 %v7797_v5  ;;  %1362 = vmatprep.subr.bf16.mxu0 %v7802_v34 }
 0x2ad   :  { %1322 = vmatpush1.bf16.msra.mxu1 %v7809_v35  ;;  %1363 = vmatpush1.bf16.msra.mxu0 %v7814_v18 }
 0x2ae   :  { %1642 = vmatprep.subr.bf16.mxu1 %v7388_v42  ;;  %1683 = vmatprep.subr.bf16.mxu0 %v7393_v51  ;;  %v374_v42 = vlaneseq }
 0x2b0   :  { %1340 = vmatmul.mubr.bf16.vlgmr.msra.gmra.mrb[40].mxu1 %v9684_v62  ;;  %1381 = vmatmul.mubr.bf16.vlgmr.msra.gmra.mrb[40].mxu0 %v9684_v62  ;;  %v7858_v51 = vshrl.u32 %v374_v42, 7 }
 0x2b1   :  { %1643 = vmatpush1.bf16.msra.mxu1 %v7429_v37  ;;  %1684 = vmatpush1.bf16.msra.mxu0 %v7434_v38 }
 0x2b2   :  { %1644 = vmatprep.subr.bf16.mxu1 %v7439_v39  ;;  %1685 = vmatprep.subr.bf16.mxu0 %v7444_v40  ;;  %v9661_v37 = vsub.s32 0, %v7858_v51  ;;  %v9660_v38 = vsub.s32 2, %v7858_v51  ;;  %v372_v39 = vld [vmem:[#allocation8] sm:$0xf]  ;;  %v9659_v40 = vsub.s32 1, %v7858_v51 }
 0x2b3   :  { %1674 = vmatprep.mubr.bf16.mxu1 %v9684_v62  ;;  %1715 = vmatprep.mubr.bf16.mxu0 %v9684_v62 }
 0x2b5   :  { %1645 = vmatpush1.bf16.msra.mxu1 %v7453_v41  ;;  %1686 = vmatpush1.bf16.msra.mxu0 %v7458_v44  ;;  %v9658_v41 = vsub.s32 3, %v7858_v51 }
 0x2b6   :  { %1646 = vmatprep.subr.bf16.mxu1 %v7465_v45  ;;  %1687 = vmatprep.subr.bf16.mxu0 %v7470_v46  ;;  %v7870_v46 = vrot.slane %v372_v39, %v9661_v37 }
 0x2b9   :  { %1647 = vmatpush1.bf16.msra.mxu1 %v7479_v47  ;;  %1688 = vmatpush1.bf16.msra.mxu0 %v7484_v48  ;;  %v7874_v47 = vrot.slane %v372_v39, %v9660_v38 }
 0x2ba   :  { %1648 = vmatprep.subr.bf16.mxu1 %v7491_v49  ;;  %1689 = vmatprep.subr.bf16.mxu0 %v7496_v50  ;;  %v7882_v50 = vrot.slane %v372_v39, %v9659_v40 }
 0x2bd   :  { %1649 = vmatpush1.bf16.msra.mxu1 %v7505_v53  ;;  %1690 = vmatpush1.bf16.msra.mxu0 %v7510_v54  ;;  %v7886_v53 = vrot.slane %v372_v39, %v9658_v41 }
 0x2be   :  { %1650 = vmatprep.subr.bf16.mxu1 %v7517_v55  ;;  %1691 = vmatprep.subr.bf16.mxu0 %v7522_v56 }
 0x2c1   :  { %1651 = vmatpush1.bf16.msra.mxu1 %v7531_v57  ;;  %1692 = vmatpush1.bf16.msra.mxu0 %v7536_v58 }
 0x2c2   :  { %1652 = vmatprep.subr.bf16.mxu1 %v7543_v59  ;;  %1693 = vmatprep.subr.bf16.mxu0 %v7548_v60 }
 0x2c5   :  { %1653 = vmatpush1.bf16.msra.mxu1 %v7557_v63  ;;  %1694 = vmatpush1.bf16.msra.mxu0 %v7562_v0 }
 0x2c6   :  { %1654 = vmatprep.subr.bf16.mxu1 %v7569_v1  ;;  %1695 = vmatprep.subr.bf16.mxu0 %v7574_v2 }
 0x2c9   :  { %1655 = vmatpush1.bf16.msra.mxu1 %v7583_v3  ;;  %1696 = vmatpush1.bf16.msra.mxu0 %v7588_v36 }
 0x2ca   :  { %1656 = vmatprep.subr.bf16.mxu1 %v7595_v4  ;;  %1697 = vmatprep.subr.bf16.mxu0 %v7600_v6 }
 0x2cd   :  { %1657 = vmatpush1.bf16.msra.mxu1 %v7611_v7  ;;  %1698 = vmatpush1.bf16.msra.mxu0 %v7616_v8 }
 0x2ce   :  { %1926 = vmatprep.subr.bf16.mxu1 %v7623_v9  ;;  %1967 = vmatprep.subr.bf16.mxu0 %v7628_v10 }
 0x323   :  { %v7864_v44 = vpop.f32.mrb[4].mxu1  ;;  %v7866_v45 = vpop.f32.mrb[4].mxu0 }
 0x324   :  { %v7876_v48 = vpop.f32.mrb[5].mxu1  ;;  %v7878_v49 = vpop.f32.mrb[5].mxu0 }
 0x325   :  { %v464_v54 = vpop.f32.mrb[6].mxu1  ;;  %v537_v55 = vpop.f32.mrb[6].mxu0 }
 0x326   :  { %v7889_v56 = vadd.f32 %v464_v54, %v7870_v46  ;;  %v7892_v57 = vadd.f32 %v537_v55, %v7874_v47  ;;  %v466_v58 = vpop.f32.mrb[7].mxu1  ;;  %v539_v59 = vpop.f32.mrb[7].mxu0 }
 0x327   :  { %v7895_v60 = vadd.f32 %v466_v58, %v7882_v50  ;;  %v7898_v63 = vadd.f32 %v539_v59, %v7886_v53 }
 0x329   :  { %9685 = vst [vmem:[#allocation12_spill] sm:$0xff] %v7898_v63 }
 0x32b   :  { %v470_v0 = vpop.f32.mrb[8].mxu1  ;;  %v543_v1 = vpop.f32.mrb[8].mxu0 }
 0x32c   :  { %v7901_v2 = vadd.f32 %v470_v0, %v7870_v46  ;;  %v7904_v3 = vadd.f32 %v543_v1, %v7874_v47  ;;  %v472_v36 = vpop.f32.mrb[9].mxu1  ;;  %v545_v4 = vpop.f32.mrb[9].mxu0 }
 0x32d   :  { %v7907_v6 = vadd.f32 %v472_v36, %v7882_v50  ;;  %v7910_v7 = vadd.f32 %v545_v4, %v7886_v53  ;;  %v474_v8 = vpop.f32.mrb[10].mxu1  ;;  %v547_v9 = vpop.f32.mrb[10].mxu0 }
 0x32e   :  { %9686 = vst [vmem:[#allocation13_spill] sm:$0xff] %v7901_v2  ;;  %9687 = vst [vmem:[#allocation14_spill] sm:$0xff] %v7904_v3  ;;  %v7913_v10 = vadd.f32 %v474_v8, %v7870_v46  ;;  %v7916_v42 = vadd.f32 %v547_v9, %v7874_v47  ;;  %v476_v39 = vpop.f32.mrb[11].mxu1  ;;  %v549_v54 = vpop.f32.mrb[11].mxu0 }
 0x32f   :  { %9688 = vst [vmem:[#allocation15_spill] sm:$0xff] %v7907_v6  ;;  %9689 = vst [vmem:[#allocation16_spill] sm:$0xff] %v7910_v7  ;;  %v7919_v55 = vadd.f32 %v476_v39, %v7882_v50  ;;  %v7922_v58 = vadd.f32 %v549_v54, %v7886_v53 }
 0x330   :  { %9690 = vst [vmem:[#allocation17_spill] sm:$0xff] %v7913_v10  ;;  %9691 = vst [vmem:[#allocation18_spill] sm:$0xff] %v7916_v42 }
 0x331   :  { %9692 = vst [vmem:[#allocation19_spill] sm:$0xff] %v7919_v55  ;;  %9693 = vst [vmem:[#allocation20_spill] sm:$0xff] %v7922_v58 }
 0x333   :  { %v480_v59 = vpop.f32.mrb[12].mxu1  ;;  %v553_v0 = vpop.f32.mrb[12].mxu0 }
 0x334   :  { %v7925_v1 = vadd.f32 %v480_v59, %v7870_v46  ;;  %v7928_v36 = vadd.f32 %v553_v0, %v7874_v47  ;;  %v482_v4 = vpop.f32.mrb[13].mxu1  ;;  %v555_v8 = vpop.f32.mrb[13].mxu0 }
 0x335   :  { %v7931_v9 = vadd.f32 %v482_v4, %v7882_v50  ;;  %v7934_v41 = vadd.f32 %v555_v8, %v7886_v53  ;;  %v484_v39 = vpop.f32.mrb[14].mxu1  ;;  %v557_v40 = vpop.f32.mrb[14].mxu0 }
 0x336   :  { %9694 = vst [vmem:[#allocation21_spill] sm:$0xff] %v7925_v1  ;;  %9695 = vst [vmem:[#allocation22_spill] sm:$0xff] %v7928_v36  ;;  %v7937_v54 = vadd.f32 %v484_v39, %v7870_v46  ;;  %v7940_v38 = vadd.f32 %v557_v40, %v7874_v47  ;;  %v486_v59 = vpop.f32.mrb[15].mxu1  ;;  %v559_v37 = vpop.f32.mrb[15].mxu0 }
 0x337   :  { %9696 = vst [vmem:[#allocation23_spill] sm:$0xff] %v7931_v9  ;;  %9697 = vst [vmem:[#allocation24_spill] sm:$0xff] %v7934_v41  ;;  %v7943_v0 = vadd.f32 %v486_v59, %v7882_v50  ;;  %v7946_v36 = vadd.f32 %v559_v37, %v7886_v53  ;;  %v608_v37 = vld [vmem:[#allocation8 + $0x4] sm:$0xf] }
 0x338   :  { %9698 = vst [vmem:[#allocation25_spill] sm:$0xff] %v7937_v54  ;;  %9699 = vst [vmem:[#allocation26_spill] sm:$0xff] %v7940_v38 }
 0x339   :  { %9700 = vst [vmem:[#allocation27_spill] sm:$0xff] %v7943_v0  ;;  %9701 = vst [vmem:[#allocation28_spill] sm:$0xff] %v7946_v36 }
 0x33b   :  { %v490_v4 = vpop.f32.mrb[16].mxu1  ;;  %v563_v9 = vpop.f32.mrb[16].mxu0 }
 0x33c   :  { %v7949_v8 = vadd.f32 %v490_v4, %v7870_v46  ;;  %v7952_v41 = vadd.f32 %v563_v9, %v7874_v47  ;;  %v492_v39 = vpop.f32.mrb[17].mxu1  ;;  %v565_v54 = vpop.f32.mrb[17].mxu0 }
 0x33d   :  { %v7955_v40 = vadd.f32 %v492_v39, %v7882_v50  ;;  %v7958_v38 = vadd.f32 %v565_v54, %v7886_v53  ;;  %v494_v59 = vpop.f32.mrb[18].mxu1  ;;  %v567_v0 = vpop.f32.mrb[18].mxu0  ;;  %v9710_v54 = vsub.s32 0, %v7858_v51 }
 0x33e   :  { %9702 = vst [vmem:[#allocation29_spill] sm:$0xff] %v7949_v8  ;;  %9703 = vst [vmem:[#allocation30_spill] sm:$0xff] %v7952_v41  ;;  %v7961_v36 = vadd.f32 %v494_v59, %v7870_v46  ;;  %v7964_v4 = vadd.f32 %v567_v0, %v7874_v47  ;;  %v496_v8 = vpop.f32.mrb[19].mxu1  ;;  %v569_v9 = vpop.f32.mrb[19].mxu0  ;;  %v9712_v59 = vsub.s32 1, %v7858_v51 }
 0x33f   :  { %9704 = vst [vmem:[#allocation31_spill] sm:$0xff] %v7955_v40  ;;  %9705 = vst [vmem:[#allocation32_spill] sm:$0xff] %v7958_v38  ;;  %v7967_v41 = vadd.f32 %v496_v8, %v7882_v50  ;;  %v7970_v39 = vadd.f32 %v569_v9, %v7886_v53  ;;  %v7974_v38 = vrot.slane %v608_v37, %v9710_v54  ;;  %v9711_v40 = vsub.s32 2, %v7858_v51 }
 0x340   :  { %9706 = vst [vmem:[#allocation33_spill] sm:$0xff] %v7961_v36  ;;  %9707 = vst [vmem:[#allocation34_spill] sm:$0xff] %v7964_v4  ;;  %v7982_v0 = vrot.slane %v608_v37, %v9712_v59  ;;  %v9713_v4 = vsub.s32 3, %v7858_v51 }
 0x341   :  { %9708 = vst [vmem:[#allocation35_spill] sm:$0xff] %v7967_v41  ;;  %9709 = vst [vmem:[#allocation36_spill] sm:$0xff] %v7970_v39  ;;  %v7978_v1 = vrot.slane %v608_v37, %v9711_v40 }
 0x342   :  { %v7986_v36 = vrot.slane %v608_v37, %v9713_v4 }
 0x343   :  { %v684_v8 = vpop.f32.mrb[20].mxu1  ;;  %v757_v41 = vpop.f32.mrb[20].mxu0 }
 0x344   :  { %v7989_v9 = vadd.f32 %v684_v8, %v7974_v38  ;;  %v7992_v54 = vadd.f32 %v757_v41, %v7978_v1  ;;  %v686_v39 = vpop.f32.mrb[21].mxu1  ;;  %v759_v58 = vpop.f32.mrb[21].mxu0 }
 0x345   :  { %v7995_v40 = vadd.f32 %v686_v39, %v7982_v0  ;;  %v7998_v59 = vadd.f32 %v759_v58, %v7986_v36  ;;  %v688_v55 = vpop.f32.mrb[22].mxu1  ;;  %v761_v51 = vpop.f32.mrb[22].mxu0 }
 0x346   :  { %9714 = vst [vmem:[#allocation37_spill] sm:$0xff] %v7989_v9  ;;  %9715 = vst [vmem:[#allocation38_spill] sm:$0xff] %v7992_v54  ;;  %v8001_v37 = vadd.f32 %v688_v55, %v7974_v38  ;;  %v8004_v4 = vadd.f32 %v761_v51, %v7978_v1  ;;  %v690_v8 = vpop.f32.mrb[23].mxu1  ;;  %v763_v9 = vpop.f32.mrb[23].mxu0 }
 0x347   :  { %9716 = vst [vmem:[#allocation39_spill] sm:$0xff] %v7995_v40  ;;  %9717 = vst [vmem:[#allocation40_spill] sm:$0xff] %v7998_v59  ;;  %v8007_v41 = vadd.f32 %v690_v8, %v7982_v0  ;;  %v8010_v54 = vadd.f32 %v763_v9, %v7986_v36 }
 0x348   :  { %9718 = vst [vmem:[#allocation41_spill] sm:$0xff] %v8001_v37  ;;  %9719 = vst [vmem:[#allocation42_spill] sm:$0xff] %v8004_v4 }
 0x349   :  { %9720 = vst [vmem:[#allocation43_spill] sm:$0xff] %v8007_v41  ;;  %9721 = vst [vmem:[#allocation44_spill] sm:$0xff] %v8010_v54 }
 0x34b   :  { %v694_v39 = vpop.f32.mrb[24].mxu1  ;;  %v767_v40 = vpop.f32.mrb[24].mxu0 }
 0x34c   :  { %v8013_v58 = vadd.f32 %v694_v39, %v7974_v38  ;;  %v8016_v59 = vadd.f32 %v767_v40, %v7978_v1  ;;  %v696_v55 = vpop.f32.mrb[25].mxu1  ;;  %v769_v37 = vpop.f32.mrb[25].mxu0 }
 0x34d   :  { %v8019_v51 = vadd.f32 %v696_v55, %v7982_v0  ;;  %v8022_v4 = vadd.f32 %v769_v37, %v7986_v36  ;;  %v698_v8 = vpop.f32.mrb[26].mxu1  ;;  %v771_v41 = vpop.f32.mrb[26].mxu0 }
 0x34e   :  { %9722 = vst [vmem:[#allocation45_spill] sm:$0xff] %v8013_v58  ;;  %9723 = vst [vmem:[#allocation46_spill] sm:$0xff] %v8016_v59  ;;  %v8025_v9 = vadd.f32 %v698_v8, %v7974_v38  ;;  %v8028_v54 = vadd.f32 %v771_v41, %v7978_v1  ;;  %v700_v39 = vpop.f32.mrb[27].mxu1  ;;  %v773_v58 = vpop.f32.mrb[27].mxu0 }
 0x34f   :  { %9724 = vst [vmem:[#allocation47_spill] sm:$0xff] %v8019_v51  ;;  %9725 = vst [vmem:[#allocation48_spill] sm:$0xff] %v8022_v4  ;;  %v8031_v40 = vadd.f32 %v700_v39, %v7982_v0  ;;  %v8034_v59 = vadd.f32 %v773_v58, %v7986_v36 }
 0x350   :  { %9726 = vst [vmem:[#allocation49_spill] sm:$0xff] %v8025_v9  ;;  %9727 = vst [vmem:[#allocation50_spill] sm:$0xff] %v8028_v54 }
 0x351   :  { %9728 = vst [vmem:[#allocation51_spill] sm:$0xff] %v8031_v40  ;;  %9729 = vst [vmem:[#allocation52_spill] sm:$0xff] %v8034_v59 }
 0x353   :  { %v704_v55 = vpop.f32.mrb[28].mxu1  ;;  %v777_v51 = vpop.f32.mrb[28].mxu0 }
 0x354   :  { %v8037_v37 = vadd.f32 %v704_v55, %v7974_v38  ;;  %v8040_v4 = vadd.f32 %v777_v51, %v7978_v1  ;;  %v706_v8 = vpop.f32.mrb[29].mxu1  ;;  %v779_v9 = vpop.f32.mrb[29].mxu0 }
 0x355   :  { %v8043_v41 = vadd.f32 %v706_v8, %v7982_v0  ;;  %v8046_v54 = vadd.f32 %v779_v9, %v7986_v36  ;;  %v708_v39 = vpop.f32.mrb[30].mxu1  ;;  %v781_v40 = vpop.f32.mrb[30].mxu0 }
 0x356   :  { %9730 = vst [vmem:[#allocation53_spill] sm:$0xff] %v8037_v37  ;;  %9731 = vst [vmem:[#allocation54_spill] sm:$0xff] %v8040_v4  ;;  %v8049_v58 = vadd.f32 %v708_v39, %v7974_v38  ;;  %v8052_v59 = vadd.f32 %v781_v40, %v7978_v1  ;;  %v710_v55 = vpop.f32.mrb[31].mxu1  ;;  %v783_v37 = vpop.f32.mrb[31].mxu0 }
 0x357   :  { %9732 = vst [vmem:[#allocation55_spill] sm:$0xff] %v8043_v41  ;;  %9733 = vst [vmem:[#allocation56_spill] sm:$0xff] %v8046_v54  ;;  %v8055_v51 = vadd.f32 %v710_v55, %v7982_v0  ;;  %v8058_v4 = vadd.f32 %v783_v37, %v7986_v36 }
 0x358   :  { %9734 = vst [vmem:[#allocation57_spill] sm:$0xff] %v8049_v58  ;;  %9735 = vst [vmem:[#allocation58_spill] sm:$0xff] %v8052_v59  ;;  %v461_v59 = vadd.f32 %v7864_v44, %v7870_v46 }
 0x359   :  { %9736 = vst [vmem:[#allocation59_spill] sm:$0xff] %v8055_v51  ;;  %9737 = vst [vmem:[#allocation60_spill] sm:$0xff] %v8058_v4 }
 0x35b   :  { %v714_v8 = vpop.f32.mrb[32].mxu1  ;;  %v787_v41 = vpop.f32.mrb[32].mxu0 }
 0x35c   :  { %v8061_v9 = vadd.f32 %v714_v8, %v7974_v38  ;;  %v8064_v54 = vadd.f32 %v787_v41, %v7978_v1  ;;  %v716_v39 = vpop.f32.mrb[33].mxu1  ;;  %v789_v42 = vpop.f32.mrb[33].mxu0  ;;  %v534_v8 = vadd.f32 %v7866_v45, %v7874_v47  ;;  %v463_v41 = vadd.f32 %v7876_v48, %v7882_v50 }
 0x35d   :  { %v8067_v40 = vadd.f32 %v716_v39, %v7982_v0  ;;  %v8070_v10 = vadd.f32 %v789_v42, %v7986_v36  ;;  %v718_v55 = vpop.f32.mrb[34].mxu1  ;;  %v791_v51 = vpop.f32.mrb[34].mxu0  ;;  %v536_v39 = vadd.f32 %v7878_v49, %v7886_v53 }
 0x35e   :  { %9738 = vst [vmem:[#allocation61_spill] sm:$0xff] %v8061_v9  ;;  %9739 = vst [vmem:[#allocation62_spill] sm:$0xff] %v8064_v54  ;;  %v720_v37 = vpop.f32.mrb[35].mxu1  ;;  %v793_v4 = vpop.f32.mrb[35].mxu0 }
 0x35f   :  { %9740 = vst [vmem:[#allocation63_spill] sm:$0xff] %v8067_v40  ;;  %9741 = vst [vmem:[#allocation64_spill] sm:$0xff] %v8070_v10 }
 0x363   :  { %v1058_v58 = vpop.f32.mrb[36].mxu1  ;;  %v1099_v7 = vpop.f32.mrb[36].mxu0 }
 0x364   :  { %v1106_v42 = vadd.f32 %v1058_v58, %v461_v59  ;;  %v1108_v6 = vadd.f32 %v1099_v7, %v534_v8  ;;  %v1060_v3 = vpop.f32.mrb[37].mxu1  ;;  %v1101_v2 = vpop.f32.mrb[37].mxu0  ;;  %v794_v8 = vadd.f32 %v793_v4, %v7986_v36 }
 0x365   :  { %v1107_v10 = vadd.f32 %v1060_v3, %v463_v41  ;;  %v1109_v40 = vadd.f32 %v1101_v2, %v536_v39  ;;  %v1062_v54 = vpop.f32.mrb[38].mxu1  ;;  %v1103_v9 = vpop.f32.mrb[38].mxu0 }
 0x366   :  { %v5892_v44 = vmul.f32 -1.442695, %v1106_v42  ;;  %v1063_v46 = vpop.f32.mrb[39].mxu1  ;;  %v1104_v63 = vpop.f32.mrb[39].mxu0 }
 0x367   :  { %v5893_v45 = vmul.f32 -1.442695, %v1107_v10  ;;  %v5894_v47 = vmul.f32 -1.442695, %v1109_v40  ;;  %v719_v63 = vadd.f32 %v718_v55, %v7974_v38  ;;  %v792_v10 = vadd.f32 %v791_v51, %v7978_v1 }
 0x368   :  { %6831 = vpow2.f32 %v5892_v44  ;;  %v721_v40 = vadd.f32 %v720_v37, %v7982_v0 }
 0x369   :  { %6833 = vpow2.f32 %v5893_v45 }
 0x36a   :  { %6835 = vpow2.f32 %v5894_v47 }
 0x36b   :  { %6837 = vtanh.f32 %v1108_v6 }
 0x372   :  { %v6832_v48 = vpop.eup %6831 }
 0x373   :  { %v6834_v50 = vpop.eup %6833  ;;  %v1396_v49 = vadd.f32 1.0, %v6832_v48 }
 0x374   :  { %v1402_v53 = vadd.f32 1.0, %v6834_v50  ;;  %v6836_v7 = vpop.eup %6835 }
 0x375   :  { %6839 = vrcp.f32 %v1396_v49  ;;  %v6838_v3 = vpop.eup %6837  ;;  %v1409_v58 = vadd.f32 1.0, %v6836_v7 }
 0x376   :  { %6841 = vrcp.f32 %v1402_v53 }
 0x377   :  { %6843 = vrcp.f32 %v1409_v58 }
 0x37f   :  { %v6840_v2 = vpop.eup %6839 }
 0x380   :  { %v6842_v54 = vpop.eup %6841  ;;  %v1413_v59 = vmul.f32 %v6840_v2, %v6838_v3 }
 0x381   :  { %v1412_v9 = vmul.f32 0.0, %v6842_v54  ;;  %v6844_v36 = vpop.eup %6843 }
 0x383   :  { %v8084_v41 = vadd.f32 %v1413_v59, %v1412_v9  ;;  %v1341_v6 = vpop.f32.mrb[40].mxu1  ;;  %v1382_v39 = vpop.f32.mrb[40].mxu0  ;;  %v8239_v9 = vld [vmem:[%s9651_s7 + $0x80] ss:$16 sps:$4 sm:$0xff]  }
 0x384   :  { %v1389_v42 = vadd.f32 %v1341_v6, %v719_v63  ;;  %v1391_v44 = vadd.f32 %v1382_v39, %v792_v10  ;;  %v1343_v46 = vpop.f32.mrb[41].mxu1  ;;  %v1384_v45 = vpop.f32.mrb[41].mxu0  ;;  %v8244_v63 = vld [vmem:[%s9651_s7 + $0x88] ss:$16 sps:$4 sm:$0xff]   ;;  %v8253_v10 = vld [vmem:[%s9651_s7 + $0xa4] ss:$16 sps:$4 sm:$0xff]  }
 0x385   :  { %6845 = vtanh.f32 %v8084_v41  ;;  %v1390_v47 = vadd.f32 %v1343_v46, %v721_v40  ;;  %v1392_v48 = vadd.f32 %v1384_v45, %v794_v8  ;;  %v1345_v38 = vpop.f32.mrb[42].mxu1  ;;  %v1386_v55 = vpop.f32.mrb[42].mxu0  ;;  %v8258_v40 = vld [vmem:[%s9651_s7 + $0xac] ss:$16 sps:$4 sm:$0xff]   ;;  %v8263_v8 = vld [vmem:[%s9651_s7 + $0xa0] ss:$16 sps:$4 sm:$0xff]  }
 0x386   :  { %v5895_v1 = vmul.f32 -1.442695, %v1389_v42  ;;  %v1346_v51 = vpop.f32.mrb[43].mxu1  ;;  %v1387_v0 = vpop.f32.mrb[43].mxu0  ;;  %v8268_v6 = vld [vmem:[%s9651_s7 + $0xa8] ss:$16 sps:$4 sm:$0xff]  }
 0x387   :  { %v5896_v37 = vmul.f32 -1.442695, %v1390_v47  ;;  %v5897_v50 = vmul.f32 -1.442695, %v1392_v48  ;;  %v8277_v39 = vld [vmem:[%s9651_s7 + $0xc4] ss:$16 sps:$4 sm:$0xff]  }
 0x388   :  { %6847 = vpow2.f32 %v5895_v1  ;;  %v8282_v42 = vld [vmem:[%s9651_s7 + $0xcc] ss:$16 sps:$4 sm:$0xff]   ;;  %v8292_v46 = vld [vmem:[%s9651_s7 + $0xc8] ss:$16 sps:$4 sm:$0xff]   ;;  %v8301_v45 = vld [vmem:[%s9651_s7 + $0xe4] ss:$16 sps:$4 sm:$0xff]  }
 0x389   :  { %6849 = vpow2.f32 %v5896_v37  ;;  %v8306_v47 = vld [vmem:[%s9651_s7 + $0xec] ss:$16 sps:$4 sm:$0xff]   ;;  %v8311_v48 = vld [vmem:[%s9651_s7 + $0xe0] ss:$16 sps:$4 sm:$0xff]   ;;  %v8316_v38 = vld [vmem:[%s9651_s7 + $0xe8] ss:$16 sps:$4 sm:$0xff]  }
 0x38a   :  { %6851 = vpow2.f32 %v5897_v50  ;;  %v8325_v55 = vld [vmem:[%s9652_s8 + $0x4] ss:$16 sps:$4 sm:$0xff]   ;;  %v8330_v1 = vld [vmem:[%s9652_s8 + $0xc] ss:$16 sps:$4 sm:$0xff]  }
 0x38b   :  { %6853 = vtanh.f32 %v1391_v44  ;;  %v8287_v44 = vld [vmem:[%s9651_s7 + $0xc0] ss:$16 sps:$4 sm:$0xff]  }
 0x38f   :  { %v6846_v4 = vpop.eup %6845 }
 0x390   :  { %v1416_v49 = vmul.f32 %v6846_v4, %v6844_v36 }
 0x392   :  { %v6848_v53 = vpop.eup %6847  ;;  %1441 = vst [vmem:[%s9653_s9] sm:$0xff] %v1416_v49  ;;  %v1449_v7 = vpack.c.bf16 %v1416_v49, %v1416_v49 }
 0x393   :  { %v6850_v3 = vpop.eup %6849  ;;  %v1420_v2 = vadd.f32 1.0, %v6848_v53  ;;  %v9743_v53 = vld [vmem:[#allocation12_spill] sm:$0xff] }
 0x394   :  { %v1426_v54 = vadd.f32 1.0, %v6850_v3  ;;  %1675 = vmatmul.mubr.bf16.vlgmr.msra.gmra.mrb[44].mxu1 %v1449_v7  ;;  %1716 = vmatmul.mubr.bf16.vlgmr.msra.gmra.mrb[44].mxu0 %v1449_v7 }
 0x395   :  { %6855 = vrcp.f32 %v1420_v2  ;;  %1927 = vmatpush1.bf16.msra.mxu1 %v7637_v11  ;;  %1968 = vmatpush1.bf16.msra.mxu0 %v7642_v12  ;;  %v6852_v11 = vpop.eup %6851 }
 0x396   :  { %6857 = vrcp.f32 %v1426_v54  ;;  %1928 = vmatprep.subr.bf16.mxu1 %v7649_v13  ;;  %1969 = vmatprep.subr.bf16.mxu0 %v7654_v14  ;;  %v6854_v12 = vpop.eup %6853 }
 0x397   :  { %1958 = vmatprep.mubr.bf16.mxu1 %v9684_v62  ;;  %1999 = vmatprep.mubr.bf16.mxu0 %v9684_v62 }
 0x399   :  { %1929 = vmatpush1.bf16.msra.mxu1 %v7663_v43  ;;  %1970 = vmatpush1.bf16.msra.mxu0 %v7668_v15  ;;  %v1433_v43 = vadd.f32 1.0, %v6852_v11 }
 0x39a   :  { %1930 = vmatprep.subr.bf16.mxu1 %v7675_v16  ;;  %1971 = vmatprep.subr.bf16.mxu0 %v7680_v17  ;;  %v9742_v16 = vld [vmem:[#allocation11_spill] sm:$0xff] }
 0x39b   :  { %6859 = vrcp.f32 %v1433_v43 }
 0x39d   :  { %1931 = vmatpush1.bf16.msra.mxu1 %v7689_v61  ;;  %1972 = vmatpush1.bf16.msra.mxu0 %v7694_v22 }
 0x39e   :  { %1932 = vmatprep.subr.bf16.mxu1 %v7701_v52  ;;  %1973 = vmatprep.subr.bf16.mxu0 %v7706_v26  ;;  %v8133_v26 = vld [vmem:[%s9651_s7 + $0x4] ss:$16 sps:$4 sm:$0xff]  }
 0x39f   :  { %v6856_v13 = vpop.eup %6855 }
 0x3a0   :  { %v6858_v14 = vpop.eup %6857  ;;  %v1437_v59 = vmul.f32 %v6856_v13, %v6854_v12 }
 0x3a1   :  { %v1436_v58 = vmul.f32 0.0, %v6858_v14  ;;  %1933 = vmatpush1.bf16.msra.mxu1 %v7713_v27  ;;  %1974 = vmatpush1.bf16.msra.mxu0 %v7718_v28  ;;  %v8143_v27 = vld [vmem:[%s9651_s7] ss:$16 sps:$4 sm:$0xff]   ;;  %v8148_v28 = vld [vmem:[%s9651_s7 + $0x8] ss:$16 sps:$4 sm:$0xff]  }
 0x3a2   :  { %1934 = vmatprep.subr.bf16.mxu1 %v7725_v19  ;;  %1975 = vmatprep.subr.bf16.mxu0 %v7730_v20  ;;  %v8157_v19 = vld [vmem:[%s9651_s7 + $0x24] ss:$16 sps:$4 sm:$0xff]   ;;  %v8162_v20 = vld [vmem:[%s9651_s7 + $0x2c] ss:$16 sps:$4 sm:$0xff]  }
 0x3a3   :  { %v8108_v15 = vadd.f32 %v1437_v59, %v1436_v58 }
 0x3a5   :  { %6861 = vtanh.f32 %v8108_v15  ;;  %1935 = vmatpush1.bf16.msra.mxu1 %v7737_v21  ;;  %1976 = vmatpush1.bf16.msra.mxu0 %v7742_v29  ;;  %v6860_v17 = vpop.eup %6859  ;;  %v8167_v21 = vld [vmem:[%s9651_s7 + $0x20] ss:$16 sps:$4 sm:$0xff]   ;;  %v8172_v29 = vld [vmem:[%s9651_s7 + $0x28] ss:$16 sps:$4 sm:$0xff]  }
 0x3a6   :  { %1936 = vmatprep.subr.bf16.mxu1 %v7749_v23  ;;  %1977 = vmatprep.subr.bf16.mxu0 %v7754_v24  ;;  %v8181_v23 = vld [vmem:[%s9651_s7 + $0x44] ss:$16 sps:$4 sm:$0xff]   ;;  %v8186_v24 = vld [vmem:[%s9651_s7 + $0x4c] ss:$16 sps:$4 sm:$0xff]  }
 0x3a9   :  { %1937 = vmatpush1.bf16.msra.mxu1 %v7761_v25  ;;  %1978 = vmatpush1.bf16.msra.mxu0 %v7766_v30  ;;  %v8191_v25 = vld [vmem:[%s9651_s7 + $0x40] ss:$16 sps:$4 sm:$0xff]   ;;  %v8196_v30 = vld [vmem:[%s9651_s7 + $0x48] ss:$16 sps:$4 sm:$0xff]  }
 0x3aa   :  { %1938 = vmatprep.subr.bf16.mxu1 %v7773_v31  ;;  %1979 = vmatprep.subr.bf16.mxu0 %v7778_v32  ;;  %v8205_v31 = vld [vmem:[%s9651_s7 + $0x64] ss:$16 sps:$4 sm:$0xff]   ;;  %v8210_v32 = vld [vmem:[%s9651_s7 + $0x6c] ss:$16 sps:$4 sm:$0xff]  }
 0x3ad   :  { %1939 = vmatpush1.bf16.msra.mxu1 %v7785_v33  ;;  %1980 = vmatpush1.bf16.msra.mxu0 %v9742_v16  ;;  %v8215_v33 = vld [vmem:[%s9651_s7 + $0x60] ss:$16 sps:$4 sm:$0xff]  }
 0x3ae   :  { %1940 = vmatprep.subr.bf16.mxu1 %v7797_v5  ;;  %1981 = vmatprep.subr.bf16.mxu0 %v7802_v34  ;;  %v8220_v5 = vld [vmem:[%s9651_s7 + $0x68] ss:$16 sps:$4 sm:$0xff]   ;;  %v8229_v34 = vld [vmem:[%s9651_s7 + $0x84] ss:$16 sps:$4 sm:$0xff]  }
 0x3af   :  { %v6862_v61 = vpop.eup %6861 }
 0x3b0   :  { %v1440_v22 = vmul.f32 %v6862_v61, %v6860_v17 }
 0x3b1   :  { %1941 = vmatpush1.bf16.msra.mxu1 %v7809_v35  ;;  %1982 = vmatpush1.bf16.msra.mxu0 %v7814_v18  ;;  %v8138_v18 = vld [vmem:[%s9651_s7 + $0xc] ss:$16 sps:$4 sm:$0xff]  }
 0x3b2   :  { %5898 = vst [vmem:[%s9654_s10 + $0x38] sm:$0xff] %v1440_v22  ;;  %v1733_v52 = vpack.c.bf16 %v1440_v22, %v1440_v22  ;;  %2262 = vmatprep.subr.bf16.mxu1 %v8133_v26  ;;  %2303 = vmatprep.subr.bf16.mxu0 %v8138_v18  ;;  %v8234_v35 = vld [vmem:[%s9651_s7 + $0x8c] ss:$16 sps:$4 sm:$0xff]  }
 0x3b4   :  { %1959 = vmatmul.mubr.bf16.vlgmr.msra.gmra.mrb[48].mxu1 %v1733_v52  ;;  %2000 = vmatmul.mubr.bf16.vlgmr.msra.gmra.mrb[48].mxu0 %v1733_v52 }
 0x3b5   :  { %2294 = vmatprep.mubr.bf16.mxu1 %v9684_v62  ;;  %2335 = vmatprep.mubr.bf16.mxu0 %v9684_v62 }
 0x3b6   :  { %2263 = vmatpush1.bf16.msra.mxu1 %v8143_v27  ;;  %2304 = vmatpush1.bf16.msra.mxu0 %v8148_v28 }
 0x3b7   :  { %2264 = vmatprep.subr.bf16.mxu1 %v8157_v19  ;;  %2305 = vmatprep.subr.bf16.mxu0 %v8162_v20 }
 0x3ba   :  { %2265 = vmatpush1.bf16.msra.mxu1 %v8167_v21  ;;  %2306 = vmatpush1.bf16.msra.mxu0 %v8172_v29 }
 0x3bb   :  { %2266 = vmatprep.subr.bf16.mxu1 %v8181_v23  ;;  %2307 = vmatprep.subr.bf16.mxu0 %v8186_v24 }
 0x3be   :  { %2267 = vmatpush1.bf16.msra.mxu1 %v8191_v25  ;;  %2308 = vmatpush1.bf16.msra.mxu0 %v8196_v30 }
 0x3bf   :  { %2268 = vmatprep.subr.bf16.mxu1 %v8205_v31  ;;  %2309 = vmatprep.subr.bf16.mxu0 %v8210_v32 }
 0x3c2   :  { %2269 = vmatpush1.bf16.msra.mxu1 %v8215_v33  ;;  %2310 = vmatpush1.bf16.msra.mxu0 %v8220_v5 }
 0x3c3   :  { %2270 = vmatprep.subr.bf16.mxu1 %v8229_v34  ;;  %2311 = vmatprep.subr.bf16.mxu0 %v8234_v35 }
 0x3c6   :  { %2271 = vmatpush1.bf16.msra.mxu1 %v8239_v9  ;;  %2312 = vmatpush1.bf16.msra.mxu0 %v8244_v63 }
 0x3c7   :  { %2272 = vmatprep.subr.bf16.mxu1 %v8253_v10  ;;  %2313 = vmatprep.subr.bf16.mxu0 %v8258_v40 }
 0x3ca   :  { %2273 = vmatpush1.bf16.msra.mxu1 %v8263_v8  ;;  %2314 = vmatpush1.bf16.msra.mxu0 %v8268_v6 }
 0x3cb   :  { %2274 = vmatprep.subr.bf16.mxu1 %v8277_v39  ;;  %2315 = vmatprep.subr.bf16.mxu0 %v8282_v42 }
 0x3ce   :  { %2275 = vmatpush1.bf16.msra.mxu1 %v8287_v44  ;;  %2316 = vmatpush1.bf16.msra.mxu0 %v8292_v46 }
 0x3cf   :  { %2276 = vmatprep.subr.bf16.mxu1 %v8301_v45  ;;  %2317 = vmatprep.subr.bf16.mxu0 %v8306_v47 }
 0x3d2   :  { %2277 = vmatpush1.bf16.msra.mxu1 %v8311_v48  ;;  %2318 = vmatpush1.bf16.msra.mxu0 %v8316_v38 }
 0x3d3   :  { %2546 = vmatprep.subr.bf16.mxu1 %v8325_v55  ;;  %2587 = vmatprep.subr.bf16.mxu0 %v8330_v1 }
 0x467   :  { %v1676_v51 = vpop.f32.mrb[44].mxu1  ;;  %v1717_v0 = vpop.f32.mrb[44].mxu0 }
 0x468   :  { %v1724_v37 = vadd.f32 %v1676_v51, %v7889_v56  ;;  %v1726_v36 = vadd.f32 %v1717_v0, %v7892_v57  ;;  %v1678_v4 = vpop.f32.mrb[45].mxu1  ;;  %v1719_v50 = vpop.f32.mrb[45].mxu0 }
 0x469   :  { %v1725_v49 = vadd.f32 %v1678_v4, %v7895_v60  ;;  %v1727_v7 = vadd.f32 %v1719_v50, %v9743_v53  ;;  %v1680_v3 = vpop.f32.mrb[46].mxu1  ;;  %v1721_v2 = vpop.f32.mrb[46].mxu0  ;;  %v9744_v4 = vld [vmem:[#allocation61_spill] sm:$0xff] }
 0x46a   :  { %v5963_v54 = vmul.f32 -1.442695, %v1724_v37  ;;  %v1681_v11 = vpop.f32.mrb[47].mxu1  ;;  %v1722_v12 = vpop.f32.mrb[47].mxu0  ;;  %v9746_v3 = vld [vmem:[#allocation63_spill] sm:$0xff] }
 0x46b   :  { %v5964_v13 = vmul.f32 -1.442695, %v1725_v49  ;;  %v5965_v14 = vmul.f32 -1.442695, %v1727_v7  ;;  %v9745_v49 = vld [vmem:[#allocation62_spill] sm:$0xff] }
 0x46c   :  { %6863 = vpow2.f32 %v5963_v54  ;;  %v9747_v54 = vld [vmem:[#allocation64_spill] sm:$0xff] }
 0x46d   :  { %6865 = vpow2.f32 %v5964_v13 }
 0x46e   :  { %6867 = vpow2.f32 %v5965_v14 }
 0x46f   :  { %6869 = vtanh.f32 %v1726_v36 }
 0x476   :  { %v6864_v59 = vpop.eup %6863 }
 0x477   :  { %v6866_v43 = vpop.eup %6865  ;;  %v2015_v56 = vadd.f32 1.0, %v6864_v59 }
 0x478   :  { %v2021_v57 = vadd.f32 1.0, %v6866_v43  ;;  %v6868_v60 = vpop.eup %6867 }
 0x479   :  { %6871 = vrcp.f32 %v2015_v56  ;;  %v6870_v58 = vpop.eup %6869  ;;  %v2028_v22 = vadd.f32 1.0, %v6868_v60 }
 0x47a   :  { %6873 = vrcp.f32 %v2021_v57 }
 0x47b   :  { %6875 = vrcp.f32 %v2028_v22 }
 0x483   :  { %v6872_v16 = vpop.eup %6871 }
 0x484   :  { %v6874_v17 = vpop.eup %6873  ;;  %v2032_v61 = vmul.f32 %v6872_v16, %v6870_v58  ;;  %v8349_v16 = vld [vmem:[%s9652_s8] ss:$16 sps:$4 sm:$0xff]  }
 0x485   :  { %v2031_v52 = vmul.f32 %v6874_v17, %v8084_v41  ;;  %v6876_v56 = vpop.eup %6875  ;;  %v8354_v17 = vld [vmem:[%s9652_s8 + $0x8] ss:$16 sps:$4 sm:$0xff]  }
 0x487   :  { %v8339_v51 = vadd.f32 %v2032_v61, %v2031_v52  ;;  %v1960_v0 = vpop.f32.mrb[48].mxu1  ;;  %v2001_v37 = vpop.f32.mrb[48].mxu0  ;;  %v8362_v52 = vld [vmem:[%s9652_s8 + $0x24] ss:$16 sps:$4 sm:$0xff]  }
 0x488   :  { %v2008_v50 = vadd.f32 %v1960_v0, %v9744_v4  ;;  %v2010_v36 = vadd.f32 %v2001_v37, %v9745_v49  ;;  %v1962_v53 = vpop.f32.mrb[49].mxu1  ;;  %v2003_v7 = vpop.f32.mrb[49].mxu0  ;;  %v8367_v0 = vld [vmem:[%s9652_s8 + $0x2c] ss:$16 sps:$4 sm:$0xff]   ;;  %v8374_v49 = vld [vmem:[%s9652_s8 + $0x20] ss:$16 sps:$4 sm:$0xff]  }
 0x489   :  { %6877 = vtanh.f32 %v8339_v51  ;;  %v2009_v2 = vadd.f32 %v1962_v53, %v9746_v3  ;;  %v2011_v11 = vadd.f32 %v2003_v7, %v9747_v54  ;;  %v1964_v12 = vpop.f32.mrb[50].mxu1  ;;  %v2005_v13 = vpop.f32.mrb[50].mxu0  ;;  %v8379_v53 = vld [vmem:[%s9652_s8 + $0x28] ss:$16 sps:$4 sm:$0xff]   ;;  %v8391_v7 = vld [vmem:[%s9652_s8 + $0x4c] ss:$16 sps:$4 sm:$0xff]  }
 0x48a   :  { %v5966_v41 = vmul.f32 -1.442695, %v2008_v50  ;;  %v1965_v14 = vpop.f32.mrb[51].mxu1  ;;  %v2006_v59 = vpop.f32.mrb[51].mxu0  ;;  %v8400_v3 = vld [vmem:[%s9652_s8 + $0x40] ss:$16 sps:$4 sm:$0xff]  }
 0x48b   :  { %v5967_v43 = vmul.f32 -1.442695, %v2009_v2  ;;  %v5968_v60 = vmul.f32 -1.442695, %v2011_v11  ;;  %v8405_v2 = vld [vmem:[%s9652_s8 + $0x48] ss:$16 sps:$4 sm:$0xff]  }
 0x48c   :  { %6879 = vpow2.f32 %v5966_v41  ;;  %v8412_v54 = vld [vmem:[%s9652_s8 + $0x64] ss:$16 sps:$4 sm:$0xff]   ;;  %v8417_v11 = vld [vmem:[%s9652_s8 + $0x6c] ss:$16 sps:$4 sm:$0xff]   ;;  %v8424_v13 = vld [vmem:[%s9652_s8 + $0x60] ss:$16 sps:$4 sm:$0xff]  }
 0x48d   :  { %6881 = vpow2.f32 %v5967_v43  ;;  %v8429_v41 = vld [vmem:[%s9652_s8 + $0x68] ss:$16 sps:$4 sm:$0xff]   ;;  %v8436_v59 = vld [vmem:[%s9652_s8 + $0x84] ss:$16 sps:$4 sm:$0xff]   ;;  %v8441_v43 = vld [vmem:[%s9652_s8 + $0x8c] ss:$16 sps:$4 sm:$0xff]  }
 0x48e   :  { %6883 = vpow2.f32 %v5968_v60 }
 0x48f   :  { %6885 = vtanh.f32 %v2010_v36  ;;  %v8386_v36 = vld [vmem:[%s9652_s8 + $0x44] ss:$16 sps:$4 sm:$0xff]  }
 0x493   :  { %v6878_v57 = vpop.eup %6877 }
 0x494   :  { %v2035_v58 = vmul.f32 %v6878_v57, %v6876_v56 }
 0x496   :  { %v6880_v61 = vpop.eup %6879  ;;  %5969 = vst [vmem:[%s9653_s9 + $0x8] sm:$0xff] %v2035_v58  ;;  %v2069_v22 = vpack.c.bf16 %v2035_v58, %v2035_v58 }
 0x497   :  { %v6882_v37 = vpop.eup %6881  ;;  %v2039_v4 = vadd.f32 1.0, %v6880_v61 }
 0x498   :  { %v2045_v50 = vadd.f32 1.0, %v6882_v37  ;;  %2295 = vmatmul.mubr.bf16.vlgmr.msra.gmra.mrb[52].mxu1 %v2069_v22  ;;  %2336 = vmatmul.mubr.bf16.vlgmr.msra.gmra.mrb[52].mxu0 %v2069_v22  ;;  %v6884_v12 = vpop.eup %6883  ;;  %v8449_v22 = vld [vmem:[%s9652_s8 + $0x80] ss:$16 sps:$4 sm:$0xff]   ;;  %v8454_v37 = vld [vmem:[%s9652_s8 + $0x88] ss:$16 sps:$4 sm:$0xff]  }
 0x499   :  { %6887 = vrcp.f32 %v2039_v4  ;;  %2547 = vmatpush1.bf16.msra.mxu1 %v8349_v16  ;;  %2588 = vmatpush1.bf16.msra.mxu0 %v8354_v17  ;;  %v6886_v14 = vpop.eup %6885  ;;  %v2052_v58 = vadd.f32 1.0, %v6884_v12  ;;  %v8466_v4 = vld [vmem:[%s9652_s8 + $0xac] ss:$16 sps:$4 sm:$0xff]   ;;  %v8476_v12 = vld [vmem:[%s9652_s8 + $0xa0] ss:$16 sps:$4 sm:$0xff]  }
 0x49a   :  { %6889 = vrcp.f32 %v2045_v50  ;;  %2548 = vmatprep.subr.bf16.mxu1 %v8362_v52  ;;  %2589 = vmatprep.subr.bf16.mxu0 %v8367_v0  ;;  %9749 = vst [vmem:[#allocation12_spill] sm:$0xff] %v8466_v4  ;;  %9750 = vst [vmem:[#allocation61_spill] sm:$0xff] %v8476_v12 }
 0x49b   :  { %2578 = vmatprep.mubr.bf16.mxu1 %v9684_v62  ;;  %2619 = vmatprep.mubr.bf16.mxu0 %v9684_v62  ;;  %6891 = vrcp.f32 %v2052_v58  ;;  %v8505_v58 = vld [vmem:[%s9652_s8 + $0xc8] ss:$16 sps:$4 sm:$0xff]  }
 0x49c   :  { %9754 = vst [vmem:[#allocation65_spill] sm:$0xff] %v8505_v58 }
 0x49d   :  { %2549 = vmatpush1.bf16.msra.mxu1 %v8374_v49  ;;  %2590 = vmatpush1.bf16.msra.mxu0 %v8379_v53 }
 0x49e   :  { %2550 = vmatprep.subr.bf16.mxu1 %v8386_v36  ;;  %2591 = vmatprep.subr.bf16.mxu0 %v8391_v7 }
 0x4a1   :  { %2551 = vmatpush1.bf16.msra.mxu1 %v8400_v3  ;;  %2592 = vmatpush1.bf16.msra.mxu0 %v8405_v2 }
 0x4a2   :  { %2552 = vmatprep.subr.bf16.mxu1 %v8412_v54  ;;  %2593 = vmatprep.subr.bf16.mxu0 %v8417_v11 }
 0x4a3   :  { %v6888_v56 = vpop.eup %6887 }
 0x4a4   :  { %v6890_v57 = vpop.eup %6889  ;;  %v2056_v60 = vmul.f32 %v6888_v56, %v6886_v14  ;;  %v8481_v14 = vld [vmem:[%s9652_s8 + $0xa8] ss:$16 sps:$4 sm:$0xff]   ;;  %v8488_v56 = vld [vmem:[%s9652_s8 + $0xc4] ss:$16 sps:$4 sm:$0xff]  }
 0x4a5   :  { %v2055_v61 = vmul.f32 %v6890_v57, %v8108_v15  ;;  %2553 = vmatpush1.bf16.msra.mxu1 %v8424_v13  ;;  %2594 = vmatpush1.bf16.msra.mxu0 %v8429_v41  ;;  %v8461_v15 = vld [vmem:[%s9652_s8 + $0xa4] ss:$16 sps:$4 sm:$0xff]   ;;  %9751 = vst [vmem:[#allocation62_spill] sm:$0xff] %v8481_v14  ;;  %9752 = vst [vmem:[#allocation63_spill] sm:$0xff] %v8488_v56  ;;  %v8493_v57 = vld [vmem:[%s9652_s8 + $0xcc] ss:$16 sps:$4 sm:$0xff]  }
 0x4a6   :  { %2554 = vmatprep.subr.bf16.mxu1 %v8436_v59  ;;  %2595 = vmatprep.subr.bf16.mxu0 %v8441_v43  ;;  %9748 = vst [vmem:[#allocation11_spill] sm:$0xff] %v8461_v15  ;;  %9753 = vst [vmem:[#allocation64_spill] sm:$0xff] %v8493_v57 }
 0x4a7   :  { %v8468_v50 = vadd.f32 %v2056_v60, %v2055_v61  ;;  %v8500_v60 = vld [vmem:[%s9652_s8 + $0xc0] ss:$16 sps:$4 sm:$0xff]   ;;  %v8512_v61 = vld [vmem:[%s9652_s8 + $0xe4] ss:$16 sps:$4 sm:$0xff]  }
 0x4a9   :  { %6893 = vtanh.f32 %v8468_v50  ;;  %2555 = vmatpush1.bf16.msra.mxu1 %v8449_v22  ;;  %2596 = vmatpush1.bf16.msra.mxu0 %v8454_v37 }
 0x4aa   :  { %2556 = vmatprep.subr.bf16.mxu1 %v8461_v15  ;;  %2597 = vmatprep.subr.bf16.mxu0 %v8466_v4 }
 0x4ad   :  { %2557 = vmatpush1.bf16.msra.mxu1 %v8476_v12  ;;  %2598 = vmatpush1.bf16.msra.mxu0 %v8481_v14  ;;  %v8517_v14 = vld [vmem:[%s9652_s8 + $0xec] ss:$16 sps:$4 sm:$0xff]   ;;  %v6892_v12 = vpop.eup %6891 }
 0x4ae   :  { %2558 = vmatprep.subr.bf16.mxu1 %v8488_v56  ;;  %2599 = vmatprep.subr.bf16.mxu0 %v8493_v57  ;;  %v8524_v56 = vld [vmem:[%s9652_s8 + $0xe0] ss:$16 sps:$4 sm:$0xff]   ;;  %v8529_v57 = vld [vmem:[%s9652_s8 + $0xe8] ss:$16 sps:$4 sm:$0xff]  }
 0x4b1   :  { %2559 = vmatpush1.bf16.msra.mxu1 %v8500_v60  ;;  %2600 = vmatpush1.bf16.msra.mxu0 %v8505_v58 }
 0x4b2   :  { %2560 = vmatprep.subr.bf16.mxu1 %v8512_v61  ;;  %2601 = vmatprep.subr.bf16.mxu0 %v8517_v14 }
 0x4b3   :  { %v6894_v4 = vpop.eup %6893 }
 0x4b4   :  { %v2059_v15 = vmul.f32 %v6894_v4, %v6892_v12  ;;  %v9760_v4 = vld [vmem:[#allocation58_spill] sm:$0xff] }
 0x4b5   :  { %2561 = vmatpush1.bf16.msra.mxu1 %v8524_v56  ;;  %2602 = vmatpush1.bf16.msra.mxu0 %v8529_v57 }
 0x4b6   :  { %5970 = vst [vmem:[%s9654_s10 + $0x30] sm:$0xff] %v2059_v15  ;;  %v2353_v58 = vpack.c.bf16 %v2059_v15, %v2059_v15  ;;  %2882 = vmatprep.subr.bf16.mxu1 %v8133_v26  ;;  %2923 = vmatprep.subr.bf16.mxu0 %v8138_v18 }
 0x4b8   :  { %2579 = vmatmul.mubr.bf16.vlgmr.msra.gmra.mrb[56].mxu1 %v2353_v58  ;;  %2620 = vmatmul.mubr.bf16.vlgmr.msra.gmra.mrb[56].mxu0 %v2353_v58 }
 0x4b9   :  { %2883 = vmatpush1.bf16.msra.mxu1 %v8143_v27  ;;  %2924 = vmatpush1.bf16.msra.mxu0 %v8148_v28  ;;  %v9755_v27 = vld [vmem:[#allocation13_spill] sm:$0xff] }
 0x4ba   :  { %2884 = vmatprep.subr.bf16.mxu1 %v8157_v19  ;;  %2925 = vmatprep.subr.bf16.mxu0 %v8162_v20  ;;  %v9756_v19 = vld [vmem:[#allocation14_spill] sm:$0xff] }
 0x4bb   :  { %2914 = vmatprep.mubr.bf16.mxu1 %v9684_v62  ;;  %2955 = vmatprep.mubr.bf16.mxu0 %v9684_v62 }
 0x4bd   :  { %2885 = vmatpush1.bf16.msra.mxu1 %v8167_v21  ;;  %2926 = vmatpush1.bf16.msra.mxu0 %v8172_v29 }
 0x4be   :  { %2886 = vmatprep.subr.bf16.mxu1 %v8181_v23  ;;  %2927 = vmatprep.subr.bf16.mxu0 %v8186_v24  ;;  %v9757_v23 = vld [vmem:[#allocation15_spill] sm:$0xff] }
 0x4c1   :  { %2887 = vmatpush1.bf16.msra.mxu1 %v8191_v25  ;;  %2928 = vmatpush1.bf16.msra.mxu0 %v8196_v30  ;;  %v9758_v25 = vld [vmem:[#allocation16_spill] sm:$0xff] }
 0x4c2   :  { %2888 = vmatprep.subr.bf16.mxu1 %v8205_v31  ;;  %2929 = vmatprep.subr.bf16.mxu0 %v8210_v32 }
 0x4c5   :  { %2889 = vmatpush1.bf16.msra.mxu1 %v8215_v33  ;;  %2930 = vmatpush1.bf16.msra.mxu0 %v8220_v5 }
 0x4c6   :  { %2890 = vmatprep.subr.bf16.mxu1 %v8229_v34  ;;  %2931 = vmatprep.subr.bf16.mxu0 %v8234_v35 }
 0x4c9   :  { %2891 = vmatpush1.bf16.msra.mxu1 %v8239_v9  ;;  %2932 = vmatpush1.bf16.msra.mxu0 %v8244_v63 }
 0x4ca   :  { %2892 = vmatprep.subr.bf16.mxu1 %v8253_v10  ;;  %2933 = vmatprep.subr.bf16.mxu0 %v8258_v40 }
 0x4cd   :  { %2893 = vmatpush1.bf16.msra.mxu1 %v8263_v8  ;;  %2934 = vmatpush1.bf16.msra.mxu0 %v8268_v6 }
 0x4ce   :  { %2894 = vmatprep.subr.bf16.mxu1 %v8277_v39  ;;  %2935 = vmatprep.subr.bf16.mxu0 %v8282_v42 }
 0x4d1   :  { %2895 = vmatpush1.bf16.msra.mxu1 %v8287_v44  ;;  %2936 = vmatpush1.bf16.msra.mxu0 %v8292_v46 }
 0x4d2   :  { %2896 = vmatprep.subr.bf16.mxu1 %v8301_v45  ;;  %2937 = vmatprep.subr.bf16.mxu0 %v8306_v47 }
 0x4d5   :  { %2897 = vmatpush1.bf16.msra.mxu1 %v8311_v48  ;;  %2938 = vmatpush1.bf16.msra.mxu0 %v8316_v38 }
 0x4d6   :  { %3166 = vmatprep.subr.bf16.mxu1 %v8325_v55  ;;  %3207 = vmatprep.subr.bf16.mxu0 %v8330_v1  ;;  %v9759_v1 = vld [vmem:[#allocation57_spill] sm:$0xff] }
 0x56b   :  { %v2296_v26 = vpop.f32.mrb[52].mxu1  ;;  %v2337_v18 = vpop.f32.mrb[52].mxu0 }
 0x56c   :  { %v2344_v28 = vadd.f32 %v2296_v26, %v9755_v27  ;;  %v2346_v20 = vadd.f32 %v2337_v18, %v9756_v19  ;;  %v2298_v21 = vpop.f32.mrb[53].mxu1  ;;  %v2339_v29 = vpop.f32.mrb[53].mxu0  ;;  %v9761_v18 = vld [vmem:[#allocation59_spill] sm:$0xff] }
 0x56d   :  { %v2345_v24 = vadd.f32 %v2298_v21, %v9757_v23  ;;  %v2347_v30 = vadd.f32 %v2339_v29, %v9758_v25  ;;  %v2300_v31 = vpop.f32.mrb[54].mxu1  ;;  %v2341_v32 = vpop.f32.mrb[54].mxu0 }
 0x56e   :  { %v6035_v33 = vmul.f32 -1.442695, %v2344_v28  ;;  %v2301_v5 = vpop.f32.mrb[55].mxu1  ;;  %v2342_v34 = vpop.f32.mrb[55].mxu0  ;;  %v9762_v28 = vld [vmem:[#allocation60_spill] sm:$0xff] }
 0x56f   :  { %v6036_v35 = vmul.f32 -1.442695, %v2345_v24  ;;  %v6037_v9 = vmul.f32 -1.442695, %v2347_v30 }
 0x570   :  { %6895 = vpow2.f32 %v6035_v33 }
 0x571   :  { %6897 = vpow2.f32 %v6036_v35 }
 0x572   :  { %6899 = vpow2.f32 %v6037_v9 }
 0x573   :  { %6901 = vtanh.f32 %v2346_v20 }
 0x57a   :  { %v6896_v63 = vpop.eup %6895 }
 0x57b   :  { %v6898_v10 = vpop.eup %6897  ;;  %v2635_v40 = vadd.f32 1.0, %v6896_v63 }
 0x57c   :  { %v2641_v8 = vadd.f32 1.0, %v6898_v10  ;;  %v6900_v6 = vpop.eup %6899  ;;  %v8667_v10 = vld [vmem:[%s9651_s7 + $0x20] ss:$16 sps:$4 sm:$0xff]  }
 0x57d   :  { %6903 = vrcp.f32 %v2635_v40  ;;  %v6902_v39 = vpop.eup %6901  ;;  %v2648_v45 = vadd.f32 1.0, %v6900_v6  ;;  %v8672_v40 = vld [vmem:[%s9651_s7 + $0x28] ss:$16 sps:$4 sm:$0xff]   ;;  %v8686_v6 = vld [vmem:[%s9651_s7 + $0x4c] ss:$16 sps:$4 sm:$0xff]  }
 0x57e   :  { %6905 = vrcp.f32 %v2641_v8  ;;  %v8681_v8 = vld [vmem:[%s9651_s7 + $0x44] ss:$16 sps:$4 sm:$0xff]  }
 0x57f   :  { %6907 = vrcp.f32 %v2648_v45  ;;  %v8715_v45 = vld [vmem:[%s9651_s7 + $0x60] ss:$16 sps:$4 sm:$0xff]  }
 0x587   :  { %v6904_v42 = vpop.eup %6903 }
 0x588   :  { %v6906_v44 = vpop.eup %6905  ;;  %v2652_v46 = vmul.f32 %v6904_v42, %v6902_v39  ;;  %v8691_v39 = vld [vmem:[%s9651_s7 + $0x40] ss:$16 sps:$4 sm:$0xff]   ;;  %v8696_v42 = vld [vmem:[%s9651_s7 + $0x48] ss:$16 sps:$4 sm:$0xff]  }
 0x589   :  { %v2651_v47 = vmul.f32 %v6906_v44, %v8339_v51  ;;  %v6908_v25 = vpop.eup %6907  ;;  %v8705_v44 = vld [vmem:[%s9651_s7 + $0x64] ss:$16 sps:$4 sm:$0xff]  }
 0x58b   :  { %v8579_v48 = vadd.f32 %v2652_v46, %v2651_v47  ;;  %v2580_v38 = vpop.f32.mrb[56].mxu1  ;;  %v2621_v55 = vpop.f32.mrb[56].mxu0  ;;  %v8710_v46 = vld [vmem:[%s9651_s7 + $0x6c] ss:$16 sps:$4 sm:$0xff]   ;;  %v8720_v47 = vld [vmem:[%s9651_s7 + $0x68] ss:$16 sps:$4 sm:$0xff]  }
 0x58c   :  { %v2628_v15 = vadd.f32 %v2580_v38, %v9759_v1  ;;  %v2630_v12 = vadd.f32 %v2621_v55, %v9760_v4  ;;  %v2582_v58 = vpop.f32.mrb[57].mxu1  ;;  %v2623_v26 = vpop.f32.mrb[57].mxu0  ;;  %v8729_v38 = vld [vmem:[%s9651_s7 + $0x84] ss:$16 sps:$4 sm:$0xff]   ;;  %v8734_v55 = vld [vmem:[%s9651_s7 + $0x8c] ss:$16 sps:$4 sm:$0xff]  }
 0x58d   :  { %6909 = vtanh.f32 %v8579_v48  ;;  %v2629_v27 = vadd.f32 %v2582_v58, %v9761_v18  ;;  %v2631_v19 = vadd.f32 %v2623_v26, %v9762_v28  ;;  %v2584_v20 = vpop.f32.mrb[58].mxu1  ;;  %v2625_v21 = vpop.f32.mrb[58].mxu0  ;;  %v8739_v1 = vld [vmem:[%s9651_s7 + $0x80] ss:$16 sps:$4 sm:$0xff]   ;;  %v8753_v4 = vld [vmem:[%s9651_s7 + $0xa4] ss:$16 sps:$4 sm:$0xff]  }
 0x58e   :  { %v6038_v51 = vmul.f32 -1.442695, %v2628_v15  ;;  %v2585_v29 = vpop.f32.mrb[59].mxu1  ;;  %v2626_v23 = vpop.f32.mrb[59].mxu0  ;;  %v8744_v15 = vld [vmem:[%s9651_s7 + $0x88] ss:$16 sps:$4 sm:$0xff]  }
 0x58f   :  { %v6039_v24 = vmul.f32 -1.442695, %v2629_v27  ;;  %v6040_v31 = vmul.f32 -1.442695, %v2631_v19  ;;  %v8763_v58 = vld [vmem:[%s9651_s7 + $0xa0] ss:$16 sps:$4 sm:$0xff]  }
 0x590   :  { %6911 = vpow2.f32 %v6038_v51  ;;  %v8768_v26 = vld [vmem:[%s9651_s7 + $0xa8] ss:$16 sps:$4 sm:$0xff]   ;;  %v8777_v18 = vld [vmem:[%s9651_s7 + $0xc4] ss:$16 sps:$4 sm:$0xff]   ;;  %v8782_v27 = vld [vmem:[%s9651_s7 + $0xcc] ss:$16 sps:$4 sm:$0xff]  }
 0x591   :  { %6913 = vpow2.f32 %v6039_v24  ;;  %v8787_v28 = vld [vmem:[%s9651_s7 + $0xc0] ss:$16 sps:$4 sm:$0xff]   ;;  %v8792_v19 = vld [vmem:[%s9651_s7 + $0xc8] ss:$16 sps:$4 sm:$0xff]   ;;  %v8801_v20 = vld [vmem:[%s9651_s7 + $0xe4] ss:$16 sps:$4 sm:$0xff]  }
 0x592   :  { %6915 = vpow2.f32 %v6040_v31  ;;  %v8806_v21 = vld [vmem:[%s9651_s7 + $0xec] ss:$16 sps:$4 sm:$0xff]   ;;  %v8811_v51 = vld [vmem:[%s9651_s7 + $0xe0] ss:$16 sps:$4 sm:$0xff]   ;;  %v8816_v29 = vld [vmem:[%s9651_s7 + $0xe8] ss:$16 sps:$4 sm:$0xff]  }
 0x593   :  { %6917 = vtanh.f32 %v2630_v12  ;;  %v8758_v12 = vld [vmem:[%s9651_s7 + $0xac] ss:$16 sps:$4 sm:$0xff]   ;;  %v8825_v23 = vld [vmem:[%s9652_s8 + $0x4] ss:$16 sps:$4 sm:$0xff]  }
 0x594   :  { %v8830_v24 = vld [vmem:[%s9652_s8 + $0xc] ss:$16 sps:$4 sm:$0xff]  }
 0x595   :  { %v9770_v31 = vld [vmem:[#allocation17_spill] sm:$0xff] }
 0x597   :  { %v6910_v30 = vpop.eup %6909 }
 0x598   :  { %v2655_v32 = vmul.f32 %v6910_v30, %v6908_v25 }
 0x59a   :  { %v6912_v33 = vpop.eup %6911  ;;  %6041 = vst [vmem:[%s9653_s9 + $0x10] sm:$0xff] %v2655_v32  ;;  %v2689_v5 = vpack.c.bf16 %v2655_v32, %v2655_v32 }
 0x59b   :  { %v6914_v34 = vpop.eup %6913  ;;  %v2659_v35 = vadd.f32 1.0, %v6912_v33  ;;  %v9771_v33 = vld [vmem:[#allocation18_spill] sm:$0xff] }
 0x59c   :  { %v2665_v9 = vadd.f32 1.0, %v6914_v34  ;;  %2915 = vmatmul.mubr.bf16.vlgmr.msra.gmra.mrb[60].mxu1 %v2689_v5  ;;  %2956 = vmatmul.mubr.bf16.vlgmr.msra.gmra.mrb[60].mxu0 %v2689_v5 }
 0x59d   :  { %6919 = vrcp.f32 %v2659_v35  ;;  %3167 = vmatpush1.bf16.msra.mxu1 %v8349_v16  ;;  %3208 = vmatpush1.bf16.msra.mxu0 %v8354_v17  ;;  %v6916_v16 = vpop.eup %6915 }
 0x59e   :  { %6921 = vrcp.f32 %v2665_v9  ;;  %3168 = vmatprep.subr.bf16.mxu1 %v8362_v52  ;;  %3209 = vmatprep.subr.bf16.mxu0 %v8367_v0  ;;  %v6918_v17 = vpop.eup %6917  ;;  %v9772_v9 = vld [vmem:[#allocation19_spill] sm:$0xff] }
 0x59f   :  { %3198 = vmatprep.mubr.bf16.mxu1 %v9684_v62  ;;  %3239 = vmatprep.mubr.bf16.mxu0 %v9684_v62 }
 0x5a1   :  { %3169 = vmatpush1.bf16.msra.mxu1 %v8374_v49  ;;  %3210 = vmatpush1.bf16.msra.mxu0 %v8379_v53  ;;  %v2672_v49 = vadd.f32 1.0, %v6916_v16 }
 0x5a2   :  { %3170 = vmatprep.subr.bf16.mxu1 %v8386_v36  ;;  %3211 = vmatprep.subr.bf16.mxu0 %v8391_v7  ;;  %v9763_v7 = vld [vmem:[#allocation11_spill] sm:$0xff] }
 0x5a3   :  { %6923 = vrcp.f32 %v2672_v49 }
 0x5a5   :  { %3171 = vmatpush1.bf16.msra.mxu1 %v8400_v3  ;;  %3212 = vmatpush1.bf16.msra.mxu0 %v8405_v2  ;;  %v9764_v3 = vld [vmem:[#allocation12_spill] sm:$0xff]  ;;  %v9765_v2 = vld [vmem:[#allocation61_spill] sm:$0xff] }
 0x5a6   :  { %3172 = vmatprep.subr.bf16.mxu1 %v8412_v54  ;;  %3213 = vmatprep.subr.bf16.mxu0 %v8417_v11  ;;  %v9766_v54 = vld [vmem:[#allocation62_spill] sm:$0xff]  ;;  %v9767_v11 = vld [vmem:[#allocation63_spill] sm:$0xff] }
 0x5a7   :  { %v6920_v52 = vpop.eup %6919 }
 0x5a8   :  { %v6922_v0 = vpop.eup %6921  ;;  %v2676_v63 = vmul.f32 %v6920_v52, %v6918_v17  ;;  %v9773_v17 = vld [vmem:[#allocation20_spill] sm:$0xff] }
 0x5a9   :  { %v2675_v53 = vmul.f32 %v6922_v0, %v8468_v50  ;;  %3173 = vmatpush1.bf16.msra.mxu1 %v8424_v13  ;;  %3214 = vmatpush1.bf16.msra.mxu0 %v8429_v41  ;;  %v9768_v13 = vld [vmem:[#allocation64_spill] sm:$0xff]  ;;  %v9769_v41 = vld [vmem:[#allocation65_spill] sm:$0xff] }
 0x5aa   :  { %3174 = vmatprep.subr.bf16.mxu1 %v8436_v59  ;;  %3215 = vmatprep.subr.bf16.mxu0 %v8441_v43  ;;  %v8633_v50 = vld [vmem:[%s9651_s7 + $0x4] ss:$16 sps:$4 sm:$0xff]  }
 0x5ab   :  { %v8608_v36 = vadd.f32 %v2676_v63, %v2675_v53 }
 0x5ad   :  { %6925 = vtanh.f32 %v8608_v36  ;;  %3175 = vmatpush1.bf16.msra.mxu1 %v8449_v22  ;;  %3216 = vmatpush1.bf16.msra.mxu0 %v8454_v37  ;;  %v6924_v59 = vpop.eup %6923 }
 0x5ae   :  { %3176 = vmatprep.subr.bf16.mxu1 %v9763_v7  ;;  %3217 = vmatprep.subr.bf16.mxu0 %v9764_v3 }
 0x5b1   :  { %3177 = vmatpush1.bf16.msra.mxu1 %v9765_v2  ;;  %3218 = vmatpush1.bf16.msra.mxu0 %v9766_v54 }
 0x5b2   :  { %3178 = vmatprep.subr.bf16.mxu1 %v9767_v11  ;;  %3219 = vmatprep.subr.bf16.mxu0 %v9768_v13 }
 0x5b5   :  { %3179 = vmatpush1.bf16.msra.mxu1 %v8500_v60  ;;  %3220 = vmatpush1.bf16.msra.mxu0 %v9769_v41  ;;  %v8657_v60 = vld [vmem:[%s9651_s7 + $0x24] ss:$16 sps:$4 sm:$0xff]  }
 0x5b6   :  { %3180 = vmatprep.subr.bf16.mxu1 %v8512_v61  ;;  %3221 = vmatprep.subr.bf16.mxu0 %v8517_v14  ;;  %v8638_v14 = vld [vmem:[%s9651_s7 + $0xc] ss:$16 sps:$4 sm:$0xff]  }
 0x5b7   :  { %v6926_v43 = vpop.eup %6925  ;;  %v8662_v61 = vld [vmem:[%s9651_s7 + $0x2c] ss:$16 sps:$4 sm:$0xff]  }
 0x5b8   :  { %v2679_v22 = vmul.f32 %v6926_v43, %v6924_v59 }
 0x5b9   :  { %3181 = vmatpush1.bf16.msra.mxu1 %v8524_v56  ;;  %3222 = vmatpush1.bf16.msra.mxu0 %v8529_v57  ;;  %v8643_v56 = vld [vmem:[%s9651_s7] ss:$16 sps:$4 sm:$0xff]   ;;  %v8648_v57 = vld [vmem:[%s9651_s7 + $0x8] ss:$16 sps:$4 sm:$0xff]  }
 0x5ba   :  { %6042 = vst [vmem:[%s9654_s10 + $0x28] sm:$0xff] %v2679_v22  ;;  %v2973_v37 = vpack.c.bf16 %v2679_v22, %v2679_v22  ;;  %3502 = vmatprep.subr.bf16.mxu1 %v8633_v50  ;;  %3543 = vmatprep.subr.bf16.mxu0 %v8638_v14 }
 0x5bc   :  { %3199 = vmatmul.mubr.bf16.vlgmr.msra.gmra.mrb[64].mxu1 %v2973_v37  ;;  %3240 = vmatmul.mubr.bf16.vlgmr.msra.gmra.mrb[64].mxu0 %v2973_v37 }
 0x5bd   :  { %3534 = vmatprep.mubr.bf16.mxu1 %v9684_v62  ;;  %3575 = vmatprep.mubr.bf16.mxu0 %v9684_v62 }
 0x5be   :  { %3503 = vmatpush1.bf16.msra.mxu1 %v8643_v56  ;;  %3544 = vmatpush1.bf16.msra.mxu0 %v8648_v57 }
 0x5bf   :  { %3504 = vmatprep.subr.bf16.mxu1 %v8657_v60  ;;  %3545 = vmatprep.subr.bf16.mxu0 %v8662_v61 }
 0x5c2   :  { %3505 = vmatpush1.bf16.msra.mxu1 %v8667_v10  ;;  %3546 = vmatpush1.bf16.msra.mxu0 %v8672_v40 }
 0x5c3   :  { %3506 = vmatprep.subr.bf16.mxu1 %v8681_v8  ;;  %3547 = vmatprep.subr.bf16.mxu0 %v8686_v6 }
 0x5c6   :  { %3507 = vmatpush1.bf16.msra.mxu1 %v8691_v39  ;;  %3548 = vmatpush1.bf16.msra.mxu0 %v8696_v42 }
 0x5c7   :  { %3508 = vmatprep.subr.bf16.mxu1 %v8705_v44  ;;  %3549 = vmatprep.subr.bf16.mxu0 %v8710_v46 }
 0x5ca   :  { %3509 = vmatpush1.bf16.msra.mxu1 %v8715_v45  ;;  %3550 = vmatpush1.bf16.msra.mxu0 %v8720_v47 }
 0x5cb   :  { %3510 = vmatprep.subr.bf16.mxu1 %v8729_v38  ;;  %3551 = vmatprep.subr.bf16.mxu0 %v8734_v55 }
 0x5ce   :  { %3511 = vmatpush1.bf16.msra.mxu1 %v8739_v1  ;;  %3552 = vmatpush1.bf16.msra.mxu0 %v8744_v15 }
 0x5cf   :  { %3512 = vmatprep.subr.bf16.mxu1 %v8753_v4  ;;  %3553 = vmatprep.subr.bf16.mxu0 %v8758_v12 }
 0x5d2   :  { %3513 = vmatpush1.bf16.msra.mxu1 %v8763_v58  ;;  %3554 = vmatpush1.bf16.msra.mxu0 %v8768_v26 }
 0x5d3   :  { %3514 = vmatprep.subr.bf16.mxu1 %v8777_v18  ;;  %3555 = vmatprep.subr.bf16.mxu0 %v8782_v27 }
 0x5d6   :  { %3515 = vmatpush1.bf16.msra.mxu1 %v8787_v28  ;;  %3556 = vmatpush1.bf16.msra.mxu0 %v8792_v19 }
 0x5d7   :  { %3516 = vmatprep.subr.bf16.mxu1 %v8801_v20  ;;  %3557 = vmatprep.subr.bf16.mxu0 %v8806_v21 }
 0x5da   :  { %3517 = vmatpush1.bf16.msra.mxu1 %v8811_v51  ;;  %3558 = vmatpush1.bf16.msra.mxu0 %v8816_v29 }
 0x5db   :  { %3786 = vmatprep.subr.bf16.mxu1 %v8825_v23  ;;  %3827 = vmatprep.subr.bf16.mxu0 %v8830_v24 }
 0x66f   :  { %v2916_v25 = vpop.f32.mrb[60].mxu1  ;;  %v2957_v30 = vpop.f32.mrb[60].mxu0 }
 0x670   :  { %v2964_v32 = vadd.f32 %v2916_v25, %v9770_v31  ;;  %v2966_v5 = vadd.f32 %v2957_v30, %v9771_v33  ;;  %v2918_v34 = vpop.f32.mrb[61].mxu1  ;;  %v2959_v35 = vpop.f32.mrb[61].mxu0 }
 0x671   :  { %v2965_v16 = vadd.f32 %v2918_v34, %v9772_v9  ;;  %v2967_v52 = vadd.f32 %v2959_v35, %v9773_v17  ;;  %v2920_v0 = vpop.f32.mrb[62].mxu1  ;;  %v2961_v63 = vpop.f32.mrb[62].mxu0  ;;  %v9774_v35 = vld [vmem:[#allocation53_spill] sm:$0xff] }
 0x672   :  { %v6107_v49 = vmul.f32 -1.442695, %v2964_v32  ;;  %v2921_v53 = vpop.f32.mrb[63].mxu1  ;;  %v2962_v7 = vpop.f32.mrb[63].mxu0  ;;  %v9776_v0 = vld [vmem:[#allocation55_spill] sm:$0xff] }
 0x673   :  { %v6108_v3 = vmul.f32 -1.442695, %v2965_v16  ;;  %v6109_v2 = vmul.f32 -1.442695, %v2967_v52  ;;  %v9775_v16 = vld [vmem:[#allocation54_spill] sm:$0xff] }
 0x674   :  { %6927 = vpow2.f32 %v6107_v49  ;;  %v9777_v49 = vld [vmem:[#allocation56_spill] sm:$0xff] }
 0x675   :  { %6929 = vpow2.f32 %v6108_v3 }
 0x676   :  { %6931 = vpow2.f32 %v6109_v2 }
 0x677   :  { %6933 = vtanh.f32 %v2966_v5 }
 0x67e   :  { %v6928_v54 = vpop.eup %6927 }
 0x67f   :  { %v6930_v11 = vpop.eup %6929  ;;  %v3255_v13 = vadd.f32 1.0, %v6928_v54 }
 0x680   :  { %v3261_v41 = vadd.f32 1.0, %v6930_v11  ;;  %v6932_v59 = vpop.eup %6931 }
 0x681   :  { %6935 = vrcp.f32 %v3255_v13  ;;  %v6934_v43 = vpop.eup %6933  ;;  %v3268_v30 = vadd.f32 1.0, %v6932_v59 }
 0x682   :  { %6937 = vrcp.f32 %v3261_v41 }
 0x683   :  { %6939 = vrcp.f32 %v3268_v30 }
 0x68b   :  { %v6936_v22 = vpop.eup %6935 }
 0x68c   :  { %v6938_v37 = vpop.eup %6937  ;;  %v3272_v25 = vmul.f32 %v6936_v22, %v6934_v43  ;;  %v8849_v22 = vld [vmem:[%s9652_s8] ss:$16 sps:$4 sm:$0xff]  }
 0x68d   :  { %v3271_v31 = vmul.f32 %v6938_v37, %v8579_v48  ;;  %v6940_v13 = vpop.eup %6939  ;;  %v8854_v37 = vld [vmem:[%s9652_s8 + $0x8] ss:$16 sps:$4 sm:$0xff]  }
 0x68f   :  { %v8839_v32 = vadd.f32 %v3272_v25, %v3271_v31  ;;  %v3200_v33 = vpop.f32.mrb[64].mxu1  ;;  %v3241_v34 = vpop.f32.mrb[64].mxu0  ;;  %v8862_v31 = vld [vmem:[%s9652_s8 + $0x24] ss:$16 sps:$4 sm:$0xff]  }
 0x690   :  { %v3248_v9 = vadd.f32 %v3200_v33, %v9774_v35  ;;  %v3250_v5 = vadd.f32 %v3241_v34, %v9775_v16  ;;  %v3202_v17 = vpop.f32.mrb[65].mxu1  ;;  %v3243_v52 = vpop.f32.mrb[65].mxu0  ;;  %v8867_v33 = vld [vmem:[%s9652_s8 + $0x2c] ss:$16 sps:$4 sm:$0xff]   ;;  %v8874_v16 = vld [vmem:[%s9652_s8 + $0x20] ss:$16 sps:$4 sm:$0xff]  }
 0x691   :  { %6941 = vtanh.f32 %v8839_v32  ;;  %v3249_v63 = vadd.f32 %v3202_v17, %v9776_v0  ;;  %v3251_v53 = vadd.f32 %v3243_v52, %v9777_v49  ;;  %v3204_v7 = vpop.f32.mrb[66].mxu1  ;;  %v3245_v3 = vpop.f32.mrb[66].mxu0  ;;  %v8879_v17 = vld [vmem:[%s9652_s8 + $0x28] ss:$16 sps:$4 sm:$0xff]   ;;  %v8891_v52 = vld [vmem:[%s9652_s8 + $0x4c] ss:$16 sps:$4 sm:$0xff]  }
 0x692   :  { %v6110_v48 = vmul.f32 -1.442695, %v3248_v9  ;;  %v3205_v2 = vpop.f32.mrb[67].mxu1  ;;  %v3246_v54 = vpop.f32.mrb[67].mxu0  ;;  %v8900_v0 = vld [vmem:[%s9652_s8 + $0x40] ss:$16 sps:$4 sm:$0xff]  }
 0x693   :  { %v6111_v11 = vmul.f32 -1.442695, %v3249_v63  ;;  %v6112_v59 = vmul.f32 -1.442695, %v3251_v53  ;;  %v8905_v63 = vld [vmem:[%s9652_s8 + $0x48] ss:$16 sps:$4 sm:$0xff]  }
 0x694   :  { %6943 = vpow2.f32 %v6110_v48  ;;  %v8912_v49 = vld [vmem:[%s9652_s8 + $0x64] ss:$16 sps:$4 sm:$0xff]   ;;  %v8917_v53 = vld [vmem:[%s9652_s8 + $0x6c] ss:$16 sps:$4 sm:$0xff]   ;;  %v8924_v3 = vld [vmem:[%s9652_s8 + $0x60] ss:$16 sps:$4 sm:$0xff]  }
 0x695   :  { %6945 = vpow2.f32 %v6111_v11  ;;  %v8929_v48 = vld [vmem:[%s9652_s8 + $0x68] ss:$16 sps:$4 sm:$0xff]   ;;  %v8936_v54 = vld [vmem:[%s9652_s8 + $0x84] ss:$16 sps:$4 sm:$0xff]   ;;  %v8941_v11 = vld [vmem:[%s9652_s8 + $0x8c] ss:$16 sps:$4 sm:$0xff]  }
 0x696   :  { %6947 = vpow2.f32 %v6112_v59 }
 0x697   :  { %6949 = vtanh.f32 %v3250_v5  ;;  %v8886_v5 = vld [vmem:[%s9652_s8 + $0x44] ss:$16 sps:$4 sm:$0xff]  }
 0x69b   :  { %v6942_v41 = vpop.eup %6941 }
 0x69c   :  { %v3275_v43 = vmul.f32 %v6942_v41, %v6940_v13 }
 0x69e   :  { %v6944_v25 = vpop.eup %6943  ;;  %6113 = vst [vmem:[%s9653_s9 + $0x18] sm:$0xff] %v3275_v43  ;;  %v3309_v30 = vpack.c.bf16 %v3275_v43, %v3275_v43 }
 0x69f   :  { %v6946_v34 = vpop.eup %6945  ;;  %v3279_v35 = vadd.f32 1.0, %v6944_v25 }
 0x6a0   :  { %v3285_v9 = vadd.f32 1.0, %v6946_v34  ;;  %3535 = vmatmul.mubr.bf16.vlgmr.msra.gmra.mrb[68].mxu1 %v3309_v30  ;;  %3576 = vmatmul.mubr.bf16.vlgmr.msra.gmra.mrb[68].mxu0 %v3309_v30  ;;  %v6948_v7 = vpop.eup %6947  ;;  %v8949_v30 = vld [vmem:[%s9652_s8 + $0x80] ss:$16 sps:$4 sm:$0xff]   ;;  %v8954_v34 = vld [vmem:[%s9652_s8 + $0x88] ss:$16 sps:$4 sm:$0xff]  }
 0x6a1   :  { %6951 = vrcp.f32 %v3279_v35  ;;  %3787 = vmatpush1.bf16.msra.mxu1 %v8849_v22  ;;  %3828 = vmatpush1.bf16.msra.mxu0 %v8854_v37  ;;  %v6950_v2 = vpop.eup %6949  ;;  %v3292_v43 = vadd.f32 1.0, %v6948_v7  ;;  %v8966_v35 = vld [vmem:[%s9652_s8 + $0xac] ss:$16 sps:$4 sm:$0xff]   ;;  %v8976_v7 = vld [vmem:[%s9652_s8 + $0xa0] ss:$16 sps:$4 sm:$0xff]  }
 0x6a2   :  { %6953 = vrcp.f32 %v3285_v9  ;;  %3788 = vmatprep.subr.bf16.mxu1 %v8862_v31  ;;  %3829 = vmatprep.subr.bf16.mxu0 %v8867_v33  ;;  %9779 = vst [vmem:[#allocation14_spill] sm:$0xff] %v8966_v35  ;;  %9780 = vst [vmem:[#allocation15_spill] sm:$0xff] %v8976_v7 }
 0x6a3   :  { %3818 = vmatprep.mubr.bf16.mxu1 %v9684_v62  ;;  %3859 = vmatprep.mubr.bf16.mxu0 %v9684_v62  ;;  %6955 = vrcp.f32 %v3292_v43  ;;  %v9005_v43 = vld [vmem:[%s9652_s8 + $0xc8] ss:$16 sps:$4 sm:$0xff]  }
 0x6a4   :  { %9784 = vst [vmem:[#allocation59_spill] sm:$0xff] %v9005_v43 }
 0x6a5   :  { %3789 = vmatpush1.bf16.msra.mxu1 %v8874_v16  ;;  %3830 = vmatpush1.bf16.msra.mxu0 %v8879_v17 }
 0x6a6   :  { %3790 = vmatprep.subr.bf16.mxu1 %v8886_v5  ;;  %3831 = vmatprep.subr.bf16.mxu0 %v8891_v52 }
 0x6a9   :  { %3791 = vmatpush1.bf16.msra.mxu1 %v8900_v0  ;;  %3832 = vmatpush1.bf16.msra.mxu0 %v8905_v63 }
 0x6aa   :  { %3792 = vmatprep.subr.bf16.mxu1 %v8912_v49  ;;  %3833 = vmatprep.subr.bf16.mxu0 %v8917_v53 }
 0x6ab   :  { %v6952_v13 = vpop.eup %6951 }
 0x6ac   :  { %v6954_v41 = vpop.eup %6953  ;;  %v3296_v59 = vmul.f32 %v6952_v13, %v6950_v2  ;;  %v8981_v2 = vld [vmem:[%s9652_s8 + $0xa8] ss:$16 sps:$4 sm:$0xff]   ;;  %v8988_v13 = vld [vmem:[%s9652_s8 + $0xc4] ss:$16 sps:$4 sm:$0xff]  }
 0x6ad   :  { %v3295_v25 = vmul.f32 %v6954_v41, %v8608_v36  ;;  %3793 = vmatpush1.bf16.msra.mxu1 %v8924_v3  ;;  %3834 = vmatpush1.bf16.msra.mxu0 %v8929_v48  ;;  %v8961_v36 = vld [vmem:[%s9652_s8 + $0xa4] ss:$16 sps:$4 sm:$0xff]   ;;  %9781 = vst [vmem:[#allocation16_spill] sm:$0xff] %v8981_v2  ;;  %9782 = vst [vmem:[#allocation57_spill] sm:$0xff] %v8988_v13  ;;  %v8993_v41 = vld [vmem:[%s9652_s8 + $0xcc] ss:$16 sps:$4 sm:$0xff]  }
 0x6ae   :  { %3794 = vmatprep.subr.bf16.mxu1 %v8936_v54  ;;  %3835 = vmatprep.subr.bf16.mxu0 %v8941_v11  ;;  %9778 = vst [vmem:[#allocation13_spill] sm:$0xff] %v8961_v36  ;;  %9783 = vst [vmem:[#allocation58_spill] sm:$0xff] %v8993_v41 }
 0x6af   :  { %v8968_v9 = vadd.f32 %v3296_v59, %v3295_v25  ;;  %v9000_v59 = vld [vmem:[%s9652_s8 + $0xc0] ss:$16 sps:$4 sm:$0xff]   ;;  %v9012_v25 = vld [vmem:[%s9652_s8 + $0xe4] ss:$16 sps:$4 sm:$0xff]  }
 0x6b1   :  { %6957 = vtanh.f32 %v8968_v9  ;;  %3795 = vmatpush1.bf16.msra.mxu1 %v8949_v30  ;;  %3836 = vmatpush1.bf16.msra.mxu0 %v8954_v34 }
 0x6b2   :  { %3796 = vmatprep.subr.bf16.mxu1 %v8961_v36  ;;  %3837 = vmatprep.subr.bf16.mxu0 %v8966_v35 }
 0x6b5   :  { %3797 = vmatpush1.bf16.msra.mxu1 %v8976_v7  ;;  %3838 = vmatpush1.bf16.msra.mxu0 %v8981_v2  ;;  %v9017_v2 = vld [vmem:[%s9652_s8 + $0xec] ss:$16 sps:$4 sm:$0xff]   ;;  %v6956_v7 = vpop.eup %6955 }
 0x6b6   :  { %3798 = vmatprep.subr.bf16.mxu1 %v8988_v13  ;;  %3839 = vmatprep.subr.bf16.mxu0 %v8993_v41  ;;  %v9024_v13 = vld [vmem:[%s9652_s8 + $0xe0] ss:$16 sps:$4 sm:$0xff]   ;;  %v9029_v41 = vld [vmem:[%s9652_s8 + $0xe8] ss:$16 sps:$4 sm:$0xff]  }
 0x6b9   :  { %3799 = vmatpush1.bf16.msra.mxu1 %v9000_v59  ;;  %3840 = vmatpush1.bf16.msra.mxu0 %v9005_v43 }
 0x6ba   :  { %3800 = vmatprep.subr.bf16.mxu1 %v9012_v25  ;;  %3841 = vmatprep.subr.bf16.mxu0 %v9017_v2 }
 0x6bb   :  { %v6958_v35 = vpop.eup %6957 }
 0x6bc   :  { %v3299_v36 = vmul.f32 %v6958_v35, %v6956_v7  ;;  %v9790_v35 = vld [vmem:[#allocation50_spill] sm:$0xff] }
 0x6bd   :  { %3801 = vmatpush1.bf16.msra.mxu1 %v9024_v13  ;;  %3842 = vmatpush1.bf16.msra.mxu0 %v9029_v41 }
 0x6be   :  { %6114 = vst [vmem:[%s9654_s10 + $0x20] sm:$0xff] %v3299_v36  ;;  %v3593_v43 = vpack.c.bf16 %v3299_v36, %v3299_v36  ;;  %4122 = vmatprep.subr.bf16.mxu1 %v8633_v50  ;;  %4163 = vmatprep.subr.bf16.mxu0 %v8638_v14 }
 0x6c0   :  { %3819 = vmatmul.mubr.bf16.vlgmr.msra.gmra.mrb[72].mxu1 %v3593_v43  ;;  %3860 = vmatmul.mubr.bf16.vlgmr.msra.gmra.mrb[72].mxu0 %v3593_v43 }
 0x6c1   :  { %4123 = vmatpush1.bf16.msra.mxu1 %v8643_v56  ;;  %4164 = vmatpush1.bf16.msra.mxu0 %v8648_v57  ;;  %v9785_v56 = vld [vmem:[#allocation21_spill] sm:$0xff] }
 0x6c2   :  { %4124 = vmatprep.subr.bf16.mxu1 %v8657_v60  ;;  %4165 = vmatprep.subr.bf16.mxu0 %v8662_v61  ;;  %v9786_v60 = vld [vmem:[#allocation22_spill] sm:$0xff] }
 0x6c3   :  { %4154 = vmatprep.mubr.bf16.mxu1 %v9684_v62  ;;  %4195 = vmatprep.mubr.bf16.mxu0 %v9684_v62 }
 0x6c5   :  { %4125 = vmatpush1.bf16.msra.mxu1 %v8667_v10  ;;  %4166 = vmatpush1.bf16.msra.mxu0 %v8672_v40 }
 0x6c6   :  { %4126 = vmatprep.subr.bf16.mxu1 %v8681_v8  ;;  %4167 = vmatprep.subr.bf16.mxu0 %v8686_v6  ;;  %v9787_v8 = vld [vmem:[#allocation23_spill] sm:$0xff] }
 0x6c9   :  { %4127 = vmatpush1.bf16.msra.mxu1 %v8691_v39  ;;  %4168 = vmatpush1.bf16.msra.mxu0 %v8696_v42  ;;  %v9788_v39 = vld [vmem:[#allocation24_spill] sm:$0xff] }
 0x6ca   :  { %4128 = vmatprep.subr.bf16.mxu1 %v8705_v44  ;;  %4169 = vmatprep.subr.bf16.mxu0 %v8710_v46 }
 0x6cd   :  { %4129 = vmatpush1.bf16.msra.mxu1 %v8715_v45  ;;  %4170 = vmatpush1.bf16.msra.mxu0 %v8720_v47 }
 0x6ce   :  { %4130 = vmatprep.subr.bf16.mxu1 %v8729_v38  ;;  %4171 = vmatprep.subr.bf16.mxu0 %v8734_v55 }
 0x6d1   :  { %4131 = vmatpush1.bf16.msra.mxu1 %v8739_v1  ;;  %4172 = vmatpush1.bf16.msra.mxu0 %v8744_v15 }
 0x6d2   :  { %4132 = vmatprep.subr.bf16.mxu1 %v8753_v4  ;;  %4173 = vmatprep.subr.bf16.mxu0 %v8758_v12 }
 0x6d5   :  { %4133 = vmatpush1.bf16.msra.mxu1 %v8763_v58  ;;  %4174 = vmatpush1.bf16.msra.mxu0 %v8768_v26 }
 0x6d6   :  { %4134 = vmatprep.subr.bf16.mxu1 %v8777_v18  ;;  %4175 = vmatprep.subr.bf16.mxu0 %v8782_v27 }
 0x6d9   :  { %4135 = vmatpush1.bf16.msra.mxu1 %v8787_v28  ;;  %4176 = vmatpush1.bf16.msra.mxu0 %v8792_v19 }
 0x6da   :  { %4136 = vmatprep.subr.bf16.mxu1 %v8801_v20  ;;  %4177 = vmatprep.subr.bf16.mxu0 %v8806_v21 }
 0x6dd   :  { %4137 = vmatpush1.bf16.msra.mxu1 %v8811_v51  ;;  %4178 = vmatpush1.bf16.msra.mxu0 %v8816_v29 }
 0x6de   :  { %4406 = vmatprep.subr.bf16.mxu1 %v8825_v23  ;;  %4447 = vmatprep.subr.bf16.mxu0 %v8830_v24  ;;  %v9789_v24 = vld [vmem:[#allocation49_spill] sm:$0xff] }
 0x773   :  { %v3536_v50 = vpop.f32.mrb[68].mxu1  ;;  %v3577_v14 = vpop.f32.mrb[68].mxu0 }
 0x774   :  { %v3584_v57 = vadd.f32 %v3536_v50, %v9785_v56  ;;  %v3586_v61 = vadd.f32 %v3577_v14, %v9786_v60  ;;  %v3538_v10 = vpop.f32.mrb[69].mxu1  ;;  %v3579_v40 = vpop.f32.mrb[69].mxu0  ;;  %v9791_v14 = vld [vmem:[#allocation51_spill] sm:$0xff] }
 0x775   :  { %v3585_v6 = vadd.f32 %v3538_v10, %v9787_v8  ;;  %v3587_v42 = vadd.f32 %v3579_v40, %v9788_v39  ;;  %v3540_v44 = vpop.f32.mrb[70].mxu1  ;;  %v3581_v46 = vpop.f32.mrb[70].mxu0 }
 0x776   :  { %v6179_v45 = vmul.f32 -1.442695, %v3584_v57  ;;  %v3541_v47 = vpop.f32.mrb[71].mxu1  ;;  %v3582_v38 = vpop.f32.mrb[71].mxu0  ;;  %v9792_v57 = vld [vmem:[#allocation52_spill] sm:$0xff] }
 0x777   :  { %v6180_v55 = vmul.f32 -1.442695, %v3585_v6  ;;  %v6181_v1 = vmul.f32 -1.442695, %v3587_v42 }
 0x778   :  { %6959 = vpow2.f32 %v6179_v45 }
 0x779   :  { %6961 = vpow2.f32 %v6180_v55 }
 0x77a   :  { %6963 = vpow2.f32 %v6181_v1 }
 0x77b   :  { %6965 = vtanh.f32 %v3586_v61 }
 0x782   :  { %v6960_v15 = vpop.eup %6959 }
 0x783   :  { %v6962_v4 = vpop.eup %6961  ;;  %v3875_v12 = vadd.f32 1.0, %v6960_v15 }
 0x784   :  { %v3881_v58 = vadd.f32 1.0, %v6962_v4  ;;  %v6964_v26 = vpop.eup %6963  ;;  %v9167_v4 = vld [vmem:[%s9651_s7 + $0x20] ss:$16 sps:$4 sm:$0xff]  }
 0x785   :  { %6967 = vrcp.f32 %v3875_v12  ;;  %v6966_v18 = vpop.eup %6965  ;;  %v3888_v20 = vadd.f32 1.0, %v6964_v26  ;;  %v9172_v12 = vld [vmem:[%s9651_s7 + $0x28] ss:$16 sps:$4 sm:$0xff]   ;;  %v9186_v26 = vld [vmem:[%s9651_s7 + $0x4c] ss:$16 sps:$4 sm:$0xff]  }
 0x786   :  { %6969 = vrcp.f32 %v3881_v58  ;;  %v9181_v58 = vld [vmem:[%s9651_s7 + $0x44] ss:$16 sps:$4 sm:$0xff]  }
 0x787   :  { %6971 = vrcp.f32 %v3888_v20  ;;  %v9215_v20 = vld [vmem:[%s9651_s7 + $0x60] ss:$16 sps:$4 sm:$0xff]  }
 0x78f   :  { %v6968_v27 = vpop.eup %6967 }
 0x790   :  { %v6970_v28 = vpop.eup %6969  ;;  %v3892_v19 = vmul.f32 %v6968_v27, %v6966_v18  ;;  %v9191_v18 = vld [vmem:[%s9651_s7 + $0x40] ss:$16 sps:$4 sm:$0xff]   ;;  %v9196_v27 = vld [vmem:[%s9651_s7 + $0x48] ss:$16 sps:$4 sm:$0xff]  }
 0x791   :  { %v3891_v21 = vmul.f32 %v6970_v28, %v8839_v32  ;;  %v6972_v39 = vpop.eup %6971  ;;  %v9205_v28 = vld [vmem:[%s9651_s7 + $0x64] ss:$16 sps:$4 sm:$0xff]  }
 0x793   :  { %v9079_v51 = vadd.f32 %v3892_v19, %v3891_v21  ;;  %v3820_v29 = vpop.f32.mrb[72].mxu1  ;;  %v3861_v23 = vpop.f32.mrb[72].mxu0  ;;  %v9210_v19 = vld [vmem:[%s9651_s7 + $0x6c] ss:$16 sps:$4 sm:$0xff]   ;;  %v9220_v21 = vld [vmem:[%s9651_s7 + $0x68] ss:$16 sps:$4 sm:$0xff]  }
 0x794   :  { %v3868_v36 = vadd.f32 %v3820_v29, %v9789_v24  ;;  %v3870_v7 = vadd.f32 %v3861_v23, %v9790_v35  ;;  %v3822_v43 = vpop.f32.mrb[73].mxu1  ;;  %v3863_v50 = vpop.f32.mrb[73].mxu0  ;;  %v9229_v29 = vld [vmem:[%s9651_s7 + $0x84] ss:$16 sps:$4 sm:$0xff]   ;;  %v9234_v23 = vld [vmem:[%s9651_s7 + $0x8c] ss:$16 sps:$4 sm:$0xff]  }
 0x795   :  { %6973 = vtanh.f32 %v9079_v51  ;;  %v3869_v56 = vadd.f32 %v3822_v43, %v9791_v14  ;;  %v3871_v60 = vadd.f32 %v3863_v50, %v9792_v57  ;;  %v3824_v61 = vpop.f32.mrb[74].mxu1  ;;  %v3865_v10 = vpop.f32.mrb[74].mxu0  ;;  %v9239_v24 = vld [vmem:[%s9651_s7 + $0x80] ss:$16 sps:$4 sm:$0xff]   ;;  %v9253_v35 = vld [vmem:[%s9651_s7 + $0xa4] ss:$16 sps:$4 sm:$0xff]  }
 0x796   :  { %v6182_v32 = vmul.f32 -1.442695, %v3868_v36  ;;  %v3825_v40 = vpop.f32.mrb[75].mxu1  ;;  %v3866_v8 = vpop.f32.mrb[75].mxu0  ;;  %v9244_v36 = vld [vmem:[%s9651_s7 + $0x88] ss:$16 sps:$4 sm:$0xff]  }
 0x797   :  { %v6183_v6 = vmul.f32 -1.442695, %v3869_v56  ;;  %v6184_v44 = vmul.f32 -1.442695, %v3871_v60  ;;  %v9263_v43 = vld [vmem:[%s9651_s7 + $0xa0] ss:$16 sps:$4 sm:$0xff]  }
 0x798   :  { %6975 = vpow2.f32 %v6182_v32  ;;  %v9268_v50 = vld [vmem:[%s9651_s7 + $0xa8] ss:$16 sps:$4 sm:$0xff]   ;;  %v9277_v14 = vld [vmem:[%s9651_s7 + $0xc4] ss:$16 sps:$4 sm:$0xff]   ;;  %v9282_v56 = vld [vmem:[%s9651_s7 + $0xcc] ss:$16 sps:$4 sm:$0xff]  }
 0x799   :  { %6977 = vpow2.f32 %v6183_v6  ;;  %v9287_v57 = vld [vmem:[%s9651_s7 + $0xc0] ss:$16 sps:$4 sm:$0xff]   ;;  %v9292_v60 = vld [vmem:[%s9651_s7 + $0xc8] ss:$16 sps:$4 sm:$0xff]   ;;  %v9301_v61 = vld [vmem:[%s9651_s7 + $0xe4] ss:$16 sps:$4 sm:$0xff]  }
 0x79a   :  { %6979 = vpow2.f32 %v6184_v44  ;;  %v9306_v10 = vld [vmem:[%s9651_s7 + $0xec] ss:$16 sps:$4 sm:$0xff]   ;;  %v9311_v32 = vld [vmem:[%s9651_s7 + $0xe0] ss:$16 sps:$4 sm:$0xff]   ;;  %v9316_v40 = vld [vmem:[%s9651_s7 + $0xe8] ss:$16 sps:$4 sm:$0xff]  }
 0x79b   :  { %6981 = vtanh.f32 %v3870_v7  ;;  %v9258_v7 = vld [vmem:[%s9651_s7 + $0xac] ss:$16 sps:$4 sm:$0xff]   ;;  %v9325_v8 = vld [vmem:[%s9652_s8 + $0x4] ss:$16 sps:$4 sm:$0xff]  }
 0x79c   :  { %v9330_v6 = vld [vmem:[%s9652_s8 + $0xc] ss:$16 sps:$4 sm:$0xff]  }
 0x79d   :  { %v9800_v44 = vld [vmem:[#allocation25_spill] sm:$0xff] }
 0x79f   :  { %v6974_v42 = vpop.eup %6973 }
 0x7a0   :  { %v3895_v46 = vmul.f32 %v6974_v42, %v6972_v39 }
 0x7a2   :  { %v6976_v45 = vpop.eup %6975  ;;  %6185 = vst [vmem:[%s9653_s9 + $0x20] sm:$0xff] %v3895_v46  ;;  %v3929_v47 = vpack.c.bf16 %v3895_v46, %v3895_v46 }
 0x7a3   :  { %v6978_v38 = vpop.eup %6977  ;;  %v3899_v55 = vadd.f32 1.0, %v6976_v45  ;;  %v9801_v45 = vld [vmem:[#allocation26_spill] sm:$0xff] }
 0x7a4   :  { %v3905_v1 = vadd.f32 1.0, %v6978_v38  ;;  %4155 = vmatmul.mubr.bf16.vlgmr.msra.gmra.mrb[76].mxu1 %v3929_v47  ;;  %4196 = vmatmul.mubr.bf16.vlgmr.msra.gmra.mrb[76].mxu0 %v3929_v47 }
 0x7a5   :  { %6983 = vrcp.f32 %v3899_v55  ;;  %4407 = vmatpush1.bf16.msra.mxu1 %v8849_v22  ;;  %4448 = vmatpush1.bf16.msra.mxu0 %v8854_v37  ;;  %v6980_v22 = vpop.eup %6979 }
 0x7a6   :  { %6985 = vrcp.f32 %v3905_v1  ;;  %4408 = vmatprep.subr.bf16.mxu1 %v8862_v31  ;;  %4449 = vmatprep.subr.bf16.mxu0 %v8867_v33  ;;  %v6982_v37 = vpop.eup %6981  ;;  %v9802_v1 = vld [vmem:[#allocation27_spill] sm:$0xff] }
 0x7a7   :  { %4438 = vmatprep.mubr.bf16.mxu1 %v9684_v62  ;;  %4479 = vmatprep.mubr.bf16.mxu0 %v9684_v62 }
 0x7a9   :  { %4409 = vmatpush1.bf16.msra.mxu1 %v8874_v16  ;;  %4450 = vmatpush1.bf16.msra.mxu0 %v8879_v17  ;;  %v3912_v16 = vadd.f32 1.0, %v6980_v22 }
 0x7aa   :  { %4410 = vmatprep.subr.bf16.mxu1 %v8886_v5  ;;  %4451 = vmatprep.subr.bf16.mxu0 %v8891_v52  ;;  %v9793_v52 = vld [vmem:[#allocation13_spill] sm:$0xff] }
 0x7ab   :  { %6987 = vrcp.f32 %v3912_v16 }
 0x7ad   :  { %4411 = vmatpush1.bf16.msra.mxu1 %v8900_v0  ;;  %4452 = vmatpush1.bf16.msra.mxu0 %v8905_v63  ;;  %v9794_v0 = vld [vmem:[#allocation14_spill] sm:$0xff]  ;;  %v9795_v63 = vld [vmem:[#allocation15_spill] sm:$0xff] }
 0x7ae   :  { %4412 = vmatprep.subr.bf16.mxu1 %v8912_v49  ;;  %4453 = vmatprep.subr.bf16.mxu0 %v8917_v53  ;;  %v9796_v49 = vld [vmem:[#allocation16_spill] sm:$0xff]  ;;  %v9797_v53 = vld [vmem:[#allocation57_spill] sm:$0xff] }
 0x7af   :  { %v6984_v31 = vpop.eup %6983 }
 0x7b0   :  { %v6986_v33 = vpop.eup %6985  ;;  %v3916_v15 = vmul.f32 %v6984_v31, %v6982_v37  ;;  %v9803_v37 = vld [vmem:[#allocation28_spill] sm:$0xff] }
 0x7b1   :  { %v3915_v17 = vmul.f32 %v6986_v33, %v8968_v9  ;;  %4413 = vmatpush1.bf16.msra.mxu1 %v8924_v3  ;;  %4454 = vmatpush1.bf16.msra.mxu0 %v8929_v48  ;;  %v9798_v3 = vld [vmem:[#allocation58_spill] sm:$0xff]  ;;  %v9799_v48 = vld [vmem:[#allocation59_spill] sm:$0xff] }
 0x7b2   :  { %4414 = vmatprep.subr.bf16.mxu1 %v8936_v54  ;;  %4455 = vmatprep.subr.bf16.mxu0 %v8941_v11  ;;  %v9133_v9 = vld [vmem:[%s9651_s7 + $0x4] ss:$16 sps:$4 sm:$0xff]  }
 0x7b3   :  { %v9108_v5 = vadd.f32 %v3916_v15, %v3915_v17 }
 0x7b5   :  { %6989 = vtanh.f32 %v9108_v5  ;;  %4415 = vmatpush1.bf16.msra.mxu1 %v8949_v30  ;;  %4456 = vmatpush1.bf16.msra.mxu0 %v8954_v34  ;;  %v6988_v54 = vpop.eup %6987 }
 0x7b6   :  { %4416 = vmatprep.subr.bf16.mxu1 %v9793_v52  ;;  %4457 = vmatprep.subr.bf16.mxu0 %v9794_v0 }
 0x7b9   :  { %4417 = vmatpush1.bf16.msra.mxu1 %v9795_v63  ;;  %4458 = vmatpush1.bf16.msra.mxu0 %v9796_v49 }
 0x7ba   :  { %4418 = vmatprep.subr.bf16.mxu1 %v9797_v53  ;;  %4459 = vmatprep.subr.bf16.mxu0 %v9798_v3 }
 0x7bd   :  { %4419 = vmatpush1.bf16.msra.mxu1 %v9000_v59  ;;  %4460 = vmatpush1.bf16.msra.mxu0 %v9799_v48  ;;  %v9157_v59 = vld [vmem:[%s9651_s7 + $0x24] ss:$16 sps:$4 sm:$0xff]  }
 0x7be   :  { %4420 = vmatprep.subr.bf16.mxu1 %v9012_v25  ;;  %4461 = vmatprep.subr.bf16.mxu0 %v9017_v2  ;;  %v9138_v2 = vld [vmem:[%s9651_s7 + $0xc] ss:$16 sps:$4 sm:$0xff]  }
 0x7bf   :  { %v6990_v11 = vpop.eup %6989  ;;  %v9162_v25 = vld [vmem:[%s9651_s7 + $0x2c] ss:$16 sps:$4 sm:$0xff]  }
 0x7c0   :  { %v3919_v30 = vmul.f32 %v6990_v11, %v6988_v54 }
 0x7c1   :  { %4421 = vmatpush1.bf16.msra.mxu1 %v9024_v13  ;;  %4462 = vmatpush1.bf16.msra.mxu0 %v9029_v41  ;;  %v9143_v13 = vld [vmem:[%s9651_s7] ss:$16 sps:$4 sm:$0xff]   ;;  %v9148_v41 = vld [vmem:[%s9651_s7 + $0x8] ss:$16 sps:$4 sm:$0xff]  }
 0x7c2   :  { %6186 = vst [vmem:[%s9654_s10 + $0x18] sm:$0xff] %v3919_v30  ;;  %v4213_v34 = vpack.c.bf16 %v3919_v30, %v3919_v30  ;;  %4742 = vmatprep.subr.bf16.mxu1 %v9133_v9  ;;  %4783 = vmatprep.subr.bf16.mxu0 %v9138_v2 }
 0x7c4   :  { %4439 = vmatmul.mubr.bf16.vlgmr.msra.gmra.mrb[80].mxu1 %v4213_v34  ;;  %4480 = vmatmul.mubr.bf16.vlgmr.msra.gmra.mrb[80].mxu0 %v4213_v34 }
 0x7c5   :  { %4774 = vmatprep.mubr.bf16.mxu1 %v9684_v62  ;;  %4815 = vmatprep.mubr.bf16.mxu0 %v9684_v62 }
 0x7c6   :  { %4743 = vmatpush1.bf16.msra.mxu1 %v9143_v13  ;;  %4784 = vmatpush1.bf16.msra.mxu0 %v9148_v41 }
 0x7c7   :  { %4744 = vmatprep.subr.bf16.mxu1 %v9157_v59  ;;  %4785 = vmatprep.subr.bf16.mxu0 %v9162_v25 }
 0x7ca   :  { %4745 = vmatpush1.bf16.msra.mxu1 %v9167_v4  ;;  %4786 = vmatpush1.bf16.msra.mxu0 %v9172_v12 }
 0x7cb   :  { %4746 = vmatprep.subr.bf16.mxu1 %v9181_v58  ;;  %4787 = vmatprep.subr.bf16.mxu0 %v9186_v26 }
 0x7ce   :  { %4747 = vmatpush1.bf16.msra.mxu1 %v9191_v18  ;;  %4788 = vmatpush1.bf16.msra.mxu0 %v9196_v27 }
 0x7cf   :  { %4748 = vmatprep.subr.bf16.mxu1 %v9205_v28  ;;  %4789 = vmatprep.subr.bf16.mxu0 %v9210_v19 }
 0x7d2   :  { %4749 = vmatpush1.bf16.msra.mxu1 %v9215_v20  ;;  %4790 = vmatpush1.bf16.msra.mxu0 %v9220_v21 }
 0x7d3   :  { %4750 = vmatprep.subr.bf16.mxu1 %v9229_v29  ;;  %4791 = vmatprep.subr.bf16.mxu0 %v9234_v23 }
 0x7d6   :  { %4751 = vmatpush1.bf16.msra.mxu1 %v9239_v24  ;;  %4792 = vmatpush1.bf16.msra.mxu0 %v9244_v36 }
 0x7d7   :  { %4752 = vmatprep.subr.bf16.mxu1 %v9253_v35  ;;  %4793 = vmatprep.subr.bf16.mxu0 %v9258_v7 }
 0x7da   :  { %4753 = vmatpush1.bf16.msra.mxu1 %v9263_v43  ;;  %4794 = vmatpush1.bf16.msra.mxu0 %v9268_v50 }
 0x7db   :  { %4754 = vmatprep.subr.bf16.mxu1 %v9277_v14  ;;  %4795 = vmatprep.subr.bf16.mxu0 %v9282_v56 }
 0x7de   :  { %4755 = vmatpush1.bf16.msra.mxu1 %v9287_v57  ;;  %4796 = vmatpush1.bf16.msra.mxu0 %v9292_v60 }
 0x7df   :  { %4756 = vmatprep.subr.bf16.mxu1 %v9301_v61  ;;  %4797 = vmatprep.subr.bf16.mxu0 %v9306_v10 }
 0x7e2   :  { %4757 = vmatpush1.bf16.msra.mxu1 %v9311_v32  ;;  %4798 = vmatpush1.bf16.msra.mxu0 %v9316_v40 }
 0x7e3   :  { %5026 = vmatprep.subr.bf16.mxu1 %v9325_v8  ;;  %5067 = vmatprep.subr.bf16.mxu0 %v9330_v6 }
 0x877   :  { %v4156_v39 = vpop.f32.mrb[76].mxu1  ;;  %v4197_v42 = vpop.f32.mrb[76].mxu0 }
 0x878   :  { %v4204_v46 = vadd.f32 %v4156_v39, %v9800_v44  ;;  %v4206_v47 = vadd.f32 %v4197_v42, %v9801_v45  ;;  %v4158_v38 = vpop.f32.mrb[77].mxu1  ;;  %v4199_v55 = vpop.f32.mrb[77].mxu0 }
 0x879   :  { %v4205_v22 = vadd.f32 %v4158_v38, %v9802_v1  ;;  %v4207_v31 = vadd.f32 %v4199_v55, %v9803_v37  ;;  %v4160_v33 = vpop.f32.mrb[78].mxu1  ;;  %v4201_v15 = vpop.f32.mrb[78].mxu0  ;;  %v9804_v55 = vld [vmem:[#allocation45_spill] sm:$0xff] }
 0x87a   :  { %v6251_v16 = vmul.f32 -1.442695, %v4204_v46  ;;  %v4161_v17 = vpop.f32.mrb[79].mxu1  ;;  %v4202_v52 = vpop.f32.mrb[79].mxu0  ;;  %v9806_v33 = vld [vmem:[#allocation47_spill] sm:$0xff] }
 0x87b   :  { %v6252_v0 = vmul.f32 -1.442695, %v4205_v22  ;;  %v6253_v63 = vmul.f32 -1.442695, %v4207_v31  ;;  %v9805_v22 = vld [vmem:[#allocation46_spill] sm:$0xff] }
 0x87c   :  { %6991 = vpow2.f32 %v6251_v16  ;;  %v9807_v16 = vld [vmem:[#allocation48_spill] sm:$0xff] }
 0x87d   :  { %6993 = vpow2.f32 %v6252_v0 }
 0x87e   :  { %6995 = vpow2.f32 %v6253_v63 }
 0x87f   :  { %6997 = vtanh.f32 %v4206_v47 }
 0x886   :  { %v6992_v49 = vpop.eup %6991 }
 0x887   :  { %v6994_v53 = vpop.eup %6993  ;;  %v4495_v3 = vadd.f32 1.0, %v6992_v49 }
 0x888   :  { %v4501_v48 = vadd.f32 1.0, %v6994_v53  ;;  %v6996_v54 = vpop.eup %6995 }
 0x889   :  { %6999 = vrcp.f32 %v4495_v3  ;;  %v6998_v11 = vpop.eup %6997  ;;  %v4508_v42 = vadd.f32 1.0, %v6996_v54 }
 0x88a   :  { %7001 = vrcp.f32 %v4501_v48 }
 0x88b   :  { %7003 = vrcp.f32 %v4508_v42 }
 0x893   :  { %v7000_v30 = vpop.eup %6999 }
 0x894   :  { %v7002_v34 = vpop.eup %7001  ;;  %v4512_v39 = vmul.f32 %v7000_v30, %v6998_v11  ;;  %v9349_v30 = vld [vmem:[%s9652_s8] ss:$16 sps:$4 sm:$0xff]  }
 0x895   :  { %v4511_v44 = vmul.f32 %v7002_v34, %v9079_v51  ;;  %v7004_v3 = vpop.eup %7003  ;;  %v9354_v34 = vld [vmem:[%s9652_s8 + $0x8] ss:$16 sps:$4 sm:$0xff]  }
 0x897   :  { %v9339_v46 = vadd.f32 %v4512_v39, %v4511_v44  ;;  %v4440_v45 = vpop.f32.mrb[80].mxu1  ;;  %v4481_v38 = vpop.f32.mrb[80].mxu0  ;;  %v9362_v44 = vld [vmem:[%s9652_s8 + $0x24] ss:$16 sps:$4 sm:$0xff]  }
 0x898   :  { %v4488_v1 = vadd.f32 %v4440_v45, %v9804_v55  ;;  %v4490_v47 = vadd.f32 %v4481_v38, %v9805_v22  ;;  %v4442_v37 = vpop.f32.mrb[81].mxu1  ;;  %v4483_v31 = vpop.f32.mrb[81].mxu0  ;;  %v9367_v45 = vld [vmem:[%s9652_s8 + $0x2c] ss:$16 sps:$4 sm:$0xff]   ;;  %v9374_v22 = vld [vmem:[%s9652_s8 + $0x20] ss:$16 sps:$4 sm:$0xff]  }
 0x899   :  { %7005 = vtanh.f32 %v9339_v46  ;;  %v4489_v15 = vadd.f32 %v4442_v37, %v9806_v33  ;;  %v4491_v17 = vadd.f32 %v4483_v31, %v9807_v16  ;;  %v4444_v52 = vpop.f32.mrb[82].mxu1  ;;  %v4485_v0 = vpop.f32.mrb[82].mxu0  ;;  %v9379_v37 = vld [vmem:[%s9652_s8 + $0x28] ss:$16 sps:$4 sm:$0xff]   ;;  %v9391_v31 = vld [vmem:[%s9652_s8 + $0x4c] ss:$16 sps:$4 sm:$0xff]  }
 0x89a   :  { %v6254_v51 = vmul.f32 -1.442695, %v4488_v1  ;;  %v4445_v63 = vpop.f32.mrb[83].mxu1  ;;  %v4486_v49 = vpop.f32.mrb[83].mxu0  ;;  %v9400_v33 = vld [vmem:[%s9652_s8 + $0x40] ss:$16 sps:$4 sm:$0xff]  }
 0x89b   :  { %v6255_v53 = vmul.f32 -1.442695, %v4489_v15  ;;  %v6256_v54 = vmul.f32 -1.442695, %v4491_v17  ;;  %v9405_v15 = vld [vmem:[%s9652_s8 + $0x48] ss:$16 sps:$4 sm:$0xff]  }
 0x89c   :  { %7007 = vpow2.f32 %v6254_v51  ;;  %v9412_v16 = vld [vmem:[%s9652_s8 + $0x64] ss:$16 sps:$4 sm:$0xff]   ;;  %v9417_v17 = vld [vmem:[%s9652_s8 + $0x6c] ss:$16 sps:$4 sm:$0xff]   ;;  %v9424_v0 = vld [vmem:[%s9652_s8 + $0x60] ss:$16 sps:$4 sm:$0xff]  }
 0x89d   :  { %7009 = vpow2.f32 %v6255_v53  ;;  %v9429_v51 = vld [vmem:[%s9652_s8 + $0x68] ss:$16 sps:$4 sm:$0xff]   ;;  %v9436_v49 = vld [vmem:[%s9652_s8 + $0x84] ss:$16 sps:$4 sm:$0xff]   ;;  %v9441_v53 = vld [vmem:[%s9652_s8 + $0x8c] ss:$16 sps:$4 sm:$0xff]  }
 0x89e   :  { %7011 = vpow2.f32 %v6256_v54 }
 0x89f   :  { %7013 = vtanh.f32 %v4490_v47  ;;  %v9386_v47 = vld [vmem:[%s9652_s8 + $0x44] ss:$16 sps:$4 sm:$0xff]  }
 0x8a3   :  { %v7006_v48 = vpop.eup %7005 }
 0x8a4   :  { %v4515_v11 = vmul.f32 %v7006_v48, %v7004_v3 }
 0x8a6   :  { %v7008_v39 = vpop.eup %7007  ;;  %6257 = vst [vmem:[%s9653_s9 + $0x28] sm:$0xff] %v4515_v11  ;;  %v4549_v42 = vpack.c.bf16 %v4515_v11, %v4515_v11 }
 0x8a7   :  { %v7010_v38 = vpop.eup %7009  ;;  %v4519_v55 = vadd.f32 1.0, %v7008_v39 }
 0x8a8   :  { %v4525_v1 = vadd.f32 1.0, %v7010_v38  ;;  %4775 = vmatmul.mubr.bf16.vlgmr.msra.gmra.mrb[84].mxu1 %v4549_v42  ;;  %4816 = vmatmul.mubr.bf16.vlgmr.msra.gmra.mrb[84].mxu0 %v4549_v42  ;;  %v7012_v52 = vpop.eup %7011  ;;  %v9449_v42 = vld [vmem:[%s9652_s8 + $0x80] ss:$16 sps:$4 sm:$0xff]   ;;  %v9454_v38 = vld [vmem:[%s9652_s8 + $0x88] ss:$16 sps:$4 sm:$0xff]  }
 0x8a9   :  { %7015 = vrcp.f32 %v4519_v55  ;;  %5027 = vmatpush1.bf16.msra.mxu1 %v9349_v30  ;;  %5068 = vmatpush1.bf16.msra.mxu0 %v9354_v34  ;;  %v7014_v63 = vpop.eup %7013  ;;  %v4532_v11 = vadd.f32 1.0, %v7012_v52  ;;  %v9466_v55 = vld [vmem:[%s9652_s8 + $0xac] ss:$16 sps:$4 sm:$0xff]   ;;  %v9476_v52 = vld [vmem:[%s9652_s8 + $0xa0] ss:$16 sps:$4 sm:$0xff]  }
 0x8aa   :  { %7017 = vrcp.f32 %v4525_v1  ;;  %5028 = vmatprep.subr.bf16.mxu1 %v9362_v44  ;;  %5069 = vmatprep.subr.bf16.mxu0 %v9367_v45  ;;  %9809 = vst [vmem:[#allocation11_spill] sm:$0xff] %v9466_v55  ;;  %9810 = vst [vmem:[#allocation12_spill] sm:$0xff] %v9476_v52 }
 0x8ab   :  { %5058 = vmatprep.mubr.bf16.mxu1 %v9684_v62  ;;  %5099 = vmatprep.mubr.bf16.mxu0 %v9684_v62  ;;  %7019 = vrcp.f32 %v4532_v11  ;;  %v9505_v11 = vld [vmem:[%s9652_s8 + $0xc8] ss:$16 sps:$4 sm:$0xff]  }
 0x8ac   :  { %9814 = vst [vmem:[#allocation64_spill] sm:$0xff] %v9505_v11 }
 0x8ad   :  { %5029 = vmatpush1.bf16.msra.mxu1 %v9374_v22  ;;  %5070 = vmatpush1.bf16.msra.mxu0 %v9379_v37 }
 0x8ae   :  { %5030 = vmatprep.subr.bf16.mxu1 %v9386_v47  ;;  %5071 = vmatprep.subr.bf16.mxu0 %v9391_v31 }
 0x8b1   :  { %5031 = vmatpush1.bf16.msra.mxu1 %v9400_v33  ;;  %5072 = vmatpush1.bf16.msra.mxu0 %v9405_v15 }
 0x8b2   :  { %5032 = vmatprep.subr.bf16.mxu1 %v9412_v16  ;;  %5073 = vmatprep.subr.bf16.mxu0 %v9417_v17 }
 0x8b3   :  { %v7016_v3 = vpop.eup %7015 }
 0x8b4   :  { %v7018_v48 = vpop.eup %7017  ;;  %v4536_v54 = vmul.f32 %v7016_v3, %v7014_v63  ;;  %v9481_v63 = vld [vmem:[%s9652_s8 + $0xa8] ss:$16 sps:$4 sm:$0xff]   ;;  %v9488_v3 = vld [vmem:[%s9652_s8 + $0xc4] ss:$16 sps:$4 sm:$0xff]  }
 0x8b5   :  { %v4535_v39 = vmul.f32 %v7018_v48, %v9108_v5  ;;  %5033 = vmatpush1.bf16.msra.mxu1 %v9424_v0  ;;  %5074 = vmatpush1.bf16.msra.mxu0 %v9429_v51  ;;  %v9461_v5 = vld [vmem:[%s9652_s8 + $0xa4] ss:$16 sps:$4 sm:$0xff]   ;;  %9811 = vst [vmem:[#allocation61_spill] sm:$0xff] %v9481_v63  ;;  %9812 = vst [vmem:[#allocation62_spill] sm:$0xff] %v9488_v3  ;;  %v9493_v48 = vld [vmem:[%s9652_s8 + $0xcc] ss:$16 sps:$4 sm:$0xff]  }
 0x8b6   :  { %5034 = vmatprep.subr.bf16.mxu1 %v9436_v49  ;;  %5075 = vmatprep.subr.bf16.mxu0 %v9441_v53  ;;  %9808 = vst [vmem:[#allocation60_spill] sm:$0xff] %v9461_v5  ;;  %9813 = vst [vmem:[#allocation63_spill] sm:$0xff] %v9493_v48 }
 0x8b7   :  { %v9468_v1 = vadd.f32 %v4536_v54, %v4535_v39  ;;  %v9500_v54 = vld [vmem:[%s9652_s8 + $0xc0] ss:$16 sps:$4 sm:$0xff]   ;;  %v9512_v39 = vld [vmem:[%s9652_s8 + $0xe4] ss:$16 sps:$4 sm:$0xff]  }
 0x8b9   :  { %7021 = vtanh.f32 %v9468_v1  ;;  %5035 = vmatpush1.bf16.msra.mxu1 %v9449_v42  ;;  %5076 = vmatpush1.bf16.msra.mxu0 %v9454_v38 }
 0x8ba   :  { %5036 = vmatprep.subr.bf16.mxu1 %v9461_v5  ;;  %5077 = vmatprep.subr.bf16.mxu0 %v9466_v55 }
 0x8bd   :  { %5037 = vmatpush1.bf16.msra.mxu1 %v9476_v52  ;;  %5078 = vmatpush1.bf16.msra.mxu0 %v9481_v63  ;;  %v9517_v63 = vld [vmem:[%s9652_s8 + $0xec] ss:$16 sps:$4 sm:$0xff]   ;;  %v7020_v52 = vpop.eup %7019 }
 0x8be   :  { %5038 = vmatprep.subr.bf16.mxu1 %v9488_v3  ;;  %5079 = vmatprep.subr.bf16.mxu0 %v9493_v48  ;;  %v9524_v3 = vld [vmem:[%s9652_s8 + $0xe0] ss:$16 sps:$4 sm:$0xff]   ;;  %v9529_v48 = vld [vmem:[%s9652_s8 + $0xe8] ss:$16 sps:$4 sm:$0xff]  }
 0x8c1   :  { %5039 = vmatpush1.bf16.msra.mxu1 %v9500_v54  ;;  %5080 = vmatpush1.bf16.msra.mxu0 %v9505_v11 }
 0x8c2   :  { %5040 = vmatprep.subr.bf16.mxu1 %v9512_v39  ;;  %5081 = vmatprep.subr.bf16.mxu0 %v9517_v63 }
 0x8c3   :  { %v7022_v55 = vpop.eup %7021 }
 0x8c4   :  { %v4539_v5 = vmul.f32 %v7022_v55, %v7020_v52  ;;  %v9820_v55 = vld [vmem:[#allocation42_spill] sm:$0xff] }
 0x8c5   :  { %5041 = vmatpush1.bf16.msra.mxu1 %v9524_v3  ;;  %5082 = vmatpush1.bf16.msra.mxu0 %v9529_v48 }
 0x8c6   :  { %6258 = vst [vmem:[%s9654_s10 + $0x10] sm:$0xff] %v4539_v5  ;;  %v4833_v11 = vpack.c.bf16 %v4539_v5, %v4539_v5  ;;  %5362 = vmatprep.subr.bf16.mxu1 %v9133_v9  ;;  %5403 = vmatprep.subr.bf16.mxu0 %v9138_v2 }
 0x8c8   :  { %5059 = vmatmul.mubr.bf16.vlgmr.msra.gmra.mrb[88].mxu1 %v4833_v11  ;;  %5100 = vmatmul.mubr.bf16.vlgmr.msra.gmra.mrb[88].mxu0 %v4833_v11 }
 0x8c9   :  { %5363 = vmatpush1.bf16.msra.mxu1 %v9143_v13  ;;  %5404 = vmatpush1.bf16.msra.mxu0 %v9148_v41  ;;  %v9815_v13 = vld [vmem:[#allocation29_spill] sm:$0xff] }
 0x8ca   :  { %5364 = vmatprep.subr.bf16.mxu1 %v9157_v59  ;;  %5405 = vmatprep.subr.bf16.mxu0 %v9162_v25  ;;  %v9816_v59 = vld [vmem:[#allocation30_spill] sm:$0xff] }
 0x8cb   :  { %5394 = vmatprep.mubr.bf16.mxu1 %v9684_v62  ;;  %5435 = vmatprep.mubr.bf16.mxu0 %v9684_v62 }
 0x8cd   :  { %5365 = vmatpush1.bf16.msra.mxu1 %v9167_v4  ;;  %5406 = vmatpush1.bf16.msra.mxu0 %v9172_v12 }
 0x8ce   :  { %5366 = vmatprep.subr.bf16.mxu1 %v9181_v58  ;;  %5407 = vmatprep.subr.bf16.mxu0 %v9186_v26  ;;  %v9817_v58 = vld [vmem:[#allocation31_spill] sm:$0xff] }
 0x8d1   :  { %5367 = vmatpush1.bf16.msra.mxu1 %v9191_v18  ;;  %5408 = vmatpush1.bf16.msra.mxu0 %v9196_v27  ;;  %v9818_v18 = vld [vmem:[#allocation32_spill] sm:$0xff] }
 0x8d2   :  { %5368 = vmatprep.subr.bf16.mxu1 %v9205_v28  ;;  %5409 = vmatprep.subr.bf16.mxu0 %v9210_v19 }
 0x8d5   :  { %5369 = vmatpush1.bf16.msra.mxu1 %v9215_v20  ;;  %5410 = vmatpush1.bf16.msra.mxu0 %v9220_v21 }
 0x8d6   :  { %5370 = vmatprep.subr.bf16.mxu1 %v9229_v29  ;;  %5411 = vmatprep.subr.bf16.mxu0 %v9234_v23 }
 0x8d9   :  { %5371 = vmatpush1.bf16.msra.mxu1 %v9239_v24  ;;  %5412 = vmatpush1.bf16.msra.mxu0 %v9244_v36 }
 0x8da   :  { %5372 = vmatprep.subr.bf16.mxu1 %v9253_v35  ;;  %5413 = vmatprep.subr.bf16.mxu0 %v9258_v7 }
 0x8dd   :  { %5373 = vmatpush1.bf16.msra.mxu1 %v9263_v43  ;;  %5414 = vmatpush1.bf16.msra.mxu0 %v9268_v50 }
 0x8de   :  { %5374 = vmatprep.subr.bf16.mxu1 %v9277_v14  ;;  %5415 = vmatprep.subr.bf16.mxu0 %v9282_v56 }
 0x8e1   :  { %5375 = vmatpush1.bf16.msra.mxu1 %v9287_v57  ;;  %5416 = vmatpush1.bf16.msra.mxu0 %v9292_v60 }
 0x8e2   :  { %5376 = vmatprep.subr.bf16.mxu1 %v9301_v61  ;;  %5417 = vmatprep.subr.bf16.mxu0 %v9306_v10 }
 0x8e5   :  { %5377 = vmatpush1.bf16.msra.mxu1 %v9311_v32  ;;  %5418 = vmatpush1.bf16.msra.mxu0 %v9316_v40 }
 0x8e6   :  { %5645 = vmatprep.subr.bf16.mxu1 %v9325_v8  ;;  %5686 = vmatprep.subr.bf16.mxu0 %v9330_v6  ;;  %v9819_v6 = vld [vmem:[#allocation41_spill] sm:$0xff] }
 0x97b   :  { %v4776_v9 = vpop.f32.mrb[84].mxu1  ;;  %v4817_v2 = vpop.f32.mrb[84].mxu0 }
 0x97c   :  { %v4824_v41 = vadd.f32 %v4776_v9, %v9815_v13  ;;  %v4826_v25 = vadd.f32 %v4817_v2, %v9816_v59  ;;  %v4778_v4 = vpop.f32.mrb[85].mxu1  ;;  %v4819_v12 = vpop.f32.mrb[85].mxu0  ;;  %v9821_v2 = vld [vmem:[#allocation43_spill] sm:$0xff] }
 0x97d   :  { %v4825_v26 = vadd.f32 %v4778_v4, %v9817_v58  ;;  %v4827_v27 = vadd.f32 %v4819_v12, %v9818_v18  ;;  %v4780_v28 = vpop.f32.mrb[86].mxu1  ;;  %v4821_v19 = vpop.f32.mrb[86].mxu0 }
 0x97e   :  { %v6323_v20 = vmul.f32 -1.442695, %v4824_v41  ;;  %v4781_v21 = vpop.f32.mrb[87].mxu1  ;;  %v4822_v29 = vpop.f32.mrb[87].mxu0  ;;  %v9822_v41 = vld [vmem:[#allocation44_spill] sm:$0xff] }
 0x97f   :  { %v6324_v23 = vmul.f32 -1.442695, %v4825_v26  ;;  %v6325_v24 = vmul.f32 -1.442695, %v4827_v27 }
 0x980   :  { %7023 = vpow2.f32 %v6323_v20 }
 0x981   :  { %7025 = vpow2.f32 %v6324_v23 }
 0x982   :  { %7027 = vpow2.f32 %v6325_v24 }
 0x983   :  { %7029 = vtanh.f32 %v4826_v25 }
 0x98a   :  { %v7024_v36 = vpop.eup %7023 }
 0x98b   :  { %v7026_v35 = vpop.eup %7025  ;;  %v5115_v7 = vadd.f32 1.0, %v7024_v36  ;;  %v9830_v36 = vld [vmem:[#allocation33_spill] sm:$0xff] }
 0x98c   :  { %v5121_v43 = vadd.f32 1.0, %v7026_v35  ;;  %v7028_v50 = vpop.eup %7027 }
 0x98d   :  { %7031 = vrcp.f32 %v5115_v7  ;;  %v7030_v14 = vpop.eup %7029  ;;  %v5128_v61 = vadd.f32 1.0, %v7028_v50  ;;  %v9832_v50 = vld [vmem:[#allocation35_spill] sm:$0xff] }
 0x98e   :  { %7033 = vrcp.f32 %v5121_v43 }
 0x98f   :  { %7035 = vrcp.f32 %v5128_v61 }
 0x997   :  { %v7032_v56 = vpop.eup %7031 }
 0x998   :  { %v7034_v57 = vpop.eup %7033  ;;  %v5132_v60 = vmul.f32 %v7032_v56, %v7030_v14 }
 0x999   :  { %v5131_v10 = vmul.f32 %v7034_v57, %v9339_v46  ;;  %v7036_v18 = vpop.eup %7035 }
 0x99b   :  { %v9579_v32 = vadd.f32 %v5132_v60, %v5131_v10  ;;  %v5060_v40 = vpop.f32.mrb[88].mxu1  ;;  %v5101_v8 = vpop.f32.mrb[88].mxu0 }
 0x99c   :  { %v5108_v5 = vadd.f32 %v5060_v40, %v9819_v6  ;;  %v5110_v52 = vadd.f32 %v5101_v8, %v9820_v55  ;;  %v5062_v11 = vpop.f32.mrb[89].mxu1  ;;  %v5103_v9 = vpop.f32.mrb[89].mxu0 }
 0x99d   :  { %7037 = vtanh.f32 %v9579_v32  ;;  %v5109_v13 = vadd.f32 %v5062_v11, %v9821_v2  ;;  %v5111_v59 = vadd.f32 %v5103_v9, %v9822_v41  ;;  %v5064_v25 = vpop.f32.mrb[90].mxu1  ;;  %v5105_v4 = vpop.f32.mrb[90].mxu0 }
 0x99e   :  { %v6326_v46 = vmul.f32 -1.442695, %v5108_v5  ;;  %v5065_v12 = vpop.f32.mrb[91].mxu1  ;;  %v5106_v58 = vpop.f32.mrb[91].mxu0 }
 0x99f   :  { %v6327_v26 = vmul.f32 -1.442695, %v5109_v13  ;;  %v6328_v28 = vmul.f32 -1.442695, %v5111_v59  ;;  %v9834_v58 = vld [vmem:[#allocation37_spill] sm:$0xff] }
 0x9a0   :  { %7039 = vpow2.f32 %v6326_v46 }
 0x9a1   :  { %7041 = vpow2.f32 %v6327_v26 }
 0x9a2   :  { %7043 = vpow2.f32 %v6328_v28 }
 0x9a3   :  { %7045 = vtanh.f32 %v5110_v52 }
 0x9a7   :  { %v7038_v27 = vpop.eup %7037 }
 0x9a8   :  { %v5135_v19 = vmul.f32 %v7038_v27, %v7036_v18  ;;  %v9835_v18 = vld [vmem:[#allocation38_spill] sm:$0xff] }
 0x9aa   :  { %v7040_v20 = vpop.eup %7039  ;;  %6329 = vst [vmem:[%s9653_s9 + $0x30] sm:$0xff] %v5135_v19  ;;  %v5169_v21 = vpack.c.bf16 %v5135_v19, %v5135_v19 }
 0x9ab   :  { %v7042_v29 = vpop.eup %7041  ;;  %v5139_v23 = vadd.f32 1.0, %v7040_v20  ;;  %v9836_v20 = vld [vmem:[#allocation39_spill] sm:$0xff] }
 0x9ac   :  { %v5145_v24 = vadd.f32 1.0, %v7042_v29  ;;  %5395 = vmatmul.mubr.bf16.vlgmr.msra.gmra.mrb[92].mxu1 %v5169_v21  ;;  %5436 = vmatmul.mubr.bf16.vlgmr.msra.gmra.mrb[92].mxu0 %v5169_v21  ;;  %v9837_v29 = vld [vmem:[#allocation40_spill] sm:$0xff] }
 0x9ad   :  { %7047 = vrcp.f32 %v5139_v23  ;;  %5646 = vmatpush1.bf16.msra.mxu1 %v9349_v30  ;;  %5687 = vmatpush1.bf16.msra.mxu0 %v9354_v34  ;;  %v7044_v30 = vpop.eup %7043 }
 0x9ae   :  { %7049 = vrcp.f32 %v5145_v24  ;;  %5647 = vmatprep.subr.bf16.mxu1 %v9362_v44  ;;  %5688 = vmatprep.subr.bf16.mxu0 %v9367_v45  ;;  %v7046_v34 = vpop.eup %7045 }
 0x9af   :  { %5677 = vmatprep.mubr.bf16.mxu1 %v9684_v62  ;;  %5718 = vmatprep.mubr.bf16.mxu0 %v9684_v62 }
 0x9b1   :  { %5648 = vmatpush1.bf16.msra.mxu1 %v9374_v22  ;;  %5689 = vmatpush1.bf16.msra.mxu0 %v9379_v37  ;;  %v5152_v22 = vadd.f32 1.0, %v7044_v30 }
 0x9b2   :  { %5649 = vmatprep.subr.bf16.mxu1 %v9386_v47  ;;  %5690 = vmatprep.subr.bf16.mxu0 %v9391_v31  ;;  %v9823_v31 = vld [vmem:[#allocation60_spill] sm:$0xff] }
 0x9b3   :  { %7051 = vrcp.f32 %v5152_v22 }
 0x9b5   :  { %5650 = vmatpush1.bf16.msra.mxu1 %v9400_v33  ;;  %5691 = vmatpush1.bf16.msra.mxu0 %v9405_v15  ;;  %v9824_v33 = vld [vmem:[#allocation11_spill] sm:$0xff]  ;;  %v9825_v15 = vld [vmem:[#allocation12_spill] sm:$0xff] }
 0x9b6   :  { %5651 = vmatprep.subr.bf16.mxu1 %v9412_v16  ;;  %5692 = vmatprep.subr.bf16.mxu0 %v9417_v17  ;;  %v9826_v16 = vld [vmem:[#allocation61_spill] sm:$0xff]  ;;  %v9827_v17 = vld [vmem:[#allocation62_spill] sm:$0xff] }
 0x9b7   :  { %v7048_v44 = vpop.eup %7047 }
 0x9b8   :  { %v7050_v62 = vpop.eup %7049  ;;  %v5156_v45 = vmul.f32 %v7048_v44, %v7046_v34 }
 0x9b9   :  { %v5155_v37 = vmul.f32 %v7050_v62, %v9468_v1  ;;  %5652 = vmatpush1.bf16.msra.mxu1 %v9424_v0  ;;  %5693 = vmatpush1.bf16.msra.mxu0 %v9429_v51  ;;  %v9828_v0 = vld [vmem:[#allocation63_spill] sm:$0xff]  ;;  %v9829_v51 = vld [vmem:[#allocation64_spill] sm:$0xff] }
 0x9ba   :  { %5653 = vmatprep.subr.bf16.mxu1 %v9436_v49  ;;  %5694 = vmatprep.subr.bf16.mxu0 %v9441_v53 }
 0x9bb   :  { %v9608_v47 = vadd.f32 %v5156_v45, %v5155_v37 }
 0x9bd   :  { %7053 = vtanh.f32 %v9608_v47  ;;  %5654 = vmatpush1.bf16.msra.mxu1 %v9449_v42  ;;  %5695 = vmatpush1.bf16.msra.mxu0 %v9454_v38  ;;  %v7052_v49 = vpop.eup %7051 }
 0x9be   :  { %5655 = vmatprep.subr.bf16.mxu1 %v9823_v31  ;;  %5696 = vmatprep.subr.bf16.mxu0 %v9824_v33 }
 0x9c1   :  { %5656 = vmatpush1.bf16.msra.mxu1 %v9825_v15  ;;  %5697 = vmatpush1.bf16.msra.mxu0 %v9826_v16 }
 0x9c2   :  { %5657 = vmatprep.subr.bf16.mxu1 %v9827_v17  ;;  %5698 = vmatprep.subr.bf16.mxu0 %v9828_v0 }
 0x9c5   :  { %5658 = vmatpush1.bf16.msra.mxu1 %v9500_v54  ;;  %5699 = vmatpush1.bf16.msra.mxu0 %v9829_v51 }
 0x9c6   :  { %5659 = vmatprep.subr.bf16.mxu1 %v9512_v39  ;;  %5700 = vmatprep.subr.bf16.mxu0 %v9517_v63  ;;  %v9831_v39 = vld [vmem:[#allocation34_spill] sm:$0xff] }
 0x9c7   :  { %v7054_v53 = vpop.eup %7053 }
 0x9c8   :  { %v5159_v42 = vmul.f32 %v7054_v53, %v7052_v49 }
 0x9c9   :  { %5660 = vmatpush1.bf16.msra.mxu1 %v9524_v3  ;;  %5701 = vmatpush1.bf16.msra.mxu0 %v9529_v48  ;;  %v9833_v3 = vld [vmem:[#allocation36_spill] sm:$0xff] }
 0x9ca   :  { %6330 = vst [vmem:[%s9654_s10 + $0x8] sm:$0xff] %v5159_v42  ;;  %v5452_v38 = vpack.c.bf16 %v5159_v42, %v5159_v42 }
 0x9cc   :  { %5678 = vmatmul.mubr.bf16.vlgmr.msra.gmra.mrb[96].mxu1 %v5452_v38  ;;  %5719 = vmatmul.mubr.bf16.vlgmr.msra.gmra.mrb[96].mxu0 %v5452_v38 }
 0xa7f   :  { %v5396_v1 = vpop.f32.mrb[92].mxu1  ;;  %v5437_v54 = vpop.f32.mrb[92].mxu0 }
 0xa80   :  { %v5444_v35 = vadd.f32 %v5396_v1, %v9830_v36  ;;  %v5446_v7 = vadd.f32 %v5437_v54, %v9831_v39  ;;  %v5398_v63 = vpop.f32.mrb[93].mxu1  ;;  %v5439_v43 = vpop.f32.mrb[93].mxu0 }
 0xa81   :  { %v5445_v14 = vadd.f32 %v5398_v63, %v9832_v50  ;;  %v5447_v56 = vadd.f32 %v5439_v43, %v9833_v3  ;;  %v5400_v48 = vpop.f32.mrb[94].mxu1  ;;  %v5441_v57 = vpop.f32.mrb[94].mxu0 }
 0xa82   :  { %v6395_v60 = vmul.f32 -1.442695, %v5444_v35  ;;  %v5401_v61 = vpop.f32.mrb[95].mxu1  ;;  %v5442_v10 = vpop.f32.mrb[95].mxu0 }
 0xa83   :  { %v6396_v40 = vmul.f32 -1.442695, %v5445_v14  ;;  %v6397_v8 = vmul.f32 -1.442695, %v5447_v56 }
 0xa84   :  { %7055 = vpow2.f32 %v6395_v60 }
 0xa85   :  { %7057 = vpow2.f32 %v6396_v40 }
 0xa86   :  { %7059 = vpow2.f32 %v6397_v8 }
 0xa87   :  { %7061 = vtanh.f32 %v5446_v7 }
 0xa8e   :  { %v7056_v6 = vpop.eup %7055 }
 0xa8f   :  { %v7058_v5 = vpop.eup %7057  ;;  %v5734_v55 = vadd.f32 1.0, %v7056_v6 }
 0xa90   :  { %v5740_v52 = vadd.f32 1.0, %v7058_v5  ;;  %v7060_v11 = vpop.eup %7059 }
 0xa91   :  { %7063 = vrcp.f32 %v5734_v55  ;;  %v7062_v9 = vpop.eup %7061  ;;  %v5747_v59 = vadd.f32 1.0, %v7060_v11 }
 0xa92   :  { %7065 = vrcp.f32 %v5740_v52 }
 0xa93   :  { %7067 = vrcp.f32 %v5747_v59 }
 0xa9b   :  { %v7064_v2 = vpop.eup %7063 }
 0xa9c   :  { %v7066_v13 = vpop.eup %7065  ;;  %v5751_v41 = vmul.f32 %v7064_v2, %v7062_v9 }
 0xa9d   :  { %v5750_v25 = vmul.f32 %v7066_v13, %v9579_v32  ;;  %v7068_v45 = vpop.eup %7067 }
 0xa9f   :  { %v5752_v4 = vadd.f32 %v5751_v41, %v5750_v25  ;;  %v5679_v46 = vpop.f32.mrb[96].mxu1  ;;  %v5720_v12 = vpop.f32.mrb[96].mxu0 }
 0xaa0   :  { %v5727_v26 = vadd.f32 %v5679_v46, %v9834_v58  ;;  %v5729_v27 = vadd.f32 %v5720_v12, %v9835_v18  ;;  %v5681_v28 = vpop.f32.mrb[97].mxu1  ;;  %v5722_v19 = vpop.f32.mrb[97].mxu0 }
 0xaa1   :  { %7069 = vtanh.f32 %v5752_v4  ;;  %v5728_v21 = vadd.f32 %v5681_v28, %v9836_v20  ;;  %v5730_v23 = vadd.f32 %v5722_v19, %v9837_v29  ;;  %v5683_v24 = vpop.f32.mrb[98].mxu1  ;;  %v5724_v30 = vpop.f32.mrb[98].mxu0 }
 0xaa2   :  { %v6398_v34 = vmul.f32 -1.442695, %v5727_v26  ;;  %v5684_v44 = vpop.f32.mrb[99].mxu1  ;;  %v5725_v32 = vpop.f32.mrb[99].mxu0 }
 0xaa3   :  { %v6399_v62 = vmul.f32 -1.442695, %v5728_v21  ;;  %v6400_v37 = vmul.f32 -1.442695, %v5730_v23 }
 0xaa4   :  { %7071 = vpow2.f32 %v6398_v34 }
 0xaa5   :  { %7073 = vpow2.f32 %v6399_v62 }
 0xaa6   :  { %7075 = vpow2.f32 %v6400_v37 }
 0xaa7   :  { %7077 = vtanh.f32 %v5729_v27 }
 0xaab   :  { %v7070_v22 = vpop.eup %7069 }
 0xaac   :  { %v5754_v31 = vmul.f32 %v7070_v22, %v7068_v45 }
 0xaae   :  { %v7072_v33 = vpop.eup %7071  ;;  %6401 = vst [vmem:[%s9653_s9 + $0x38] sm:$0xff] %v5754_v31 }
 0xaaf   :  { %v7074_v15 = vpop.eup %7073  ;;  %v5758_v16 = vadd.f32 1.0, %v7072_v33 }
 0xab0   :  { %v5764_v17 = vadd.f32 1.0, %v7074_v15  ;;  %v7076_v0 = vpop.eup %7075 }
 0xab1   :  { %7079 = vrcp.f32 %v5758_v16  ;;  %v7078_v51 = vpop.eup %7077  ;;  %v5771_v38 = vadd.f32 1.0, %v7076_v0 }
 0xab2   :  { %7081 = vrcp.f32 %v5764_v17 }
 0xab3   :  { %7083 = vrcp.f32 %v5771_v38 }
 0xabb   :  { %v7080_v49 = vpop.eup %7079 }
 0xabc   :  { %v7082_v53 = vpop.eup %7081  ;;  %v5775_v42 = vmul.f32 %v7080_v49, %v7078_v51 }
 0xabd   :  { %v5774_v1 = vmul.f32 %v7082_v53, %v9608_v47  ;;  %v7084_v36 = vpop.eup %7083 }
 0xabf   :  { %v5776_v54 = vadd.f32 %v5775_v42, %v5774_v1 }
 0xac1   :  { %7085 = vtanh.f32 %v5776_v54 }
 0xacb   :  { %v7086_v35 = vpop.eup %7085 }
 0xacc   :  { %v5778_v39 = vmul.f32 %v7086_v35, %v7084_v36 }
 0xace   :  { %5781 = vst [vmem:[%s9654_s10] sm:$0xff] %v5778_v39 }
 0xacf   :  { %5790 = vsyncpa [#allocation5], 1 }
 0xad0   :  { %5791 = vsyncpa [#allocation7], 1 }

// kernel: net4_forward.4
= control target key start
LH: loop header
LB: loop body
LE: loop exit
PB: predicated region body
PF: predicated region fallthrough
CT: control target
= control target key end

     0   :  { %v10724_v3 = vmov 0   ;;  %s10716_s2 = inlined_call_operand.vmem [shape: bf16[256,1024], index: 2, kind: input, shape index: {}]   ;;  %s10717_s1 = inlined_call_operand.vmem [shape: f32[8,8,128], index: 1, kind: input, shape index: {}]   ;;  %s10718_s4 = inlined_call_operand.vmem [shape: bf16[128,512], index: 4, kind: input, shape index: {}]   ;;  %s10719_s0 = inlined_call_operand.vmem [shape: f32[8,8,128], index: 0, kind: input, shape index: {}]   ;;  %s10720_s5 = inlined_call_operand.vmem [shape: bf16[128,512], index: 5, kind: input, shape index: {}]   ;;  %s10721_s3 = inlined_call_operand.vmem [shape: f32[1,1024], index: 3, kind: input, shape index: {}]   ;;  %s10722_s6 = inlined_call_operand.vmem [shape: f32[8,8,128], index: 6, kind: output, shape index: {0}]   ;;  %s10723_s7 = inlined_call_operand.vmem [shape: f32[8,8,128], index: 7, kind: output, shape index: {1}]  }
   0x1   :  { %v82_v0 = vld [vmem:[%s10716_s2 + $0x200] sm:$0xff]  ;;  %v83_v2 = vld [vmem:[%s10716_s2 + $0x208] sm:$0xff]  ;;  %306 = vmatprep.mubr.bf16.mxu0 %v10724_v3  ;;  %379 = vmatprep.mubr.bf16.mxu1 %v10724_v3 }
   0x2   :  { %v84_v1 = vld [vmem:[%s10716_s2 + $0x220] sm:$0xff]  ;;  %v85_v5 = vld [vmem:[%s10716_s2 + $0x228] sm:$0xff] }
   0x3   :  { %v6537_v4 = vcombine.high %v82_v0, %v84_v1  ;;  %v6536_v6 = vcombine.low %v82_v0, %v84_v1  ;;  %v86_v7 = vld [vmem:[%s10716_s2 + $0x240] sm:$0xff]  ;;  %v6539_v9 = vcombine.high %v83_v2, %v85_v5  ;;  %v6538_v10 = vcombine.low %v83_v2, %v85_v5  ;;  %v87_v12 = vld [vmem:[%s10716_s2 + $0x248] sm:$0xff] }
   0x4   :  { %v88_v8 = vld [vmem:[%s10716_s2 + $0x260] sm:$0xff]  ;;  %v89_v13 = vld [vmem:[%s10716_s2 + $0x268] sm:$0xff] }
   0x5   :  { %v6541_v11 = vcombine.high %v86_v7, %v88_v8  ;;  %v90_v14 = vld [vmem:[%s10716_s2 + $0x280] sm:$0xff]  ;;  %274 = vmatprep.subr.bf16.mxu0 %v6537_v4  ;;  %v6543_v15 = vcombine.high %v87_v12, %v89_v13  ;;  %v91_v17 = vld [vmem:[%s10716_s2 + $0x288] sm:$0xff]  ;;  %347 = vmatprep.subr.bf16.mxu1 %v6539_v9  ;;  %v6540_v19 = vcombine.low %v86_v7, %v88_v8 }
   0x6   :  { %v92_v16 = vld [vmem:[%s10716_s2 + $0x2a0] sm:$0xff]  ;;  %v93_v18 = vld [vmem:[%s10716_s2 + $0x2a8] sm:$0xff]  ;;  %275 = vmatpush1.bf16.msra.mxu0 %v6536_v6  ;;  %348 = vmatpush1.bf16.msra.mxu1 %v6538_v10  ;;  %v6542_v20 = vcombine.low %v87_v12, %v89_v13 }
   0x7   :  { %276 = vmatprep.subr.bf16.mxu0 %v6541_v11  ;;  %v6545_v21 = vcombine.high %v90_v14, %v92_v16  ;;  %349 = vmatprep.subr.bf16.mxu1 %v6543_v15  ;;  %v6547_v22 = vcombine.high %v91_v17, %v93_v18  ;;  %v94_v23 = vld [vmem:[%s10716_s2 + $0x2c0] sm:$0xff]  ;;  %v95_v25 = vld [vmem:[%s10716_s2 + $0x2c8] sm:$0xff]  ;;  %v6544_v27 = vcombine.low %v90_v14, %v92_v16 }
   0x8   :  { %v96_v24 = vld [vmem:[%s10716_s2 + $0x2e0] sm:$0xff]  ;;  %v97_v26 = vld [vmem:[%s10716_s2 + $0x2e8] sm:$0xff]  ;;  %v6546_v28 = vcombine.low %v91_v17, %v93_v18 }
   0x9   :  { %v6549_v29 = vcombine.high %v94_v23, %v96_v24  ;;  %v6551_v30 = vcombine.high %v95_v25, %v97_v26  ;;  %v98_v31 = vld [vmem:[%s10716_s2 + $0x300] sm:$0xff]  ;;  %v99_v33 = vld [vmem:[%s10716_s2 + $0x308] sm:$0xff]  ;;  %v6548_v35 = vcombine.low %v94_v23, %v96_v24  ;;  %v6550_v36 = vcombine.low %v95_v25, %v97_v26  ;;  %v40_v24 = vld [vmem:[%s10717_s1 + $0x10] sm:$0xff] }
   0xa   :  { %277 = vmatpush1.bf16.msra.mxu0 %v6540_v19  ;;  %350 = vmatpush1.bf16.msra.mxu1 %v6542_v20  ;;  %v100_v32 = vld [vmem:[%s10716_s2 + $0x320] sm:$0xff]  ;;  %v101_v34 = vld [vmem:[%s10716_s2 + $0x328] sm:$0xff]  ;;  %v41_v25 = vld [vmem:[%s10717_s1 + $0x18] sm:$0xff] }
   0xb   :  { %278 = vmatprep.subr.bf16.mxu0 %v6545_v21  ;;  %351 = vmatprep.subr.bf16.mxu1 %v6547_v22  ;;  %v6553_v37 = vcombine.high %v98_v31, %v100_v32  ;;  %v6555_v38 = vcombine.high %v99_v33, %v101_v34  ;;  %v102_v39 = vld [vmem:[%s10716_s2 + $0x340] sm:$0xff]  ;;  %v103_v41 = vld [vmem:[%s10716_s2 + $0x348] sm:$0xff]  ;;  %v6552_v43 = vcombine.low %v98_v31, %v100_v32 }
   0xc   :  { %v104_v40 = vld [vmem:[%s10716_s2 + $0x360] sm:$0xff]  ;;  %v105_v42 = vld [vmem:[%s10716_s2 + $0x368] sm:$0xff]  ;;  %v6554_v44 = vcombine.low %v99_v33, %v101_v34  ;;  %v8142_v31 = vpack.c.bf16 %v41_v25, %v40_v24  ;;  %v848_v24 = vld [vmem:[%s10716_s2 + $0x250] sm:$0xff] }
   0xd   :  { %v6557_v45 = vcombine.high %v102_v39, %v104_v40  ;;  %v6559_v46 = vcombine.high %v103_v41, %v105_v42  ;;  %v106_v47 = vld [vmem:[%s10716_s2 + $0x380] sm:$0xff]  ;;  %v107_v49 = vld [vmem:[%s10716_s2 + $0x388] sm:$0xff]  ;;  %v6556_v51 = vcombine.low %v102_v39, %v104_v40  ;;  %v6558_v52 = vcombine.low %v103_v41, %v105_v42  ;;  %v850_v25 = vld [vmem:[%s10716_s2 + $0x270] sm:$0xff] }
   0xe   :  { %279 = vmatpush1.bf16.msra.mxu0 %v6544_v27  ;;  %352 = vmatpush1.bf16.msra.mxu1 %v6546_v28  ;;  %v108_v48 = vld [vmem:[%s10716_s2 + $0x3a0] sm:$0xff]  ;;  %v109_v50 = vld [vmem:[%s10716_s2 + $0x3a8] sm:$0xff] }
   0xf   :  { %280 = vmatprep.subr.bf16.mxu0 %v6549_v29  ;;  %353 = vmatprep.subr.bf16.mxu1 %v6551_v30  ;;  %v6561_v53 = vcombine.high %v106_v47, %v108_v48  ;;  %v6563_v54 = vcombine.high %v107_v49, %v109_v50  ;;  %v110_v55 = vld [vmem:[%s10716_s2 + $0x3c0] sm:$0xff]  ;;  %v111_v57 = vld [vmem:[%s10716_s2 + $0x3c8] sm:$0xff]  ;;  %v6560_v59 = vcombine.low %v106_v47, %v108_v48 }
  0x10   :  { %v112_v56 = vld [vmem:[%s10716_s2 + $0x3e0] sm:$0xff]  ;;  %v113_v58 = vld [vmem:[%s10716_s2 + $0x3e8] sm:$0xff]  ;;  %v6562_v60 = vcombine.low %v107_v49, %v109_v50 }
  0x11   :  { %v6565_v61 = vcombine.high %v110_v55, %v112_v56  ;;  %v6567_v62 = vcombine.high %v111_v57, %v113_v58  ;;  %v50_v63 = vld [vmem:[%s10716_s2] sm:$0xff]  ;;  %v51_v1 = vld [vmem:[%s10716_s2 + $0x8] sm:$0xff]  ;;  %v6564_v4 = vcombine.low %v110_v55, %v112_v56  ;;  %v6566_v7 = vcombine.low %v111_v57, %v113_v58  ;;  %v44_v57 = vld [vmem:[%s10717_s1 + $0x30] sm:$0xff] }
  0x12   :  { %281 = vmatpush1.bf16.msra.mxu0 %v6548_v35  ;;  %354 = vmatpush1.bf16.msra.mxu1 %v6550_v36  ;;  %v52_v0 = vld [vmem:[%s10716_s2 + $0x20] sm:$0xff]  ;;  %v53_v2 = vld [vmem:[%s10716_s2 + $0x28] sm:$0xff] }
  0x13   :  { %282 = vmatprep.subr.bf16.mxu0 %v6553_v37  ;;  %355 = vmatprep.subr.bf16.mxu1 %v6555_v38  ;;  %v38_v5 = vld [vmem:[%s10717_s1] sm:$0xff]  ;;  %v39_v6 = vld [vmem:[%s10717_s1 + $0x8] sm:$0xff]  ;;  %v6569_v8 = vcombine.high %v50_v63, %v52_v0  ;;  %v6571_v9 = vcombine.high %v51_v1, %v53_v2  ;;  %v6568_v15 = vcombine.low %v50_v63, %v52_v0  ;;  %v45_v63 = vld [vmem:[%s10717_s1 + $0x38] sm:$0xff] }
  0x14   :  { %v54_v10 = vld [vmem:[%s10716_s2 + $0x40] sm:$0xff]  ;;  %v8106_v12 = vpack.c.bf16 %v39_v6, %v38_v5  ;;  %v55_v13 = vld [vmem:[%s10716_s2 + $0x48] sm:$0xff]  ;;  %v6570_v16 = vcombine.low %v51_v1, %v53_v2  ;;  %v8214_v6 = vpack.c.bf16 %v45_v63, %v44_v57  ;;  %v861_v57 = vld [vmem:[%s10716_s2 + $0x318] sm:$0xff] }
  0x15   :  { %v56_v11 = vld [vmem:[%s10716_s2 + $0x60] sm:$0xff]  ;;  %v57_v14 = vld [vmem:[%s10716_s2 + $0x68] sm:$0xff] }
  0x16   :  { %283 = vmatpush1.bf16.msra.mxu0 %v6552_v43  ;;  %356 = vmatpush1.bf16.msra.mxu1 %v6554_v44  ;;  %v6573_v17 = vcombine.high %v54_v10, %v56_v11  ;;  %v6575_v18 = vcombine.high %v55_v13, %v57_v14  ;;  %v58_v19 = vld [vmem:[%s10716_s2 + $0x80] sm:$0xff]  ;;  %v59_v21 = vld [vmem:[%s10716_s2 + $0x88] sm:$0xff]  ;;  %v6572_v23 = vcombine.low %v54_v10, %v56_v11 }
  0x17   :  { %284 = vmatprep.subr.bf16.mxu0 %v6557_v45  ;;  %357 = vmatprep.subr.bf16.mxu1 %v6559_v46  ;;  %v60_v20 = vld [vmem:[%s10716_s2 + $0xa0] sm:$0xff]  ;;  %v61_v22 = vld [vmem:[%s10716_s2 + $0xa8] sm:$0xff]  ;;  %v6574_v26 = vcombine.low %v55_v13, %v57_v14 }
  0x18   :  { %v6577_v27 = vcombine.high %v58_v19, %v60_v20  ;;  %v6579_v28 = vcombine.high %v59_v21, %v61_v22  ;;  %v62_v29 = vld [vmem:[%s10716_s2 + $0xc0] sm:$0xff]  ;;  %v63_v32 = vld [vmem:[%s10716_s2 + $0xc8] sm:$0xff]  ;;  %v6576_v34 = vcombine.low %v58_v19, %v60_v20  ;;  %v6578_v35 = vcombine.low %v59_v21, %v61_v22 }
  0x19   :  { %v64_v30 = vld [vmem:[%s10716_s2 + $0xe0] sm:$0xff]  ;;  %v65_v33 = vld [vmem:[%s10716_s2 + $0xe8] sm:$0xff] }
  0x1a   :  { %285 = vmatpush1.bf16.msra.mxu0 %v6556_v51  ;;  %358 = vmatpush1.bf16.msra.mxu1 %v6558_v52  ;;  %v6581_v36 = vcombine.high %v62_v29, %v64_v30  ;;  %v6583_v37 = vcombine.high %v63_v32, %v65_v33  ;;  %v66_v38 = vld [vmem:[%s10716_s2 + $0x100] sm:$0xff]  ;;  %v67_v40 = vld [vmem:[%s10716_s2 + $0x108] sm:$0xff]  ;;  %v6580_v42 = vcombine.low %v62_v29, %v64_v30 }
  0x1b   :  { %286 = vmatprep.subr.bf16.mxu0 %v6561_v53  ;;  %359 = vmatprep.subr.bf16.mxu1 %v6563_v54  ;;  %v68_v39 = vld [vmem:[%s10716_s2 + $0x120] sm:$0xff]  ;;  %v69_v41 = vld [vmem:[%s10716_s2 + $0x128] sm:$0xff]  ;;  %v6582_v45 = vcombine.low %v63_v32, %v65_v33  ;;  %v6605_v32 = vcombine.high %v848_v24, %v850_v25 }
  0x1c   :  { %v42_v43 = vld [vmem:[%s10717_s1 + $0x20] sm:$0xff]  ;;  %v43_v44 = vld [vmem:[%s10717_s1 + $0x28] sm:$0xff]  ;;  %v6585_v46 = vcombine.high %v66_v38, %v68_v39  ;;  %v6587_v47 = vcombine.high %v67_v40, %v69_v41  ;;  %v6584_v53 = vcombine.low %v66_v38, %v68_v39  ;;  %v6586_v54 = vcombine.low %v67_v40, %v69_v41  ;;  %v855_v38 = vld [vmem:[%s10716_s2 + $0x2b8] sm:$0xff] }
  0x1d   :  { %v70_v48 = vld [vmem:[%s10716_s2 + $0x140] sm:$0xff]  ;;  %v8178_v50 = vpack.c.bf16 %v43_v44, %v42_v43  ;;  %v71_v51 = vld [vmem:[%s10716_s2 + $0x148] sm:$0xff]  ;;  %v6604_v39 = vcombine.low %v848_v24, %v850_v25  ;;  %v29_v40 = vld [vmem:[%s10719_s0 + $0x18] sm:$0xff] }
  0x1e   :  { %287 = vmatpush1.bf16.msra.mxu0 %v6560_v59  ;;  %360 = vmatpush1.bf16.msra.mxu1 %v6562_v60  ;;  %v72_v49 = vld [vmem:[%s10716_s2 + $0x160] sm:$0xff]  ;;  %v73_v52 = vld [vmem:[%s10716_s2 + $0x168] sm:$0xff]  ;;  %v856_v44 = vld [vmem:[%s10716_s2 + $0x2d0] sm:$0xff] }
  0x1f   :  { %288 = vmatprep.subr.bf16.mxu0 %v6565_v61  ;;  %361 = vmatprep.subr.bf16.mxu1 %v6567_v62  ;;  %v6589_v55 = vcombine.high %v70_v48, %v72_v49  ;;  %v6591_v56 = vcombine.high %v71_v51, %v73_v52  ;;  %v74_v58 = vld [vmem:[%s10716_s2 + $0x180] sm:$0xff]  ;;  %v75_v60 = vld [vmem:[%s10716_s2 + $0x188] sm:$0xff]  ;;  %v6588_v62 = vcombine.low %v70_v48, %v72_v49  ;;  %v859_v48 = vld [vmem:[%s10716_s2 + $0x2f8] sm:$0xff] }
  0x20   :  { %v76_v59 = vld [vmem:[%s10716_s2 + $0x1a0] sm:$0xff]  ;;  %v77_v61 = vld [vmem:[%s10716_s2 + $0x1a8] sm:$0xff]  ;;  %v6590_v0 = vcombine.low %v71_v51, %v73_v52  ;;  %v873_v25 = vld [vmem:[%s10716_s2 + $0x3d8] sm:$0xff] }
  0x21   :  { %v6593_v1 = vcombine.high %v74_v58, %v76_v59  ;;  %v6595_v2 = vcombine.high %v75_v60, %v77_v61  ;;  %v80_v5 = vld [vmem:[%s10716_s2 + $0x1e0] sm:$0xff]  ;;  %v6594_v10 = vcombine.low %v75_v60, %v77_v61  ;;  %v27_v20 = vld [vmem:[%s10719_s0 + $0x8] sm:$0xff] }
  0x22   :  { %289 = vmatpush1.bf16.msra.mxu0 %v6564_v4  ;;  %362 = vmatpush1.bf16.msra.mxu1 %v6566_v7  ;;  %v78_v4 = vld [vmem:[%s10716_s2 + $0x1c0] sm:$0xff]  ;;  %v79_v7 = vld [vmem:[%s10716_s2 + $0x1c8] sm:$0xff] }
  0x23   :  { %580 = vmatprep.subr.bf16.mxu0 %v6569_v8  ;;  %653 = vmatprep.subr.bf16.mxu1 %v6571_v9  ;;  %v81_v8 = vld [vmem:[%s10716_s2 + $0x1e8] sm:$0xff]  ;;  %v6592_v9 = vcombine.low %v74_v58, %v76_v59  ;;  %v6597_v11 = vcombine.high %v78_v4, %v80_v5  ;;  %v26_v14 = vld [vmem:[%s10719_s0] sm:$0xff]  ;;  %v6596_v19 = vcombine.low %v78_v4, %v80_v5  ;;  %v863_v58 = vld [vmem:[%s10716_s2 + $0x338] sm:$0xff] }
  0x24   :  { %v6599_v13 = vcombine.high %v79_v7, %v81_v8  ;;  %v6598_v21 = vcombine.low %v79_v7, %v81_v8  ;;  %v31_v60 = vld [vmem:[%s10719_s0 + $0x28] sm:$0xff]  ;;  %v6619_v63 = vcombine.high %v861_v57, %v863_v58  ;;  %v865_v4 = vld [vmem:[%s10716_s2 + $0x358] sm:$0xff]  ;;  %v6618_v8 = vcombine.low %v861_v57, %v863_v58  ;;  %v826_v57 = vld [vmem:[%s10716_s2 + $0xf0] sm:$0xff] }
  0x25   :  { %307 = vmatmul.mubr.bf16.vlgmr.msra.gmra.mrb[0].mxu0 %v8106_v12  ;;  %380 = vmatmul.mubr.bf16.vlgmr.msra.gmra.mrb[0].mxu1 %v8106_v12  ;;  %v867_v5 = vld [vmem:[%s10716_s2 + $0x378] sm:$0xff] }
  0x26   :  { %581 = vmatpush1.bf16.msra.mxu0 %v6568_v15  ;;  %654 = vmatpush1.bf16.msra.mxu1 %v6570_v16  ;;  %v844_v15 = vld [vmem:[%s10716_s2 + $0x210] sm:$0xff] }
  0x27   :  { %582 = vmatprep.subr.bf16.mxu0 %v6573_v17  ;;  %655 = vmatprep.subr.bf16.mxu1 %v6575_v18  ;;  %v846_v16 = vld [vmem:[%s10716_s2 + $0x230] sm:$0xff]  ;;  %v845_v17 = vld [vmem:[%s10716_s2 + $0x218] sm:$0xff] }
  0x28   :  { %316 = vmatprep.mubr.bf16.mxu0 %v10724_v3  ;;  %389 = vmatprep.mubr.bf16.mxu1 %v10724_v3  ;;  %v847_v18 = vld [vmem:[%s10716_s2 + $0x238] sm:$0xff]  ;;  %v6601_v22 = vcombine.high %v844_v15, %v846_v16  ;;  %v6600_v29 = vcombine.low %v844_v15, %v846_v16 }
  0x29   :  { %v6602_v30 = vcombine.low %v845_v17, %v847_v18  ;;  %v869_v15 = vld [vmem:[%s10716_s2 + $0x398] sm:$0xff] }
  0x2a   :  { %583 = vmatpush1.bf16.msra.mxu0 %v6572_v23  ;;  %656 = vmatpush1.bf16.msra.mxu1 %v6574_v26  ;;  %v6603_v23 = vcombine.high %v845_v17, %v847_v18  ;;  %v8250_v26 = vpack.c.bf16 %v27_v20, %v26_v14  ;;  %v870_v14 = vld [vmem:[%s10716_s2 + $0x3b0] sm:$0xff]  ;;  %v871_v16 = vld [vmem:[%s10716_s2 + $0x3b8] sm:$0xff] }
  0x2b   :  { %584 = vmatprep.subr.bf16.mxu0 %v6577_v27  ;;  %657 = vmatprep.subr.bf16.mxu1 %v6579_v28  ;;  %v849_v27 = vld [vmem:[%s10716_s2 + $0x258] sm:$0xff] }
  0x2c   :  { %v851_v28 = vld [vmem:[%s10716_s2 + $0x278] sm:$0xff] }
  0x2d   :  { %317 = vmatmul.mubr.bf16.gmra.mrb[4].mxu0 %v8142_v31  ;;  %390 = vmatmul.mubr.bf16.gmra.mrb[4].mxu1 %v8142_v31  ;;  %v6607_v33 = vcombine.high %v849_v27, %v851_v28  ;;  %v6606_v41 = vcombine.low %v849_v27, %v851_v28  ;;  %v33_v18 = vld [vmem:[%s10719_s0 + $0x38] sm:$0xff] }
  0x2e   :  { %585 = vmatpush1.bf16.msra.mxu0 %v6576_v34  ;;  %658 = vmatpush1.bf16.msra.mxu1 %v6578_v35  ;;  %v28_v34 = vld [vmem:[%s10719_s0 + $0x10] sm:$0xff]  ;;  %v875_v27 = vld [vmem:[%s10716_s2 + $0x3f8] sm:$0xff] }
  0x2f   :  { %586 = vmatprep.subr.bf16.mxu0 %v6581_v36  ;;  %659 = vmatprep.subr.bf16.mxu1 %v6583_v37  ;;  %v852_v35 = vld [vmem:[%s10716_s2 + $0x290] sm:$0xff]  ;;  %v853_v37 = vld [vmem:[%s10716_s2 + $0x298] sm:$0xff] }
  0x30   :  { %326 = vmatprep.mubr.bf16.mxu0 %v10724_v3  ;;  %399 = vmatprep.mubr.bf16.mxu1 %v10724_v3  ;;  %v854_v36 = vld [vmem:[%s10716_s2 + $0x2b0] sm:$0xff]  ;;  %v6611_v43 = vcombine.high %v853_v37, %v855_v38  ;;  %v6610_v51 = vcombine.low %v853_v37, %v855_v38 }
  0x31   :  { %v6608_v49 = vcombine.low %v852_v35, %v854_v36  ;;  %v816_v38 = vld [vmem:[%s10716_s2 + $0x50] sm:$0xff] }
  0x32   :  { %587 = vmatpush1.bf16.msra.mxu0 %v6580_v42  ;;  %660 = vmatpush1.bf16.msra.mxu1 %v6582_v45  ;;  %v6609_v42 = vcombine.high %v852_v35, %v854_v36  ;;  %v858_v45 = vld [vmem:[%s10716_s2 + $0x2f0] sm:$0xff]  ;;  %v813_v35 = vld [vmem:[%s10716_s2 + $0x18] sm:$0xff] }
  0x33   :  { %588 = vmatprep.subr.bf16.mxu0 %v6585_v46  ;;  %661 = vmatprep.subr.bf16.mxu1 %v6587_v47  ;;  %v8286_v46 = vpack.c.bf16 %v29_v40, %v28_v34  ;;  %v857_v47 = vld [vmem:[%s10716_s2 + $0x2d8] sm:$0xff]  ;;  %v6613_v52 = vcombine.high %v856_v44, %v858_v45  ;;  %v6612_v59 = vcombine.low %v856_v44, %v858_v45 }
  0x34   :  { %v6614_v61 = vcombine.low %v857_v47, %v859_v48  ;;  %v6631_v34 = vcombine.high %v873_v25, %v875_v27  ;;  %v815_v36 = vld [vmem:[%s10716_s2 + $0x38] sm:$0xff]  ;;  %v6630_v40 = vcombine.low %v873_v25, %v875_v27 }
  0x35   :  { %327 = vmatmul.mubr.bf16.gmra.mrb[8].mxu0 %v8178_v50  ;;  %400 = vmatmul.mubr.bf16.gmra.mrb[8].mxu1 %v8178_v50  ;;  %v6635_v44 = vcombine.high %v813_v35, %v815_v36 }
  0x36   :  { %589 = vmatpush1.bf16.msra.mxu0 %v6584_v53  ;;  %662 = vmatpush1.bf16.msra.mxu1 %v6586_v54  ;;  %v6615_v53 = vcombine.high %v857_v47, %v859_v48  ;;  %v30_v54 = vld [vmem:[%s10719_s0 + $0x20] sm:$0xff]  ;;  %v820_v47 = vld [vmem:[%s10716_s2 + $0x90] sm:$0xff] }
  0x37   :  { %590 = vmatprep.subr.bf16.mxu0 %v6589_v55  ;;  %663 = vmatprep.subr.bf16.mxu1 %v6591_v56  ;;  %v860_v55 = vld [vmem:[%s10716_s2 + $0x310] sm:$0xff] }
  0x38   :  { %336 = vmatprep.mubr.bf16.mxu0 %v10724_v3  ;;  %409 = vmatprep.mubr.bf16.mxu1 %v10724_v3  ;;  %v862_v56 = vld [vmem:[%s10716_s2 + $0x330] sm:$0xff] }
  0x39   :  { %v6616_v7 = vcombine.low %v860_v55, %v862_v56  ;;  %v822_v48 = vld [vmem:[%s10716_s2 + $0xb0] sm:$0xff] }
  0x3a   :  { %591 = vmatpush1.bf16.msra.mxu0 %v6588_v62  ;;  %664 = vmatpush1.bf16.msra.mxu1 %v6590_v0  ;;  %v6617_v62 = vcombine.high %v860_v55, %v862_v56  ;;  %v864_v0 = vld [vmem:[%s10716_s2 + $0x350] sm:$0xff] }
  0x3b   :  { %592 = vmatprep.subr.bf16.mxu0 %v6593_v1  ;;  %665 = vmatprep.subr.bf16.mxu1 %v6595_v2  ;;  %v866_v1 = vld [vmem:[%s10716_s2 + $0x370] sm:$0xff]  ;;  %v8322_v2 = vpack.c.bf16 %v31_v60, %v30_v54  ;;  %v825_v60 = vld [vmem:[%s10716_s2 + $0xd8] sm:$0xff] }
  0x3c   :  { %v6620_v17 = vcombine.low %v864_v0, %v866_v1  ;;  %v824_v56 = vld [vmem:[%s10716_s2 + $0xd0] sm:$0xff] }
  0x3d   :  { %337 = vmatmul.mubr.bf16.gmra.mrb[12].mxu0 %v8214_v6  ;;  %410 = vmatmul.mubr.bf16.gmra.mrb[12].mxu1 %v8214_v6 }
  0x3e   :  { %593 = vmatpush1.bf16.msra.mxu0 %v6592_v9  ;;  %666 = vmatpush1.bf16.msra.mxu1 %v6594_v10  ;;  %v6621_v9 = vcombine.high %v864_v0, %v866_v1  ;;  %v6623_v10 = vcombine.high %v865_v4, %v867_v5  ;;  %v830_v0 = vld [vmem:[%s10716_s2 + $0x130] sm:$0xff] }
  0x3f   :  { %594 = vmatprep.subr.bf16.mxu0 %v6597_v11  ;;  %667 = vmatprep.subr.bf16.mxu1 %v6599_v13  ;;  %v32_v11 = vld [vmem:[%s10719_s0 + $0x30] sm:$0xff] }
  0x40   :  { %612 = vmatprep.mubr.bf16.mxu0 %v10724_v3  ;;  %685 = vmatprep.mubr.bf16.mxu1 %v10724_v3  ;;  %v868_v13 = vld [vmem:[%s10716_s2 + $0x390] sm:$0xff]  ;;  %v8358_v24 = vpack.c.bf16 %v33_v18, %v32_v11 }
  0x41   :  { %v6625_v20 = vcombine.high %v868_v13, %v870_v14  ;;  %v6624_v28 = vcombine.low %v868_v13, %v870_v14  ;;  %v834_v11 = vld [vmem:[%s10716_s2 + $0x170] sm:$0xff] }
  0x42   :  { %595 = vmatpush1.bf16.msra.mxu0 %v6596_v19  ;;  %668 = vmatpush1.bf16.msra.mxu1 %v6598_v21  ;;  %v6622_v19 = vcombine.low %v865_v4, %v867_v5  ;;  %v6627_v21 = vcombine.high %v869_v15, %v871_v16  ;;  %v6645_v4 = vcombine.high %v824_v56, %v826_v57  ;;  %v829_v5 = vld [vmem:[%s10716_s2 + $0x118] sm:$0xff]  ;;  %v836_v18 = vld [vmem:[%s10716_s2 + $0x190] sm:$0xff] }
  0x43   :  { %1036 = vmatprep.subr.bf16.mxu0 %v6601_v22  ;;  %1109 = vmatprep.subr.bf16.mxu1 %v6603_v23  ;;  %v872_v22 = vld [vmem:[%s10716_s2 + $0x3d0] sm:$0xff] }
  0x44   :  { %v874_v23 = vld [vmem:[%s10716_s2 + $0x3f0] sm:$0xff] }
  0x45   :  { %613 = vmatmul.mubr.bf16.vlgmr.msra.gmra.mrb[0].mxu0 %v8250_v26  ;;  %686 = vmatmul.mubr.bf16.vlgmr.msra.gmra.mrb[0].mxu1 %v8250_v26  ;;  %v6628_v37 = vcombine.low %v872_v22, %v874_v23 }
  0x46   :  { %1037 = vmatpush1.bf16.msra.mxu0 %v6600_v29  ;;  %1110 = vmatpush1.bf16.msra.mxu1 %v6602_v30  ;;  %v812_v29 = vld [vmem:[%s10716_s2 + $0x10] sm:$0xff]  ;;  %v6626_v30 = vcombine.low %v869_v15, %v871_v16  ;;  %v833_v15 = vld [vmem:[%s10716_s2 + $0x158] sm:$0xff] }
  0x47   :  { %1038 = vmatprep.subr.bf16.mxu0 %v6605_v32  ;;  %1111 = vmatprep.subr.bf16.mxu1 %v6607_v33  ;;  %v6629_v32 = vcombine.high %v872_v22, %v874_v23  ;;  %v814_v33 = vld [vmem:[%s10716_s2 + $0x30] sm:$0xff]  ;;  %v837_v22 = vld [vmem:[%s10716_s2 + $0x198] sm:$0xff] }
  0x48   :  { %622 = vmatprep.mubr.bf16.mxu0 %v10724_v3  ;;  %695 = vmatprep.mubr.bf16.mxu1 %v10724_v3  ;;  %v6632_v45 = vcombine.low %v812_v29, %v814_v33  ;;  %v839_v23 = vld [vmem:[%s10716_s2 + $0x1b8] sm:$0xff] }
  0x4a   :  { %1039 = vmatpush1.bf16.msra.mxu0 %v6604_v39  ;;  %1112 = vmatpush1.bf16.msra.mxu1 %v6606_v41  ;;  %v818_v39 = vld [vmem:[%s10716_s2 + $0x70] sm:$0xff]  ;;  %v6633_v41 = vcombine.high %v812_v29, %v814_v33  ;;  %v841_v33 = vld [vmem:[%s10716_s2 + $0x1d8] sm:$0xff] }
  0x4b   :  { %1040 = vmatprep.subr.bf16.mxu0 %v6609_v42  ;;  %1113 = vmatprep.subr.bf16.mxu1 %v6611_v43  ;;  %v817_v42 = vld [vmem:[%s10716_s2 + $0x58] sm:$0xff]  ;;  %v6636_v55 = vcombine.low %v816_v38, %v818_v39  ;;  %v842_v29 = vld [vmem:[%s10716_s2 + $0x1f0] sm:$0xff] }
  0x4c   :  { %v819_v43 = vld [vmem:[%s10716_s2 + $0x78] sm:$0xff] }
  0x4d   :  { %623 = vmatmul.mubr.bf16.gmra.mrb[4].mxu0 %v8286_v46  ;;  %696 = vmatmul.mubr.bf16.gmra.mrb[4].mxu1 %v8286_v46  ;;  %v6639_v54 = vcombine.high %v817_v42, %v819_v43  ;;  %v6638_v58 = vcombine.low %v817_v42, %v819_v43  ;;  %v8494_v43 = vld [vmem:[%s10718_s4] ss:$16 sps:$4 sm:$0xff]  }
  0x4e   :  { %1041 = vmatpush1.bf16.msra.mxu0 %v6608_v49  ;;  %1114 = vmatpush1.bf16.msra.mxu1 %v6610_v51  ;;  %v6634_v49 = vcombine.low %v813_v35, %v815_v36  ;;  %v6637_v51 = vcombine.high %v816_v38, %v818_v39  ;;  %v6658_v36 = vcombine.low %v837_v22, %v839_v23  ;;  %v8482_v39 = vld [vmem:[%s10718_s4 + $0x4] ss:$16 sps:$4 sm:$0xff]  }
  0x4f   :  { %1042 = vmatprep.subr.bf16.mxu0 %v6613_v52  ;;  %1115 = vmatprep.subr.bf16.mxu1 %v6615_v53  ;;  %v821_v52 = vld [vmem:[%s10716_s2 + $0x98] sm:$0xff] }
  0x50   :  { %632 = vmatprep.mubr.bf16.mxu0 %v10724_v3  ;;  %705 = vmatprep.mubr.bf16.mxu1 %v10724_v3  ;;  %v823_v53 = vld [vmem:[%s10716_s2 + $0xb8] sm:$0xff] }
  0x51   :  { %v6642_v1 = vcombine.low %v821_v52, %v823_v53 }
  0x52   :  { %1043 = vmatpush1.bf16.msra.mxu0 %v6612_v59  ;;  %1116 = vmatpush1.bf16.msra.mxu1 %v6614_v61  ;;  %v6641_v59 = vcombine.high %v820_v47, %v822_v48  ;;  %v6643_v61 = vcombine.high %v821_v52, %v823_v53  ;;  %v8544_v52 = vld [vmem:[%s10718_s4 + $0x40] ss:$16 sps:$4 sm:$0xff]   ;;  %v8555_v53 = vld [vmem:[%s10718_s4 + $0x64] ss:$16 sps:$4 sm:$0xff]  }
  0x53   :  { %1044 = vmatprep.subr.bf16.mxu0 %v6617_v62  ;;  %1117 = vmatprep.subr.bf16.mxu1 %v6619_v63  ;;  %v6640_v62 = vcombine.low %v820_v47, %v822_v48  ;;  %v828_v63 = vld [vmem:[%s10716_s2 + $0x110] sm:$0xff]  ;;  %v8523_v48 = vld [vmem:[%s10718_s4 + $0x28] ss:$16 sps:$4 sm:$0xff]  }
  0x54   :  { %v6649_v14 = vcombine.high %v828_v63, %v830_v0  ;;  %v8517_v47 = vld [vmem:[%s10718_s4 + $0x20] ss:$16 sps:$4 sm:$0xff]  }
  0x55   :  { %633 = vmatmul.mubr.bf16.gmra.mrb[8].mxu0 %v8322_v2  ;;  %706 = vmatmul.mubr.bf16.gmra.mrb[8].mxu1 %v8322_v2 }
  0x56   :  { %1045 = vmatpush1.bf16.msra.mxu0 %v6616_v7  ;;  %1118 = vmatpush1.bf16.msra.mxu1 %v6618_v8  ;;  %v831_v7 = vld [vmem:[%s10716_s2 + $0x138] sm:$0xff] }
  0x57   :  { %1046 = vmatprep.subr.bf16.mxu0 %v6621_v9  ;;  %1119 = vmatprep.subr.bf16.mxu1 %v6623_v10  ;;  %v6644_v9 = vcombine.low %v824_v56, %v826_v57  ;;  %v832_v10 = vld [vmem:[%s10716_s2 + $0x150] sm:$0xff]  ;;  %v6651_v16 = vcombine.high %v829_v5, %v831_v7  ;;  %v8575_v56 = vld [vmem:[%s10718_s4 + $0x68] ss:$16 sps:$4 sm:$0xff]  }
  0x58   :  { %642 = vmatprep.mubr.bf16.mxu0 %v10724_v3  ;;  %715 = vmatprep.mubr.bf16.mxu1 %v10724_v3  ;;  %v6652_v27 = vcombine.low %v832_v10, %v834_v11  ;;  %v8580_v57 = vld [vmem:[%s10718_s4 + $0x84] ss:$16 sps:$4 sm:$0xff]  }
  0x5a   :  { %1047 = vmatpush1.bf16.msra.mxu0 %v6620_v17  ;;  %1120 = vmatpush1.bf16.msra.mxu1 %v6622_v19  ;;  %v6648_v17 = vcombine.low %v828_v63, %v830_v0  ;;  %v838_v19 = vld [vmem:[%s10716_s2 + $0x1b0] sm:$0xff]  ;;  %v8641_v0 = vld [vmem:[%s10718_s4 + $0xcc] ss:$16 sps:$4 sm:$0xff]  }
  0x5b   :  { %1048 = vmatprep.subr.bf16.mxu0 %v6625_v20  ;;  %1121 = vmatprep.subr.bf16.mxu1 %v6627_v21  ;;  %v6650_v20 = vcombine.low %v829_v5, %v831_v7  ;;  %v6653_v21 = vcombine.high %v832_v10, %v834_v11  ;;  %v6656_v35 = vcombine.low %v836_v18, %v838_v19  ;;  %v8632_v63 = vld [vmem:[%s10718_s4 + $0xc4] ss:$16 sps:$4 sm:$0xff]   ;;  %v8665_v5 = vld [vmem:[%s10718_s4 + $0xec] ss:$16 sps:$4 sm:$0xff]   ;;  %v8676_v7 = vld [vmem:[%s10718_s4 + $0xe0] ss:$16 sps:$4 sm:$0xff]  }
  0x5c   :  { %v8702_v10 = vld [vmem:[%s10720_s5] ss:$16 sps:$4 sm:$0xff]   ;;  %v8709_v11 = vld [vmem:[%s10720_s5 + $0x8] ss:$16 sps:$4 sm:$0xff]  }
  0x5d   :  { %643 = vmatmul.mubr.bf16.gmra.mrb[12].mxu0 %v8358_v24  ;;  %716 = vmatmul.mubr.bf16.gmra.mrb[12].mxu1 %v8358_v24 }
  0x5e   :  { %1049 = vmatpush1.bf16.msra.mxu0 %v6624_v28  ;;  %1122 = vmatpush1.bf16.msra.mxu1 %v6626_v30  ;;  %v840_v28 = vld [vmem:[%s10716_s2 + $0x1d0] sm:$0xff] }
  0x5f   :  { %1050 = vmatprep.subr.bf16.mxu0 %v6629_v32  ;;  %1123 = vmatprep.subr.bf16.mxu1 %v6631_v34  ;;  %v6657_v32 = vcombine.high %v836_v18, %v838_v19  ;;  %v6659_v34 = vcombine.high %v837_v22, %v839_v23  ;;  %v8754_v18 = vld [vmem:[%s10720_s5 + $0x40] ss:$16 sps:$4 sm:$0xff]   ;;  %v8761_v19 = vld [vmem:[%s10720_s5 + $0x48] ss:$16 sps:$4 sm:$0xff]  }
  0x60   :  { %1068 = vmatprep.mubr.bf16.mxu0 %v10724_v3  ;;  %1141 = vmatprep.mubr.bf16.mxu1 %v10724_v3  ;;  %v8778_v22 = vld [vmem:[%s10720_s5 + $0x60] ss:$16 sps:$4 sm:$0xff]   ;;  %v8785_v23 = vld [vmem:[%s10720_s5 + $0x68] ss:$16 sps:$4 sm:$0xff]  }
  0x62   :  { %1051 = vmatpush1.bf16.msra.mxu0 %v6628_v37  ;;  %1124 = vmatpush1.bf16.msra.mxu1 %v6630_v40  ;;  %v6661_v37 = vcombine.high %v840_v28, %v842_v29  ;;  %v6660_v40 = vcombine.low %v840_v28, %v842_v29  ;;  %v8802_v28 = vld [vmem:[%s10720_s5 + $0x80] ss:$16 sps:$4 sm:$0xff]   ;;  %v8809_v29 = vld [vmem:[%s10720_s5 + $0x88] ss:$16 sps:$4 sm:$0xff]  }
  0x63   :  { %1342 = vmatprep.subr.bf16.mxu0 %v6633_v41  ;;  %1415 = vmatprep.subr.bf16.mxu1 %v6635_v44  ;;  %v8488_v41 = vld [vmem:[%s10718_s4 + $0xc] ss:$16 sps:$4 sm:$0xff]   ;;  %v8505_v44 = vld [vmem:[%s10718_s4 + $0x24] ss:$16 sps:$4 sm:$0xff]  }
  0x65   :  { %1069 = vmatmul.mubr.bf16.vlgmr.msra.gmra.mrb[16].mxu0 %v8106_v12  ;;  %1142 = vmatmul.mubr.bf16.vlgmr.msra.gmra.mrb[16].mxu1 %v8106_v12  ;;  %v827_v12 = vld [vmem:[%s10716_s2 + $0xf8] sm:$0xff] }
  0x66   :  { %1343 = vmatpush1.bf16.msra.mxu0 %v6632_v45  ;;  %1416 = vmatpush1.bf16.msra.mxu1 %v6634_v49  ;;  %v6647_v8 = vcombine.high %v825_v60, %v827_v12  ;;  %v6646_v13 = vcombine.low %v825_v60, %v827_v12  ;;  %v8510_v45 = vld [vmem:[%s10718_s4 + $0x2c] ss:$16 sps:$4 sm:$0xff]   ;;  %v8528_v49 = vld [vmem:[%s10718_s4 + $0x44] ss:$16 sps:$4 sm:$0xff]  }
  0x67   :  { %1344 = vmatprep.subr.bf16.mxu0 %v6637_v51  ;;  %1417 = vmatprep.subr.bf16.mxu1 %v6639_v54  ;;  %v8535_v51 = vld [vmem:[%s10718_s4 + $0x4c] ss:$16 sps:$4 sm:$0xff]   ;;  %v8607_v60 = vld [vmem:[%s10718_s4 + $0xa4] ss:$16 sps:$4 sm:$0xff]  }
  0x68   :  { %1078 = vmatprep.mubr.bf16.mxu0 %v10724_v3  ;;  %1151 = vmatprep.mubr.bf16.mxu1 %v10724_v3  ;;  %v8561_v54 = vld [vmem:[%s10718_s4 + $0x6c] ss:$16 sps:$4 sm:$0xff]  }
  0x69   :  { %v8613_v12 = vld [vmem:[%s10718_s4 + $0xac] ss:$16 sps:$4 sm:$0xff]  }
  0x6a   :  { %1345 = vmatpush1.bf16.msra.mxu0 %v6636_v55  ;;  %1418 = vmatpush1.bf16.msra.mxu1 %v6638_v58  ;;  %v8569_v55 = vld [vmem:[%s10718_s4 + $0x60] ss:$16 sps:$4 sm:$0xff]   ;;  %v8587_v58 = vld [vmem:[%s10718_s4 + $0x8c] ss:$16 sps:$4 sm:$0xff]  }
  0x6b   :  { %1346 = vmatprep.subr.bf16.mxu0 %v6641_v59  ;;  %1419 = vmatprep.subr.bf16.mxu1 %v6643_v61  ;;  %v8596_v59 = vld [vmem:[%s10718_s4 + $0x80] ss:$16 sps:$4 sm:$0xff]  }
  0x6c   :  { %v8621_v61 = vld [vmem:[%s10718_s4 + $0xa0] ss:$16 sps:$4 sm:$0xff]  }
  0x6d   :  { %1079 = vmatmul.mubr.bf16.gmra.mrb[20].mxu0 %v8142_v31  ;;  %1152 = vmatmul.mubr.bf16.gmra.mrb[20].mxu1 %v8142_v31  ;;  %v835_v31 = vld [vmem:[%s10716_s2 + $0x178] sm:$0xff] }
  0x6e   :  { %1347 = vmatpush1.bf16.msra.mxu0 %v6640_v62  ;;  %1420 = vmatpush1.bf16.msra.mxu1 %v6642_v1  ;;  %v6655_v25 = vcombine.high %v833_v15, %v835_v31  ;;  %v6654_v30 = vcombine.low %v833_v15, %v835_v31  ;;  %v8627_v62 = vld [vmem:[%s10718_s4 + $0xa8] ss:$16 sps:$4 sm:$0xff]   ;;  %v8648_v1 = vld [vmem:[%s10718_s4 + $0xc0] ss:$16 sps:$4 sm:$0xff]  }
  0x6f   :  { %1348 = vmatprep.subr.bf16.mxu0 %v6645_v4  ;;  %1421 = vmatprep.subr.bf16.mxu1 %v6647_v8  ;;  %v8659_v4 = vld [vmem:[%s10718_s4 + $0xe4] ss:$16 sps:$4 sm:$0xff]   ;;  %v8683_v8 = vld [vmem:[%s10718_s4 + $0xe8] ss:$16 sps:$4 sm:$0xff]   ;;  %v8728_v15 = vld [vmem:[%s10720_s5 + $0x20] ss:$16 sps:$4 sm:$0xff]  }
  0x70   :  { %1088 = vmatprep.mubr.bf16.mxu0 %v10724_v3  ;;  %1161 = vmatprep.mubr.bf16.mxu1 %v10724_v3  ;;  %v8735_v31 = vld [vmem:[%s10720_s5 + $0x28] ss:$16 sps:$4 sm:$0xff]  }
  0x72   :  { %1349 = vmatpush1.bf16.msra.mxu0 %v6644_v9  ;;  %1422 = vmatpush1.bf16.msra.mxu1 %v6646_v13  ;;  %v8695_v9 = vld [vmem:[%s10720_s5 + $0xc] ss:$16 sps:$4 sm:$0xff]   ;;  %v8714_v13 = vld [vmem:[%s10720_s5 + $0x24] ss:$16 sps:$4 sm:$0xff]  }
  0x73   :  { %1350 = vmatprep.subr.bf16.mxu0 %v6649_v14  ;;  %1423 = vmatprep.subr.bf16.mxu1 %v6651_v16  ;;  %v8720_v14 = vld [vmem:[%s10720_s5 + $0x2c] ss:$16 sps:$4 sm:$0xff]   ;;  %v8740_v16 = vld [vmem:[%s10720_s5 + $0x44] ss:$16 sps:$4 sm:$0xff]  }
  0x75   :  { %1089 = vmatmul.mubr.bf16.gmra.mrb[24].mxu0 %v8178_v50  ;;  %1162 = vmatmul.mubr.bf16.gmra.mrb[24].mxu1 %v8178_v50  ;;  %v843_v50 = vld [vmem:[%s10716_s2 + $0x1f8] sm:$0xff] }
  0x76   :  { %1351 = vmatpush1.bf16.msra.mxu0 %v6648_v17  ;;  %1424 = vmatpush1.bf16.msra.mxu1 %v6650_v20  ;;  %v6663_v38 = vcombine.high %v841_v33, %v843_v50  ;;  %v6662_v42 = vcombine.low %v841_v33, %v843_v50  ;;  %v8746_v17 = vld [vmem:[%s10720_s5 + $0x4c] ss:$16 sps:$4 sm:$0xff]   ;;  %v8766_v20 = vld [vmem:[%s10720_s5 + $0x64] ss:$16 sps:$4 sm:$0xff]   ;;  %v8826_v33 = vld [vmem:[%s10720_s5 + $0xa0] ss:$16 sps:$4 sm:$0xff]  }
  0x77   :  { %1352 = vmatprep.subr.bf16.mxu0 %v6653_v21  ;;  %1425 = vmatprep.subr.bf16.mxu1 %v6655_v25  ;;  %v8772_v21 = vld [vmem:[%s10720_s5 + $0x6c] ss:$16 sps:$4 sm:$0xff]   ;;  %v8790_v25 = vld [vmem:[%s10720_s5 + $0x84] ss:$16 sps:$4 sm:$0xff]   ;;  %v8833_v50 = vld [vmem:[%s10720_s5 + $0xa8] ss:$16 sps:$4 sm:$0xff]  }
  0x78   :  { %1098 = vmatprep.mubr.bf16.mxu0 %v10724_v3  ;;  %1171 = vmatprep.mubr.bf16.mxu1 %v10724_v3 }
  0x7a   :  { %1353 = vmatpush1.bf16.msra.mxu0 %v6652_v27  ;;  %1426 = vmatpush1.bf16.msra.mxu1 %v6654_v30  ;;  %v8796_v27 = vld [vmem:[%s10720_s5 + $0x8c] ss:$16 sps:$4 sm:$0xff]   ;;  %v8814_v30 = vld [vmem:[%s10720_s5 + $0xa4] ss:$16 sps:$4 sm:$0xff]  }
  0x7b   :  { %1354 = vmatprep.subr.bf16.mxu0 %v6657_v32  ;;  %1427 = vmatprep.subr.bf16.mxu1 %v6659_v34  ;;  %v8820_v32 = vld [vmem:[%s10720_s5 + $0xac] ss:$16 sps:$4 sm:$0xff]   ;;  %v8838_v34 = vld [vmem:[%s10720_s5 + $0xc4] ss:$16 sps:$4 sm:$0xff]  }
  0x7d   :  { %1099 = vmatmul.mubr.bf16.gmra.mrb[28].mxu0 %v8214_v6  ;;  %1172 = vmatmul.mubr.bf16.gmra.mrb[28].mxu1 %v8214_v6  ;;  %v8500_v6 = vld [vmem:[%s10718_s4 + $0x8] ss:$16 sps:$4 sm:$0xff]  }
  0x7e   :  { %1355 = vmatpush1.bf16.msra.mxu0 %v6656_v35  ;;  %1428 = vmatpush1.bf16.msra.mxu1 %v6658_v36  ;;  %v8844_v35 = vld [vmem:[%s10720_s5 + $0xcc] ss:$16 sps:$4 sm:$0xff]   ;;  %v8850_v36 = vld [vmem:[%s10720_s5 + $0xc0] ss:$16 sps:$4 sm:$0xff]  }
  0x7f   :  { %1356 = vmatprep.subr.bf16.mxu0 %v6661_v37  ;;  %1429 = vmatprep.subr.bf16.mxu1 %v6663_v38  ;;  %10752 = vst [vmem:[#allocation4_spill] sm:$0xff] %v8850_v36  ;;  %v8857_v37 = vld [vmem:[%s10720_s5 + $0xc8] ss:$16 sps:$4 sm:$0xff]   ;;  %v8862_v38 = vld [vmem:[%s10720_s5 + $0xe4] ss:$16 sps:$4 sm:$0xff]  }
  0x80   :  { %1374 = vmatprep.mubr.bf16.mxu0 %v10724_v3  ;;  %1447 = vmatprep.mubr.bf16.mxu1 %v10724_v3 }
  0x82   :  { %1357 = vmatpush1.bf16.msra.mxu0 %v6660_v40  ;;  %1430 = vmatpush1.bf16.msra.mxu1 %v6662_v42  ;;  %v8868_v40 = vld [vmem:[%s10720_s5 + $0xec] ss:$16 sps:$4 sm:$0xff]   ;;  %v8874_v42 = vld [vmem:[%s10720_s5 + $0xe0] ss:$16 sps:$4 sm:$0xff]  }
  0x83   :  { %1770 = vmatprep.subr.bf16.mxu0 %v8482_v39  ;;  %1811 = vmatprep.subr.bf16.mxu1 %v8488_v41 }
  0x85   :  { %1375 = vmatmul.mubr.bf16.vlgmr.msra.gmra.mrb[16].mxu0 %v8250_v26  ;;  %1448 = vmatmul.mubr.bf16.vlgmr.msra.gmra.mrb[16].mxu1 %v8250_v26  ;;  %v8550_v26 = vld [vmem:[%s10718_s4 + $0x48] ss:$16 sps:$4 sm:$0xff]  }
  0x86   :  { %1771 = vmatpush1.bf16.msra.mxu0 %v8494_v43  ;;  %1812 = vmatpush1.bf16.msra.mxu1 %v8500_v6 }
  0x87   :  { %1772 = vmatprep.subr.bf16.mxu0 %v8505_v44  ;;  %1813 = vmatprep.subr.bf16.mxu1 %v8510_v45 }
  0x88   :  { %1384 = vmatprep.mubr.bf16.mxu0 %v10724_v3  ;;  %1457 = vmatprep.mubr.bf16.mxu1 %v10724_v3 }
  0x8a   :  { %1773 = vmatpush1.bf16.msra.mxu0 %v8517_v47  ;;  %1814 = vmatpush1.bf16.msra.mxu1 %v8523_v48 }
  0x8b   :  { %1774 = vmatprep.subr.bf16.mxu0 %v8528_v49  ;;  %1815 = vmatprep.subr.bf16.mxu1 %v8535_v51 }
  0x8d   :  { %1385 = vmatmul.mubr.bf16.gmra.mrb[20].mxu0 %v8286_v46  ;;  %1458 = vmatmul.mubr.bf16.gmra.mrb[20].mxu1 %v8286_v46  ;;  %v8602_v46 = vld [vmem:[%s10718_s4 + $0x88] ss:$16 sps:$4 sm:$0xff]  }
  0x8e   :  { %1775 = vmatpush1.bf16.msra.mxu0 %v8544_v52  ;;  %1816 = vmatpush1.bf16.msra.mxu1 %v8550_v26 }
  0x8f   :  { %1776 = vmatprep.subr.bf16.mxu0 %v8555_v53  ;;  %1817 = vmatprep.subr.bf16.mxu1 %v8561_v54 }
  0x90   :  { %1394 = vmatprep.mubr.bf16.mxu0 %v10724_v3  ;;  %1467 = vmatprep.mubr.bf16.mxu1 %v10724_v3 }
  0x92   :  { %1777 = vmatpush1.bf16.msra.mxu0 %v8569_v55  ;;  %1818 = vmatpush1.bf16.msra.mxu1 %v8575_v56 }
  0x93   :  { %1778 = vmatprep.subr.bf16.mxu0 %v8580_v57  ;;  %1819 = vmatprep.subr.bf16.mxu1 %v8587_v58 }
  0x95   :  { %1395 = vmatmul.mubr.bf16.gmra.mrb[24].mxu0 %v8322_v2  ;;  %1468 = vmatmul.mubr.bf16.gmra.mrb[24].mxu1 %v8322_v2  ;;  %v8654_v2 = vld [vmem:[%s10718_s4 + $0xc8] ss:$16 sps:$4 sm:$0xff]  }
  0x96   :  { %1779 = vmatpush1.bf16.msra.mxu0 %v8596_v59  ;;  %1820 = vmatpush1.bf16.msra.mxu1 %v8602_v46 }
  0x97   :  { %1780 = vmatprep.subr.bf16.mxu0 %v8607_v60  ;;  %1821 = vmatprep.subr.bf16.mxu1 %v8613_v12 }
  0x98   :  { %1404 = vmatprep.mubr.bf16.mxu0 %v10724_v3  ;;  %1477 = vmatprep.mubr.bf16.mxu1 %v10724_v3 }
  0x9a   :  { %1781 = vmatpush1.bf16.msra.mxu0 %v8621_v61  ;;  %1822 = vmatpush1.bf16.msra.mxu1 %v8627_v62 }
  0x9b   :  { %1782 = vmatprep.subr.bf16.mxu0 %v8632_v63  ;;  %1823 = vmatprep.subr.bf16.mxu1 %v8641_v0 }
  0x9d   :  { %1405 = vmatmul.mubr.bf16.gmra.mrb[28].mxu0 %v8358_v24  ;;  %1478 = vmatmul.mubr.bf16.gmra.mrb[28].mxu1 %v8358_v24  ;;  %v8688_v24 = vld [vmem:[%s10720_s5 + $0x4] ss:$16 sps:$4 sm:$0xff]  }
  0x9e   :  { %1783 = vmatpush1.bf16.msra.mxu0 %v8648_v1  ;;  %1824 = vmatpush1.bf16.msra.mxu1 %v8654_v2 }
  0x9f   :  { %1784 = vmatprep.subr.bf16.mxu0 %v8659_v4  ;;  %1825 = vmatprep.subr.bf16.mxu1 %v8665_v5 }
  0xa0   :  { %1802 = vmatprep.mubr.bf16.mxu0 %v10724_v3  ;;  %1843 = vmatprep.mubr.bf16.mxu1 %v10724_v3 }
  0xa2   :  { %1785 = vmatpush1.bf16.msra.mxu0 %v8676_v7  ;;  %1826 = vmatpush1.bf16.msra.mxu1 %v8683_v8 }
  0xa3   :  { %2053 = vmatprep.subr.bf16.mxu0 %v8688_v24  ;;  %2094 = vmatprep.subr.bf16.mxu1 %v8695_v9 }
  0xa5   :  { %1803 = vmatmul.mubr.bf16.vlgmr.msra.gmra.mrb[32].mxu0 %v10724_v3  ;;  %1844 = vmatmul.mubr.bf16.vlgmr.msra.gmra.mrb[32].mxu1 %v10724_v3 }
  0xa6   :  { %2054 = vmatpush1.bf16.msra.mxu0 %v8702_v10  ;;  %2095 = vmatpush1.bf16.msra.mxu1 %v8709_v11 }
  0xa7   :  { %2055 = vmatprep.subr.bf16.mxu0 %v8714_v13  ;;  %2096 = vmatprep.subr.bf16.mxu1 %v8720_v14 }
  0xa8   :  { %2085 = vmatprep.mubr.bf16.mxu0 %v10724_v3  ;;  %2126 = vmatprep.mubr.bf16.mxu1 %v10724_v3  ;;  %v8881_v3 = vld [vmem:[%s10720_s5 + $0xe8] ss:$16 sps:$4 sm:$0xff]  }
  0xaa   :  { %2056 = vmatpush1.bf16.msra.mxu0 %v8728_v15  ;;  %2097 = vmatpush1.bf16.msra.mxu1 %v8735_v31 }
  0xab   :  { %2057 = vmatprep.subr.bf16.mxu0 %v8740_v16  ;;  %2098 = vmatprep.subr.bf16.mxu1 %v8746_v17 }
  0xae   :  { %2058 = vmatpush1.bf16.msra.mxu0 %v8754_v18  ;;  %2099 = vmatpush1.bf16.msra.mxu1 %v8761_v19 }
  0xaf   :  { %2059 = vmatprep.subr.bf16.mxu0 %v8766_v20  ;;  %2100 = vmatprep.subr.bf16.mxu1 %v8772_v21 }
  0xb2   :  { %2060 = vmatpush1.bf16.msra.mxu0 %v8778_v22  ;;  %2101 = vmatpush1.bf16.msra.mxu1 %v8785_v23 }
  0xb3   :  { %2061 = vmatprep.subr.bf16.mxu0 %v8790_v25  ;;  %2102 = vmatprep.subr.bf16.mxu1 %v8796_v27 }
  0xb6   :  { %2062 = vmatpush1.bf16.msra.mxu0 %v8802_v28  ;;  %2103 = vmatpush1.bf16.msra.mxu1 %v8809_v29 }
  0xb7   :  { %2063 = vmatprep.subr.bf16.mxu0 %v8814_v30  ;;  %2104 = vmatprep.subr.bf16.mxu1 %v8820_v32 }
  0xba   :  { %2064 = vmatpush1.bf16.msra.mxu0 %v8826_v33  ;;  %2105 = vmatpush1.bf16.msra.mxu1 %v8833_v50 }
  0xbb   :  { %2065 = vmatprep.subr.bf16.mxu0 %v8838_v34  ;;  %2106 = vmatprep.subr.bf16.mxu1 %v8844_v35 }
  0xbe   :  { %2066 = vmatpush1.bf16.msra.mxu0 %v8850_v36  ;;  %2107 = vmatpush1.bf16.msra.mxu1 %v8857_v37  ;;  %v10753_v36 = vmov 0  }
  0xbf   :  { %2067 = vmatprep.subr.bf16.mxu0 %v8862_v38  ;;  %2108 = vmatprep.subr.bf16.mxu1 %v8868_v40 }
  0xc2   :  { %2068 = vmatpush1.bf16.msra.mxu0 %v8874_v42  ;;  %2109 = vmatpush1.bf16.msra.mxu1 %v8881_v3 }
  0xc3   :  { %2388 = vmatprep.subr.bf16.mxu0 %v8482_v39  ;;  %2429 = vmatprep.subr.bf16.mxu1 %v8488_v41  ;;  %v728_v39 = vlaneseq }
  0xc5   :  { %2086 = vmatmul.mubr.bf16.vlgmr.msra.gmra.mrb[36].mxu0 %v10753_v36  ;;  %2127 = vmatmul.mubr.bf16.vlgmr.msra.gmra.mrb[36].mxu1 %v10753_v36  ;;  %v8924_v41 = vshrl.u32 %v728_v39, 7 }
  0xc6   :  { %2389 = vmatpush1.bf16.msra.mxu0 %v8494_v43  ;;  %2430 = vmatpush1.bf16.msra.mxu1 %v8500_v6  ;;  %v726_v6 = vld [vmem:[%s10721_s3] sm:$0xf] }
  0xc7   :  { %2390 = vmatprep.subr.bf16.mxu0 %v8505_v44  ;;  %2431 = vmatprep.subr.bf16.mxu1 %v8510_v45  ;;  %v10730_v43 = vsub.s32 0, %v8924_v41  ;;  %v10729_v44 = vsub.s32 2, %v8924_v41  ;;  %v10728_v45 = vsub.s32 1, %v8924_v41 }
  0xc8   :  { %2420 = vmatprep.mubr.bf16.mxu0 %v10753_v36  ;;  %2461 = vmatprep.mubr.bf16.mxu1 %v10753_v36 }
  0xca   :  { %2391 = vmatpush1.bf16.msra.mxu0 %v8517_v47  ;;  %2432 = vmatpush1.bf16.msra.mxu1 %v8523_v48  ;;  %v10727_v47 = vsub.s32 3, %v8924_v41 }
  0xcb   :  { %2392 = vmatprep.subr.bf16.mxu0 %v8528_v49  ;;  %2433 = vmatprep.subr.bf16.mxu1 %v8535_v51  ;;  %v8937_v49 = vrot.slane %v726_v6, %v10730_v43 }
  0xce   :  { %2393 = vmatpush1.bf16.msra.mxu0 %v8544_v52  ;;  %2434 = vmatpush1.bf16.msra.mxu1 %v8550_v26  ;;  %v8945_v26 = vrot.slane %v726_v6, %v10729_v44 }
  0xcf   :  { %2394 = vmatprep.subr.bf16.mxu0 %v8555_v53  ;;  %2435 = vmatprep.subr.bf16.mxu1 %v8561_v54  ;;  %v8949_v53 = vrot.slane %v726_v6, %v10728_v45 }
  0xd2   :  { %2395 = vmatpush1.bf16.msra.mxu0 %v8569_v55  ;;  %2436 = vmatpush1.bf16.msra.mxu1 %v8575_v56  ;;  %v8955_v56 = vrot.slane %v726_v6, %v10727_v47 }
  0xd3   :  { %2396 = vmatprep.subr.bf16.mxu0 %v8580_v57  ;;  %2437 = vmatprep.subr.bf16.mxu1 %v8587_v58 }
  0xd6   :  { %2397 = vmatpush1.bf16.msra.mxu0 %v8596_v59  ;;  %2438 = vmatpush1.bf16.msra.mxu1 %v8602_v46 }
  0xd7   :  { %2398 = vmatprep.subr.bf16.mxu0 %v8607_v60  ;;  %2439 = vmatprep.subr.bf16.mxu1 %v8613_v12 }
  0xda   :  { %2399 = vmatpush1.bf16.msra.mxu0 %v8621_v61  ;;  %2440 = vmatpush1.bf16.msra.mxu1 %v8627_v62 }
  0xdb   :  { %2400 = vmatprep.subr.bf16.mxu0 %v8632_v63  ;;  %2441 = vmatprep.subr.bf16.mxu1 %v8641_v0 }
  0xde   :  { %2401 = vmatpush1.bf16.msra.mxu0 %v8648_v1  ;;  %2442 = vmatpush1.bf16.msra.mxu1 %v8654_v2 }
  0xdf   :  { %2402 = vmatprep.subr.bf16.mxu0 %v8659_v4  ;;  %2443 = vmatprep.subr.bf16.mxu1 %v8665_v5 }
  0xe2   :  { %2403 = vmatpush1.bf16.msra.mxu0 %v8676_v7  ;;  %2444 = vmatpush1.bf16.msra.mxu1 %v8683_v8 }
  0xe3   :  { %2672 = vmatprep.subr.bf16.mxu0 %v8688_v24  ;;  %2713 = vmatprep.subr.bf16.mxu1 %v8695_v9 }
 0x118   :  { %v8933_v48 = vpop.f32.mrb[0].mxu0  ;;  %v8939_v51 = vpop.f32.mrb[0].mxu1 }
 0x119   :  { %v8941_v52 = vpop.f32.mrb[1].mxu0  ;;  %v8951_v54 = vpop.f32.mrb[1].mxu1 }
 0x11a   :  { %v618_v55 = vpop.f32.mrb[2].mxu0  ;;  %v691_v58 = vpop.f32.mrb[2].mxu1 }
 0x11b   :  { %v8958_v57 = vadd.f32 %v8937_v49, %v618_v55  ;;  %v620_v59 = vpop.f32.mrb[3].mxu0  ;;  %v8961_v46 = vadd.f32 %v8945_v26, %v691_v58  ;;  %v693_v12 = vpop.f32.mrb[3].mxu1 }
 0x11c   :  { %v8964_v60 = vadd.f32 %v8949_v53, %v620_v59  ;;  %v8967_v61 = vadd.f32 %v8955_v56, %v693_v12 }
 0x11e   :  { %10754 = vst [vmem:[#allocation5_spill] sm:$0xff] %v8964_v60  ;;  %10755 = vst [vmem:[#allocation6_spill] sm:$0xff] %v8967_v61 }
 0x120   :  { %v624_v62 = vpop.f32.mrb[4].mxu0  ;;  %v697_v0 = vpop.f32.mrb[4].mxu1 }
 0x121   :  { %v8970_v63 = vadd.f32 %v8937_v49, %v624_v62  ;;  %v626_v1 = vpop.f32.mrb[5].mxu0  ;;  %v8973_v2 = vadd.f32 %v8945_v26, %v697_v0  ;;  %v699_v5 = vpop.f32.mrb[5].mxu1 }
 0x122   :  { %v8976_v4 = vadd.f32 %v8949_v53, %v626_v1  ;;  %v628_v7 = vpop.f32.mrb[6].mxu0  ;;  %v8979_v8 = vadd.f32 %v8955_v56, %v699_v5  ;;  %v701_v9 = vpop.f32.mrb[6].mxu1 }
 0x123   :  { %10756 = vst [vmem:[#allocation7_spill] sm:$0xff] %v8970_v63  ;;  %10757 = vst [vmem:[#allocation8_spill] sm:$0xff] %v8973_v2  ;;  %v8982_v24 = vadd.f32 %v8937_v49, %v628_v7  ;;  %v630_v39 = vpop.f32.mrb[7].mxu0  ;;  %v8985_v6 = vadd.f32 %v8945_v26, %v701_v9  ;;  %v703_v58 = vpop.f32.mrb[7].mxu1 }
 0x124   :  { %10758 = vst [vmem:[#allocation9_spill] sm:$0xff] %v8976_v4  ;;  %10759 = vst [vmem:[#allocation10_spill] sm:$0xff] %v8979_v8  ;;  %v8988_v55 = vadd.f32 %v8949_v53, %v630_v39  ;;  %v8991_v59 = vadd.f32 %v8955_v56, %v703_v58 }
 0x125   :  { %10760 = vst [vmem:[#allocation11_spill] sm:$0xff] %v8982_v24  ;;  %10761 = vst [vmem:[#allocation12_spill] sm:$0xff] %v8985_v6 }
 0x126   :  { %10762 = vst [vmem:[#allocation13_spill] sm:$0xff] %v8988_v55  ;;  %10763 = vst [vmem:[#allocation14_spill] sm:$0xff] %v8991_v59 }
 0x128   :  { %v634_v12 = vpop.f32.mrb[8].mxu0  ;;  %v707_v0 = vpop.f32.mrb[8].mxu1 }
 0x129   :  { %v8994_v62 = vadd.f32 %v8937_v49, %v634_v12  ;;  %v636_v1 = vpop.f32.mrb[9].mxu0  ;;  %v8997_v5 = vadd.f32 %v8945_v26, %v707_v0  ;;  %v709_v9 = vpop.f32.mrb[9].mxu1 }
 0x12a   :  { %v9000_v7 = vadd.f32 %v8949_v53, %v636_v1  ;;  %v638_v47 = vpop.f32.mrb[10].mxu0  ;;  %v9003_v39 = vadd.f32 %v8955_v56, %v709_v9  ;;  %v711_v45 = vpop.f32.mrb[10].mxu1 }
 0x12b   :  { %10764 = vst [vmem:[#allocation15_spill] sm:$0xff] %v8994_v62  ;;  %10765 = vst [vmem:[#allocation16_spill] sm:$0xff] %v8997_v5  ;;  %v9006_v58 = vadd.f32 %v8937_v49, %v638_v47  ;;  %v640_v44 = vpop.f32.mrb[11].mxu0  ;;  %v9009_v12 = vadd.f32 %v8945_v26, %v711_v45  ;;  %v713_v0 = vpop.f32.mrb[11].mxu1 }
 0x12c   :  { %10766 = vst [vmem:[#allocation17_spill] sm:$0xff] %v9000_v7  ;;  %10767 = vst [vmem:[#allocation18_spill] sm:$0xff] %v9003_v39  ;;  %v9012_v43 = vadd.f32 %v8949_v53, %v640_v44  ;;  %v9015_v1 = vadd.f32 %v8955_v56, %v713_v0 }
 0x12d   :  { %10768 = vst [vmem:[#allocation19_spill] sm:$0xff] %v9006_v58  ;;  %10769 = vst [vmem:[#allocation20_spill] sm:$0xff] %v9009_v12 }
 0x12e   :  { %10770 = vst [vmem:[#allocation21_spill] sm:$0xff] %v9012_v43  ;;  %10771 = vst [vmem:[#allocation22_spill] sm:$0xff] %v9015_v1 }
 0x130   :  { %v644_v7 = vpop.f32.mrb[12].mxu0  ;;  %v717_v9 = vpop.f32.mrb[12].mxu1 }
 0x131   :  { %v9018_v5 = vadd.f32 %v8937_v49, %v644_v7  ;;  %v646_v39 = vpop.f32.mrb[13].mxu0  ;;  %v9021_v47 = vadd.f32 %v8945_v26, %v717_v9  ;;  %v719_v45 = vpop.f32.mrb[13].mxu1 }
 0x132   :  { %v9024_v58 = vadd.f32 %v8949_v53, %v646_v39  ;;  %v648_v12 = vpop.f32.mrb[14].mxu0  ;;  %v9027_v44 = vadd.f32 %v8955_v56, %v719_v45  ;;  %v721_v1 = vpop.f32.mrb[14].mxu1  ;;  %v1488_v45 = vld [vmem:[%s10721_s3 + $0x4] sm:$0xf] }
 0x133   :  { %10772 = vst [vmem:[#allocation23_spill] sm:$0xff] %v9018_v5  ;;  %10773 = vst [vmem:[#allocation24_spill] sm:$0xff] %v9021_v47  ;;  %v9030_v0 = vadd.f32 %v8937_v49, %v648_v12  ;;  %v650_v43 = vpop.f32.mrb[15].mxu0  ;;  %v9033_v7 = vadd.f32 %v8945_v26, %v721_v1  ;;  %v723_v9 = vpop.f32.mrb[15].mxu1  ;;  %v10782_v1 = vsub.s32 1, %v8924_v41 }
 0x134   :  { %10774 = vst [vmem:[#allocation25_spill] sm:$0xff] %v9024_v58  ;;  %10775 = vst [vmem:[#allocation26_spill] sm:$0xff] %v9027_v44  ;;  %v9036_v5 = vadd.f32 %v8949_v53, %v650_v43  ;;  %v9039_v39 = vadd.f32 %v8955_v56, %v723_v9  ;;  %v10780_v44 = vsub.s32 0, %v8924_v41 }
 0x135   :  { %10776 = vst [vmem:[#allocation27_spill] sm:$0xff] %v9030_v0  ;;  %10777 = vst [vmem:[#allocation28_spill] sm:$0xff] %v9033_v7  ;;  %v10781_v0 = vsub.s32 2, %v8924_v41  ;;  %v9054_v43 = vrot.slane %v1488_v45, %v10782_v1 }
 0x136   :  { %10778 = vst [vmem:[#allocation29_spill] sm:$0xff] %v9036_v5  ;;  %10779 = vst [vmem:[#allocation30_spill] sm:$0xff] %v9039_v39  ;;  %v9046_v12 = vrot.slane %v1488_v45, %v10780_v44  ;;  %v10783_v5 = vsub.s32 3, %v8924_v41 }
 0x137   :  { %v9050_v58 = vrot.slane %v1488_v45, %v10781_v0 }
 0x138   :  { %v9058_v9 = vrot.slane %v1488_v45, %v10783_v5 }
 0x158   :  { %v1376_v39 = vpop.f32.mrb[16].mxu0  ;;  %v1449_v47 = vpop.f32.mrb[16].mxu1 }
 0x159   :  { %v9061_v7 = vadd.f32 %v9046_v12, %v1376_v39  ;;  %v1378_v62 = vpop.f32.mrb[17].mxu0  ;;  %v9064_v44 = vadd.f32 %v9050_v58, %v1449_v47  ;;  %v1451_v59 = vpop.f32.mrb[17].mxu1 }
 0x15a   :  { %v9067_v0 = vadd.f32 %v9054_v43, %v1378_v62  ;;  %v1380_v55 = vpop.f32.mrb[18].mxu0  ;;  %v9070_v1 = vadd.f32 %v9058_v9, %v1451_v59  ;;  %v1453_v5 = vpop.f32.mrb[18].mxu1 }
 0x15b   :  { %10784 = vst [vmem:[#allocation31_spill] sm:$0xff] %v9061_v7  ;;  %10785 = vst [vmem:[#allocation32_spill] sm:$0xff] %v9064_v44  ;;  %v9073_v41 = vadd.f32 %v9046_v12, %v1380_v55  ;;  %v1382_v45 = vpop.f32.mrb[19].mxu0  ;;  %v9076_v39 = vadd.f32 %v9050_v58, %v1453_v5  ;;  %v1455_v47 = vpop.f32.mrb[19].mxu1 }
 0x15c   :  { %10786 = vst [vmem:[#allocation33_spill] sm:$0xff] %v9067_v0  ;;  %10787 = vst [vmem:[#allocation34_spill] sm:$0xff] %v9070_v1  ;;  %v9079_v7 = vadd.f32 %v9054_v43, %v1382_v45  ;;  %v9082_v62 = vadd.f32 %v9058_v9, %v1455_v47 }
 0x15d   :  { %10788 = vst [vmem:[#allocation35_spill] sm:$0xff] %v9073_v41  ;;  %10789 = vst [vmem:[#allocation36_spill] sm:$0xff] %v9076_v39 }
 0x15e   :  { %10790 = vst [vmem:[#allocation37_spill] sm:$0xff] %v9079_v7  ;;  %10791 = vst [vmem:[#allocation38_spill] sm:$0xff] %v9082_v62 }
 0x160   :  { %v1386_v0 = vpop.f32.mrb[20].mxu0  ;;  %v1459_v59 = vpop.f32.mrb[20].mxu1 }
 0x161   :  { %v9085_v44 = vadd.f32 %v9046_v12, %v1386_v0  ;;  %v1388_v1 = vpop.f32.mrb[21].mxu0  ;;  %v9088_v55 = vadd.f32 %v9050_v58, %v1459_v59  ;;  %v1461_v5 = vpop.f32.mrb[21].mxu1 }
 0x162   :  { %v9091_v41 = vadd.f32 %v9054_v43, %v1388_v1  ;;  %v1390_v39 = vpop.f32.mrb[22].mxu0  ;;  %v9094_v45 = vadd.f32 %v9058_v9, %v1461_v5  ;;  %v1463_v62 = vpop.f32.mrb[22].mxu1 }
 0x163   :  { %10792 = vst [vmem:[#allocation39_spill] sm:$0xff] %v9085_v44  ;;  %10793 = vst [vmem:[#allocation40_spill] sm:$0xff] %v9088_v55  ;;  %v9097_v47 = vadd.f32 %v9046_v12, %v1390_v39  ;;  %v1392_v7 = vpop.f32.mrb[23].mxu0  ;;  %v9100_v0 = vadd.f32 %v9050_v58, %v1463_v62  ;;  %v1465_v59 = vpop.f32.mrb[23].mxu1 }
 0x164   :  { %10794 = vst [vmem:[#allocation41_spill] sm:$0xff] %v9091_v41  ;;  %10795 = vst [vmem:[#allocation42_spill] sm:$0xff] %v9094_v45  ;;  %v9103_v44 = vadd.f32 %v9054_v43, %v1392_v7  ;;  %v9106_v1 = vadd.f32 %v9058_v9, %v1465_v59 }
 0x165   :  { %10796 = vst [vmem:[#allocation43_spill] sm:$0xff] %v9097_v47  ;;  %10797 = vst [vmem:[#allocation44_spill] sm:$0xff] %v9100_v0 }
 0x166   :  { %10798 = vst [vmem:[#allocation45_spill] sm:$0xff] %v9103_v44  ;;  %10799 = vst [vmem:[#allocation46_spill] sm:$0xff] %v9106_v1 }
 0x168   :  { %v1396_v41 = vpop.f32.mrb[24].mxu0  ;;  %v1469_v5 = vpop.f32.mrb[24].mxu1 }
 0x169   :  { %v9109_v55 = vadd.f32 %v9046_v12, %v1396_v41  ;;  %v1398_v45 = vpop.f32.mrb[25].mxu0  ;;  %v9112_v39 = vadd.f32 %v9050_v58, %v1469_v5  ;;  %v1471_v62 = vpop.f32.mrb[25].mxu1 }
 0x16a   :  { %v9115_v47 = vadd.f32 %v9054_v43, %v1398_v45  ;;  %v1400_v0 = vpop.f32.mrb[26].mxu0  ;;  %v9118_v7 = vadd.f32 %v9058_v9, %v1471_v62  ;;  %v1473_v1 = vpop.f32.mrb[26].mxu1 }
 0x16b   :  { %10800 = vst [vmem:[#allocation47_spill] sm:$0xff] %v9109_v55  ;;  %10801 = vst [vmem:[#allocation48_spill] sm:$0xff] %v9112_v39  ;;  %v9121_v59 = vadd.f32 %v9046_v12, %v1400_v0  ;;  %v1402_v44 = vpop.f32.mrb[27].mxu0  ;;  %v9124_v41 = vadd.f32 %v9050_v58, %v1473_v1  ;;  %v1475_v5 = vpop.f32.mrb[27].mxu1 }
 0x16c   :  { %10802 = vst [vmem:[#allocation49_spill] sm:$0xff] %v9115_v47  ;;  %10803 = vst [vmem:[#allocation50_spill] sm:$0xff] %v9118_v7  ;;  %v9127_v55 = vadd.f32 %v9054_v43, %v1402_v44  ;;  %v9130_v45 = vadd.f32 %v9058_v9, %v1475_v5 }
 0x16d   :  { %10804 = vst [vmem:[#allocation51_spill] sm:$0xff] %v9121_v59  ;;  %10805 = vst [vmem:[#allocation52_spill] sm:$0xff] %v9124_v41  ;;  %v750_v41 = vadd.f32 %v8945_v26, %v8939_v51 }
 0x16e   :  { %10806 = vst [vmem:[#allocation53_spill] sm:$0xff] %v9127_v55  ;;  %10807 = vst [vmem:[#allocation54_spill] sm:$0xff] %v9130_v45 }
 0x170   :  { %v1406_v47 = vpop.f32.mrb[28].mxu0  ;;  %v1479_v62 = vpop.f32.mrb[28].mxu1 }
 0x171   :  { %v9133_v39 = vadd.f32 %v9046_v12, %v1406_v47  ;;  %v1408_v7 = vpop.f32.mrb[29].mxu0  ;;  %v9136_v0 = vadd.f32 %v9050_v58, %v1479_v62  ;;  %v1481_v1 = vpop.f32.mrb[29].mxu1  ;;  %v748_v47 = vadd.f32 %v8937_v49, %v8933_v48  ;;  %v749_v62 = vadd.f32 %v8949_v53, %v8941_v52 }
 0x172   :  { %v9139_v6 = vadd.f32 %v9054_v43, %v1408_v7  ;;  %v1410_v24 = vpop.f32.mrb[30].mxu0  ;;  %v9142_v44 = vadd.f32 %v9058_v9, %v1481_v1  ;;  %v1483_v55 = vpop.f32.mrb[30].mxu1  ;;  %v751_v7 = vadd.f32 %v8955_v56, %v8951_v54 }
 0x173   :  { %10808 = vst [vmem:[#allocation55_spill] sm:$0xff] %v9133_v39  ;;  %10809 = vst [vmem:[#allocation56_spill] sm:$0xff] %v9136_v0  ;;  %v1412_v5 = vpop.f32.mrb[31].mxu0  ;;  %v1485_v45 = vpop.f32.mrb[31].mxu1 }
 0x174   :  { %10810 = vst [vmem:[#allocation57_spill] sm:$0xff] %v9139_v6  ;;  %10811 = vst [vmem:[#allocation58_spill] sm:$0xff] %v9142_v44 }
 0x178   :  { %v1804_v59 = vpop.f32.mrb[32].mxu0  ;;  %v1845_v4 = vpop.f32.mrb[32].mxu1 }
 0x179   :  { %v1852_v8 = vadd.f32 %v1804_v59, %v748_v47  ;;  %v1806_v1 = vpop.f32.mrb[33].mxu0  ;;  %v1854_v2 = vadd.f32 %v1845_v4, %v750_v41  ;;  %v1847_v44 = vpop.f32.mrb[33].mxu1 }
 0x17a   :  { %v1853_v63 = vadd.f32 %v1806_v1, %v749_v62  ;;  %v1808_v6 = vpop.f32.mrb[34].mxu0  ;;  %v1855_v39 = vadd.f32 %v1847_v44, %v751_v7  ;;  %v1849_v49 = vpop.f32.mrb[34].mxu1 }
 0x17b   :  { %v6728_v0 = vmul.f32 -1.442695, %v1852_v8  ;;  %v1809_v48 = vpop.f32.mrb[35].mxu0  ;;  %v1850_v51 = vpop.f32.mrb[35].mxu1 }
 0x17c   :  { %v6729_v61 = vmul.f32 -1.442695, %v1853_v63  ;;  %v6730_v52 = vmul.f32 -1.442695, %v1855_v39  ;;  %v1538_v63 = vadd.f32 %v9046_v12, %v1410_v24  ;;  %v1539_v39 = vadd.f32 %v9054_v43, %v1412_v5 }
 0x17d   :  { %7687 = vpow2.f32 %v6728_v0 }
 0x17e   :  { %7689 = vpow2.f32 %v6729_v61  ;;  %v1540_v61 = vadd.f32 %v9050_v58, %v1483_v55 }
 0x17f   :  { %7691 = vpow2.f32 %v6730_v52 }
 0x180   :  { %7693 = vtanh.f32 %v1854_v2  ;;  %v1541_v2 = vadd.f32 %v9058_v9, %v1485_v45 }
 0x187   :  { %v7688_v26 = vpop.eup %7687 }
 0x188   :  { %v7690_v53 = vpop.eup %7689  ;;  %v2142_v60 = vadd.f32 1.0, %v7688_v26 }
 0x189   :  { %v2148_v54 = vadd.f32 1.0, %v7690_v53  ;;  %v7692_v56 = vpop.eup %7691 }
 0x18a   :  { %7695 = vrcp.f32 %v2142_v60  ;;  %v7694_v4 = vpop.eup %7693  ;;  %v2155_v41 = vadd.f32 1.0, %v7692_v56 }
 0x18b   :  { %7697 = vrcp.f32 %v2148_v54 }
 0x18c   :  { %7699 = vrcp.f32 %v2155_v41  ;;  %v9311_v41 = vld [vmem:[%s10718_s4 + $0x80] ss:$16 sps:$4 sm:$0xff]  }
 0x194   :  { %v7696_v6 = vpop.eup %7695 }
 0x195   :  { %v7698_v8 = vpop.eup %7697  ;;  %v2159_v59 = vmul.f32 %v7696_v6, %v7694_v4 }
 0x196   :  { %v2158_v44 = vmul.f32 0.0, %v7698_v8  ;;  %v7700_v52 = vpop.eup %7699 }
 0x198   :  { %v9155_v0 = vadd.f32 %v2159_v59, %v2158_v44  ;;  %v2087_v47 = vpop.f32.mrb[36].mxu0  ;;  %v2128_v62 = vpop.f32.mrb[36].mxu1  ;;  %v9316_v44 = vld [vmem:[%s10718_s4 + $0x88] ss:$16 sps:$4 sm:$0xff]  }
 0x199   :  { %v2135_v60 = vadd.f32 %v2087_v47, %v1538_v63  ;;  %v2089_v7 = vpop.f32.mrb[37].mxu0  ;;  %v2137_v1 = vadd.f32 %v2128_v62, %v1540_v61  ;;  %v2130_v49 = vpop.f32.mrb[37].mxu1  ;;  %v9325_v63 = vld [vmem:[%s10718_s4 + $0xa4] ss:$16 sps:$4 sm:$0xff]   ;;  %v9330_v61 = vld [vmem:[%s10718_s4 + $0xac] ss:$16 sps:$4 sm:$0xff]  }
 0x19a   :  { %7701 = vtanh.f32 %v9155_v0  ;;  %v2136_v48 = vadd.f32 %v2089_v7, %v1539_v39  ;;  %v2091_v51 = vpop.f32.mrb[38].mxu0  ;;  %v2138_v12 = vadd.f32 %v2130_v49, %v1541_v2  ;;  %v2132_v55 = vpop.f32.mrb[38].mxu1  ;;  %v9335_v39 = vld [vmem:[%s10718_s4 + $0xa0] ss:$16 sps:$4 sm:$0xff]   ;;  %v9340_v47 = vld [vmem:[%s10718_s4 + $0xa8] ss:$16 sps:$4 sm:$0xff]  }
 0x19b   :  { %v6731_v24 = vmul.f32 -1.442695, %v2135_v60  ;;  %v2092_v58 = vpop.f32.mrb[39].mxu0  ;;  %v2133_v5 = vpop.f32.mrb[39].mxu1  ;;  %v9349_v2 = vld [vmem:[%s10718_s4 + $0xc4] ss:$16 sps:$4 sm:$0xff]  }
 0x19c   :  { %v6732_v43 = vmul.f32 -1.442695, %v2136_v48  ;;  %v6733_v45 = vmul.f32 -1.442695, %v2138_v12  ;;  %v9354_v60 = vld [vmem:[%s10718_s4 + $0xcc] ss:$16 sps:$4 sm:$0xff]  }
 0x19d   :  { %7703 = vpow2.f32 %v6731_v24  ;;  %v9359_v62 = vld [vmem:[%s10718_s4 + $0xc0] ss:$16 sps:$4 sm:$0xff]   ;;  %v9364_v7 = vld [vmem:[%s10718_s4 + $0xc8] ss:$16 sps:$4 sm:$0xff]   ;;  %v9378_v48 = vld [vmem:[%s10718_s4 + $0xec] ss:$16 sps:$4 sm:$0xff]  }
 0x19e   :  { %7705 = vpow2.f32 %v6732_v43  ;;  %v9383_v49 = vld [vmem:[%s10718_s4 + $0xe0] ss:$16 sps:$4 sm:$0xff]   ;;  %v9388_v51 = vld [vmem:[%s10718_s4 + $0xe8] ss:$16 sps:$4 sm:$0xff]   ;;  %v9397_v24 = vld [vmem:[%s10720_s5 + $0x4] ss:$16 sps:$4 sm:$0xff]  }
 0x19f   :  { %7707 = vpow2.f32 %v6733_v45  ;;  %v9402_v12 = vld [vmem:[%s10720_s5 + $0xc] ss:$16 sps:$4 sm:$0xff]  }
 0x1a0   :  { %7709 = vtanh.f32 %v2137_v1  ;;  %v9373_v1 = vld [vmem:[%s10718_s4 + $0xe4] ss:$16 sps:$4 sm:$0xff]   ;;  %v10813_v45 = vld [vmem:[#allocation5_spill] sm:$0xff] }
 0x1a4   :  { %v7702_v9 = vpop.eup %7701 }
 0x1a5   :  { %v2162_v26 = vmul.f32 %v7702_v9, %v7700_v52 }
 0x1a7   :  { %v7704_v53 = vpop.eup %7703  ;;  %2187 = vst [vmem:[%s10722_s6] sm:$0xff] %v2162_v26  ;;  %v2195_v54 = vpack.c.bf16 %v2162_v26, %v2162_v26 }
 0x1a8   :  { %v7706_v56 = vpop.eup %7705  ;;  %v2166_v4 = vadd.f32 1.0, %v7704_v53  ;;  %v10814_v53 = vld [vmem:[#allocation6_spill] sm:$0xff] }
 0x1a9   :  { %v2172_v6 = vadd.f32 1.0, %v7706_v56  ;;  %2421 = vmatmul.mubr.bf16.vlgmr.msra.gmra.mrb[40].mxu0 %v2195_v54  ;;  %2462 = vmatmul.mubr.bf16.vlgmr.msra.gmra.mrb[40].mxu1 %v2195_v54 }
 0x1aa   :  { %7711 = vrcp.f32 %v2166_v4  ;;  %2673 = vmatpush1.bf16.msra.mxu0 %v8702_v10  ;;  %2714 = vmatpush1.bf16.msra.mxu1 %v8709_v11  ;;  %v7708_v10 = vpop.eup %7707 }
 0x1ab   :  { %7713 = vrcp.f32 %v2172_v6  ;;  %2674 = vmatprep.subr.bf16.mxu0 %v8714_v13  ;;  %2715 = vmatprep.subr.bf16.mxu1 %v8720_v14  ;;  %v7710_v11 = vpop.eup %7709 }
 0x1ac   :  { %2704 = vmatprep.mubr.bf16.mxu0 %v10753_v36  ;;  %2745 = vmatprep.mubr.bf16.mxu1 %v10753_v36 }
 0x1ae   :  { %2675 = vmatpush1.bf16.msra.mxu0 %v8728_v15  ;;  %2716 = vmatpush1.bf16.msra.mxu1 %v8735_v31  ;;  %v2179_v15 = vadd.f32 1.0, %v7708_v10 }
 0x1af   :  { %2676 = vmatprep.subr.bf16.mxu0 %v8740_v16  ;;  %2717 = vmatprep.subr.bf16.mxu1 %v8746_v17  ;;  %v10812_v16 = vld [vmem:[#allocation4_spill] sm:$0xff] }
 0x1b0   :  { %7715 = vrcp.f32 %v2179_v15 }
 0x1b2   :  { %2677 = vmatpush1.bf16.msra.mxu0 %v8754_v18  ;;  %2718 = vmatpush1.bf16.msra.mxu1 %v8761_v19 }
 0x1b3   :  { %2678 = vmatprep.subr.bf16.mxu0 %v8766_v20  ;;  %2719 = vmatprep.subr.bf16.mxu1 %v8772_v21  ;;  %v9205_v21 = vld [vmem:[%s10718_s4 + $0x4] ss:$16 sps:$4 sm:$0xff]  }
 0x1b4   :  { %v7712_v13 = vpop.eup %7711 }
 0x1b5   :  { %v7714_v14 = vpop.eup %7713  ;;  %v2183_v8 = vmul.f32 %v7712_v13, %v7710_v11 }
 0x1b6   :  { %v2182_v59 = vmul.f32 0.0, %v7714_v14  ;;  %2679 = vmatpush1.bf16.msra.mxu0 %v8778_v22  ;;  %2720 = vmatpush1.bf16.msra.mxu1 %v8785_v23  ;;  %v9215_v22 = vld [vmem:[%s10718_s4] ss:$16 sps:$4 sm:$0xff]   ;;  %v9220_v23 = vld [vmem:[%s10718_s4 + $0x8] ss:$16 sps:$4 sm:$0xff]  }
 0x1b7   :  { %2680 = vmatprep.subr.bf16.mxu0 %v8790_v25  ;;  %2721 = vmatprep.subr.bf16.mxu1 %v8796_v27  ;;  %v9229_v25 = vld [vmem:[%s10718_s4 + $0x24] ss:$16 sps:$4 sm:$0xff]   ;;  %v9234_v27 = vld [vmem:[%s10718_s4 + $0x2c] ss:$16 sps:$4 sm:$0xff]  }
 0x1b8   :  { %v9180_v31 = vadd.f32 %v2183_v8, %v2182_v59 }
 0x1ba   :  { %7717 = vtanh.f32 %v9180_v31  ;;  %2681 = vmatpush1.bf16.msra.mxu0 %v8802_v28  ;;  %2722 = vmatpush1.bf16.msra.mxu1 %v8809_v29  ;;  %v7716_v17 = vpop.eup %7715  ;;  %v9239_v28 = vld [vmem:[%s10718_s4 + $0x20] ss:$16 sps:$4 sm:$0xff]   ;;  %v9244_v29 = vld [vmem:[%s10718_s4 + $0x28] ss:$16 sps:$4 sm:$0xff]  }
 0x1bb   :  { %2682 = vmatprep.subr.bf16.mxu0 %v8814_v30  ;;  %2723 = vmatprep.subr.bf16.mxu1 %v8820_v32  ;;  %v9253_v30 = vld [vmem:[%s10718_s4 + $0x44] ss:$16 sps:$4 sm:$0xff]   ;;  %v9258_v32 = vld [vmem:[%s10718_s4 + $0x4c] ss:$16 sps:$4 sm:$0xff]  }
 0x1be   :  { %2683 = vmatpush1.bf16.msra.mxu0 %v8826_v33  ;;  %2724 = vmatpush1.bf16.msra.mxu1 %v8833_v50  ;;  %v9263_v33 = vld [vmem:[%s10718_s4 + $0x40] ss:$16 sps:$4 sm:$0xff]   ;;  %v9268_v50 = vld [vmem:[%s10718_s4 + $0x48] ss:$16 sps:$4 sm:$0xff]  }
 0x1bf   :  { %2684 = vmatprep.subr.bf16.mxu0 %v8838_v34  ;;  %2725 = vmatprep.subr.bf16.mxu1 %v8844_v35  ;;  %v9277_v34 = vld [vmem:[%s10718_s4 + $0x64] ss:$16 sps:$4 sm:$0xff]   ;;  %v9282_v35 = vld [vmem:[%s10718_s4 + $0x6c] ss:$16 sps:$4 sm:$0xff]  }
 0x1c2   :  { %2685 = vmatpush1.bf16.msra.mxu0 %v10812_v16  ;;  %2726 = vmatpush1.bf16.msra.mxu1 %v8857_v37  ;;  %v9287_v37 = vld [vmem:[%s10718_s4 + $0x60] ss:$16 sps:$4 sm:$0xff]  }
 0x1c3   :  { %2686 = vmatprep.subr.bf16.mxu0 %v8862_v38  ;;  %2727 = vmatprep.subr.bf16.mxu1 %v8868_v40  ;;  %v9292_v38 = vld [vmem:[%s10718_s4 + $0x68] ss:$16 sps:$4 sm:$0xff]   ;;  %v9301_v40 = vld [vmem:[%s10718_s4 + $0x84] ss:$16 sps:$4 sm:$0xff]  }
 0x1c4   :  { %v7718_v18 = vpop.eup %7717 }
 0x1c5   :  { %v2186_v19 = vmul.f32 %v7718_v18, %v7716_v17 }
 0x1c6   :  { %2687 = vmatpush1.bf16.msra.mxu0 %v8874_v42  ;;  %2728 = vmatpush1.bf16.msra.mxu1 %v8881_v3  ;;  %v9210_v3 = vld [vmem:[%s10718_s4 + $0xc] ss:$16 sps:$4 sm:$0xff]  }
 0x1c7   :  { %6734 = vst [vmem:[%s10723_s7 + $0x38] sm:$0xff] %v2186_v19  ;;  %v2479_v20 = vpack.c.bf16 %v2186_v19, %v2186_v19  ;;  %3008 = vmatprep.subr.bf16.mxu0 %v9205_v21  ;;  %3049 = vmatprep.subr.bf16.mxu1 %v9210_v3  ;;  %v9306_v42 = vld [vmem:[%s10718_s4 + $0x8c] ss:$16 sps:$4 sm:$0xff]  }
 0x1c9   :  { %2705 = vmatmul.mubr.bf16.vlgmr.msra.gmra.mrb[44].mxu0 %v2479_v20  ;;  %2746 = vmatmul.mubr.bf16.vlgmr.msra.gmra.mrb[44].mxu1 %v2479_v20 }
 0x1ca   :  { %3040 = vmatprep.mubr.bf16.mxu0 %v10753_v36  ;;  %3081 = vmatprep.mubr.bf16.mxu1 %v10753_v36 }
 0x1cb   :  { %3009 = vmatpush1.bf16.msra.mxu0 %v9215_v22  ;;  %3050 = vmatpush1.bf16.msra.mxu1 %v9220_v23 }
 0x1cc   :  { %3010 = vmatprep.subr.bf16.mxu0 %v9229_v25  ;;  %3051 = vmatprep.subr.bf16.mxu1 %v9234_v27 }
 0x1cf   :  { %3011 = vmatpush1.bf16.msra.mxu0 %v9239_v28  ;;  %3052 = vmatpush1.bf16.msra.mxu1 %v9244_v29 }
 0x1d0   :  { %3012 = vmatprep.subr.bf16.mxu0 %v9253_v30  ;;  %3053 = vmatprep.subr.bf16.mxu1 %v9258_v32 }
 0x1d3   :  { %3013 = vmatpush1.bf16.msra.mxu0 %v9263_v33  ;;  %3054 = vmatpush1.bf16.msra.mxu1 %v9268_v50 }
 0x1d4   :  { %3014 = vmatprep.subr.bf16.mxu0 %v9277_v34  ;;  %3055 = vmatprep.subr.bf16.mxu1 %v9282_v35 }
 0x1d7   :  { %3015 = vmatpush1.bf16.msra.mxu0 %v9287_v37  ;;  %3056 = vmatpush1.bf16.msra.mxu1 %v9292_v38 }
 0x1d8   :  { %3016 = vmatprep.subr.bf16.mxu0 %v9301_v40  ;;  %3057 = vmatprep.subr.bf16.mxu1 %v9306_v42 }
 0x1db   :  { %3017 = vmatpush1.bf16.msra.mxu0 %v9311_v41  ;;  %3058 = vmatpush1.bf16.msra.mxu1 %v9316_v44 }
 0x1dc   :  { %3018 = vmatprep.subr.bf16.mxu0 %v9325_v63  ;;  %3059 = vmatprep.subr.bf16.mxu1 %v9330_v61 }
 0x1df   :  { %3019 = vmatpush1.bf16.msra.mxu0 %v9335_v39  ;;  %3060 = vmatpush1.bf16.msra.mxu1 %v9340_v47 }
 0x1e0   :  { %3020 = vmatprep.subr.bf16.mxu0 %v9349_v2  ;;  %3061 = vmatprep.subr.bf16.mxu1 %v9354_v60 }
 0x1e3   :  { %3021 = vmatpush1.bf16.msra.mxu0 %v9359_v62  ;;  %3062 = vmatpush1.bf16.msra.mxu1 %v9364_v7 }
 0x1e4   :  { %3022 = vmatprep.subr.bf16.mxu0 %v9373_v1  ;;  %3063 = vmatprep.subr.bf16.mxu1 %v9378_v48 }
 0x1e7   :  { %3023 = vmatpush1.bf16.msra.mxu0 %v9383_v49  ;;  %3064 = vmatpush1.bf16.msra.mxu1 %v9388_v51 }
 0x1e8   :  { %3292 = vmatprep.subr.bf16.mxu0 %v9397_v24  ;;  %3333 = vmatprep.subr.bf16.mxu1 %v9402_v12 }
 0x27c   :  { %v2422_v58 = vpop.f32.mrb[40].mxu0  ;;  %v2463_v55 = vpop.f32.mrb[40].mxu1 }
 0x27d   :  { %v2470_v43 = vadd.f32 %v2422_v58, %v8958_v57  ;;  %v2472_v5 = vadd.f32 %v2463_v55, %v8961_v46  ;;  %v2424_v52 = vpop.f32.mrb[41].mxu0  ;;  %v2465_v9 = vpop.f32.mrb[41].mxu1 }
 0x27e   :  { %v2471_v26 = vadd.f32 %v2424_v52, %v10813_v45  ;;  %v2473_v54 = vadd.f32 %v2465_v9, %v10814_v53  ;;  %v2426_v56 = vpop.f32.mrb[42].mxu0  ;;  %v2467_v4 = vpop.f32.mrb[42].mxu1  ;;  %v10815_v9 = vld [vmem:[#allocation55_spill] sm:$0xff] }
 0x27f   :  { %v6799_v6 = vmul.f32 -1.442695, %v2470_v43  ;;  %v2427_v10 = vpop.f32.mrb[43].mxu0  ;;  %v2468_v11 = vpop.f32.mrb[43].mxu1  ;;  %v10817_v56 = vld [vmem:[#allocation57_spill] sm:$0xff] }
 0x280   :  { %v6800_v13 = vmul.f32 -1.442695, %v2471_v26  ;;  %v6801_v14 = vmul.f32 -1.442695, %v2473_v54  ;;  %v10816_v26 = vld [vmem:[#allocation56_spill] sm:$0xff] }
 0x281   :  { %7719 = vpow2.f32 %v6799_v6  ;;  %v10818_v6 = vld [vmem:[#allocation58_spill] sm:$0xff] }
 0x282   :  { %7721 = vpow2.f32 %v6800_v13 }
 0x283   :  { %7723 = vpow2.f32 %v6801_v14 }
 0x284   :  { %7725 = vtanh.f32 %v2472_v5 }
 0x28b   :  { %v7720_v8 = vpop.eup %7719 }
 0x28c   :  { %v7722_v15 = vpop.eup %7721  ;;  %v2761_v57 = vadd.f32 1.0, %v7720_v8 }
 0x28d   :  { %v2767_v46 = vadd.f32 1.0, %v7722_v15  ;;  %v7724_v59 = vpop.eup %7723 }
 0x28e   :  { %7727 = vrcp.f32 %v2761_v57  ;;  %v7726_v16 = vpop.eup %7725  ;;  %v2774_v20 = vadd.f32 1.0, %v7724_v59 }
 0x28f   :  { %7729 = vrcp.f32 %v2767_v46 }
 0x290   :  { %7731 = vrcp.f32 %v2774_v20 }
 0x298   :  { %v7728_v17 = vpop.eup %7727 }
 0x299   :  { %v7730_v18 = vpop.eup %7729  ;;  %v2778_v19 = vmul.f32 %v7728_v17, %v7726_v16  ;;  %v9421_v17 = vld [vmem:[%s10720_s5] ss:$16 sps:$4 sm:$0xff]  }
 0x29a   :  { %v2777_v58 = vmul.f32 %v7730_v18, %v9155_v0  ;;  %v7732_v57 = vpop.eup %7731  ;;  %v9426_v18 = vld [vmem:[%s10720_s5 + $0x8] ss:$16 sps:$4 sm:$0xff]  }
 0x29c   :  { %v9411_v55 = vadd.f32 %v2778_v19, %v2777_v58  ;;  %v2706_v43 = vpop.f32.mrb[44].mxu0  ;;  %v2747_v52 = vpop.f32.mrb[44].mxu1  ;;  %v9434_v58 = vld [vmem:[%s10720_s5 + $0x24] ss:$16 sps:$4 sm:$0xff]  }
 0x29d   :  { %v2754_v45 = vadd.f32 %v2706_v43, %v10815_v9  ;;  %v2756_v5 = vadd.f32 %v2747_v52, %v10816_v26  ;;  %v2708_v53 = vpop.f32.mrb[45].mxu0  ;;  %v2749_v54 = vpop.f32.mrb[45].mxu1  ;;  %v9439_v43 = vld [vmem:[%s10720_s5 + $0x2c] ss:$16 sps:$4 sm:$0xff]   ;;  %v9446_v26 = vld [vmem:[%s10720_s5 + $0x20] ss:$16 sps:$4 sm:$0xff]  }
 0x29e   :  { %7733 = vtanh.f32 %v9411_v55  ;;  %v2755_v4 = vadd.f32 %v2708_v53, %v10817_v56  ;;  %v2757_v10 = vadd.f32 %v2749_v54, %v10818_v6  ;;  %v2710_v11 = vpop.f32.mrb[46].mxu0  ;;  %v2751_v13 = vpop.f32.mrb[46].mxu1  ;;  %v9451_v53 = vld [vmem:[%s10720_s5 + $0x28] ss:$16 sps:$4 sm:$0xff]   ;;  %v9463_v54 = vld [vmem:[%s10720_s5 + $0x4c] ss:$16 sps:$4 sm:$0xff]  }
 0x29f   :  { %v6802_v0 = vmul.f32 -1.442695, %v2754_v45  ;;  %v2711_v14 = vpop.f32.mrb[47].mxu0  ;;  %v2752_v8 = vpop.f32.mrb[47].mxu1  ;;  %v9472_v56 = vld [vmem:[%s10720_s5 + $0x40] ss:$16 sps:$4 sm:$0xff]  }
 0x2a0   :  { %v6803_v15 = vmul.f32 -1.442695, %v2755_v4  ;;  %v6804_v59 = vmul.f32 -1.442695, %v2757_v10  ;;  %v9477_v4 = vld [vmem:[%s10720_s5 + $0x48] ss:$16 sps:$4 sm:$0xff]  }
 0x2a1   :  { %7735 = vpow2.f32 %v6802_v0  ;;  %v9484_v6 = vld [vmem:[%s10720_s5 + $0x64] ss:$16 sps:$4 sm:$0xff]   ;;  %v9489_v10 = vld [vmem:[%s10720_s5 + $0x6c] ss:$16 sps:$4 sm:$0xff]   ;;  %v9496_v13 = vld [vmem:[%s10720_s5 + $0x60] ss:$16 sps:$4 sm:$0xff]  }
 0x2a2   :  { %7737 = vpow2.f32 %v6803_v15  ;;  %v9501_v0 = vld [vmem:[%s10720_s5 + $0x68] ss:$16 sps:$4 sm:$0xff]   ;;  %v9508_v8 = vld [vmem:[%s10720_s5 + $0x84] ss:$16 sps:$4 sm:$0xff]   ;;  %v9513_v15 = vld [vmem:[%s10720_s5 + $0x8c] ss:$16 sps:$4 sm:$0xff]  }
 0x2a3   :  { %7739 = vpow2.f32 %v6804_v59 }
 0x2a4   :  { %7741 = vtanh.f32 %v2756_v5  ;;  %v9458_v5 = vld [vmem:[%s10720_s5 + $0x44] ss:$16 sps:$4 sm:$0xff]  }
 0x2a8   :  { %v7734_v46 = vpop.eup %7733 }
 0x2a9   :  { %v2781_v16 = vmul.f32 %v7734_v46, %v7732_v57 }
 0x2ab   :  { %v7736_v19 = vpop.eup %7735  ;;  %6805 = vst [vmem:[%s10722_s6 + $0x8] sm:$0xff] %v2781_v16  ;;  %v2815_v20 = vpack.c.bf16 %v2781_v16, %v2781_v16 }
 0x2ac   :  { %v7738_v52 = vpop.eup %7737  ;;  %v2785_v9 = vadd.f32 1.0, %v7736_v19 }
 0x2ad   :  { %v2791_v45 = vadd.f32 1.0, %v7738_v52  ;;  %3041 = vmatmul.mubr.bf16.vlgmr.msra.gmra.mrb[48].mxu0 %v2815_v20  ;;  %3082 = vmatmul.mubr.bf16.vlgmr.msra.gmra.mrb[48].mxu1 %v2815_v20  ;;  %v7740_v11 = vpop.eup %7739  ;;  %v9521_v20 = vld [vmem:[%s10720_s5 + $0x80] ss:$16 sps:$4 sm:$0xff]   ;;  %v9526_v52 = vld [vmem:[%s10720_s5 + $0x88] ss:$16 sps:$4 sm:$0xff]  }
 0x2ae   :  { %7743 = vrcp.f32 %v2785_v9  ;;  %3293 = vmatpush1.bf16.msra.mxu0 %v9421_v17  ;;  %3334 = vmatpush1.bf16.msra.mxu1 %v9426_v18  ;;  %v7742_v14 = vpop.eup %7741  ;;  %v2798_v16 = vadd.f32 1.0, %v7740_v11  ;;  %v9538_v9 = vld [vmem:[%s10720_s5 + $0xac] ss:$16 sps:$4 sm:$0xff]   ;;  %v9548_v11 = vld [vmem:[%s10720_s5 + $0xa0] ss:$16 sps:$4 sm:$0xff]  }
 0x2af   :  { %7745 = vrcp.f32 %v2791_v45  ;;  %3294 = vmatprep.subr.bf16.mxu0 %v9434_v58  ;;  %3335 = vmatprep.subr.bf16.mxu1 %v9439_v43  ;;  %10820 = vst [vmem:[#allocation5_spill] sm:$0xff] %v9538_v9  ;;  %10821 = vst [vmem:[#allocation6_spill] sm:$0xff] %v9548_v11 }
 0x2b0   :  { %3324 = vmatprep.mubr.bf16.mxu0 %v10753_v36  ;;  %3365 = vmatprep.mubr.bf16.mxu1 %v10753_v36  ;;  %7747 = vrcp.f32 %v2798_v16  ;;  %v9577_v16 = vld [vmem:[%s10720_s5 + $0xc8] ss:$16 sps:$4 sm:$0xff]  }
 0x2b1   :  { %10825 = vst [vmem:[#allocation58_spill] sm:$0xff] %v9577_v16 }
 0x2b2   :  { %3295 = vmatpush1.bf16.msra.mxu0 %v9446_v26  ;;  %3336 = vmatpush1.bf16.msra.mxu1 %v9451_v53 }
 0x2b3   :  { %3296 = vmatprep.subr.bf16.mxu0 %v9458_v5  ;;  %3337 = vmatprep.subr.bf16.mxu1 %v9463_v54 }
 0x2b6   :  { %3297 = vmatpush1.bf16.msra.mxu0 %v9472_v56  ;;  %3338 = vmatpush1.bf16.msra.mxu1 %v9477_v4 }
 0x2b7   :  { %3298 = vmatprep.subr.bf16.mxu0 %v9484_v6  ;;  %3339 = vmatprep.subr.bf16.mxu1 %v9489_v10 }
 0x2b8   :  { %v7744_v57 = vpop.eup %7743 }
 0x2b9   :  { %v7746_v46 = vpop.eup %7745  ;;  %v2802_v59 = vmul.f32 %v7744_v57, %v7742_v14  ;;  %v9553_v14 = vld [vmem:[%s10720_s5 + $0xa8] ss:$16 sps:$4 sm:$0xff]   ;;  %v9560_v57 = vld [vmem:[%s10720_s5 + $0xc4] ss:$16 sps:$4 sm:$0xff]  }
 0x2ba   :  { %v2801_v19 = vmul.f32 %v7746_v46, %v9180_v31  ;;  %3299 = vmatpush1.bf16.msra.mxu0 %v9496_v13  ;;  %3340 = vmatpush1.bf16.msra.mxu1 %v9501_v0  ;;  %v9533_v31 = vld [vmem:[%s10720_s5 + $0xa4] ss:$16 sps:$4 sm:$0xff]   ;;  %10822 = vst [vmem:[#allocation55_spill] sm:$0xff] %v9553_v14  ;;  %10823 = vst [vmem:[#allocation56_spill] sm:$0xff] %v9560_v57  ;;  %v9565_v46 = vld [vmem:[%s10720_s5 + $0xcc] ss:$16 sps:$4 sm:$0xff]  }
 0x2bb   :  { %3300 = vmatprep.subr.bf16.mxu0 %v9508_v8  ;;  %3341 = vmatprep.subr.bf16.mxu1 %v9513_v15  ;;  %10819 = vst [vmem:[#allocation4_spill] sm:$0xff] %v9533_v31  ;;  %10824 = vst [vmem:[#allocation57_spill] sm:$0xff] %v9565_v46 }
 0x2bc   :  { %v9540_v45 = vadd.f32 %v2802_v59, %v2801_v19  ;;  %v9572_v59 = vld [vmem:[%s10720_s5 + $0xc0] ss:$16 sps:$4 sm:$0xff]   ;;  %v9584_v19 = vld [vmem:[%s10720_s5 + $0xe4] ss:$16 sps:$4 sm:$0xff]  }
 0x2be   :  { %7749 = vtanh.f32 %v9540_v45  ;;  %3301 = vmatpush1.bf16.msra.mxu0 %v9521_v20  ;;  %3342 = vmatpush1.bf16.msra.mxu1 %v9526_v52 }
 0x2bf   :  { %3302 = vmatprep.subr.bf16.mxu0 %v9533_v31  ;;  %3343 = vmatprep.subr.bf16.mxu1 %v9538_v9 }
 0x2c2   :  { %3303 = vmatpush1.bf16.msra.mxu0 %v9548_v11  ;;  %3344 = vmatpush1.bf16.msra.mxu1 %v9553_v14  ;;  %v9589_v14 = vld [vmem:[%s10720_s5 + $0xec] ss:$16 sps:$4 sm:$0xff]   ;;  %v7748_v11 = vpop.eup %7747 }
 0x2c3   :  { %3304 = vmatprep.subr.bf16.mxu0 %v9560_v57  ;;  %3345 = vmatprep.subr.bf16.mxu1 %v9565_v46  ;;  %v9596_v57 = vld [vmem:[%s10720_s5 + $0xe0] ss:$16 sps:$4 sm:$0xff]   ;;  %v9601_v46 = vld [vmem:[%s10720_s5 + $0xe8] ss:$16 sps:$4 sm:$0xff]  }
 0x2c6   :  { %3305 = vmatpush1.bf16.msra.mxu0 %v9572_v59  ;;  %3346 = vmatpush1.bf16.msra.mxu1 %v9577_v16 }
 0x2c7   :  { %3306 = vmatprep.subr.bf16.mxu0 %v9584_v19  ;;  %3347 = vmatprep.subr.bf16.mxu1 %v9589_v14 }
 0x2c8   :  { %v7750_v9 = vpop.eup %7749 }
 0x2c9   :  { %v2805_v31 = vmul.f32 %v7750_v9, %v7748_v11  ;;  %v10831_v9 = vld [vmem:[#allocation52_spill] sm:$0xff] }
 0x2ca   :  { %3307 = vmatpush1.bf16.msra.mxu0 %v9596_v57  ;;  %3348 = vmatpush1.bf16.msra.mxu1 %v9601_v46 }
 0x2cb   :  { %6806 = vst [vmem:[%s10723_s7 + $0x30] sm:$0xff] %v2805_v31  ;;  %v3099_v16 = vpack.c.bf16 %v2805_v31, %v2805_v31  ;;  %3628 = vmatprep.subr.bf16.mxu0 %v9205_v21  ;;  %3669 = vmatprep.subr.bf16.mxu1 %v9210_v3 }
 0x2cd   :  { %3325 = vmatmul.mubr.bf16.vlgmr.msra.gmra.mrb[52].mxu0 %v3099_v16  ;;  %3366 = vmatmul.mubr.bf16.vlgmr.msra.gmra.mrb[52].mxu1 %v3099_v16 }
 0x2ce   :  { %3629 = vmatpush1.bf16.msra.mxu0 %v9215_v22  ;;  %3670 = vmatpush1.bf16.msra.mxu1 %v9220_v23  ;;  %v10826_v22 = vld [vmem:[#allocation7_spill] sm:$0xff] }
 0x2cf   :  { %3630 = vmatprep.subr.bf16.mxu0 %v9229_v25  ;;  %3671 = vmatprep.subr.bf16.mxu1 %v9234_v27  ;;  %v10827_v25 = vld [vmem:[#allocation8_spill] sm:$0xff] }
 0x2d0   :  { %3660 = vmatprep.mubr.bf16.mxu0 %v10753_v36  ;;  %3701 = vmatprep.mubr.bf16.mxu1 %v10753_v36 }
 0x2d2   :  { %3631 = vmatpush1.bf16.msra.mxu0 %v9239_v28  ;;  %3672 = vmatpush1.bf16.msra.mxu1 %v9244_v29 }
 0x2d3   :  { %3632 = vmatprep.subr.bf16.mxu0 %v9253_v30  ;;  %3673 = vmatprep.subr.bf16.mxu1 %v9258_v32  ;;  %v10828_v30 = vld [vmem:[#allocation9_spill] sm:$0xff] }
 0x2d6   :  { %3633 = vmatpush1.bf16.msra.mxu0 %v9263_v33  ;;  %3674 = vmatpush1.bf16.msra.mxu1 %v9268_v50  ;;  %v10829_v33 = vld [vmem:[#allocation10_spill] sm:$0xff] }
 0x2d7   :  { %3634 = vmatprep.subr.bf16.mxu0 %v9277_v34  ;;  %3675 = vmatprep.subr.bf16.mxu1 %v9282_v35 }
 0x2da   :  { %3635 = vmatpush1.bf16.msra.mxu0 %v9287_v37  ;;  %3676 = vmatpush1.bf16.msra.mxu1 %v9292_v38 }
 0x2db   :  { %3636 = vmatprep.subr.bf16.mxu0 %v9301_v40  ;;  %3677 = vmatprep.subr.bf16.mxu1 %v9306_v42 }
 0x2de   :  { %3637 = vmatpush1.bf16.msra.mxu0 %v9311_v41  ;;  %3678 = vmatpush1.bf16.msra.mxu1 %v9316_v44 }
 0x2df   :  { %3638 = vmatprep.subr.bf16.mxu0 %v9325_v63  ;;  %3679 = vmatprep.subr.bf16.mxu1 %v9330_v61 }
 0x2e2   :  { %3639 = vmatpush1.bf16.msra.mxu0 %v9335_v39  ;;  %3680 = vmatpush1.bf16.msra.mxu1 %v9340_v47 }
 0x2e3   :  { %3640 = vmatprep.subr.bf16.mxu0 %v9349_v2  ;;  %3681 = vmatprep.subr.bf16.mxu1 %v9354_v60 }
 0x2e6   :  { %3641 = vmatpush1.bf16.msra.mxu0 %v9359_v62  ;;  %3682 = vmatpush1.bf16.msra.mxu1 %v9364_v7 }
 0x2e7   :  { %3642 = vmatprep.subr.bf16.mxu0 %v9373_v1  ;;  %3683 = vmatprep.subr.bf16.mxu1 %v9378_v48 }
 0x2ea   :  { %3643 = vmatpush1.bf16.msra.mxu0 %v9383_v49  ;;  %3684 = vmatpush1.bf16.msra.mxu1 %v9388_v51 }
 0x2eb   :  { %3912 = vmatprep.subr.bf16.mxu0 %v9397_v24  ;;  %3953 = vmatprep.subr.bf16.mxu1 %v9402_v12  ;;  %v10830_v12 = vld [vmem:[#allocation51_spill] sm:$0xff] }
 0x380   :  { %v3042_v21 = vpop.f32.mrb[48].mxu0  ;;  %v3083_v3 = vpop.f32.mrb[48].mxu1 }
 0x381   :  { %v3090_v23 = vadd.f32 %v3042_v21, %v10826_v22  ;;  %v3092_v27 = vadd.f32 %v3083_v3, %v10827_v25  ;;  %v3044_v28 = vpop.f32.mrb[49].mxu0  ;;  %v3085_v29 = vpop.f32.mrb[49].mxu1  ;;  %v10832_v3 = vld [vmem:[#allocation53_spill] sm:$0xff] }
 0x382   :  { %v3091_v32 = vadd.f32 %v3044_v28, %v10828_v30  ;;  %v3093_v50 = vadd.f32 %v3085_v29, %v10829_v33  ;;  %v3046_v34 = vpop.f32.mrb[50].mxu0  ;;  %v3087_v35 = vpop.f32.mrb[50].mxu1 }
 0x383   :  { %v6871_v37 = vmul.f32 -1.442695, %v3090_v23  ;;  %v3047_v38 = vpop.f32.mrb[51].mxu0  ;;  %v3088_v40 = vpop.f32.mrb[51].mxu1  ;;  %v10833_v23 = vld [vmem:[#allocation54_spill] sm:$0xff] }
 0x384   :  { %v6872_v42 = vmul.f32 -1.442695, %v3091_v32  ;;  %v6873_v41 = vmul.f32 -1.442695, %v3093_v50 }
 0x385   :  { %7751 = vpow2.f32 %v6871_v37 }
 0x386   :  { %7753 = vpow2.f32 %v6872_v42 }
 0x387   :  { %7755 = vpow2.f32 %v6873_v41 }
 0x388   :  { %7757 = vtanh.f32 %v3092_v27 }
 0x38f   :  { %v7752_v44 = vpop.eup %7751 }
 0x390   :  { %v7754_v63 = vpop.eup %7753  ;;  %v3381_v61 = vadd.f32 1.0, %v7752_v44 }
 0x391   :  { %v3387_v39 = vadd.f32 1.0, %v7754_v63  ;;  %v7756_v47 = vpop.eup %7755  ;;  %v9739_v63 = vld [vmem:[%s10718_s4 + $0x20] ss:$16 sps:$4 sm:$0xff]  }
 0x392   :  { %7759 = vrcp.f32 %v3381_v61  ;;  %v7758_v2 = vpop.eup %7757  ;;  %v3394_v1 = vadd.f32 1.0, %v7756_v47  ;;  %v9744_v61 = vld [vmem:[%s10718_s4 + $0x28] ss:$16 sps:$4 sm:$0xff]   ;;  %v9758_v47 = vld [vmem:[%s10718_s4 + $0x4c] ss:$16 sps:$4 sm:$0xff]  }
 0x393   :  { %7761 = vrcp.f32 %v3387_v39  ;;  %v9753_v39 = vld [vmem:[%s10718_s4 + $0x44] ss:$16 sps:$4 sm:$0xff]  }
 0x394   :  { %7763 = vrcp.f32 %v3394_v1  ;;  %v9787_v1 = vld [vmem:[%s10718_s4 + $0x60] ss:$16 sps:$4 sm:$0xff]  }
 0x39c   :  { %v7760_v60 = vpop.eup %7759 }
 0x39d   :  { %v7762_v62 = vpop.eup %7761  ;;  %v3398_v7 = vmul.f32 %v7760_v60, %v7758_v2  ;;  %v9763_v2 = vld [vmem:[%s10718_s4 + $0x40] ss:$16 sps:$4 sm:$0xff]   ;;  %v9768_v60 = vld [vmem:[%s10718_s4 + $0x48] ss:$16 sps:$4 sm:$0xff]  }
 0x39e   :  { %v3397_v48 = vmul.f32 %v7762_v62, %v9411_v55  ;;  %v7764_v33 = vpop.eup %7763  ;;  %v9777_v62 = vld [vmem:[%s10718_s4 + $0x64] ss:$16 sps:$4 sm:$0xff]  }
 0x3a0   :  { %v9651_v49 = vadd.f32 %v3398_v7, %v3397_v48  ;;  %v3326_v51 = vpop.f32.mrb[52].mxu0  ;;  %v3367_v24 = vpop.f32.mrb[52].mxu1  ;;  %v9782_v7 = vld [vmem:[%s10718_s4 + $0x6c] ss:$16 sps:$4 sm:$0xff]   ;;  %v9792_v48 = vld [vmem:[%s10718_s4 + $0x68] ss:$16 sps:$4 sm:$0xff]  }
 0x3a1   :  { %v3374_v31 = vadd.f32 %v3326_v51, %v10830_v12  ;;  %v3376_v11 = vadd.f32 %v3367_v24, %v10831_v9  ;;  %v3328_v16 = vpop.f32.mrb[53].mxu0  ;;  %v3369_v21 = vpop.f32.mrb[53].mxu1  ;;  %v9801_v51 = vld [vmem:[%s10718_s4 + $0x84] ss:$16 sps:$4 sm:$0xff]   ;;  %v9806_v24 = vld [vmem:[%s10718_s4 + $0x8c] ss:$16 sps:$4 sm:$0xff]  }
 0x3a2   :  { %7765 = vtanh.f32 %v9651_v49  ;;  %v3375_v22 = vadd.f32 %v3328_v16, %v10832_v3  ;;  %v3377_v25 = vadd.f32 %v3369_v21, %v10833_v23  ;;  %v3330_v27 = vpop.f32.mrb[54].mxu0  ;;  %v3371_v28 = vpop.f32.mrb[54].mxu1  ;;  %v9811_v12 = vld [vmem:[%s10718_s4 + $0x80] ss:$16 sps:$4 sm:$0xff]   ;;  %v9825_v9 = vld [vmem:[%s10718_s4 + $0xa4] ss:$16 sps:$4 sm:$0xff]  }
 0x3a3   :  { %v6874_v55 = vmul.f32 -1.442695, %v3374_v31  ;;  %v3331_v29 = vpop.f32.mrb[55].mxu0  ;;  %v3372_v30 = vpop.f32.mrb[55].mxu1  ;;  %v9816_v31 = vld [vmem:[%s10718_s4 + $0x88] ss:$16 sps:$4 sm:$0xff]  }
 0x3a4   :  { %v6875_v32 = vmul.f32 -1.442695, %v3375_v22  ;;  %v6876_v34 = vmul.f32 -1.442695, %v3377_v25  ;;  %v9835_v16 = vld [vmem:[%s10718_s4 + $0xa0] ss:$16 sps:$4 sm:$0xff]  }
 0x3a5   :  { %7767 = vpow2.f32 %v6874_v55  ;;  %v9840_v21 = vld [vmem:[%s10718_s4 + $0xa8] ss:$16 sps:$4 sm:$0xff]   ;;  %v9849_v3 = vld [vmem:[%s10718_s4 + $0xc4] ss:$16 sps:$4 sm:$0xff]   ;;  %v9854_v22 = vld [vmem:[%s10718_s4 + $0xcc] ss:$16 sps:$4 sm:$0xff]  }
 0x3a6   :  { %7769 = vpow2.f32 %v6875_v32  ;;  %v9859_v23 = vld [vmem:[%s10718_s4 + $0xc0] ss:$16 sps:$4 sm:$0xff]   ;;  %v9864_v25 = vld [vmem:[%s10718_s4 + $0xc8] ss:$16 sps:$4 sm:$0xff]   ;;  %v9873_v27 = vld [vmem:[%s10718_s4 + $0xe4] ss:$16 sps:$4 sm:$0xff]  }
 0x3a7   :  { %7771 = vpow2.f32 %v6876_v34  ;;  %v9878_v28 = vld [vmem:[%s10718_s4 + $0xec] ss:$16 sps:$4 sm:$0xff]   ;;  %v9883_v55 = vld [vmem:[%s10718_s4 + $0xe0] ss:$16 sps:$4 sm:$0xff]   ;;  %v9888_v29 = vld [vmem:[%s10718_s4 + $0xe8] ss:$16 sps:$4 sm:$0xff]  }
 0x3a8   :  { %7773 = vtanh.f32 %v3376_v11  ;;  %v9830_v11 = vld [vmem:[%s10718_s4 + $0xac] ss:$16 sps:$4 sm:$0xff]   ;;  %v9897_v30 = vld [vmem:[%s10720_s5 + $0x4] ss:$16 sps:$4 sm:$0xff]  }
 0x3a9   :  { %v9902_v32 = vld [vmem:[%s10720_s5 + $0xc] ss:$16 sps:$4 sm:$0xff]  }
 0x3aa   :  { %v10841_v34 = vld [vmem:[#allocation11_spill] sm:$0xff] }
 0x3ac   :  { %v7766_v50 = vpop.eup %7765 }
 0x3ad   :  { %v3401_v35 = vmul.f32 %v7766_v50, %v7764_v33 }
 0x3af   :  { %v7768_v37 = vpop.eup %7767  ;;  %6877 = vst [vmem:[%s10722_s6 + $0x10] sm:$0xff] %v3401_v35  ;;  %v3435_v38 = vpack.c.bf16 %v3401_v35, %v3401_v35 }
 0x3b0   :  { %v7770_v40 = vpop.eup %7769  ;;  %v3405_v42 = vadd.f32 1.0, %v7768_v37  ;;  %v10842_v37 = vld [vmem:[#allocation12_spill] sm:$0xff] }
 0x3b1   :  { %v3411_v41 = vadd.f32 1.0, %v7770_v40  ;;  %3661 = vmatmul.mubr.bf16.vlgmr.msra.gmra.mrb[56].mxu0 %v3435_v38  ;;  %3702 = vmatmul.mubr.bf16.vlgmr.msra.gmra.mrb[56].mxu1 %v3435_v38 }
 0x3b2   :  { %7775 = vrcp.f32 %v3405_v42  ;;  %3913 = vmatpush1.bf16.msra.mxu0 %v9421_v17  ;;  %3954 = vmatpush1.bf16.msra.mxu1 %v9426_v18  ;;  %v7772_v17 = vpop.eup %7771 }
 0x3b3   :  { %7777 = vrcp.f32 %v3411_v41  ;;  %3914 = vmatprep.subr.bf16.mxu0 %v9434_v58  ;;  %3955 = vmatprep.subr.bf16.mxu1 %v9439_v43  ;;  %v7774_v18 = vpop.eup %7773  ;;  %v10843_v41 = vld [vmem:[#allocation13_spill] sm:$0xff] }
 0x3b4   :  { %3944 = vmatprep.mubr.bf16.mxu0 %v10753_v36  ;;  %3985 = vmatprep.mubr.bf16.mxu1 %v10753_v36 }
 0x3b6   :  { %3915 = vmatpush1.bf16.msra.mxu0 %v9446_v26  ;;  %3956 = vmatpush1.bf16.msra.mxu1 %v9451_v53  ;;  %v3418_v26 = vadd.f32 1.0, %v7772_v17 }
 0x3b7   :  { %3916 = vmatprep.subr.bf16.mxu0 %v9458_v5  ;;  %3957 = vmatprep.subr.bf16.mxu1 %v9463_v54  ;;  %v10834_v54 = vld [vmem:[#allocation4_spill] sm:$0xff] }
 0x3b8   :  { %7779 = vrcp.f32 %v3418_v26 }
 0x3ba   :  { %3917 = vmatpush1.bf16.msra.mxu0 %v9472_v56  ;;  %3958 = vmatpush1.bf16.msra.mxu1 %v9477_v4  ;;  %v10835_v56 = vld [vmem:[#allocation5_spill] sm:$0xff]  ;;  %v10836_v4 = vld [vmem:[#allocation6_spill] sm:$0xff] }
 0x3bb   :  { %3918 = vmatprep.subr.bf16.mxu0 %v9484_v6  ;;  %3959 = vmatprep.subr.bf16.mxu1 %v9489_v10  ;;  %v10837_v6 = vld [vmem:[#allocation55_spill] sm:$0xff]  ;;  %v10838_v10 = vld [vmem:[#allocation56_spill] sm:$0xff] }
 0x3bc   :  { %v7776_v58 = vpop.eup %7775 }
 0x3bd   :  { %v7778_v43 = vpop.eup %7777  ;;  %v3422_v44 = vmul.f32 %v7776_v58, %v7774_v18  ;;  %v10844_v18 = vld [vmem:[#allocation14_spill] sm:$0xff] }
 0x3be   :  { %v3421_v53 = vmul.f32 %v7778_v43, %v9540_v45  ;;  %3919 = vmatpush1.bf16.msra.mxu0 %v9496_v13  ;;  %3960 = vmatpush1.bf16.msra.mxu1 %v9501_v0  ;;  %v10839_v13 = vld [vmem:[#allocation57_spill] sm:$0xff]  ;;  %v10840_v0 = vld [vmem:[#allocation58_spill] sm:$0xff] }
 0x3bf   :  { %3920 = vmatprep.subr.bf16.mxu0 %v9508_v8  ;;  %3961 = vmatprep.subr.bf16.mxu1 %v9513_v15  ;;  %v9705_v45 = vld [vmem:[%s10718_s4 + $0x4] ss:$16 sps:$4 sm:$0xff]  }
 0x3c0   :  { %v9680_v5 = vadd.f32 %v3422_v44, %v3421_v53 }
 0x3c2   :  { %7781 = vtanh.f32 %v9680_v5  ;;  %3921 = vmatpush1.bf16.msra.mxu0 %v9521_v20  ;;  %3962 = vmatpush1.bf16.msra.mxu1 %v9526_v52  ;;  %v7780_v8 = vpop.eup %7779 }
 0x3c3   :  { %3922 = vmatprep.subr.bf16.mxu0 %v10834_v54  ;;  %3963 = vmatprep.subr.bf16.mxu1 %v10835_v56 }
 0x3c6   :  { %3923 = vmatpush1.bf16.msra.mxu0 %v10836_v4  ;;  %3964 = vmatpush1.bf16.msra.mxu1 %v10837_v6 }
 0x3c7   :  { %3924 = vmatprep.subr.bf16.mxu0 %v10838_v10  ;;  %3965 = vmatprep.subr.bf16.mxu1 %v10839_v13 }
 0x3ca   :  { %3925 = vmatpush1.bf16.msra.mxu0 %v9572_v59  ;;  %3966 = vmatpush1.bf16.msra.mxu1 %v10840_v0  ;;  %v9729_v59 = vld [vmem:[%s10718_s4 + $0x24] ss:$16 sps:$4 sm:$0xff]  }
 0x3cb   :  { %3926 = vmatprep.subr.bf16.mxu0 %v9584_v19  ;;  %3967 = vmatprep.subr.bf16.mxu1 %v9589_v14  ;;  %v9710_v14 = vld [vmem:[%s10718_s4 + $0xc] ss:$16 sps:$4 sm:$0xff]  }
 0x3cc   :  { %v7782_v15 = vpop.eup %7781  ;;  %v9734_v19 = vld [vmem:[%s10718_s4 + $0x2c] ss:$16 sps:$4 sm:$0xff]  }
 0x3cd   :  { %v3425_v20 = vmul.f32 %v7782_v15, %v7780_v8 }
 0x3ce   :  { %3927 = vmatpush1.bf16.msra.mxu0 %v9596_v57  ;;  %3968 = vmatpush1.bf16.msra.mxu1 %v9601_v46  ;;  %v9715_v57 = vld [vmem:[%s10718_s4] ss:$16 sps:$4 sm:$0xff]   ;;  %v9720_v46 = vld [vmem:[%s10718_s4 + $0x8] ss:$16 sps:$4 sm:$0xff]  }
 0x3cf   :  { %6878 = vst [vmem:[%s10723_s7 + $0x28] sm:$0xff] %v3425_v20  ;;  %v3719_v52 = vpack.c.bf16 %v3425_v20, %v3425_v20  ;;  %4248 = vmatprep.subr.bf16.mxu0 %v9705_v45  ;;  %4289 = vmatprep.subr.bf16.mxu1 %v9710_v14 }
 0x3d1   :  { %3945 = vmatmul.mubr.bf16.vlgmr.msra.gmra.mrb[60].mxu0 %v3719_v52  ;;  %3986 = vmatmul.mubr.bf16.vlgmr.msra.gmra.mrb[60].mxu1 %v3719_v52 }
 0x3d2   :  { %4280 = vmatprep.mubr.bf16.mxu0 %v10753_v36  ;;  %4321 = vmatprep.mubr.bf16.mxu1 %v10753_v36 }
 0x3d3   :  { %4249 = vmatpush1.bf16.msra.mxu0 %v9715_v57  ;;  %4290 = vmatpush1.bf16.msra.mxu1 %v9720_v46 }
 0x3d4   :  { %4250 = vmatprep.subr.bf16.mxu0 %v9729_v59  ;;  %4291 = vmatprep.subr.bf16.mxu1 %v9734_v19 }
 0x3d7   :  { %4251 = vmatpush1.bf16.msra.mxu0 %v9739_v63  ;;  %4292 = vmatpush1.bf16.msra.mxu1 %v9744_v61 }
 0x3d8   :  { %4252 = vmatprep.subr.bf16.mxu0 %v9753_v39  ;;  %4293 = vmatprep.subr.bf16.mxu1 %v9758_v47 }
 0x3db   :  { %4253 = vmatpush1.bf16.msra.mxu0 %v9763_v2  ;;  %4294 = vmatpush1.bf16.msra.mxu1 %v9768_v60 }
 0x3dc   :  { %4254 = vmatprep.subr.bf16.mxu0 %v9777_v62  ;;  %4295 = vmatprep.subr.bf16.mxu1 %v9782_v7 }
 0x3df   :  { %4255 = vmatpush1.bf16.msra.mxu0 %v9787_v1  ;;  %4296 = vmatpush1.bf16.msra.mxu1 %v9792_v48 }
 0x3e0   :  { %4256 = vmatprep.subr.bf16.mxu0 %v9801_v51  ;;  %4297 = vmatprep.subr.bf16.mxu1 %v9806_v24 }
 0x3e3   :  { %4257 = vmatpush1.bf16.msra.mxu0 %v9811_v12  ;;  %4298 = vmatpush1.bf16.msra.mxu1 %v9816_v31 }
 0x3e4   :  { %4258 = vmatprep.subr.bf16.mxu0 %v9825_v9  ;;  %4299 = vmatprep.subr.bf16.mxu1 %v9830_v11 }
 0x3e7   :  { %4259 = vmatpush1.bf16.msra.mxu0 %v9835_v16  ;;  %4300 = vmatpush1.bf16.msra.mxu1 %v9840_v21 }
 0x3e8   :  { %4260 = vmatprep.subr.bf16.mxu0 %v9849_v3  ;;  %4301 = vmatprep.subr.bf16.mxu1 %v9854_v22 }
 0x3eb   :  { %4261 = vmatpush1.bf16.msra.mxu0 %v9859_v23  ;;  %4302 = vmatpush1.bf16.msra.mxu1 %v9864_v25 }
 0x3ec   :  { %4262 = vmatprep.subr.bf16.mxu0 %v9873_v27  ;;  %4303 = vmatprep.subr.bf16.mxu1 %v9878_v28 }
 0x3ef   :  { %4263 = vmatpush1.bf16.msra.mxu0 %v9883_v55  ;;  %4304 = vmatpush1.bf16.msra.mxu1 %v9888_v29 }
 0x3f0   :  { %4532 = vmatprep.subr.bf16.mxu0 %v9897_v30  ;;  %4573 = vmatprep.subr.bf16.mxu1 %v9902_v32 }
 0x484   :  { %v3662_v33 = vpop.f32.mrb[56].mxu0  ;;  %v3703_v50 = vpop.f32.mrb[56].mxu1 }
 0x485   :  { %v3710_v35 = vadd.f32 %v3662_v33, %v10841_v34  ;;  %v3712_v38 = vadd.f32 %v3703_v50, %v10842_v37  ;;  %v3664_v40 = vpop.f32.mrb[57].mxu0  ;;  %v3705_v42 = vpop.f32.mrb[57].mxu1 }
 0x486   :  { %v3711_v17 = vadd.f32 %v3664_v40, %v10843_v41  ;;  %v3713_v58 = vadd.f32 %v3705_v42, %v10844_v18  ;;  %v3666_v43 = vpop.f32.mrb[58].mxu0  ;;  %v3707_v44 = vpop.f32.mrb[58].mxu1  ;;  %v10845_v42 = vld [vmem:[#allocation47_spill] sm:$0xff] }
 0x487   :  { %v6943_v26 = vmul.f32 -1.442695, %v3710_v35  ;;  %v3667_v53 = vpop.f32.mrb[59].mxu0  ;;  %v3708_v54 = vpop.f32.mrb[59].mxu1  ;;  %v10847_v43 = vld [vmem:[#allocation49_spill] sm:$0xff] }
 0x488   :  { %v6944_v56 = vmul.f32 -1.442695, %v3711_v17  ;;  %v6945_v4 = vmul.f32 -1.442695, %v3713_v58  ;;  %v10846_v17 = vld [vmem:[#allocation48_spill] sm:$0xff] }
 0x489   :  { %7783 = vpow2.f32 %v6943_v26  ;;  %v10848_v26 = vld [vmem:[#allocation50_spill] sm:$0xff] }
 0x48a   :  { %7785 = vpow2.f32 %v6944_v56 }
 0x48b   :  { %7787 = vpow2.f32 %v6945_v4 }
 0x48c   :  { %7789 = vtanh.f32 %v3712_v38 }
 0x493   :  { %v7784_v6 = vpop.eup %7783 }
 0x494   :  { %v7786_v10 = vpop.eup %7785  ;;  %v4001_v13 = vadd.f32 1.0, %v7784_v6 }
 0x495   :  { %v4007_v0 = vadd.f32 1.0, %v7786_v10  ;;  %v7788_v8 = vpop.eup %7787 }
 0x496   :  { %7791 = vrcp.f32 %v4001_v13  ;;  %v7790_v15 = vpop.eup %7789  ;;  %v4014_v50 = vadd.f32 1.0, %v7788_v8 }
 0x497   :  { %7793 = vrcp.f32 %v4007_v0 }
 0x498   :  { %7795 = vrcp.f32 %v4014_v50 }
 0x4a0   :  { %v7792_v20 = vpop.eup %7791 }
 0x4a1   :  { %v7794_v52 = vpop.eup %7793  ;;  %v4018_v33 = vmul.f32 %v7792_v20, %v7790_v15  ;;  %v9921_v20 = vld [vmem:[%s10720_s5] ss:$16 sps:$4 sm:$0xff]  }
 0x4a2   :  { %v4017_v34 = vmul.f32 %v7794_v52, %v9651_v49  ;;  %v7796_v13 = vpop.eup %7795  ;;  %v9926_v52 = vld [vmem:[%s10720_s5 + $0x8] ss:$16 sps:$4 sm:$0xff]  }
 0x4a4   :  { %v9911_v35 = vadd.f32 %v4018_v33, %v4017_v34  ;;  %v3946_v37 = vpop.f32.mrb[60].mxu0  ;;  %v3987_v40 = vpop.f32.mrb[60].mxu1  ;;  %v9934_v34 = vld [vmem:[%s10720_s5 + $0x24] ss:$16 sps:$4 sm:$0xff]  }
 0x4a5   :  { %v3994_v41 = vadd.f32 %v3946_v37, %v10845_v42  ;;  %v3996_v38 = vadd.f32 %v3987_v40, %v10846_v17  ;;  %v3948_v18 = vpop.f32.mrb[61].mxu0  ;;  %v3989_v58 = vpop.f32.mrb[61].mxu1  ;;  %v9939_v37 = vld [vmem:[%s10720_s5 + $0x2c] ss:$16 sps:$4 sm:$0xff]   ;;  %v9946_v17 = vld [vmem:[%s10720_s5 + $0x20] ss:$16 sps:$4 sm:$0xff]  }
 0x4a6   :  { %7797 = vtanh.f32 %v9911_v35  ;;  %v3995_v44 = vadd.f32 %v3948_v18, %v10847_v43  ;;  %v3997_v53 = vadd.f32 %v3989_v58, %v10848_v26  ;;  %v3950_v54 = vpop.f32.mrb[62].mxu0  ;;  %v3991_v56 = vpop.f32.mrb[62].mxu1  ;;  %v9951_v18 = vld [vmem:[%s10720_s5 + $0x28] ss:$16 sps:$4 sm:$0xff]   ;;  %v9963_v58 = vld [vmem:[%s10720_s5 + $0x4c] ss:$16 sps:$4 sm:$0xff]  }
 0x4a7   :  { %v6946_v49 = vmul.f32 -1.442695, %v3994_v41  ;;  %v3951_v4 = vpop.f32.mrb[63].mxu0  ;;  %v3992_v6 = vpop.f32.mrb[63].mxu1  ;;  %v9972_v43 = vld [vmem:[%s10720_s5 + $0x40] ss:$16 sps:$4 sm:$0xff]  }
 0x4a8   :  { %v6947_v10 = vmul.f32 -1.442695, %v3995_v44  ;;  %v6948_v8 = vmul.f32 -1.442695, %v3997_v53  ;;  %v9977_v44 = vld [vmem:[%s10720_s5 + $0x48] ss:$16 sps:$4 sm:$0xff]  }
 0x4a9   :  { %7799 = vpow2.f32 %v6946_v49  ;;  %v9984_v26 = vld [vmem:[%s10720_s5 + $0x64] ss:$16 sps:$4 sm:$0xff]   ;;  %v9989_v53 = vld [vmem:[%s10720_s5 + $0x6c] ss:$16 sps:$4 sm:$0xff]   ;;  %v9996_v56 = vld [vmem:[%s10720_s5 + $0x60] ss:$16 sps:$4 sm:$0xff]  }
 0x4aa   :  { %7801 = vpow2.f32 %v6947_v10  ;;  %v10001_v49 = vld [vmem:[%s10720_s5 + $0x68] ss:$16 sps:$4 sm:$0xff]   ;;  %v10008_v6 = vld [vmem:[%s10720_s5 + $0x84] ss:$16 sps:$4 sm:$0xff]   ;;  %v10013_v10 = vld [vmem:[%s10720_s5 + $0x8c] ss:$16 sps:$4 sm:$0xff]  }
 0x4ab   :  { %7803 = vpow2.f32 %v6948_v8 }
 0x4ac   :  { %7805 = vtanh.f32 %v3996_v38  ;;  %v9958_v38 = vld [vmem:[%s10720_s5 + $0x44] ss:$16 sps:$4 sm:$0xff]  }
 0x4b0   :  { %v7798_v0 = vpop.eup %7797 }
 0x4b1   :  { %v4021_v15 = vmul.f32 %v7798_v0, %v7796_v13 }
 0x4b3   :  { %v7800_v33 = vpop.eup %7799  ;;  %6949 = vst [vmem:[%s10722_s6 + $0x18] sm:$0xff] %v4021_v15  ;;  %v4055_v50 = vpack.c.bf16 %v4021_v15, %v4021_v15 }
 0x4b4   :  { %v7802_v40 = vpop.eup %7801  ;;  %v4025_v42 = vadd.f32 1.0, %v7800_v33 }
 0x4b5   :  { %v4031_v41 = vadd.f32 1.0, %v7802_v40  ;;  %4281 = vmatmul.mubr.bf16.vlgmr.msra.gmra.mrb[64].mxu0 %v4055_v50  ;;  %4322 = vmatmul.mubr.bf16.vlgmr.msra.gmra.mrb[64].mxu1 %v4055_v50  ;;  %v7804_v54 = vpop.eup %7803  ;;  %v10021_v50 = vld [vmem:[%s10720_s5 + $0x80] ss:$16 sps:$4 sm:$0xff]   ;;  %v10026_v40 = vld [vmem:[%s10720_s5 + $0x88] ss:$16 sps:$4 sm:$0xff]  }
 0x4b6   :  { %7807 = vrcp.f32 %v4025_v42  ;;  %4533 = vmatpush1.bf16.msra.mxu0 %v9921_v20  ;;  %4574 = vmatpush1.bf16.msra.mxu1 %v9926_v52  ;;  %v7806_v4 = vpop.eup %7805  ;;  %v4038_v15 = vadd.f32 1.0, %v7804_v54  ;;  %v10038_v42 = vld [vmem:[%s10720_s5 + $0xac] ss:$16 sps:$4 sm:$0xff]   ;;  %v10048_v54 = vld [vmem:[%s10720_s5 + $0xa0] ss:$16 sps:$4 sm:$0xff]  }
 0x4b7   :  { %7809 = vrcp.f32 %v4031_v41  ;;  %4534 = vmatprep.subr.bf16.mxu0 %v9934_v34  ;;  %4575 = vmatprep.subr.bf16.mxu1 %v9939_v37  ;;  %10850 = vst [vmem:[#allocation8_spill] sm:$0xff] %v10038_v42  ;;  %10851 = vst [vmem:[#allocation9_spill] sm:$0xff] %v10048_v54 }
 0x4b8   :  { %4564 = vmatprep.mubr.bf16.mxu0 %v10753_v36  ;;  %4605 = vmatprep.mubr.bf16.mxu1 %v10753_v36  ;;  %7811 = vrcp.f32 %v4038_v15  ;;  %v10077_v15 = vld [vmem:[%s10720_s5 + $0xc8] ss:$16 sps:$4 sm:$0xff]  }
 0x4b9   :  { %10855 = vst [vmem:[#allocation53_spill] sm:$0xff] %v10077_v15 }
 0x4ba   :  { %4535 = vmatpush1.bf16.msra.mxu0 %v9946_v17  ;;  %4576 = vmatpush1.bf16.msra.mxu1 %v9951_v18 }
 0x4bb   :  { %4536 = vmatprep.subr.bf16.mxu0 %v9958_v38  ;;  %4577 = vmatprep.subr.bf16.mxu1 %v9963_v58 }
 0x4be   :  { %4537 = vmatpush1.bf16.msra.mxu0 %v9972_v43  ;;  %4578 = vmatpush1.bf16.msra.mxu1 %v9977_v44 }
 0x4bf   :  { %4538 = vmatprep.subr.bf16.mxu0 %v9984_v26  ;;  %4579 = vmatprep.subr.bf16.mxu1 %v9989_v53 }
 0x4c0   :  { %v7808_v13 = vpop.eup %7807 }
 0x4c1   :  { %v7810_v0 = vpop.eup %7809  ;;  %v4042_v8 = vmul.f32 %v7808_v13, %v7806_v4  ;;  %v10053_v4 = vld [vmem:[%s10720_s5 + $0xa8] ss:$16 sps:$4 sm:$0xff]   ;;  %v10060_v13 = vld [vmem:[%s10720_s5 + $0xc4] ss:$16 sps:$4 sm:$0xff]  }
 0x4c2   :  { %v4041_v33 = vmul.f32 %v7810_v0, %v9680_v5  ;;  %4539 = vmatpush1.bf16.msra.mxu0 %v9996_v56  ;;  %4580 = vmatpush1.bf16.msra.mxu1 %v10001_v49  ;;  %v10033_v5 = vld [vmem:[%s10720_s5 + $0xa4] ss:$16 sps:$4 sm:$0xff]   ;;  %10852 = vst [vmem:[#allocation10_spill] sm:$0xff] %v10053_v4  ;;  %10853 = vst [vmem:[#allocation51_spill] sm:$0xff] %v10060_v13  ;;  %v10065_v0 = vld [vmem:[%s10720_s5 + $0xcc] ss:$16 sps:$4 sm:$0xff]  }
 0x4c3   :  { %4540 = vmatprep.subr.bf16.mxu0 %v10008_v6  ;;  %4581 = vmatprep.subr.bf16.mxu1 %v10013_v10  ;;  %10849 = vst [vmem:[#allocation7_spill] sm:$0xff] %v10033_v5  ;;  %10854 = vst [vmem:[#allocation52_spill] sm:$0xff] %v10065_v0 }
 0x4c4   :  { %v10040_v41 = vadd.f32 %v4042_v8, %v4041_v33  ;;  %v10072_v8 = vld [vmem:[%s10720_s5 + $0xc0] ss:$16 sps:$4 sm:$0xff]   ;;  %v10084_v33 = vld [vmem:[%s10720_s5 + $0xe4] ss:$16 sps:$4 sm:$0xff]  }
 0x4c6   :  { %7813 = vtanh.f32 %v10040_v41  ;;  %4541 = vmatpush1.bf16.msra.mxu0 %v10021_v50  ;;  %4582 = vmatpush1.bf16.msra.mxu1 %v10026_v40 }
 0x4c7   :  { %4542 = vmatprep.subr.bf16.mxu0 %v10033_v5  ;;  %4583 = vmatprep.subr.bf16.mxu1 %v10038_v42 }
 0x4ca   :  { %4543 = vmatpush1.bf16.msra.mxu0 %v10048_v54  ;;  %4584 = vmatpush1.bf16.msra.mxu1 %v10053_v4  ;;  %v10089_v4 = vld [vmem:[%s10720_s5 + $0xec] ss:$16 sps:$4 sm:$0xff]   ;;  %v7812_v54 = vpop.eup %7811 }
 0x4cb   :  { %4544 = vmatprep.subr.bf16.mxu0 %v10060_v13  ;;  %4585 = vmatprep.subr.bf16.mxu1 %v10065_v0  ;;  %v10096_v13 = vld [vmem:[%s10720_s5 + $0xe0] ss:$16 sps:$4 sm:$0xff]   ;;  %v10101_v0 = vld [vmem:[%s10720_s5 + $0xe8] ss:$16 sps:$4 sm:$0xff]  }
 0x4ce   :  { %4545 = vmatpush1.bf16.msra.mxu0 %v10072_v8  ;;  %4586 = vmatpush1.bf16.msra.mxu1 %v10077_v15 }
 0x4cf   :  { %4546 = vmatprep.subr.bf16.mxu0 %v10084_v33  ;;  %4587 = vmatprep.subr.bf16.mxu1 %v10089_v4 }
 0x4d0   :  { %v7814_v42 = vpop.eup %7813 }
 0x4d1   :  { %v4045_v5 = vmul.f32 %v7814_v42, %v7812_v54  ;;  %v10861_v42 = vld [vmem:[#allocation44_spill] sm:$0xff] }
 0x4d2   :  { %4547 = vmatpush1.bf16.msra.mxu0 %v10096_v13  ;;  %4588 = vmatpush1.bf16.msra.mxu1 %v10101_v0 }
 0x4d3   :  { %6950 = vst [vmem:[%s10723_s7 + $0x20] sm:$0xff] %v4045_v5  ;;  %v4339_v15 = vpack.c.bf16 %v4045_v5, %v4045_v5  ;;  %4868 = vmatprep.subr.bf16.mxu0 %v9705_v45  ;;  %4909 = vmatprep.subr.bf16.mxu1 %v9710_v14 }
 0x4d5   :  { %4565 = vmatmul.mubr.bf16.vlgmr.msra.gmra.mrb[68].mxu0 %v4339_v15  ;;  %4606 = vmatmul.mubr.bf16.vlgmr.msra.gmra.mrb[68].mxu1 %v4339_v15 }
 0x4d6   :  { %4869 = vmatpush1.bf16.msra.mxu0 %v9715_v57  ;;  %4910 = vmatpush1.bf16.msra.mxu1 %v9720_v46  ;;  %v10856_v57 = vld [vmem:[#allocation15_spill] sm:$0xff] }
 0x4d7   :  { %4870 = vmatprep.subr.bf16.mxu0 %v9729_v59  ;;  %4911 = vmatprep.subr.bf16.mxu1 %v9734_v19  ;;  %v10857_v59 = vld [vmem:[#allocation16_spill] sm:$0xff] }
 0x4d8   :  { %4900 = vmatprep.mubr.bf16.mxu0 %v10753_v36  ;;  %4941 = vmatprep.mubr.bf16.mxu1 %v10753_v36 }
 0x4da   :  { %4871 = vmatpush1.bf16.msra.mxu0 %v9739_v63  ;;  %4912 = vmatpush1.bf16.msra.mxu1 %v9744_v61 }
 0x4db   :  { %4872 = vmatprep.subr.bf16.mxu0 %v9753_v39  ;;  %4913 = vmatprep.subr.bf16.mxu1 %v9758_v47  ;;  %v10858_v39 = vld [vmem:[#allocation17_spill] sm:$0xff] }
 0x4de   :  { %4873 = vmatpush1.bf16.msra.mxu0 %v9763_v2  ;;  %4914 = vmatpush1.bf16.msra.mxu1 %v9768_v60  ;;  %v10859_v2 = vld [vmem:[#allocation18_spill] sm:$0xff] }
 0x4df   :  { %4874 = vmatprep.subr.bf16.mxu0 %v9777_v62  ;;  %4915 = vmatprep.subr.bf16.mxu1 %v9782_v7 }
 0x4e2   :  { %4875 = vmatpush1.bf16.msra.mxu0 %v9787_v1  ;;  %4916 = vmatpush1.bf16.msra.mxu1 %v9792_v48 }
 0x4e3   :  { %4876 = vmatprep.subr.bf16.mxu0 %v9801_v51  ;;  %4917 = vmatprep.subr.bf16.mxu1 %v9806_v24 }
 0x4e6   :  { %4877 = vmatpush1.bf16.msra.mxu0 %v9811_v12  ;;  %4918 = vmatpush1.bf16.msra.mxu1 %v9816_v31 }
 0x4e7   :  { %4878 = vmatprep.subr.bf16.mxu0 %v9825_v9  ;;  %4919 = vmatprep.subr.bf16.mxu1 %v9830_v11 }
 0x4ea   :  { %4879 = vmatpush1.bf16.msra.mxu0 %v9835_v16  ;;  %4920 = vmatpush1.bf16.msra.mxu1 %v9840_v21 }
 0x4eb   :  { %4880 = vmatprep.subr.bf16.mxu0 %v9849_v3  ;;  %4921 = vmatprep.subr.bf16.mxu1 %v9854_v22 }
 0x4ee   :  { %4881 = vmatpush1.bf16.msra.mxu0 %v9859_v23  ;;  %4922 = vmatpush1.bf16.msra.mxu1 %v9864_v25 }
 0x4ef   :  { %4882 = vmatprep.subr.bf16.mxu0 %v9873_v27  ;;  %4923 = vmatprep.subr.bf16.mxu1 %v9878_v28 }
 0x4f2   :  { %4883 = vmatpush1.bf16.msra.mxu0 %v9883_v55  ;;  %4924 = vmatpush1.bf16.msra.mxu1 %v9888_v29 }
 0x4f3   :  { %5152 = vmatprep.subr.bf16.mxu0 %v9897_v30  ;;  %5193 = vmatprep.subr.bf16.mxu1 %v9902_v32  ;;  %v10860_v32 = vld [vmem:[#allocation43_spill] sm:$0xff] }
 0x588   :  { %v4282_v45 = vpop.f32.mrb[64].mxu0  ;;  %v4323_v14 = vpop.f32.mrb[64].mxu1 }
 0x589   :  { %v4330_v46 = vadd.f32 %v4282_v45, %v10856_v57  ;;  %v4332_v19 = vadd.f32 %v4323_v14, %v10857_v59  ;;  %v4284_v63 = vpop.f32.mrb[65].mxu0  ;;  %v4325_v61 = vpop.f32.mrb[65].mxu1  ;;  %v10862_v14 = vld [vmem:[#allocation45_spill] sm:$0xff] }
 0x58a   :  { %v4331_v47 = vadd.f32 %v4284_v63, %v10858_v39  ;;  %v4333_v60 = vadd.f32 %v4325_v61, %v10859_v2  ;;  %v4286_v62 = vpop.f32.mrb[66].mxu0  ;;  %v4327_v7 = vpop.f32.mrb[66].mxu1 }
 0x58b   :  { %v7015_v1 = vmul.f32 -1.442695, %v4330_v46  ;;  %v4287_v48 = vpop.f32.mrb[67].mxu0  ;;  %v4328_v51 = vpop.f32.mrb[67].mxu1  ;;  %v10863_v46 = vld [vmem:[#allocation46_spill] sm:$0xff] }
 0x58c   :  { %v7016_v24 = vmul.f32 -1.442695, %v4331_v47  ;;  %v7017_v12 = vmul.f32 -1.442695, %v4333_v60 }
 0x58d   :  { %7815 = vpow2.f32 %v7015_v1 }
 0x58e   :  { %7817 = vpow2.f32 %v7016_v24 }
 0x58f   :  { %7819 = vpow2.f32 %v7017_v12 }
 0x590   :  { %7821 = vtanh.f32 %v4332_v19 }
 0x597   :  { %v7816_v31 = vpop.eup %7815 }
 0x598   :  { %v7818_v9 = vpop.eup %7817  ;;  %v4621_v11 = vadd.f32 1.0, %v7816_v31 }
 0x599   :  { %v4627_v16 = vadd.f32 1.0, %v7818_v9  ;;  %v7820_v21 = vpop.eup %7819  ;;  %v10239_v9 = vld [vmem:[%s10718_s4 + $0x20] ss:$16 sps:$4 sm:$0xff]  }
 0x59a   :  { %7823 = vrcp.f32 %v4621_v11  ;;  %v7822_v3 = vpop.eup %7821  ;;  %v4634_v27 = vadd.f32 1.0, %v7820_v21  ;;  %v10244_v11 = vld [vmem:[%s10718_s4 + $0x28] ss:$16 sps:$4 sm:$0xff]   ;;  %v10258_v21 = vld [vmem:[%s10718_s4 + $0x4c] ss:$16 sps:$4 sm:$0xff]  }
 0x59b   :  { %7825 = vrcp.f32 %v4627_v16  ;;  %v10253_v16 = vld [vmem:[%s10718_s4 + $0x44] ss:$16 sps:$4 sm:$0xff]  }
 0x59c   :  { %7827 = vrcp.f32 %v4634_v27  ;;  %v10287_v27 = vld [vmem:[%s10718_s4 + $0x60] ss:$16 sps:$4 sm:$0xff]  }
 0x5a4   :  { %v7824_v22 = vpop.eup %7823 }
 0x5a5   :  { %v7826_v23 = vpop.eup %7825  ;;  %v4638_v25 = vmul.f32 %v7824_v22, %v7822_v3  ;;  %v10263_v3 = vld [vmem:[%s10718_s4 + $0x40] ss:$16 sps:$4 sm:$0xff]   ;;  %v10268_v22 = vld [vmem:[%s10718_s4 + $0x48] ss:$16 sps:$4 sm:$0xff]  }
 0x5a6   :  { %v4637_v28 = vmul.f32 %v7826_v23, %v9911_v35  ;;  %v7828_v2 = vpop.eup %7827  ;;  %v10277_v23 = vld [vmem:[%s10718_s4 + $0x64] ss:$16 sps:$4 sm:$0xff]  }
 0x5a8   :  { %v10151_v55 = vadd.f32 %v4638_v25, %v4637_v28  ;;  %v4566_v29 = vpop.f32.mrb[68].mxu0  ;;  %v4607_v30 = vpop.f32.mrb[68].mxu1  ;;  %v10282_v25 = vld [vmem:[%s10718_s4 + $0x6c] ss:$16 sps:$4 sm:$0xff]   ;;  %v10292_v28 = vld [vmem:[%s10718_s4 + $0x68] ss:$16 sps:$4 sm:$0xff]  }
 0x5a9   :  { %v4614_v5 = vadd.f32 %v4566_v29, %v10860_v32  ;;  %v4616_v54 = vadd.f32 %v4607_v30, %v10861_v42  ;;  %v4568_v15 = vpop.f32.mrb[69].mxu0  ;;  %v4609_v45 = vpop.f32.mrb[69].mxu1  ;;  %v10301_v29 = vld [vmem:[%s10718_s4 + $0x84] ss:$16 sps:$4 sm:$0xff]   ;;  %v10306_v30 = vld [vmem:[%s10718_s4 + $0x8c] ss:$16 sps:$4 sm:$0xff]  }
 0x5aa   :  { %7829 = vtanh.f32 %v10151_v55  ;;  %v4615_v57 = vadd.f32 %v4568_v15, %v10862_v14  ;;  %v4617_v59 = vadd.f32 %v4609_v45, %v10863_v46  ;;  %v4570_v19 = vpop.f32.mrb[70].mxu0  ;;  %v4611_v63 = vpop.f32.mrb[70].mxu1  ;;  %v10311_v32 = vld [vmem:[%s10718_s4 + $0x80] ss:$16 sps:$4 sm:$0xff]   ;;  %v10325_v42 = vld [vmem:[%s10718_s4 + $0xa4] ss:$16 sps:$4 sm:$0xff]  }
 0x5ab   :  { %v7018_v35 = vmul.f32 -1.442695, %v4614_v5  ;;  %v4571_v61 = vpop.f32.mrb[71].mxu0  ;;  %v4612_v39 = vpop.f32.mrb[71].mxu1  ;;  %v10316_v5 = vld [vmem:[%s10718_s4 + $0x88] ss:$16 sps:$4 sm:$0xff]  }
 0x5ac   :  { %v7019_v47 = vmul.f32 -1.442695, %v4615_v57  ;;  %v7020_v62 = vmul.f32 -1.442695, %v4617_v59  ;;  %v10335_v15 = vld [vmem:[%s10718_s4 + $0xa0] ss:$16 sps:$4 sm:$0xff]  }
 0x5ad   :  { %7831 = vpow2.f32 %v7018_v35  ;;  %v10340_v45 = vld [vmem:[%s10718_s4 + $0xa8] ss:$16 sps:$4 sm:$0xff]   ;;  %v10349_v14 = vld [vmem:[%s10718_s4 + $0xc4] ss:$16 sps:$4 sm:$0xff]   ;;  %v10354_v57 = vld [vmem:[%s10718_s4 + $0xcc] ss:$16 sps:$4 sm:$0xff]  }
 0x5ae   :  { %7833 = vpow2.f32 %v7019_v47  ;;  %v10359_v46 = vld [vmem:[%s10718_s4 + $0xc0] ss:$16 sps:$4 sm:$0xff]   ;;  %v10364_v59 = vld [vmem:[%s10718_s4 + $0xc8] ss:$16 sps:$4 sm:$0xff]   ;;  %v10373_v19 = vld [vmem:[%s10718_s4 + $0xe4] ss:$16 sps:$4 sm:$0xff]  }
 0x5af   :  { %7835 = vpow2.f32 %v7020_v62  ;;  %v10378_v63 = vld [vmem:[%s10718_s4 + $0xec] ss:$16 sps:$4 sm:$0xff]   ;;  %v10383_v35 = vld [vmem:[%s10718_s4 + $0xe0] ss:$16 sps:$4 sm:$0xff]   ;;  %v10388_v61 = vld [vmem:[%s10718_s4 + $0xe8] ss:$16 sps:$4 sm:$0xff]  }
 0x5b0   :  { %7837 = vtanh.f32 %v4616_v54  ;;  %v10330_v54 = vld [vmem:[%s10718_s4 + $0xac] ss:$16 sps:$4 sm:$0xff]   ;;  %v10397_v39 = vld [vmem:[%s10720_s5 + $0x4] ss:$16 sps:$4 sm:$0xff]  }
 0x5b1   :  { %v10402_v47 = vld [vmem:[%s10720_s5 + $0xc] ss:$16 sps:$4 sm:$0xff]  }
 0x5b2   :  { %v10871_v62 = vld [vmem:[#allocation19_spill] sm:$0xff] }
 0x5b4   :  { %v7830_v60 = vpop.eup %7829 }
 0x5b5   :  { %v4641_v7 = vmul.f32 %v7830_v60, %v7828_v2 }
 0x5b7   :  { %v7832_v1 = vpop.eup %7831  ;;  %7021 = vst [vmem:[%s10722_s6 + $0x20] sm:$0xff] %v4641_v7  ;;  %v4675_v48 = vpack.c.bf16 %v4641_v7, %v4641_v7 }
 0x5b8   :  { %v7834_v51 = vpop.eup %7833  ;;  %v4645_v24 = vadd.f32 1.0, %v7832_v1  ;;  %v10872_v1 = vld [vmem:[#allocation20_spill] sm:$0xff] }
 0x5b9   :  { %v4651_v12 = vadd.f32 1.0, %v7834_v51  ;;  %4901 = vmatmul.mubr.bf16.vlgmr.msra.gmra.mrb[72].mxu0 %v4675_v48  ;;  %4942 = vmatmul.mubr.bf16.vlgmr.msra.gmra.mrb[72].mxu1 %v4675_v48 }
 0x5ba   :  { %7839 = vrcp.f32 %v4645_v24  ;;  %5153 = vmatpush1.bf16.msra.mxu0 %v9921_v20  ;;  %5194 = vmatpush1.bf16.msra.mxu1 %v9926_v52  ;;  %v7836_v20 = vpop.eup %7835 }
 0x5bb   :  { %7841 = vrcp.f32 %v4651_v12  ;;  %5154 = vmatprep.subr.bf16.mxu0 %v9934_v34  ;;  %5195 = vmatprep.subr.bf16.mxu1 %v9939_v37  ;;  %v7838_v52 = vpop.eup %7837  ;;  %v10873_v12 = vld [vmem:[#allocation21_spill] sm:$0xff] }
 0x5bc   :  { %5184 = vmatprep.mubr.bf16.mxu0 %v10753_v36  ;;  %5225 = vmatprep.mubr.bf16.mxu1 %v10753_v36 }
 0x5be   :  { %5155 = vmatpush1.bf16.msra.mxu0 %v9946_v17  ;;  %5196 = vmatpush1.bf16.msra.mxu1 %v9951_v18  ;;  %v4658_v17 = vadd.f32 1.0, %v7836_v20 }
 0x5bf   :  { %5156 = vmatprep.subr.bf16.mxu0 %v9958_v38  ;;  %5197 = vmatprep.subr.bf16.mxu1 %v9963_v58  ;;  %v10864_v58 = vld [vmem:[#allocation7_spill] sm:$0xff] }
 0x5c0   :  { %7843 = vrcp.f32 %v4658_v17 }
 0x5c2   :  { %5157 = vmatpush1.bf16.msra.mxu0 %v9972_v43  ;;  %5198 = vmatpush1.bf16.msra.mxu1 %v9977_v44  ;;  %v10865_v43 = vld [vmem:[#allocation8_spill] sm:$0xff]  ;;  %v10866_v44 = vld [vmem:[#allocation9_spill] sm:$0xff] }
 0x5c3   :  { %5158 = vmatprep.subr.bf16.mxu0 %v9984_v26  ;;  %5199 = vmatprep.subr.bf16.mxu1 %v9989_v53  ;;  %v10867_v26 = vld [vmem:[#allocation10_spill] sm:$0xff]  ;;  %v10868_v53 = vld [vmem:[#allocation51_spill] sm:$0xff] }
 0x5c4   :  { %v7840_v34 = vpop.eup %7839 }
 0x5c5   :  { %v7842_v37 = vpop.eup %7841  ;;  %v4662_v31 = vmul.f32 %v7840_v34, %v7838_v52  ;;  %v10874_v52 = vld [vmem:[#allocation22_spill] sm:$0xff] }
 0x5c6   :  { %v4661_v18 = vmul.f32 %v7842_v37, %v10040_v41  ;;  %5159 = vmatpush1.bf16.msra.mxu0 %v9996_v56  ;;  %5200 = vmatpush1.bf16.msra.mxu1 %v10001_v49  ;;  %v10869_v56 = vld [vmem:[#allocation52_spill] sm:$0xff]  ;;  %v10870_v49 = vld [vmem:[#allocation53_spill] sm:$0xff] }
 0x5c7   :  { %5160 = vmatprep.subr.bf16.mxu0 %v10008_v6  ;;  %5201 = vmatprep.subr.bf16.mxu1 %v10013_v10  ;;  %v10205_v41 = vld [vmem:[%s10718_s4 + $0x4] ss:$16 sps:$4 sm:$0xff]  }
 0x5c8   :  { %v10180_v38 = vadd.f32 %v4662_v31, %v4661_v18 }
 0x5ca   :  { %7845 = vtanh.f32 %v10180_v38  ;;  %5161 = vmatpush1.bf16.msra.mxu0 %v10021_v50  ;;  %5202 = vmatpush1.bf16.msra.mxu1 %v10026_v40  ;;  %v7844_v6 = vpop.eup %7843 }
 0x5cb   :  { %5162 = vmatprep.subr.bf16.mxu0 %v10864_v58  ;;  %5203 = vmatprep.subr.bf16.mxu1 %v10865_v43 }
 0x5ce   :  { %5163 = vmatpush1.bf16.msra.mxu0 %v10866_v44  ;;  %5204 = vmatpush1.bf16.msra.mxu1 %v10867_v26 }
 0x5cf   :  { %5164 = vmatprep.subr.bf16.mxu0 %v10868_v53  ;;  %5205 = vmatprep.subr.bf16.mxu1 %v10869_v56 }
 0x5d2   :  { %5165 = vmatpush1.bf16.msra.mxu0 %v10072_v8  ;;  %5206 = vmatpush1.bf16.msra.mxu1 %v10870_v49  ;;  %v10229_v8 = vld [vmem:[%s10718_s4 + $0x24] ss:$16 sps:$4 sm:$0xff]  }
 0x5d3   :  { %5166 = vmatprep.subr.bf16.mxu0 %v10084_v33  ;;  %5207 = vmatprep.subr.bf16.mxu1 %v10089_v4  ;;  %v10210_v4 = vld [vmem:[%s10718_s4 + $0xc] ss:$16 sps:$4 sm:$0xff]  }
 0x5d4   :  { %v7846_v10 = vpop.eup %7845  ;;  %v10234_v33 = vld [vmem:[%s10718_s4 + $0x2c] ss:$16 sps:$4 sm:$0xff]  }
 0x5d5   :  { %v4665_v50 = vmul.f32 %v7846_v10, %v7844_v6 }
 0x5d6   :  { %5167 = vmatpush1.bf16.msra.mxu0 %v10096_v13  ;;  %5208 = vmatpush1.bf16.msra.mxu1 %v10101_v0  ;;  %v10215_v13 = vld [vmem:[%s10718_s4] ss:$16 sps:$4 sm:$0xff]   ;;  %v10220_v0 = vld [vmem:[%s10718_s4 + $0x8] ss:$16 sps:$4 sm:$0xff]  }
 0x5d7   :  { %7022 = vst [vmem:[%s10723_s7 + $0x18] sm:$0xff] %v4665_v50  ;;  %v4959_v40 = vpack.c.bf16 %v4665_v50, %v4665_v50  ;;  %5488 = vmatprep.subr.bf16.mxu0 %v10205_v41  ;;  %5529 = vmatprep.subr.bf16.mxu1 %v10210_v4 }
 0x5d9   :  { %5185 = vmatmul.mubr.bf16.vlgmr.msra.gmra.mrb[76].mxu0 %v4959_v40  ;;  %5226 = vmatmul.mubr.bf16.vlgmr.msra.gmra.mrb[76].mxu1 %v4959_v40 }
 0x5da   :  { %5520 = vmatprep.mubr.bf16.mxu0 %v10753_v36  ;;  %5561 = vmatprep.mubr.bf16.mxu1 %v10753_v36 }
 0x5db   :  { %5489 = vmatpush1.bf16.msra.mxu0 %v10215_v13  ;;  %5530 = vmatpush1.bf16.msra.mxu1 %v10220_v0 }
 0x5dc   :  { %5490 = vmatprep.subr.bf16.mxu0 %v10229_v8  ;;  %5531 = vmatprep.subr.bf16.mxu1 %v10234_v33 }
 0x5df   :  { %5491 = vmatpush1.bf16.msra.mxu0 %v10239_v9  ;;  %5532 = vmatpush1.bf16.msra.mxu1 %v10244_v11 }
 0x5e0   :  { %5492 = vmatprep.subr.bf16.mxu0 %v10253_v16  ;;  %5533 = vmatprep.subr.bf16.mxu1 %v10258_v21 }
 0x5e3   :  { %5493 = vmatpush1.bf16.msra.mxu0 %v10263_v3  ;;  %5534 = vmatpush1.bf16.msra.mxu1 %v10268_v22 }
 0x5e4   :  { %5494 = vmatprep.subr.bf16.mxu0 %v10277_v23  ;;  %5535 = vmatprep.subr.bf16.mxu1 %v10282_v25 }
 0x5e7   :  { %5495 = vmatpush1.bf16.msra.mxu0 %v10287_v27  ;;  %5536 = vmatpush1.bf16.msra.mxu1 %v10292_v28 }
 0x5e8   :  { %5496 = vmatprep.subr.bf16.mxu0 %v10301_v29  ;;  %5537 = vmatprep.subr.bf16.mxu1 %v10306_v30 }
 0x5eb   :  { %5497 = vmatpush1.bf16.msra.mxu0 %v10311_v32  ;;  %5538 = vmatpush1.bf16.msra.mxu1 %v10316_v5 }
 0x5ec   :  { %5498 = vmatprep.subr.bf16.mxu0 %v10325_v42  ;;  %5539 = vmatprep.subr.bf16.mxu1 %v10330_v54 }
 0x5ef   :  { %5499 = vmatpush1.bf16.msra.mxu0 %v10335_v15  ;;  %5540 = vmatpush1.bf16.msra.mxu1 %v10340_v45 }
 0x5f0   :  { %5500 = vmatprep.subr.bf16.mxu0 %v10349_v14  ;;  %5541 = vmatprep.subr.bf16.mxu1 %v10354_v57 }
 0x5f3   :  { %5501 = vmatpush1.bf16.msra.mxu0 %v10359_v46  ;;  %5542 = vmatpush1.bf16.msra.mxu1 %v10364_v59 }
 0x5f4   :  { %5502 = vmatprep.subr.bf16.mxu0 %v10373_v19  ;;  %5543 = vmatprep.subr.bf16.mxu1 %v10378_v63 }
 0x5f7   :  { %5503 = vmatpush1.bf16.msra.mxu0 %v10383_v35  ;;  %5544 = vmatpush1.bf16.msra.mxu1 %v10388_v61 }
 0x5f8   :  { %5772 = vmatprep.subr.bf16.mxu0 %v10397_v39  ;;  %5813 = vmatprep.subr.bf16.mxu1 %v10402_v47 }
 0x68c   :  { %v4902_v2 = vpop.f32.mrb[72].mxu0  ;;  %v4943_v60 = vpop.f32.mrb[72].mxu1 }
 0x68d   :  { %v4950_v7 = vadd.f32 %v4902_v2, %v10871_v62  ;;  %v4952_v48 = vadd.f32 %v4943_v60, %v10872_v1  ;;  %v4904_v51 = vpop.f32.mrb[73].mxu0  ;;  %v4945_v24 = vpop.f32.mrb[73].mxu1 }
 0x68e   :  { %v4951_v20 = vadd.f32 %v4904_v51, %v10873_v12  ;;  %v4953_v34 = vadd.f32 %v4945_v24, %v10874_v52  ;;  %v4906_v37 = vpop.f32.mrb[74].mxu0  ;;  %v4947_v31 = vpop.f32.mrb[74].mxu1  ;;  %v10875_v24 = vld [vmem:[#allocation39_spill] sm:$0xff] }
 0x68f   :  { %v7087_v17 = vmul.f32 -1.442695, %v4950_v7  ;;  %v4907_v18 = vpop.f32.mrb[75].mxu0  ;;  %v4948_v58 = vpop.f32.mrb[75].mxu1  ;;  %v10877_v37 = vld [vmem:[#allocation41_spill] sm:$0xff] }
 0x690   :  { %v7088_v43 = vmul.f32 -1.442695, %v4951_v20  ;;  %v7089_v44 = vmul.f32 -1.442695, %v4953_v34  ;;  %v10876_v20 = vld [vmem:[#allocation40_spill] sm:$0xff] }
 0x691   :  { %7847 = vpow2.f32 %v7087_v17  ;;  %v10878_v17 = vld [vmem:[#allocation42_spill] sm:$0xff] }
 0x692   :  { %7849 = vpow2.f32 %v7088_v43 }
 0x693   :  { %7851 = vpow2.f32 %v7089_v44 }
 0x694   :  { %7853 = vtanh.f32 %v4952_v48 }
 0x69b   :  { %v7848_v26 = vpop.eup %7847 }
 0x69c   :  { %v7850_v53 = vpop.eup %7849  ;;  %v5241_v56 = vadd.f32 1.0, %v7848_v26 }
 0x69d   :  { %v5247_v49 = vadd.f32 1.0, %v7850_v53  ;;  %v7852_v6 = vpop.eup %7851 }
 0x69e   :  { %7855 = vrcp.f32 %v5241_v56  ;;  %v7854_v10 = vpop.eup %7853  ;;  %v5254_v60 = vadd.f32 1.0, %v7852_v6 }
 0x69f   :  { %7857 = vrcp.f32 %v5247_v49 }
 0x6a0   :  { %7859 = vrcp.f32 %v5254_v60 }
 0x6a8   :  { %v7856_v50 = vpop.eup %7855 }
 0x6a9   :  { %v7858_v40 = vpop.eup %7857  ;;  %v5258_v2 = vmul.f32 %v7856_v50, %v7854_v10  ;;  %v10421_v50 = vld [vmem:[%s10720_s5] ss:$16 sps:$4 sm:$0xff]  }
 0x6aa   :  { %v5257_v62 = vmul.f32 %v7858_v40, %v10151_v55  ;;  %v7860_v56 = vpop.eup %7859  ;;  %v10426_v40 = vld [vmem:[%s10720_s5 + $0x8] ss:$16 sps:$4 sm:$0xff]  }
 0x6ac   :  { %v10411_v7 = vadd.f32 %v5258_v2, %v5257_v62  ;;  %v5186_v1 = vpop.f32.mrb[76].mxu0  ;;  %v5227_v51 = vpop.f32.mrb[76].mxu1  ;;  %v10434_v62 = vld [vmem:[%s10720_s5 + $0x24] ss:$16 sps:$4 sm:$0xff]  }
 0x6ad   :  { %v5234_v12 = vadd.f32 %v5186_v1, %v10875_v24  ;;  %v5236_v48 = vadd.f32 %v5227_v51, %v10876_v20  ;;  %v5188_v52 = vpop.f32.mrb[77].mxu0  ;;  %v5229_v34 = vpop.f32.mrb[77].mxu1  ;;  %v10439_v1 = vld [vmem:[%s10720_s5 + $0x2c] ss:$16 sps:$4 sm:$0xff]   ;;  %v10446_v20 = vld [vmem:[%s10720_s5 + $0x20] ss:$16 sps:$4 sm:$0xff]  }
 0x6ae   :  { %7861 = vtanh.f32 %v10411_v7  ;;  %v5235_v31 = vadd.f32 %v5188_v52, %v10877_v37  ;;  %v5237_v18 = vadd.f32 %v5229_v34, %v10878_v17  ;;  %v5190_v58 = vpop.f32.mrb[78].mxu0  ;;  %v5231_v43 = vpop.f32.mrb[78].mxu1  ;;  %v10451_v52 = vld [vmem:[%s10720_s5 + $0x28] ss:$16 sps:$4 sm:$0xff]   ;;  %v10463_v34 = vld [vmem:[%s10720_s5 + $0x4c] ss:$16 sps:$4 sm:$0xff]  }
 0x6af   :  { %v7090_v55 = vmul.f32 -1.442695, %v5234_v12  ;;  %v5191_v44 = vpop.f32.mrb[79].mxu0  ;;  %v5232_v26 = vpop.f32.mrb[79].mxu1  ;;  %v10472_v37 = vld [vmem:[%s10720_s5 + $0x40] ss:$16 sps:$4 sm:$0xff]  }
 0x6b0   :  { %v7091_v53 = vmul.f32 -1.442695, %v5235_v31  ;;  %v7092_v6 = vmul.f32 -1.442695, %v5237_v18  ;;  %v10477_v31 = vld [vmem:[%s10720_s5 + $0x48] ss:$16 sps:$4 sm:$0xff]  }
 0x6b1   :  { %7863 = vpow2.f32 %v7090_v55  ;;  %v10484_v17 = vld [vmem:[%s10720_s5 + $0x64] ss:$16 sps:$4 sm:$0xff]   ;;  %v10489_v18 = vld [vmem:[%s10720_s5 + $0x6c] ss:$16 sps:$4 sm:$0xff]   ;;  %v10496_v43 = vld [vmem:[%s10720_s5 + $0x60] ss:$16 sps:$4 sm:$0xff]  }
 0x6b2   :  { %7865 = vpow2.f32 %v7091_v53  ;;  %v10501_v55 = vld [vmem:[%s10720_s5 + $0x68] ss:$16 sps:$4 sm:$0xff]   ;;  %v10508_v26 = vld [vmem:[%s10720_s5 + $0x84] ss:$16 sps:$4 sm:$0xff]   ;;  %v10513_v53 = vld [vmem:[%s10720_s5 + $0x8c] ss:$16 sps:$4 sm:$0xff]  }
 0x6b3   :  { %7867 = vpow2.f32 %v7092_v6 }
 0x6b4   :  { %7869 = vtanh.f32 %v5236_v48  ;;  %v10458_v48 = vld [vmem:[%s10720_s5 + $0x44] ss:$16 sps:$4 sm:$0xff]  }
 0x6b8   :  { %v7862_v49 = vpop.eup %7861 }
 0x6b9   :  { %v5261_v10 = vmul.f32 %v7862_v49, %v7860_v56 }
 0x6bb   :  { %v7864_v2 = vpop.eup %7863  ;;  %7093 = vst [vmem:[%s10722_s6 + $0x28] sm:$0xff] %v5261_v10  ;;  %v5295_v60 = vpack.c.bf16 %v5261_v10, %v5261_v10 }
 0x6bc   :  { %v7866_v51 = vpop.eup %7865  ;;  %v5265_v24 = vadd.f32 1.0, %v7864_v2 }
 0x6bd   :  { %v5271_v12 = vadd.f32 1.0, %v7866_v51  ;;  %5521 = vmatmul.mubr.bf16.vlgmr.msra.gmra.mrb[80].mxu0 %v5295_v60  ;;  %5562 = vmatmul.mubr.bf16.vlgmr.msra.gmra.mrb[80].mxu1 %v5295_v60  ;;  %v7868_v58 = vpop.eup %7867  ;;  %v10521_v60 = vld [vmem:[%s10720_s5 + $0x80] ss:$16 sps:$4 sm:$0xff]   ;;  %v10526_v51 = vld [vmem:[%s10720_s5 + $0x88] ss:$16 sps:$4 sm:$0xff]  }
 0x6be   :  { %7871 = vrcp.f32 %v5265_v24  ;;  %5773 = vmatpush1.bf16.msra.mxu0 %v10421_v50  ;;  %5814 = vmatpush1.bf16.msra.mxu1 %v10426_v40  ;;  %v7870_v44 = vpop.eup %7869  ;;  %v5278_v10 = vadd.f32 1.0, %v7868_v58  ;;  %v10538_v24 = vld [vmem:[%s10720_s5 + $0xac] ss:$16 sps:$4 sm:$0xff]   ;;  %v10548_v58 = vld [vmem:[%s10720_s5 + $0xa0] ss:$16 sps:$4 sm:$0xff]  }
 0x6bf   :  { %7873 = vrcp.f32 %v5271_v12  ;;  %5774 = vmatprep.subr.bf16.mxu0 %v10434_v62  ;;  %5815 = vmatprep.subr.bf16.mxu1 %v10439_v1  ;;  %10880 = vst [vmem:[#allocation4_spill] sm:$0xff] %v10538_v24  ;;  %10881 = vst [vmem:[#allocation5_spill] sm:$0xff] %v10548_v58 }
 0x6c0   :  { %5804 = vmatprep.mubr.bf16.mxu0 %v10753_v36  ;;  %5845 = vmatprep.mubr.bf16.mxu1 %v10753_v36  ;;  %7875 = vrcp.f32 %v5278_v10  ;;  %v10577_v10 = vld [vmem:[%s10720_s5 + $0xc8] ss:$16 sps:$4 sm:$0xff]  }
 0x6c1   :  { %10885 = vst [vmem:[#allocation57_spill] sm:$0xff] %v10577_v10 }
 0x6c2   :  { %5775 = vmatpush1.bf16.msra.mxu0 %v10446_v20  ;;  %5816 = vmatpush1.bf16.msra.mxu1 %v10451_v52 }
 0x6c3   :  { %5776 = vmatprep.subr.bf16.mxu0 %v10458_v48  ;;  %5817 = vmatprep.subr.bf16.mxu1 %v10463_v34 }
 0x6c6   :  { %5777 = vmatpush1.bf16.msra.mxu0 %v10472_v37  ;;  %5818 = vmatpush1.bf16.msra.mxu1 %v10477_v31 }
 0x6c7   :  { %5778 = vmatprep.subr.bf16.mxu0 %v10484_v17  ;;  %5819 = vmatprep.subr.bf16.mxu1 %v10489_v18 }
 0x6c8   :  { %v7872_v56 = vpop.eup %7871 }
 0x6c9   :  { %v7874_v49 = vpop.eup %7873  ;;  %v5282_v6 = vmul.f32 %v7872_v56, %v7870_v44  ;;  %v10553_v44 = vld [vmem:[%s10720_s5 + $0xa8] ss:$16 sps:$4 sm:$0xff]   ;;  %v10560_v56 = vld [vmem:[%s10720_s5 + $0xc4] ss:$16 sps:$4 sm:$0xff]  }
 0x6ca   :  { %v5281_v2 = vmul.f32 %v7874_v49, %v10180_v38  ;;  %5779 = vmatpush1.bf16.msra.mxu0 %v10496_v43  ;;  %5820 = vmatpush1.bf16.msra.mxu1 %v10501_v55  ;;  %v10533_v38 = vld [vmem:[%s10720_s5 + $0xa4] ss:$16 sps:$4 sm:$0xff]   ;;  %10882 = vst [vmem:[#allocation6_spill] sm:$0xff] %v10553_v44  ;;  %10883 = vst [vmem:[#allocation55_spill] sm:$0xff] %v10560_v56  ;;  %v10565_v49 = vld [vmem:[%s10720_s5 + $0xcc] ss:$16 sps:$4 sm:$0xff]  }
 0x6cb   :  { %5780 = vmatprep.subr.bf16.mxu0 %v10508_v26  ;;  %5821 = vmatprep.subr.bf16.mxu1 %v10513_v53  ;;  %10879 = vst [vmem:[#allocation54_spill] sm:$0xff] %v10533_v38  ;;  %10884 = vst [vmem:[#allocation56_spill] sm:$0xff] %v10565_v49 }
 0x6cc   :  { %v10540_v12 = vadd.f32 %v5282_v6, %v5281_v2  ;;  %v10572_v6 = vld [vmem:[%s10720_s5 + $0xc0] ss:$16 sps:$4 sm:$0xff]   ;;  %v10584_v2 = vld [vmem:[%s10720_s5 + $0xe4] ss:$16 sps:$4 sm:$0xff]  }
 0x6ce   :  { %7877 = vtanh.f32 %v10540_v12  ;;  %5781 = vmatpush1.bf16.msra.mxu0 %v10521_v60  ;;  %5822 = vmatpush1.bf16.msra.mxu1 %v10526_v51 }
 0x6cf   :  { %5782 = vmatprep.subr.bf16.mxu0 %v10533_v38  ;;  %5823 = vmatprep.subr.bf16.mxu1 %v10538_v24 }
 0x6d2   :  { %5783 = vmatpush1.bf16.msra.mxu0 %v10548_v58  ;;  %5824 = vmatpush1.bf16.msra.mxu1 %v10553_v44  ;;  %v10589_v44 = vld [vmem:[%s10720_s5 + $0xec] ss:$16 sps:$4 sm:$0xff]   ;;  %v7876_v58 = vpop.eup %7875 }
 0x6d3   :  { %5784 = vmatprep.subr.bf16.mxu0 %v10560_v56  ;;  %5825 = vmatprep.subr.bf16.mxu1 %v10565_v49  ;;  %v10596_v56 = vld [vmem:[%s10720_s5 + $0xe0] ss:$16 sps:$4 sm:$0xff]   ;;  %v10601_v49 = vld [vmem:[%s10720_s5 + $0xe8] ss:$16 sps:$4 sm:$0xff]  }
 0x6d6   :  { %5785 = vmatpush1.bf16.msra.mxu0 %v10572_v6  ;;  %5826 = vmatpush1.bf16.msra.mxu1 %v10577_v10 }
 0x6d7   :  { %5786 = vmatprep.subr.bf16.mxu0 %v10584_v2  ;;  %5827 = vmatprep.subr.bf16.mxu1 %v10589_v44 }
 0x6d8   :  { %v7878_v24 = vpop.eup %7877 }
 0x6d9   :  { %v5285_v38 = vmul.f32 %v7878_v24, %v7876_v58  ;;  %v10891_v24 = vld [vmem:[#allocation36_spill] sm:$0xff] }
 0x6da   :  { %5787 = vmatpush1.bf16.msra.mxu0 %v10596_v56  ;;  %5828 = vmatpush1.bf16.msra.mxu1 %v10601_v49 }
 0x6db   :  { %7094 = vst [vmem:[%s10723_s7 + $0x10] sm:$0xff] %v5285_v38  ;;  %v5579_v10 = vpack.c.bf16 %v5285_v38, %v5285_v38  ;;  %6108 = vmatprep.subr.bf16.mxu0 %v10205_v41  ;;  %6149 = vmatprep.subr.bf16.mxu1 %v10210_v4 }
 0x6dd   :  { %5805 = vmatmul.mubr.bf16.vlgmr.msra.gmra.mrb[84].mxu0 %v5579_v10  ;;  %5846 = vmatmul.mubr.bf16.vlgmr.msra.gmra.mrb[84].mxu1 %v5579_v10 }
 0x6de   :  { %6109 = vmatpush1.bf16.msra.mxu0 %v10215_v13  ;;  %6150 = vmatpush1.bf16.msra.mxu1 %v10220_v0  ;;  %v10886_v13 = vld [vmem:[#allocation23_spill] sm:$0xff] }
 0x6df   :  { %6110 = vmatprep.subr.bf16.mxu0 %v10229_v8  ;;  %6151 = vmatprep.subr.bf16.mxu1 %v10234_v33  ;;  %v10887_v8 = vld [vmem:[#allocation24_spill] sm:$0xff] }
 0x6e0   :  { %6140 = vmatprep.mubr.bf16.mxu0 %v10753_v36  ;;  %6181 = vmatprep.mubr.bf16.mxu1 %v10753_v36 }
 0x6e2   :  { %6111 = vmatpush1.bf16.msra.mxu0 %v10239_v9  ;;  %6152 = vmatpush1.bf16.msra.mxu1 %v10244_v11 }
 0x6e3   :  { %6112 = vmatprep.subr.bf16.mxu0 %v10253_v16  ;;  %6153 = vmatprep.subr.bf16.mxu1 %v10258_v21  ;;  %v10888_v16 = vld [vmem:[#allocation25_spill] sm:$0xff] }
 0x6e6   :  { %6113 = vmatpush1.bf16.msra.mxu0 %v10263_v3  ;;  %6154 = vmatpush1.bf16.msra.mxu1 %v10268_v22  ;;  %v10889_v3 = vld [vmem:[#allocation26_spill] sm:$0xff] }
 0x6e7   :  { %6114 = vmatprep.subr.bf16.mxu0 %v10277_v23  ;;  %6155 = vmatprep.subr.bf16.mxu1 %v10282_v25 }
 0x6ea   :  { %6115 = vmatpush1.bf16.msra.mxu0 %v10287_v27  ;;  %6156 = vmatpush1.bf16.msra.mxu1 %v10292_v28 }
 0x6eb   :  { %6116 = vmatprep.subr.bf16.mxu0 %v10301_v29  ;;  %6157 = vmatprep.subr.bf16.mxu1 %v10306_v30 }
 0x6ee   :  { %6117 = vmatpush1.bf16.msra.mxu0 %v10311_v32  ;;  %6158 = vmatpush1.bf16.msra.mxu1 %v10316_v5 }
 0x6ef   :  { %6118 = vmatprep.subr.bf16.mxu0 %v10325_v42  ;;  %6159 = vmatprep.subr.bf16.mxu1 %v10330_v54 }
 0x6f2   :  { %6119 = vmatpush1.bf16.msra.mxu0 %v10335_v15  ;;  %6160 = vmatpush1.bf16.msra.mxu1 %v10340_v45 }
 0x6f3   :  { %6120 = vmatprep.subr.bf16.mxu0 %v10349_v14  ;;  %6161 = vmatprep.subr.bf16.mxu1 %v10354_v57 }
 0x6f6   :  { %6121 = vmatpush1.bf16.msra.mxu0 %v10359_v46  ;;  %6162 = vmatpush1.bf16.msra.mxu1 %v10364_v59 }
 0x6f7   :  { %6122 = vmatprep.subr.bf16.mxu0 %v10373_v19  ;;  %6163 = vmatprep.subr.bf16.mxu1 %v10378_v63 }
 0x6fa   :  { %6123 = vmatpush1.bf16.msra.mxu0 %v10383_v35  ;;  %6164 = vmatpush1.bf16.msra.mxu1 %v10388_v61 }
 0x6fb   :  { %6391 = vmatprep.subr.bf16.mxu0 %v10397_v39  ;;  %6432 = vmatprep.subr.bf16.mxu1 %v10402_v47  ;;  %v10890_v47 = vld [vmem:[#allocation35_spill] sm:$0xff] }
 0x790   :  { %v5522_v41 = vpop.f32.mrb[80].mxu0  ;;  %v5563_v4 = vpop.f32.mrb[80].mxu1 }
 0x791   :  { %v5570_v0 = vadd.f32 %v5522_v41, %v10886_v13  ;;  %v5572_v33 = vadd.f32 %v5563_v4, %v10887_v8  ;;  %v5524_v9 = vpop.f32.mrb[81].mxu0  ;;  %v5565_v11 = vpop.f32.mrb[81].mxu1  ;;  %v10892_v4 = vld [vmem:[#allocation37_spill] sm:$0xff] }
 0x792   :  { %v5571_v21 = vadd.f32 %v5524_v9, %v10888_v16  ;;  %v5573_v22 = vadd.f32 %v5565_v11, %v10889_v3  ;;  %v5526_v23 = vpop.f32.mrb[82].mxu0  ;;  %v5567_v25 = vpop.f32.mrb[82].mxu1 }
 0x793   :  { %v7159_v27 = vmul.f32 -1.442695, %v5570_v0  ;;  %v5527_v28 = vpop.f32.mrb[83].mxu0  ;;  %v5568_v29 = vpop.f32.mrb[83].mxu1  ;;  %v10893_v0 = vld [vmem:[#allocation38_spill] sm:$0xff] }
 0x794   :  { %v7160_v30 = vmul.f32 -1.442695, %v5571_v21  ;;  %v7161_v32 = vmul.f32 -1.442695, %v5573_v22 }
 0x795   :  { %7879 = vpow2.f32 %v7159_v27 }
 0x796   :  { %7881 = vpow2.f32 %v7160_v30 }
 0x797   :  { %7883 = vpow2.f32 %v7161_v32 }
 0x798   :  { %7885 = vtanh.f32 %v5572_v33 }
 0x79f   :  { %v7880_v5 = vpop.eup %7879 }
 0x7a0   :  { %v7882_v42 = vpop.eup %7881  ;;  %v5861_v54 = vadd.f32 1.0, %v7880_v5  ;;  %v10901_v5 = vld [vmem:[#allocation27_spill] sm:$0xff] }
 0x7a1   :  { %v5867_v15 = vadd.f32 1.0, %v7882_v42  ;;  %v7884_v45 = vpop.eup %7883 }
 0x7a2   :  { %7887 = vrcp.f32 %v5861_v54  ;;  %v7886_v14 = vpop.eup %7885  ;;  %v5874_v19 = vadd.f32 1.0, %v7884_v45  ;;  %v10903_v45 = vld [vmem:[#allocation29_spill] sm:$0xff] }
 0x7a3   :  { %7889 = vrcp.f32 %v5867_v15 }
 0x7a4   :  { %7891 = vrcp.f32 %v5874_v19 }
 0x7ac   :  { %v7888_v57 = vpop.eup %7887 }
 0x7ad   :  { %v7890_v46 = vpop.eup %7889  ;;  %v5878_v59 = vmul.f32 %v7888_v57, %v7886_v14 }
 0x7ae   :  { %v5877_v63 = vmul.f32 %v7890_v46, %v10411_v7  ;;  %v7892_v3 = vpop.eup %7891 }
 0x7b0   :  { %v10651_v35 = vadd.f32 %v5878_v59, %v5877_v63  ;;  %v5806_v61 = vpop.f32.mrb[84].mxu0  ;;  %v5847_v39 = vpop.f32.mrb[84].mxu1 }
 0x7b1   :  { %v5854_v38 = vadd.f32 %v5806_v61, %v10890_v47  ;;  %v5856_v58 = vadd.f32 %v5847_v39, %v10891_v24  ;;  %v5808_v10 = vpop.f32.mrb[85].mxu0  ;;  %v5849_v41 = vpop.f32.mrb[85].mxu1 }
 0x7b2   :  { %7893 = vtanh.f32 %v10651_v35  ;;  %v5855_v13 = vadd.f32 %v5808_v10, %v10892_v4  ;;  %v5857_v8 = vadd.f32 %v5849_v41, %v10893_v0  ;;  %v5810_v33 = vpop.f32.mrb[86].mxu0  ;;  %v5851_v9 = vpop.f32.mrb[86].mxu1 }
 0x7b3   :  { %v7162_v7 = vmul.f32 -1.442695, %v5854_v38  ;;  %v5811_v11 = vpop.f32.mrb[87].mxu0  ;;  %v5852_v16 = vpop.f32.mrb[87].mxu1 }
 0x7b4   :  { %v7163_v21 = vmul.f32 -1.442695, %v5855_v13  ;;  %v7164_v23 = vmul.f32 -1.442695, %v5857_v8  ;;  %v10905_v16 = vld [vmem:[#allocation31_spill] sm:$0xff] }
 0x7b5   :  { %7895 = vpow2.f32 %v7162_v7 }
 0x7b6   :  { %7897 = vpow2.f32 %v7163_v21 }
 0x7b7   :  { %7899 = vpow2.f32 %v7164_v23 }
 0x7b8   :  { %7901 = vtanh.f32 %v5856_v58 }
 0x7bc   :  { %v7894_v22 = vpop.eup %7893 }
 0x7bd   :  { %v5881_v25 = vmul.f32 %v7894_v22, %v7892_v3  ;;  %v10906_v3 = vld [vmem:[#allocation32_spill] sm:$0xff] }
 0x7bf   :  { %v7896_v27 = vpop.eup %7895  ;;  %7165 = vst [vmem:[%s10722_s6 + $0x30] sm:$0xff] %v5881_v25  ;;  %v5915_v28 = vpack.c.bf16 %v5881_v25, %v5881_v25 }
 0x7c0   :  { %v7898_v29 = vpop.eup %7897  ;;  %v5885_v30 = vadd.f32 1.0, %v7896_v27  ;;  %v10907_v27 = vld [vmem:[#allocation33_spill] sm:$0xff] }
 0x7c1   :  { %v5891_v32 = vadd.f32 1.0, %v7898_v29  ;;  %6141 = vmatmul.mubr.bf16.vlgmr.msra.gmra.mrb[88].mxu0 %v5915_v28  ;;  %6182 = vmatmul.mubr.bf16.vlgmr.msra.gmra.mrb[88].mxu1 %v5915_v28  ;;  %v10908_v29 = vld [vmem:[#allocation34_spill] sm:$0xff] }
 0x7c2   :  { %7903 = vrcp.f32 %v5885_v30  ;;  %6392 = vmatpush1.bf16.msra.mxu0 %v10421_v50  ;;  %6433 = vmatpush1.bf16.msra.mxu1 %v10426_v40  ;;  %v7900_v50 = vpop.eup %7899 }
 0x7c3   :  { %7905 = vrcp.f32 %v5891_v32  ;;  %6393 = vmatprep.subr.bf16.mxu0 %v10434_v62  ;;  %6434 = vmatprep.subr.bf16.mxu1 %v10439_v1  ;;  %v7902_v40 = vpop.eup %7901 }
 0x7c4   :  { %6423 = vmatprep.mubr.bf16.mxu0 %v10753_v36  ;;  %6464 = vmatprep.mubr.bf16.mxu1 %v10753_v36 }
 0x7c6   :  { %6394 = vmatpush1.bf16.msra.mxu0 %v10446_v20  ;;  %6435 = vmatpush1.bf16.msra.mxu1 %v10451_v52  ;;  %v5898_v20 = vadd.f32 1.0, %v7900_v50 }
 0x7c7   :  { %6395 = vmatprep.subr.bf16.mxu0 %v10458_v48  ;;  %6436 = vmatprep.subr.bf16.mxu1 %v10463_v34  ;;  %v10894_v34 = vld [vmem:[#allocation54_spill] sm:$0xff] }
 0x7c8   :  { %7907 = vrcp.f32 %v5898_v20 }
 0x7ca   :  { %6396 = vmatpush1.bf16.msra.mxu0 %v10472_v37  ;;  %6437 = vmatpush1.bf16.msra.mxu1 %v10477_v31  ;;  %v10895_v37 = vld [vmem:[#allocation4_spill] sm:$0xff]  ;;  %v10896_v31 = vld [vmem:[#allocation5_spill] sm:$0xff] }
 0x7cb   :  { %6397 = vmatprep.subr.bf16.mxu0 %v10484_v17  ;;  %6438 = vmatprep.subr.bf16.mxu1 %v10489_v18  ;;  %v10897_v17 = vld [vmem:[#allocation6_spill] sm:$0xff]  ;;  %v10898_v18 = vld [vmem:[#allocation55_spill] sm:$0xff] }
 0x7cc   :  { %v7904_v62 = vpop.eup %7903 }
 0x7cd   :  { %v7906_v36 = vpop.eup %7905  ;;  %v5902_v1 = vmul.f32 %v7904_v62, %v7902_v40 }
 0x7ce   :  { %v5901_v52 = vmul.f32 %v7906_v36, %v10540_v12  ;;  %6398 = vmatpush1.bf16.msra.mxu0 %v10496_v43  ;;  %6439 = vmatpush1.bf16.msra.mxu1 %v10501_v55  ;;  %v10899_v43 = vld [vmem:[#allocation56_spill] sm:$0xff]  ;;  %v10900_v55 = vld [vmem:[#allocation57_spill] sm:$0xff] }
 0x7cf   :  { %6399 = vmatprep.subr.bf16.mxu0 %v10508_v26  ;;  %6440 = vmatprep.subr.bf16.mxu1 %v10513_v53 }
 0x7d0   :  { %v10680_v48 = vadd.f32 %v5902_v1, %v5901_v52 }
 0x7d2   :  { %7909 = vtanh.f32 %v10680_v48  ;;  %6400 = vmatpush1.bf16.msra.mxu0 %v10521_v60  ;;  %6441 = vmatpush1.bf16.msra.mxu1 %v10526_v51  ;;  %v7908_v26 = vpop.eup %7907 }
 0x7d3   :  { %6401 = vmatprep.subr.bf16.mxu0 %v10894_v34  ;;  %6442 = vmatprep.subr.bf16.mxu1 %v10895_v37 }
 0x7d6   :  { %6402 = vmatpush1.bf16.msra.mxu0 %v10896_v31  ;;  %6443 = vmatpush1.bf16.msra.mxu1 %v10897_v17 }
 0x7d7   :  { %6403 = vmatprep.subr.bf16.mxu0 %v10898_v18  ;;  %6444 = vmatprep.subr.bf16.mxu1 %v10899_v43 }
 0x7da   :  { %6404 = vmatpush1.bf16.msra.mxu0 %v10572_v6  ;;  %6445 = vmatpush1.bf16.msra.mxu1 %v10900_v55 }
 0x7db   :  { %6405 = vmatprep.subr.bf16.mxu0 %v10584_v2  ;;  %6446 = vmatprep.subr.bf16.mxu1 %v10589_v44  ;;  %v10902_v2 = vld [vmem:[#allocation28_spill] sm:$0xff] }
 0x7dc   :  { %v7910_v53 = vpop.eup %7909 }
 0x7dd   :  { %v5905_v60 = vmul.f32 %v7910_v53, %v7908_v26 }
 0x7de   :  { %6406 = vmatpush1.bf16.msra.mxu0 %v10596_v56  ;;  %6447 = vmatpush1.bf16.msra.mxu1 %v10601_v49  ;;  %v10904_v56 = vld [vmem:[#allocation30_spill] sm:$0xff] }
 0x7df   :  { %7166 = vst [vmem:[%s10723_s7 + $0x8] sm:$0xff] %v5905_v60  ;;  %v6198_v51 = vpack.c.bf16 %v5905_v60, %v5905_v60 }
 0x7e1   :  { %6424 = vmatmul.mubr.bf16.vlgmr.msra.gmra.mrb[92].mxu0 %v6198_v51  ;;  %6465 = vmatmul.mubr.bf16.vlgmr.msra.gmra.mrb[92].mxu1 %v6198_v51 }
 0x894   :  { %v6142_v12 = vpop.f32.mrb[88].mxu0  ;;  %v6183_v6 = vpop.f32.mrb[88].mxu1 }
 0x895   :  { %v6190_v42 = vadd.f32 %v6142_v12, %v10901_v5  ;;  %v6192_v54 = vadd.f32 %v6183_v6, %v10902_v2  ;;  %v6144_v44 = vpop.f32.mrb[89].mxu0  ;;  %v6185_v15 = vpop.f32.mrb[89].mxu1 }
 0x896   :  { %v6191_v14 = vadd.f32 %v6144_v44, %v10903_v45  ;;  %v6193_v57 = vadd.f32 %v6185_v15, %v10904_v56  ;;  %v6146_v49 = vpop.f32.mrb[90].mxu0  ;;  %v6187_v46 = vpop.f32.mrb[90].mxu1 }
 0x897   :  { %v7231_v59 = vmul.f32 -1.442695, %v6190_v42  ;;  %v6147_v19 = vpop.f32.mrb[91].mxu0  ;;  %v6188_v63 = vpop.f32.mrb[91].mxu1 }
 0x898   :  { %v7232_v61 = vmul.f32 -1.442695, %v6191_v14  ;;  %v7233_v39 = vmul.f32 -1.442695, %v6193_v57 }
 0x899   :  { %7911 = vpow2.f32 %v7231_v59 }
 0x89a   :  { %7913 = vpow2.f32 %v7232_v61 }
 0x89b   :  { %7915 = vpow2.f32 %v7233_v39 }
 0x89c   :  { %7917 = vtanh.f32 %v6192_v54 }
 0x8a3   :  { %v7912_v47 = vpop.eup %7911 }
 0x8a4   :  { %v7914_v38 = vpop.eup %7913  ;;  %v6480_v24 = vadd.f32 1.0, %v7912_v47 }
 0x8a5   :  { %v6486_v58 = vadd.f32 1.0, %v7914_v38  ;;  %v7916_v10 = vpop.eup %7915 }
 0x8a6   :  { %7919 = vrcp.f32 %v6480_v24  ;;  %v7918_v41 = vpop.eup %7917  ;;  %v6493_v8 = vadd.f32 1.0, %v7916_v10 }
 0x8a7   :  { %7921 = vrcp.f32 %v6486_v58 }
 0x8a8   :  { %7923 = vrcp.f32 %v6493_v8 }
 0x8b0   :  { %v7920_v4 = vpop.eup %7919 }
 0x8b1   :  { %v7922_v13 = vpop.eup %7921  ;;  %v6497_v0 = vmul.f32 %v7920_v4, %v7918_v41 }
 0x8b2   :  { %v6496_v33 = vmul.f32 %v7922_v13, %v10651_v35  ;;  %v7924_v1 = vpop.eup %7923 }
 0x8b4   :  { %v6498_v9 = vadd.f32 %v6497_v0, %v6496_v33  ;;  %v6425_v7 = vpop.f32.mrb[92].mxu0  ;;  %v6466_v11 = vpop.f32.mrb[92].mxu1 }
 0x8b5   :  { %v6473_v21 = vadd.f32 %v6425_v7, %v10905_v16  ;;  %v6475_v22 = vadd.f32 %v6466_v11, %v10906_v3  ;;  %v6427_v23 = vpop.f32.mrb[93].mxu0  ;;  %v6468_v25 = vpop.f32.mrb[93].mxu1 }
 0x8b6   :  { %7925 = vtanh.f32 %v6498_v9  ;;  %v6474_v28 = vadd.f32 %v6427_v23, %v10907_v27  ;;  %v6476_v30 = vadd.f32 %v6468_v25, %v10908_v29  ;;  %v6429_v32 = vpop.f32.mrb[94].mxu0  ;;  %v6470_v50 = vpop.f32.mrb[94].mxu1 }
 0x8b7   :  { %v7234_v40 = vmul.f32 -1.442695, %v6473_v21  ;;  %v6430_v62 = vpop.f32.mrb[95].mxu0  ;;  %v6471_v35 = vpop.f32.mrb[95].mxu1 }
 0x8b8   :  { %v7235_v36 = vmul.f32 -1.442695, %v6474_v28  ;;  %v7236_v52 = vmul.f32 -1.442695, %v6476_v30 }
 0x8b9   :  { %7927 = vpow2.f32 %v7234_v40 }
 0x8ba   :  { %7929 = vpow2.f32 %v7235_v36 }
 0x8bb   :  { %7931 = vpow2.f32 %v7236_v52 }
 0x8bc   :  { %7933 = vtanh.f32 %v6475_v22 }
 0x8c0   :  { %v7926_v20 = vpop.eup %7925 }
 0x8c1   :  { %v6500_v34 = vmul.f32 %v7926_v20, %v7924_v1 }
 0x8c3   :  { %v7928_v37 = vpop.eup %7927  ;;  %7237 = vst [vmem:[%s10722_s6 + $0x38] sm:$0xff] %v6500_v34 }
 0x8c4   :  { %v7930_v31 = vpop.eup %7929  ;;  %v6504_v17 = vadd.f32 1.0, %v7928_v37 }
 0x8c5   :  { %v6510_v18 = vadd.f32 1.0, %v7930_v31  ;;  %v7932_v43 = vpop.eup %7931 }
 0x8c6   :  { %7935 = vrcp.f32 %v6504_v17  ;;  %v7934_v55 = vpop.eup %7933  ;;  %v6517_v51 = vadd.f32 1.0, %v7932_v43 }
 0x8c7   :  { %7937 = vrcp.f32 %v6510_v18 }
 0x8c8   :  { %7939 = vrcp.f32 %v6517_v51 }
 0x8d0   :  { %v7936_v26 = vpop.eup %7935 }
 0x8d1   :  { %v7938_v53 = vpop.eup %7937  ;;  %v6521_v60 = vmul.f32 %v7936_v26, %v7934_v55 }
 0x8d2   :  { %v6520_v12 = vmul.f32 %v7938_v53, %v10680_v48  ;;  %v7940_v5 = vpop.eup %7939 }
 0x8d4   :  { %v6522_v6 = vadd.f32 %v6521_v60, %v6520_v12 }
 0x8d6   :  { %7941 = vtanh.f32 %v6522_v6 }
 0x8e0   :  { %v7942_v42 = vpop.eup %7941 }
 0x8e1   :  { %v6524_v2 = vmul.f32 %v7942_v42, %v7940_v5 }
 0x8e3   :  { %6527 = vst [vmem:[%s10723_s7] sm:$0xff] %v6524_v2 }

</bundles_post_ra>
